<compile_context>
chip_gen: v7x
topology: tpu7x:2x2x1
jax: 0.10.0
libtpu: 0.0.40
codegen_flags: <defaults>
</compile_context>

<pallas_src>
import jax
import jax.numpy as jnp
from jax import lax
from jax.experimental import pallas as pl
from jax.experimental.pallas import tpu as pltpu

B = 2
C_IN = 4
IMG = 16
HW = IMG * IMG
FC_IN = 32
NUM_CLASSES = 10
NUM_CLASSES_OVER = 100
NUM_HEADS = 5
BEST_INDEX = 0            # module sets best_index = 0 when None
KP = 128                  # per-head class dim padded to one full lane group
ROWS_CLASS = 16           # sublane-aligned row slice covering k=10
ROWS_OVER = 104           # sublane-aligned row slice covering k=100
NEG = -1e30               # python float (NOT a jnp array -> no captured const)
EPS = float(jnp.finfo(jnp.float32).eps)


# ----------------------------- in-kernel helpers ----------------------------

def _encode_feat(p_ref, cw_ref, cb_ref, n_img):
    # p: (n_img*HW, 9*C_IN) -> feat (n_img, FC_IN): conv-as-matmul + ReLU + GAP.
    h = jnp.dot(p_ref[...], cw_ref[...], preferred_element_type=jnp.float32) + cb_ref[...]
    h = jnp.maximum(h, 0.0)                                     # ReLU
    # global average pool: per-image sublane reduction (no sparse pool matmul)
    rows = [jnp.sum(h[i * HW:(i + 1) * HW, :], axis=0, keepdims=True) * (1.0 / HW)
            for i in range(n_img)]
    return jnp.concatenate(rows, axis=0)                        # (n_img, FC_IN)


def _masked_softmax(lg, valid):
    # lg: (rows, KP) logits of one head; softmax over lanes where `valid`,
    # padded lanes come out exactly 0.
    lg = jnp.where(valid, lg, NEG)
    m = jnp.max(lg, axis=-1, keepdims=True)
    e = jnp.where(valid, jnp.exp(lg - m), 0.0)
    return e / jnp.sum(e, axis=-1, keepdims=True)


# ------------------------------- Pallas kernels ------------------------------

def usl_kernel(p_ref, cw_ref, cb_ref, hw_ref, hb_ref, o_ref):
    # p : (2*B*HW, 9*C_IN)   patches of [x ; xt]
    # cw: (9*C_IN, FC_IN), cb: (1, FC_IN)
    # hw: (FC_IN, 2*NUM_HEADS*KP), hb: (1, 2*NUM_HEADS*KP)  (class heads then over heads)
    # o : (2,) f32 SMEM  ->  [sum_h MI(y, yt), sum_h MI(y_over, yt_over)]
    feat = _encode_feat(p_ref, cw_ref, cb_ref, 2 * B)                       # (2B, FC_IN)
    logits = jnp.dot(feat, hw_ref[...], preferred_element_type=jnp.float32) + hb_ref[...]

    # hoisted iotas / masks (built once, reused by every unrolled head)
    lane = lax.broadcasted_iota(jnp.int32, (2 * B, KP), 1)
    valid_class = lane < NUM_CLASSES
    valid_over = lane < NUM_CLASSES_OVER
    rc = lax.broadcasted_iota(jnp.int32, (ROWS_CLASS, KP), 0)
    cc = lax.broadcasted_iota(jnp.int32, (ROWS_CLASS, KP), 1)
    real_class = (rc < NUM_CLASSES) & (cc < NUM_CLASSES)
    ro = lax.broadcasted_iota(jnp.int32, (ROWS_OVER, KP), 0)
    co = lax.broadcasted_iota(jnp.int32, (ROWS_OVER, KP), 1)
    real_over = (ro < NUM_CLASSES_OVER) & (co < NUM_CLASSES_OVER)

    mi_class = 0.0
    mi_over = 0.0
    for s in range(2 * NUM_HEADS):                                          # static unroll
        is_class = s < NUM_HEADS
        valid = valid_class if is_class else valid_over
        real = real_class if is_class else real_over
        rows = ROWS_CLASS if is_class else ROWS_OVER

        probs = _masked_softmax(logits[:, s * KP:(s + 1) * KP], valid)      # (2B, KP)
        y = probs[0:B, :]                                                   # x branch
        yt = probs[B:2 * B, :]                                              # xt branch
        # p[i, j]  = sum_b y[b, i] * yt[b, j]   and   pT = its transpose,
        # computed as a second MXU matmul instead of an XLU transpose.
        p = lax.dot_general(y, yt, (((0,), (0,)), ((), ())),
                            preferred_element_type=jnp.float32)             # (KP, KP)
        pt = lax.dot_general(yt, y, (((0,), (0,)), ((), ())),
                             preferred_element_type=jnp.float32)            # (KP, KP)
        # rows >= k are exactly 0, so the sliced math is unchanged
        ps = 0.5 * (p[0:rows, :] + pt[0:rows, :])                           # (rows, KP)
        ps = ps / jnp.sum(ps)
        pc = jnp.where(ps < EPS, EPS, ps)                                   # eps clamp
        pcm = jnp.where(real, pc, 0.0)                                      # real KxK block only
        pi = jnp.sum(pcm, axis=1, keepdims=True)
        pj = jnp.sum(pcm, axis=0, keepdims=True)
        ratio = jnp.where(real, pi * pj / pc, 1.0)
        mi_h = jnp.sum(pcm * jnp.log(ratio))                                # single fused EUP log
        if is_class:
            mi_class = mi_class + mi_h
        else:
            mi_over = mi_over + mi_h
    o_ref[0] = mi_class
    o_ref[1] = mi_over


def eval_kernel(p_ref, cw_ref, cb_ref, hw_ref, hb_ref, oh_ref, loss_ref, pred_ref):
    # p : (B*HW, 9*C_IN); hw: (FC_IN, NUM_HEADS*KP); hb: (1, NUM_HEADS*KP)
    # oh: (B, KP) one-hot targets (padded lanes zero)
    # loss: (NUM_HEADS,) f32 SMEM, pred: (B, 1) int32 VMEM
    feat = _encode_feat(p_ref, cw_ref, cb_ref, B)                           # (B, FC_IN)
    logits = jnp.dot(feat, hw_ref[...], preferred_element_type=jnp.float32) + hb_ref[...]
    lane = lax.broadcasted_iota(jnp.int32, (B, KP), 1)                      # hoisted
    valid = lane < NUM_CLASSES
    oh = oh_ref[...]
    for h in range(NUM_HEADS):                                              # static unroll
        probs = _masked_softmax(logits[:, h * KP:(h + 1) * KP], valid)      # (B, KP)
        # F.cross_entropy applies log_softmax to its input (the softmax probs
        # here), restricted to the real NUM_CLASSES lanes.
        m = jnp.max(jnp.where(valid, probs, NEG), axis=-1, keepdims=True)
        lse = jnp.log(jnp.sum(jnp.where(valid, jnp.exp(probs - m), 0.0),
                              axis=-1, keepdims=True)) + m
        nll = -jnp.sum(oh * (probs - lse), axis=-1, keepdims=True)          # (B, 1)
        loss_ref[h] = jnp.sum(nll) * (1.0 / B)                              # mean over batch
        if h == BEST_INDEX:
            # reuse masked max `m` for the argmax (first max among valid lanes)
            cand = jnp.where((probs == m) & valid, lane, KP)
            pred_ref[...] = jnp.min(cand, axis=-1, keepdims=True)


# -------------------------------- JAX wrappers --------------------------------

def _im2col(x_nhwc):
    b, hh, ww, c = x_nhwc.shape
    xp = jnp.pad(x_nhwc, ((0, 0), (1, 1), (1, 1), (0, 0)))
    cols = [xp[:, i:i + hh, j:j + ww, :] for i in range(3) for j in range(3)]
    patches = jnp.concatenate(cols, axis=-1)                                # (b, H, W, 9*C)
    return patches.reshape(b * hh * ww, 9 * c)


def _patches(x_nchw):
    x = jnp.transpose(x_nchw, (0, 2, 3, 1)).astype(jnp.float32)             # NCHW -> NHWC
    return _im2col(x)


def _pack_heads(w, b):
    # (NH, FC_IN, K), (NH, 1, K) -> lane-dense (FC_IN, NH*KP), (1, NH*KP), zero padded
    nh, d, k = w.shape
    wp = jnp.pad(w, ((0, 0), (0, 0), (0, KP - k)))
    bp = jnp.pad(b, ((0, 0), (0, 0), (0, KP - k)))
    return jnp.transpose(wp, (1, 0, 2)).reshape(d, nh * KP), bp.reshape(1, nh * KP)


def pack_params(params):
    # One-time weight packing (kept OUT of the per-step jitted calls).
    wc, bc = _pack_heads(params["head_w"], params["head_b"])
    wo, bo = _pack_heads(params["over_w"], params["over_b"])
    return dict(
        conv_w=params["conv_w"].reshape(9 * C_IN, FC_IN),
        conv_b=params["conv_b"].reshape(1, FC_IN),
        hw_usl=jnp.concatenate([wc, wo], axis=1),        # (FC_IN, 2*NH*KP)
        hb_usl=jnp.concatenate([bc, bo], axis=1),        # (1, 2*NH*KP)
        hw_cls=wc,                                       # (FC_IN, NH*KP)
        hb_cls=bc,                                       # (1, NH*KP)
    )


@jax.jit
def iic_usl(packed, x, xt):
    # training / unsupervised path: single fused pallas_call -> shape (2,)
    patches = _patches(jnp.concatenate([x, xt], axis=0))                    # (2*B*HW, 9*Cin)
    vmem = pl.BlockSpec(memory_space=pltpu.MemorySpace.VMEM)
    return pl.pallas_call(
        usl_kernel,
        out_shape=jax.ShapeDtypeStruct((2,), jnp.float32),
        in_specs=[vmem] * 5,
        out_specs=pl.BlockSpec(memory_space=pltpu.MemorySpace.SMEM),
    )(patches, packed["conv_w"], packed["conv_b"], packed["hw_usl"], packed["hb_usl"])


@jax.jit
def iic_eval(packed, x, target):
    # eval path: single fused pallas_call -> (per-head CE, {'target','pred'})
    patches = _patches(x)                                                   # (B*HW, 9*Cin)
    oh = jax.nn.one_hot(target, KP, dtype=jnp.float32)                      # (B, KP), pad lanes 0
    vmem = pl.BlockSpec(memory_space=pltpu.MemorySpace.VMEM)
    loss, pred = pl.pallas_call(
        eval_kernel,
        out_shape=(jax.ShapeDtypeStruct((NUM_HEADS,), jnp.float32),
                   jax.ShapeDtypeStruct((B, 1), jnp.int32)),
        in_specs=[vmem] * 6,
        out_specs=(pl.BlockSpec(memory_space=pltpu.MemorySpace.SMEM),
                   pl.BlockSpec(memory_space=pltpu.MemorySpace.VMEM)),
    )(patches, packed["conv_w"], packed["conv_b"], packed["hw_cls"], packed["hb_cls"], oh)
    loss = loss.reshape(NUM_HEADS, 1)                                       # torch: (num_heads, 1)
    pred = pred.reshape(B)                  # TODO(synk): torch argmax returns int64; int32 here
    return loss, {"target": target, "pred": pred}

# TODO(synk): the __ssl path is not exercised; it is just cat([usl, sl, usl]) built
# from the same fused primitives.


def init_params(key):
    k1, k2, k3 = jax.random.split(key, 3)
    conv_w = 0.1 * jax.random.normal(k1, (3, 3, C_IN, FC_IN), jnp.float32)
    conv_b = jnp.zeros((FC_IN,), jnp.float32)
    std_c = (2.0 / (FC_IN + NUM_CLASSES)) ** 0.5                            # xavier_normal_
    std_o = (2.0 / (FC_IN + NUM_CLASSES_OVER)) ** 0.5
    head_w = std_c * jax.random.normal(k2, (NUM_HEADS, FC_IN, NUM_CLASSES), jnp.float32)
    head_b = jnp.zeros((NUM_HEADS, 1, NUM_CLASSES), jnp.float32)            # zeros_
    over_w = std_o * jax.random.normal(k3, (NUM_HEADS, FC_IN, NUM_CLASSES_OVER), jnp.float32)
    over_b = jnp.zeros((NUM_HEADS, 1, NUM_CLASSES_OVER), jnp.float32)
    return dict(conv_w=conv_w, conv_b=conv_b, head_w=head_w, head_b=head_b,
                over_w=over_w, over_b=over_b)


# ----------------------------- pure-JAX reference -----------------------------

def _ref_encode(x_nchw, conv_w, conv_b):
    x = jnp.transpose(x_nchw, (0, 2, 3, 1))
    out = lax.conv_general_dilated(x, conv_w, (1, 1), "SAME",
                                   dimension_numbers=("NHWC", "HWIO", "NHWC"))
    out = jnp.maximum(out + conv_b, 0.0)
    return out.mean(axis=(1, 2))


def _ref_heads(feat, w, b):
    logits = jnp.einsum("bd,hdk->hbk", feat, w) + b
    return jax.nn.softmax(logits, axis=-1)


def _ref_mi_sum(y, yt):
    eps = jnp.finfo(jnp.float32).eps
    total = jnp.float32(0.0)
    for h in range(NUM_HEADS):
        p = jnp.einsum("bi,bj->ij", y[h], yt[h])
        p = (p + p.T) / 2.0 / jnp.sum(p)
        p = jnp.where(p < eps, eps, p)
        pi = jnp.sum(p, 1, keepdims=True)
        pj = jnp.sum(p, 0, keepdims=True)
        total = total + jnp.sum(p * (jnp.log(pi) + jnp.log(pj) - jnp.log(p)))
    return total


if __name__ == "__main__":
    key = jax.random.PRNGKey(0)
    kp_, kx, kxt, kt = jax.random.split(key, 4)
    params = init_params(kp_)
    packed = pack_params(params)            # one-time packing, outside the jitted steps
    x = jax.random.normal(kx, (B, C_IN, IMG, IMG), jnp.float32)
    xt = x + 0.05 * jax.random.normal(kxt, (B, C_IN, IMG, IMG), jnp.float32)
    target = jax.random.randint(kt, (B,), 0, NUM_CLASSES, dtype=jnp.int32)

    # training / unsupervised path: cat([mi, mi_over]) -> shape (2,)
    usl_out = jax.block_until_ready(iic_usl(packed, x, xt))
    # eval path: (per-head CE losses, {'target', 'pred'})
    loss, aux = iic_eval(packed, x, target)
    loss = jax.block_until_ready(loss)
    pred = jax.block_until_ready(aux["pred"])

    # correctness check against a pure-JAX reference
    feat_ref = _ref_encode(x, params["conv_w"], params["conv_b"])
    featt_ref = _ref_encode(xt, params["conv_w"], params["conv_b"])
    y_ref = _ref_heads(feat_ref, params["head_w"], params["head_b"])
    yt_ref = _ref_heads(featt_ref, params["head_w"], params["head_b"])
    yo_ref = _ref_heads(feat_ref, params["over_w"], params["over_b"])
    yto_ref = _ref_heads(featt_ref, params["over_w"], params["over_b"])
    usl_ref = jnp.stack([_ref_mi_sum(y_ref, yt_ref), _ref_mi_sum(yo_ref, yto_ref)])
    lp_ref = jax.nn.log_softmax(y_ref, axis=-1)
    oh_ref = jax.nn.one_hot(target, NUM_CLASSES, dtype=jnp.float32)
    ce_ref = -jnp.mean(jnp.sum(oh_ref[None] * lp_ref, axis=-1), axis=-1)

    assert usl_out.shape == (2,)
    assert loss.shape == (NUM_HEADS, 1)
    assert pred.shape == (B,)
    assert jnp.allclose(usl_out, usl_ref, rtol=1e-3, atol=1e-4)
    assert jnp.allclose(loss.reshape(-1), ce_ref, rtol=1e-3, atol=1e-4)

    print("KERNEL_OK")
</pallas_src>

<mosaic_0001>
module attributes {stable_mosaic.version = 11 : i64} {
  func.func @usl_kernel(%arg0: memref<1024x36xf32, #tpu.memory_space<vmem>>, %arg1: memref<36x32xf32, #tpu.memory_space<vmem>>, %arg2: memref<1x32xf32, #tpu.memory_space<vmem>>, %arg3: memref<32x1280xf32, #tpu.memory_space<vmem>>, %arg4: memref<1x1280xf32, #tpu.memory_space<vmem>>, %arg5: memref<2xf32, #tpu.memory_space<smem>>) attributes {dimension_semantics = [], scalar_prefetch = 0 : i64, scratch_operands = 0 : i64, tpu.core_type = #tpu.core_type<tc>} {
    %c0 = arith.constant 0 : index
    %c0_0 = arith.constant 0 : index
    %0 = vector.load %arg0[%c0, %c0_0] : memref<1024x36xf32, #tpu.memory_space<vmem>>, vector<1024x36xf32>
    %c0_1 = arith.constant 0 : index
    %c0_2 = arith.constant 0 : index
    %1 = vector.load %arg1[%c0_1, %c0_2] : memref<36x32xf32, #tpu.memory_space<vmem>>, vector<36x32xf32>
    %cst = arith.constant dense<0.000000e+00> : vector<1024x32xf32>
    %2 = tpu.matmul %0, %1, %cst {dimension_numbers = #tpu.dot_dimension_numbers<[1], [0], [0], [1], [0, 0, 1, 1], [], []>} : vector<1024x36xf32>, vector<36x32xf32>, vector<1024x32xf32> -> vector<1024x32xf32>
    %c0_3 = arith.constant 0 : index
    %c0_4 = arith.constant 0 : index
    %3 = vector.load %arg2[%c0_3, %c0_4] : memref<1x32xf32, #tpu.memory_space<vmem>>, vector<1x32xf32>
    %4 = vector.broadcast %3 : vector<1x32xf32> to vector<1024x32xf32>
    %5 = arith.addf %2, %4 : vector<1024x32xf32>
    %cst_5 = arith.constant 0.000000e+00 : f32
    %6 = vector.broadcast %cst_5 : f32 to vector<1024x32xf32>
    %7 = arith.maximumf %5, %6 : vector<1024x32xf32>
    %8 = vector.extract_strided_slice %7 {offsets = [0, 0], sizes = [256, 32], strides = [1, 1]} : vector<1024x32xf32> to vector<256x32xf32>
    %cst_6 = arith.constant dense<0.000000e+00> : vector<32xf32>
    %9 = vector.multi_reduction <add>, %8, %cst_6 [0] : vector<256x32xf32> to vector<32xf32>
    %10 = vector.shape_cast %9 : vector<32xf32> to vector<1x32xf32>
    %cst_7 = arith.constant 3.906250e-03 : f32
    %11 = vector.broadcast %cst_7 : f32 to vector<1x32xf32>
    %12 = arith.mulf %10, %11 : vector<1x32xf32>
    %13 = vector.extract_strided_slice %7 {offsets = [256, 0], sizes = [256, 32], strides = [1, 1]} : vector<1024x32xf32> to vector<256x32xf32>
    %cst_8 = arith.constant dense<0.000000e+00> : vector<32xf32>
    %14 = vector.multi_reduction <add>, %13, %cst_8 [0] : vector<256x32xf32> to vector<32xf32>
    %15 = vector.shape_cast %14 : vector<32xf32> to vector<1x32xf32>
    %cst_9 = arith.constant 3.906250e-03 : f32
    %16 = vector.broadcast %cst_9 : f32 to vector<1x32xf32>
    %17 = arith.mulf %15, %16 : vector<1x32xf32>
    %18 = vector.extract_strided_slice %7 {offsets = [512, 0], sizes = [256, 32], strides = [1, 1]} : vector<1024x32xf32> to vector<256x32xf32>
    %cst_10 = arith.constant dense<0.000000e+00> : vector<32xf32>
    %19 = vector.multi_reduction <add>, %18, %cst_10 [0] : vector<256x32xf32> to vector<32xf32>
    %20 = vector.shape_cast %19 : vector<32xf32> to vector<1x32xf32>
    %cst_11 = arith.constant 3.906250e-03 : f32
    %21 = vector.broadcast %cst_11 : f32 to vector<1x32xf32>
    %22 = arith.mulf %20, %21 : vector<1x32xf32>
    %23 = vector.extract_strided_slice %7 {offsets = [768, 0], sizes = [256, 32], strides = [1, 1]} : vector<1024x32xf32> to vector<256x32xf32>
    %cst_12 = arith.constant dense<0.000000e+00> : vector<32xf32>
    %24 = vector.multi_reduction <add>, %23, %cst_12 [0] : vector<256x32xf32> to vector<32xf32>
    %25 = vector.shape_cast %24 : vector<32xf32> to vector<1x32xf32>
    %cst_13 = arith.constant 3.906250e-03 : f32
    %26 = vector.broadcast %cst_13 : f32 to vector<1x32xf32>
    %27 = arith.mulf %25, %26 : vector<1x32xf32>
    %28 = tpu.concatenate %12, %17, %22, %27 in 0 : vector<1x32xf32>, vector<1x32xf32>, vector<1x32xf32>, vector<1x32xf32> -> vector<4x32xf32>
    %c0_14 = arith.constant 0 : index
    %c0_15 = arith.constant 0 : index
    %29 = vector.load %arg3[%c0_14, %c0_15] : memref<32x1280xf32, #tpu.memory_space<vmem>>, vector<32x1280xf32>
    %cst_16 = arith.constant dense<0.000000e+00> : vector<4x1280xf32>
    %30 = tpu.matmul %28, %29, %cst_16 {dimension_numbers = #tpu.dot_dimension_numbers<[1], [0], [0], [1], [0, 0, 1, 1], [], []>} : vector<4x32xf32>, vector<32x1280xf32>, vector<4x1280xf32> -> vector<4x1280xf32>
    %c0_17 = arith.constant 0 : index
    %c0_18 = arith.constant 0 : index
    %31 = vector.load %arg4[%c0_17, %c0_18] : memref<1x1280xf32, #tpu.memory_space<vmem>>, vector<1x1280xf32>
    %32 = vector.broadcast %31 : vector<1x1280xf32> to vector<4x1280xf32>
    %33 = arith.addf %30, %32 : vector<4x1280xf32>
    %34 = tpu.iota {dimensions = array<i32: 1>} : vector<4x128xi32>
    %c10_i32 = arith.constant 10 : i32
    %35 = vector.broadcast %c10_i32 : i32 to vector<4x128xi32>
    %36 = arith.cmpi slt, %34, %35 : vector<4x128xi32>
    %c100_i32 = arith.constant 100 : i32
    %37 = vector.broadcast %c100_i32 : i32 to vector<4x128xi32>
    %38 = arith.cmpi slt, %34, %37 : vector<4x128xi32>
    %39 = tpu.iota {dimensions = array<i32: 0>} : vector<16x128xi32>
    %40 = tpu.iota {dimensions = array<i32: 1>} : vector<16x128xi32>
    %c10_i32_19 = arith.constant 10 : i32
    %41 = vector.broadcast %c10_i32_19 : i32 to vector<16x128xi32>
    %42 = arith.cmpi slt, %39, %41 : vector<16x128xi32>
    %c10_i32_20 = arith.constant 10 : i32
    %43 = vector.broadcast %c10_i32_20 : i32 to vector<16x128xi32>
    %44 = arith.cmpi slt, %40, %43 : vector<16x128xi32>
    %45 = arith.andi %42, %44 : vector<16x128xi1>
    %46 = tpu.iota {dimensions = array<i32: 0>} : vector<104x128xi32>
    %47 = tpu.iota {dimensions = array<i32: 1>} : vector<104x128xi32>
    %c100_i32_21 = arith.constant 100 : i32
    %48 = vector.broadcast %c100_i32_21 : i32 to vector<104x128xi32>
    %49 = arith.cmpi slt, %46, %48 : vector<104x128xi32>
    %c100_i32_22 = arith.constant 100 : i32
    %50 = vector.broadcast %c100_i32_22 : i32 to vector<104x128xi32>
    %51 = arith.cmpi slt, %47, %50 : vector<104x128xi32>
    %52 = arith.andi %49, %51 : vector<104x128xi1>
    %53 = vector.extract_strided_slice %33 {offsets = [0, 0], sizes = [4, 128], strides = [1, 1]} : vector<4x1280xf32> to vector<4x128xf32>
    %cst_23 = arith.constant -1.000000e+30 : f32
    %54 = vector.broadcast %cst_23 : f32 to vector<4x128xf32>
    %55 = arith.select %36, %53, %54 : vector<4x128xi1>, vector<4x128xf32>
    %cst_24 = arith.constant dense<0xFF800000> : vector<4xf32>
    %56 = vector.multi_reduction <maximumf>, %55, %cst_24 [1] : vector<4x128xf32> to vector<4xf32>
    %57 = vector.shape_cast %56 : vector<4xf32> to vector<4x1xf32>
    %58 = vector.broadcast %57 : vector<4x1xf32> to vector<4x128xf32>
    %59 = arith.subf %55, %58 : vector<4x128xf32>
    %60 = math.exp %59 : vector<4x128xf32>
    %cst_25 = arith.constant 0.000000e+00 : f32
    %61 = vector.broadcast %cst_25 : f32 to vector<4x128xf32>
    %62 = arith.select %36, %60, %61 : vector<4x128xi1>, vector<4x128xf32>
    %cst_26 = arith.constant dense<0.000000e+00> : vector<4xf32>
    %63 = vector.multi_reduction <add>, %62, %cst_26 [1] : vector<4x128xf32> to vector<4xf32>
    %64 = vector.shape_cast %63 : vector<4xf32> to vector<4x1xf32>
    %65 = vector.broadcast %64 : vector<4x1xf32> to vector<4x128xf32>
    %66 = arith.divf %62, %65 : vector<4x128xf32>
    %67 = vector.extract_strided_slice %66 {offsets = [0, 0], sizes = [2, 128], strides = [1, 1]} : vector<4x128xf32> to vector<2x128xf32>
    %68 = vector.extract_strided_slice %66 {offsets = [2, 0], sizes = [2, 128], strides = [1, 1]} : vector<4x128xf32> to vector<2x128xf32>
    %cst_27 = arith.constant dense<0.000000e+00> : vector<128x128xf32>
    %69 = tpu.matmul %67, %68, %cst_27 {dimension_numbers = #tpu.dot_dimension_numbers<[0], [0], [1], [1], [0, 1, 1, 1], [], []>} : vector<2x128xf32>, vector<2x128xf32>, vector<128x128xf32> -> vector<128x128xf32>
    %cst_28 = arith.constant dense<0.000000e+00> : vector<128x128xf32>
    %70 = tpu.matmul %68, %67, %cst_28 {dimension_numbers = #tpu.dot_dimension_numbers<[0], [0], [1], [1], [0, 1, 1, 1], [], []>} : vector<2x128xf32>, vector<2x128xf32>, vector<128x128xf32> -> vector<128x128xf32>
    %71 = vector.extract_strided_slice %69 {offsets = [0, 0], sizes = [16, 128], strides = [1, 1]} : vector<128x128xf32> to vector<16x128xf32>
    %72 = vector.extract_strided_slice %70 {offsets = [0, 0], sizes = [16, 128], strides = [1, 1]} : vector<128x128xf32> to vector<16x128xf32>
    %73 = arith.addf %71, %72 : vector<16x128xf32>
    %cst_29 = arith.constant 5.000000e-01 : f32
    %74 = vector.broadcast %cst_29 : f32 to vector<16x128xf32>
    %75 = arith.mulf %74, %73 : vector<16x128xf32>
    %76 = vector.shape_cast %75 : vector<16x128xf32> to vector<1x16x128xf32>
    %cst_30 = arith.constant dense<0.000000e+00> : vector<1xf32>
    %77 = vector.multi_reduction <add>, %76, %cst_30 [1, 2] : vector<1x16x128xf32> to vector<1xf32>
    %78 = vector.shape_cast %77 : vector<1xf32> to vector<1x1x1xf32>
    %79 = vector.extract %78[0, 0, 0] : f32 from vector<1x1x1xf32>
    %80 = vector.broadcast %79 : f32 to vector<16x128xf32>
    %81 = arith.divf %75, %80 : vector<16x128xf32>
    %cst_31 = arith.constant 1.1920929E-7 : f32
    %82 = vector.broadcast %cst_31 : f32 to vector<16x128xf32>
    %83 = arith.cmpf olt, %81, %82 : vector<16x128xf32>
    %cst_32 = arith.constant 1.1920929E-7 : f32
    %84 = vector.broadcast %cst_32 : f32 to vector<16x128xf32>
    %85 = arith.select %83, %84, %81 : vector<16x128xi1>, vector<16x128xf32>
    %cst_33 = arith.constant 0.000000e+00 : f32
    %86 = vector.broadcast %cst_33 : f32 to vector<16x128xf32>
    %87 = arith.select %45, %85, %86 : vector<16x128xi1>, vector<16x128xf32>
    %cst_34 = arith.constant dense<0.000000e+00> : vector<16xf32>
    %88 = vector.multi_reduction <add>, %87, %cst_34 [1] : vector<16x128xf32> to vector<16xf32>
    %89 = vector.shape_cast %88 : vector<16xf32> to vector<16x1xf32>
    %cst_35 = arith.constant dense<0.000000e+00> : vector<128xf32>
    %90 = vector.multi_reduction <add>, %87, %cst_35 [0] : vector<16x128xf32> to vector<128xf32>
    %91 = vector.shape_cast %90 : vector<128xf32> to vector<1x128xf32>
    %92 = vector.broadcast %89 : vector<16x1xf32> to vector<16x128xf32>
    %93 = vector.broadcast %91 : vector<1x128xf32> to vector<16x128xf32>
    %94 = arith.mulf %92, %93 : vector<16x128xf32>
    %95 = arith.divf %94, %85 : vector<16x128xf32>
    %cst_36 = arith.constant 1.000000e+00 : f32
    %96 = vector.broadcast %cst_36 : f32 to vector<16x128xf32>
    %97 = arith.select %45, %95, %96 : vector<16x128xi1>, vector<16x128xf32>
    %98 = math.log %97 : vector<16x128xf32>
    %99 = arith.mulf %87, %98 : vector<16x128xf32>
    %100 = vector.shape_cast %99 : vector<16x128xf32> to vector<1x16x128xf32>
    %cst_37 = arith.constant dense<0.000000e+00> : vector<1xf32>
    %101 = vector.multi_reduction <add>, %100, %cst_37 [1, 2] : vector<1x16x128xf32> to vector<1xf32>
    %102 = vector.shape_cast %101 : vector<1xf32> to vector<1x1x1xf32>
    %103 = vector.extract %102[0, 0, 0] : f32 from vector<1x1x1xf32>
    %cst_38 = arith.constant 0.000000e+00 : f32
    %104 = arith.addf %cst_38, %103 : f32
    %105 = vector.extract_strided_slice %33 {offsets = [0, 128], sizes = [4, 128], strides = [1, 1]} : vector<4x1280xf32> to vector<4x128xf32>
    %cst_39 = arith.constant -1.000000e+30 : f32
    %106 = vector.broadcast %cst_39 : f32 to vector<4x128xf32>
    %107 = arith.select %36, %105, %106 : vector<4x128xi1>, vector<4x128xf32>
    %cst_40 = arith.constant dense<0xFF800000> : vector<4xf32>
    %108 = vector.multi_reduction <maximumf>, %107, %cst_40 [1] : vector<4x128xf32> to vector<4xf32>
    %109 = vector.shape_cast %108 : vector<4xf32> to vector<4x1xf32>
    %110 = vector.broadcast %109 : vector<4x1xf32> to vector<4x128xf32>
    %111 = arith.subf %107, %110 : vector<4x128xf32>
    %112 = math.exp %111 : vector<4x128xf32>
    %cst_41 = arith.constant 0.000000e+00 : f32
    %113 = vector.broadcast %cst_41 : f32 to vector<4x128xf32>
    %114 = arith.select %36, %112, %113 : vector<4x128xi1>, vector<4x128xf32>
    %cst_42 = arith.constant dense<0.000000e+00> : vector<4xf32>
    %115 = vector.multi_reduction <add>, %114, %cst_42 [1] : vector<4x128xf32> to vector<4xf32>
    %116 = vector.shape_cast %115 : vector<4xf32> to vector<4x1xf32>
    %117 = vector.broadcast %116 : vector<4x1xf32> to vector<4x128xf32>
    %118 = arith.divf %114, %117 : vector<4x128xf32>
    %119 = vector.extract_strided_slice %118 {offsets = [0, 0], sizes = [2, 128], strides = [1, 1]} : vector<4x128xf32> to vector<2x128xf32>
    %120 = vector.extract_strided_slice %118 {offsets = [2, 0], sizes = [2, 128], strides = [1, 1]} : vector<4x128xf32> to vector<2x128xf32>
    %cst_43 = arith.constant dense<0.000000e+00> : vector<128x128xf32>
    %121 = tpu.matmul %119, %120, %cst_43 {dimension_numbers = #tpu.dot_dimension_numbers<[0], [0], [1], [1], [0, 1, 1, 1], [], []>} : vector<2x128xf32>, vector<2x128xf32>, vector<128x128xf32> -> vector<128x128xf32>
    %cst_44 = arith.constant dense<0.000000e+00> : vector<128x128xf32>
    %122 = tpu.matmul %120, %119, %cst_44 {dimension_numbers = #tpu.dot_dimension_numbers<[0], [0], [1], [1], [0, 1, 1, 1], [], []>} : vector<2x128xf32>, vector<2x128xf32>, vector<128x128xf32> -> vector<128x128xf32>
    %123 = vector.extract_strided_slice %121 {offsets = [0, 0], sizes = [16, 128], strides = [1, 1]} : vector<128x128xf32> to vector<16x128xf32>
    %124 = vector.extract_strided_slice %122 {offsets = [0, 0], sizes = [16, 128], strides = [1, 1]} : vector<128x128xf32> to vector<16x128xf32>
    %125 = arith.addf %123, %124 : vector<16x128xf32>
    %cst_45 = arith.constant 5.000000e-01 : f32
    %126 = vector.broadcast %cst_45 : f32 to vector<16x128xf32>
    %127 = arith.mulf %126, %125 : vector<16x128xf32>
    %128 = vector.shape_cast %127 : vector<16x128xf32> to vector<1x16x128xf32>
    %cst_46 = arith.constant dense<0.000000e+00> : vector<1xf32>
    %129 = vector.multi_reduction <add>, %128, %cst_46 [1, 2] : vector<1x16x128xf32> to vector<1xf32>
    %130 = vector.shape_cast %129 : vector<1xf32> to vector<1x1x1xf32>
    %131 = vector.extract %130[0, 0, 0] : f32 from vector<1x1x1xf32>
    %132 = vector.broadcast %131 : f32 to vector<16x128xf32>
    %133 = arith.divf %127, %132 : vector<16x128xf32>
    %cst_47 = arith.constant 1.1920929E-7 : f32
    %134 = vector.broadcast %cst_47 : f32 to vector<16x128xf32>
    %135 = arith.cmpf olt, %133, %134 : vector<16x128xf32>
    %cst_48 = arith.constant 1.1920929E-7 : f32
    %136 = vector.broadcast %cst_48 : f32 to vector<16x128xf32>
    %137 = arith.select %135, %136, %133 : vector<16x128xi1>, vector<16x128xf32>
    %cst_49 = arith.constant 0.000000e+00 : f32
    %138 = vector.broadcast %cst_49 : f32 to vector<16x128xf32>
    %139 = arith.select %45, %137, %138 : vector<16x128xi1>, vector<16x128xf32>
    %cst_50 = arith.constant dense<0.000000e+00> : vector<16xf32>
    %140 = vector.multi_reduction <add>, %139, %cst_50 [1] : vector<16x128xf32> to vector<16xf32>
    %141 = vector.shape_cast %140 : vector<16xf32> to vector<16x1xf32>
    %cst_51 = arith.constant dense<0.000000e+00> : vector<128xf32>
    %142 = vector.multi_reduction <add>, %139, %cst_51 [0] : vector<16x128xf32> to vector<128xf32>
    %143 = vector.shape_cast %142 : vector<128xf32> to vector<1x128xf32>
    %144 = vector.broadcast %141 : vector<16x1xf32> to vector<16x128xf32>
    %145 = vector.broadcast %143 : vector<1x128xf32> to vector<16x128xf32>
    %146 = arith.mulf %144, %145 : vector<16x128xf32>
    %147 = arith.divf %146, %137 : vector<16x128xf32>
    %cst_52 = arith.constant 1.000000e+00 : f32
    %148 = vector.broadcast %cst_52 : f32 to vector<16x128xf32>
    %149 = arith.select %45, %147, %148 : vector<16x128xi1>, vector<16x128xf32>
    %150 = math.log %149 : vector<16x128xf32>
    %151 = arith.mulf %139, %150 : vector<16x128xf32>
    %152 = vector.shape_cast %151 : vector<16x128xf32> to vector<1x16x128xf32>
    %cst_53 = arith.constant dense<0.000000e+00> : vector<1xf32>
    %153 = vector.multi_reduction <add>, %152, %cst_53 [1, 2] : vector<1x16x128xf32> to vector<1xf32>
    %154 = vector.shape_cast %153 : vector<1xf32> to vector<1x1x1xf32>
    %155 = vector.extract %154[0, 0, 0] : f32 from vector<1x1x1xf32>
    %156 = arith.addf %104, %155 : f32
    %157 = vector.extract_strided_slice %33 {offsets = [0, 256], sizes = [4, 128], strides = [1, 1]} : vector<4x1280xf32> to vector<4x128xf32>
    %cst_54 = arith.constant -1.000000e+30 : f32
    %158 = vector.broadcast %cst_54 : f32 to vector<4x128xf32>
    %159 = arith.select %36, %157, %158 : vector<4x128xi1>, vector<4x128xf32>
    %cst_55 = arith.constant dense<0xFF800000> : vector<4xf32>
    %160 = vector.multi_reduction <maximumf>, %159, %cst_55 [1] : vector<4x128xf32> to vector<4xf32>
    %161 = vector.shape_cast %160 : vector<4xf32> to vector<4x1xf32>
    %162 = vector.broadcast %161 : vector<4x1xf32> to vector<4x128xf32>
    %163 = arith.subf %159, %162 : vector<4x128xf32>
    %164 = math.exp %163 : vector<4x128xf32>
    %cst_56 = arith.constant 0.000000e+00 : f32
    %165 = vector.broadcast %cst_56 : f32 to vector<4x128xf32>
    %166 = arith.select %36, %164, %165 : vector<4x128xi1>, vector<4x128xf32>
    %cst_57 = arith.constant dense<0.000000e+00> : vector<4xf32>
    %167 = vector.multi_reduction <add>, %166, %cst_57 [1] : vector<4x128xf32> to vector<4xf32>
    %168 = vector.shape_cast %167 : vector<4xf32> to vector<4x1xf32>
    %169 = vector.broadcast %168 : vector<4x1xf32> to vector<4x128xf32>
    %170 = arith.divf %166, %169 : vector<4x128xf32>
    %171 = vector.extract_strided_slice %170 {offsets = [0, 0], sizes = [2, 128], strides = [1, 1]} : vector<4x128xf32> to vector<2x128xf32>
    %172 = vector.extract_strided_slice %170 {offsets = [2, 0], sizes = [2, 128], strides = [1, 1]} : vector<4x128xf32> to vector<2x128xf32>
    %cst_58 = arith.constant dense<0.000000e+00> : vector<128x128xf32>
    %173 = tpu.matmul %171, %172, %cst_58 {dimension_numbers = #tpu.dot_dimension_numbers<[0], [0], [1], [1], [0, 1, 1, 1], [], []>} : vector<2x128xf32>, vector<2x128xf32>, vector<128x128xf32> -> vector<128x128xf32>
    %cst_59 = arith.constant dense<0.000000e+00> : vector<128x128xf32>
    %174 = tpu.matmul %172, %171, %cst_59 {dimension_numbers = #tpu.dot_dimension_numbers<[0], [0], [1], [1], [0, 1, 1, 1], [], []>} : vector<2x128xf32>, vector<2x128xf32>, vector<128x128xf32> -> vector<128x128xf32>
    %175 = vector.extract_strided_slice %173 {offsets = [0, 0], sizes = [16, 128], strides = [1, 1]} : vector<128x128xf32> to vector<16x128xf32>
    %176 = vector.extract_strided_slice %174 {offsets = [0, 0], sizes = [16, 128], strides = [1, 1]} : vector<128x128xf32> to vector<16x128xf32>
    %177 = arith.addf %175, %176 : vector<16x128xf32>
    %cst_60 = arith.constant 5.000000e-01 : f32
    %178 = vector.broadcast %cst_60 : f32 to vector<16x128xf32>
    %179 = arith.mulf %178, %177 : vector<16x128xf32>
    %180 = vector.shape_cast %179 : vector<16x128xf32> to vector<1x16x128xf32>
    %cst_61 = arith.constant dense<0.000000e+00> : vector<1xf32>
    %181 = vector.multi_reduction <add>, %180, %cst_61 [1, 2] : vector<1x16x128xf32> to vector<1xf32>
    %182 = vector.shape_cast %181 : vector<1xf32> to vector<1x1x1xf32>
    %183 = vector.extract %182[0, 0, 0] : f32 from vector<1x1x1xf32>
    %184 = vector.broadcast %183 : f32 to vector<16x128xf32>
    %185 = arith.divf %179, %184 : vector<16x128xf32>
    %cst_62 = arith.constant 1.1920929E-7 : f32
    %186 = vector.broadcast %cst_62 : f32 to vector<16x128xf32>
    %187 = arith.cmpf olt, %185, %186 : vector<16x128xf32>
    %cst_63 = arith.constant 1.1920929E-7 : f32
    %188 = vector.broadcast %cst_63 : f32 to vector<16x128xf32>
    %189 = arith.select %187, %188, %185 : vector<16x128xi1>, vector<16x128xf32>
    %cst_64 = arith.constant 0.000000e+00 : f32
    %190 = vector.broadcast %cst_64 : f32 to vector<16x128xf32>
    %191 = arith.select %45, %189, %190 : vector<16x128xi1>, vector<16x128xf32>
    %cst_65 = arith.constant dense<0.000000e+00> : vector<16xf32>
    %192 = vector.multi_reduction <add>, %191, %cst_65 [1] : vector<16x128xf32> to vector<16xf32>
    %193 = vector.shape_cast %192 : vector<16xf32> to vector<16x1xf32>
    %cst_66 = arith.constant dense<0.000000e+00> : vector<128xf32>
    %194 = vector.multi_reduction <add>, %191, %cst_66 [0] : vector<16x128xf32> to vector<128xf32>
    %195 = vector.shape_cast %194 : vector<128xf32> to vector<1x128xf32>
    %196 = vector.broadcast %193 : vector<16x1xf32> to vector<16x128xf32>
    %197 = vector.broadcast %195 : vector<1x128xf32> to vector<16x128xf32>
    %198 = arith.mulf %196, %197 : vector<16x128xf32>
    %199 = arith.divf %198, %189 : vector<16x128xf32>
    %cst_67 = arith.constant 1.000000e+00 : f32
    %200 = vector.broadcast %cst_67 : f32 to vector<16x128xf32>
    %201 = arith.select %45, %199, %200 : vector<16x128xi1>, vector<16x128xf32>
    %202 = math.log %201 : vector<16x128xf32>
    %203 = arith.mulf %191, %202 : vector<16x128xf32>
    %204 = vector.shape_cast %203 : vector<16x128xf32> to vector<1x16x128xf32>
    %cst_68 = arith.constant dense<0.000000e+00> : vector<1xf32>
    %205 = vector.multi_reduction <add>, %204, %cst_68 [1, 2] : vector<1x16x128xf32> to vector<1xf32>
    %206 = vector.shape_cast %205 : vector<1xf32> to vector<1x1x1xf32>
    %207 = vector.extract %206[0, 0, 0] : f32 from vector<1x1x1xf32>
    %208 = arith.addf %156, %207 : f32
    %209 = vector.extract_strided_slice %33 {offsets = [0, 384], sizes = [4, 128], strides = [1, 1]} : vector<4x1280xf32> to vector<4x128xf32>
    %cst_69 = arith.constant -1.000000e+30 : f32
    %210 = vector.broadcast %cst_69 : f32 to vector<4x128xf32>
    %211 = arith.select %36, %209, %210 : vector<4x128xi1>, vector<4x128xf32>
    %cst_70 = arith.constant dense<0xFF800000> : vector<4xf32>
    %212 = vector.multi_reduction <maximumf>, %211, %cst_70 [1] : vector<4x128xf32> to vector<4xf32>
    %213 = vector.shape_cast %212 : vector<4xf32> to vector<4x1xf32>
    %214 = vector.broadcast %213 : vector<4x1xf32> to vector<4x128xf32>
    %215 = arith.subf %211, %214 : vector<4x128xf32>
    %216 = math.exp %215 : vector<4x128xf32>
    %cst_71 = arith.constant 0.000000e+00 : f32
    %217 = vector.broadcast %cst_71 : f32 to vector<4x128xf32>
    %218 = arith.select %36, %216, %217 : vector<4x128xi1>, vector<4x128xf32>
    %cst_72 = arith.constant dense<0.000000e+00> : vector<4xf32>
    %219 = vector.multi_reduction <add>, %218, %cst_72 [1] : vector<4x128xf32> to vector<4xf32>
    %220 = vector.shape_cast %219 : vector<4xf32> to vector<4x1xf32>
    %221 = vector.broadcast %220 : vector<4x1xf32> to vector<4x128xf32>
    %222 = arith.divf %218, %221 : vector<4x128xf32>
    %223 = vector.extract_strided_slice %222 {offsets = [0, 0], sizes = [2, 128], strides = [1, 1]} : vector<4x128xf32> to vector<2x128xf32>
    %224 = vector.extract_strided_slice %222 {offsets = [2, 0], sizes = [2, 128], strides = [1, 1]} : vector<4x128xf32> to vector<2x128xf32>
    %cst_73 = arith.constant dense<0.000000e+00> : vector<128x128xf32>
    %225 = tpu.matmul %223, %224, %cst_73 {dimension_numbers = #tpu.dot_dimension_numbers<[0], [0], [1], [1], [0, 1, 1, 1], [], []>} : vector<2x128xf32>, vector<2x128xf32>, vector<128x128xf32> -> vector<128x128xf32>
    %cst_74 = arith.constant dense<0.000000e+00> : vector<128x128xf32>
    %226 = tpu.matmul %224, %223, %cst_74 {dimension_numbers = #tpu.dot_dimension_numbers<[0], [0], [1], [1], [0, 1, 1, 1], [], []>} : vector<2x128xf32>, vector<2x128xf32>, vector<128x128xf32> -> vector<128x128xf32>
    %227 = vector.extract_strided_slice %225 {offsets = [0, 0], sizes = [16, 128], strides = [1, 1]} : vector<128x128xf32> to vector<16x128xf32>
    %228 = vector.extract_strided_slice %226 {offsets = [0, 0], sizes = [16, 128], strides = [1, 1]} : vector<128x128xf32> to vector<16x128xf32>
    %229 = arith.addf %227, %228 : vector<16x128xf32>
    %cst_75 = arith.constant 5.000000e-01 : f32
    %230 = vector.broadcast %cst_75 : f32 to vector<16x128xf32>
    %231 = arith.mulf %230, %229 : vector<16x128xf32>
    %232 = vector.shape_cast %231 : vector<16x128xf32> to vector<1x16x128xf32>
    %cst_76 = arith.constant dense<0.000000e+00> : vector<1xf32>
    %233 = vector.multi_reduction <add>, %232, %cst_76 [1, 2] : vector<1x16x128xf32> to vector<1xf32>
    %234 = vector.shape_cast %233 : vector<1xf32> to vector<1x1x1xf32>
    %235 = vector.extract %234[0, 0, 0] : f32 from vector<1x1x1xf32>
    %236 = vector.broadcast %235 : f32 to vector<16x128xf32>
    %237 = arith.divf %231, %236 : vector<16x128xf32>
    %cst_77 = arith.constant 1.1920929E-7 : f32
    %238 = vector.broadcast %cst_77 : f32 to vector<16x128xf32>
    %239 = arith.cmpf olt, %237, %238 : vector<16x128xf32>
    %cst_78 = arith.constant 1.1920929E-7 : f32
    %240 = vector.broadcast %cst_78 : f32 to vector<16x128xf32>
    %241 = arith.select %239, %240, %237 : vector<16x128xi1>, vector<16x128xf32>
    %cst_79 = arith.constant 0.000000e+00 : f32
    %242 = vector.broadcast %cst_79 : f32 to vector<16x128xf32>
    %243 = arith.select %45, %241, %242 : vector<16x128xi1>, vector<16x128xf32>
    %cst_80 = arith.constant dense<0.000000e+00> : vector<16xf32>
    %244 = vector.multi_reduction <add>, %243, %cst_80 [1] : vector<16x128xf32> to vector<16xf32>
    %245 = vector.shape_cast %244 : vector<16xf32> to vector<16x1xf32>
    %cst_81 = arith.constant dense<0.000000e+00> : vector<128xf32>
    %246 = vector.multi_reduction <add>, %243, %cst_81 [0] : vector<16x128xf32> to vector<128xf32>
    %247 = vector.shape_cast %246 : vector<128xf32> to vector<1x128xf32>
    %248 = vector.broadcast %245 : vector<16x1xf32> to vector<16x128xf32>
    %249 = vector.broadcast %247 : vector<1x128xf32> to vector<16x128xf32>
    %250 = arith.mulf %248, %249 : vector<16x128xf32>
    %251 = arith.divf %250, %241 : vector<16x128xf32>
    %cst_82 = arith.constant 1.000000e+00 : f32
    %252 = vector.broadcast %cst_82 : f32 to vector<16x128xf32>
    %253 = arith.select %45, %251, %252 : vector<16x128xi1>, vector<16x128xf32>
    %254 = math.log %253 : vector<16x128xf32>
    %255 = arith.mulf %243, %254 : vector<16x128xf32>
    %256 = vector.shape_cast %255 : vector<16x128xf32> to vector<1x16x128xf32>
    %cst_83 = arith.constant dense<0.000000e+00> : vector<1xf32>
    %257 = vector.multi_reduction <add>, %256, %cst_83 [1, 2] : vector<1x16x128xf32> to vector<1xf32>
    %258 = vector.shape_cast %257 : vector<1xf32> to vector<1x1x1xf32>
    %259 = vector.extract %258[0, 0, 0] : f32 from vector<1x1x1xf32>
    %260 = arith.addf %208, %259 : f32
    %261 = vector.extract_strided_slice %33 {offsets = [0, 512], sizes = [4, 128], strides = [1, 1]} : vector<4x1280xf32> to vector<4x128xf32>
    %cst_84 = arith.constant -1.000000e+30 : f32
    %262 = vector.broadcast %cst_84 : f32 to vector<4x128xf32>
    %263 = arith.select %36, %261, %262 : vector<4x128xi1>, vector<4x128xf32>
    %cst_85 = arith.constant dense<0xFF800000> : vector<4xf32>
    %264 = vector.multi_reduction <maximumf>, %263, %cst_85 [1] : vector<4x128xf32> to vector<4xf32>
    %265 = vector.shape_cast %264 : vector<4xf32> to vector<4x1xf32>
    %266 = vector.broadcast %265 : vector<4x1xf32> to vector<4x128xf32>
    %267 = arith.subf %263, %266 : vector<4x128xf32>
    %268 = math.exp %267 : vector<4x128xf32>
    %cst_86 = arith.constant 0.000000e+00 : f32
    %269 = vector.broadcast %cst_86 : f32 to vector<4x128xf32>
    %270 = arith.select %36, %268, %269 : vector<4x128xi1>, vector<4x128xf32>
    %cst_87 = arith.constant dense<0.000000e+00> : vector<4xf32>
    %271 = vector.multi_reduction <add>, %270, %cst_87 [1] : vector<4x128xf32> to vector<4xf32>
    %272 = vector.shape_cast %271 : vector<4xf32> to vector<4x1xf32>
    %273 = vector.broadcast %272 : vector<4x1xf32> to vector<4x128xf32>
    %274 = arith.divf %270, %273 : vector<4x128xf32>
    %275 = vector.extract_strided_slice %274 {offsets = [0, 0], sizes = [2, 128], strides = [1, 1]} : vector<4x128xf32> to vector<2x128xf32>
    %276 = vector.extract_strided_slice %274 {offsets = [2, 0], sizes = [2, 128], strides = [1, 1]} : vector<4x128xf32> to vector<2x128xf32>
    %cst_88 = arith.constant dense<0.000000e+00> : vector<128x128xf32>
    %277 = tpu.matmul %275, %276, %cst_88 {dimension_numbers = #tpu.dot_dimension_numbers<[0], [0], [1], [1], [0, 1, 1, 1], [], []>} : vector<2x128xf32>, vector<2x128xf32>, vector<128x128xf32> -> vector<128x128xf32>
    %cst_89 = arith.constant dense<0.000000e+00> : vector<128x128xf32>
    %278 = tpu.matmul %276, %275, %cst_89 {dimension_numbers = #tpu.dot_dimension_numbers<[0], [0], [1], [1], [0, 1, 1, 1], [], []>} : vector<2x128xf32>, vector<2x128xf32>, vector<128x128xf32> -> vector<128x128xf32>
    %279 = vector.extract_strided_slice %277 {offsets = [0, 0], sizes = [16, 128], strides = [1, 1]} : vector<128x128xf32> to vector<16x128xf32>
    %280 = vector.extract_strided_slice %278 {offsets = [0, 0], sizes = [16, 128], strides = [1, 1]} : vector<128x128xf32> to vector<16x128xf32>
    %281 = arith.addf %279, %280 : vector<16x128xf32>
    %cst_90 = arith.constant 5.000000e-01 : f32
    %282 = vector.broadcast %cst_90 : f32 to vector<16x128xf32>
    %283 = arith.mulf %282, %281 : vector<16x128xf32>
    %284 = vector.shape_cast %283 : vector<16x128xf32> to vector<1x16x128xf32>
    %cst_91 = arith.constant dense<0.000000e+00> : vector<1xf32>
    %285 = vector.multi_reduction <add>, %284, %cst_91 [1, 2] : vector<1x16x128xf32> to vector<1xf32>
    %286 = vector.shape_cast %285 : vector<1xf32> to vector<1x1x1xf32>
    %287 = vector.extract %286[0, 0, 0] : f32 from vector<1x1x1xf32>
    %288 = vector.broadcast %287 : f32 to vector<16x128xf32>
    %289 = arith.divf %283, %288 : vector<16x128xf32>
    %cst_92 = arith.constant 1.1920929E-7 : f32
    %290 = vector.broadcast %cst_92 : f32 to vector<16x128xf32>
    %291 = arith.cmpf olt, %289, %290 : vector<16x128xf32>
    %cst_93 = arith.constant 1.1920929E-7 : f32
    %292 = vector.broadcast %cst_93 : f32 to vector<16x128xf32>
    %293 = arith.select %291, %292, %289 : vector<16x128xi1>, vector<16x128xf32>
    %cst_94 = arith.constant 0.000000e+00 : f32
    %294 = vector.broadcast %cst_94 : f32 to vector<16x128xf32>
    %295 = arith.select %45, %293, %294 : vector<16x128xi1>, vector<16x128xf32>
    %cst_95 = arith.constant dense<0.000000e+00> : vector<16xf32>
    %296 = vector.multi_reduction <add>, %295, %cst_95 [1] : vector<16x128xf32> to vector<16xf32>
    %297 = vector.shape_cast %296 : vector<16xf32> to vector<16x1xf32>
    %cst_96 = arith.constant dense<0.000000e+00> : vector<128xf32>
    %298 = vector.multi_reduction <add>, %295, %cst_96 [0] : vector<16x128xf32> to vector<128xf32>
    %299 = vector.shape_cast %298 : vector<128xf32> to vector<1x128xf32>
    %300 = vector.broadcast %297 : vector<16x1xf32> to vector<16x128xf32>
    %301 = vector.broadcast %299 : vector<1x128xf32> to vector<16x128xf32>
    %302 = arith.mulf %300, %301 : vector<16x128xf32>
    %303 = arith.divf %302, %293 : vector<16x128xf32>
    %cst_97 = arith.constant 1.000000e+00 : f32
    %304 = vector.broadcast %cst_97 : f32 to vector<16x128xf32>
    %305 = arith.select %45, %303, %304 : vector<16x128xi1>, vector<16x128xf32>
    %306 = math.log %305 : vector<16x128xf32>
    %307 = arith.mulf %295, %306 : vector<16x128xf32>
    %308 = vector.shape_cast %307 : vector<16x128xf32> to vector<1x16x128xf32>
    %cst_98 = arith.constant dense<0.000000e+00> : vector<1xf32>
    %309 = vector.multi_reduction <add>, %308, %cst_98 [1, 2] : vector<1x16x128xf32> to vector<1xf32>
    %310 = vector.shape_cast %309 : vector<1xf32> to vector<1x1x1xf32>
    %311 = vector.extract %310[0, 0, 0] : f32 from vector<1x1x1xf32>
    %312 = arith.addf %260, %311 : f32
    %313 = vector.extract_strided_slice %33 {offsets = [0, 640], sizes = [4, 128], strides = [1, 1]} : vector<4x1280xf32> to vector<4x128xf32>
    %cst_99 = arith.constant -1.000000e+30 : f32
    %314 = vector.broadcast %cst_99 : f32 to vector<4x128xf32>
    %315 = arith.select %38, %313, %314 : vector<4x128xi1>, vector<4x128xf32>
    %cst_100 = arith.constant dense<0xFF800000> : vector<4xf32>
    %316 = vector.multi_reduction <maximumf>, %315, %cst_100 [1] : vector<4x128xf32> to vector<4xf32>
    %317 = vector.shape_cast %316 : vector<4xf32> to vector<4x1xf32>
    %318 = vector.broadcast %317 : vector<4x1xf32> to vector<4x128xf32>
    %319 = arith.subf %315, %318 : vector<4x128xf32>
    %320 = math.exp %319 : vector<4x128xf32>
    %cst_101 = arith.constant 0.000000e+00 : f32
    %321 = vector.broadcast %cst_101 : f32 to vector<4x128xf32>
    %322 = arith.select %38, %320, %321 : vector<4x128xi1>, vector<4x128xf32>
    %cst_102 = arith.constant dense<0.000000e+00> : vector<4xf32>
    %323 = vector.multi_reduction <add>, %322, %cst_102 [1] : vector<4x128xf32> to vector<4xf32>
    %324 = vector.shape_cast %323 : vector<4xf32> to vector<4x1xf32>
    %325 = vector.broadcast %324 : vector<4x1xf32> to vector<4x128xf32>
    %326 = arith.divf %322, %325 : vector<4x128xf32>
    %327 = vector.extract_strided_slice %326 {offsets = [0, 0], sizes = [2, 128], strides = [1, 1]} : vector<4x128xf32> to vector<2x128xf32>
    %328 = vector.extract_strided_slice %326 {offsets = [2, 0], sizes = [2, 128], strides = [1, 1]} : vector<4x128xf32> to vector<2x128xf32>
    %cst_103 = arith.constant dense<0.000000e+00> : vector<128x128xf32>
    %329 = tpu.matmul %327, %328, %cst_103 {dimension_numbers = #tpu.dot_dimension_numbers<[0], [0], [1], [1], [0, 1, 1, 1], [], []>} : vector<2x128xf32>, vector<2x128xf32>, vector<128x128xf32> -> vector<128x128xf32>
    %cst_104 = arith.constant dense<0.000000e+00> : vector<128x128xf32>
    %330 = tpu.matmul %328, %327, %cst_104 {dimension_numbers = #tpu.dot_dimension_numbers<[0], [0], [1], [1], [0, 1, 1, 1], [], []>} : vector<2x128xf32>, vector<2x128xf32>, vector<128x128xf32> -> vector<128x128xf32>
    %331 = vector.extract_strided_slice %329 {offsets = [0, 0], sizes = [104, 128], strides = [1, 1]} : vector<128x128xf32> to vector<104x128xf32>
    %332 = vector.extract_strided_slice %330 {offsets = [0, 0], sizes = [104, 128], strides = [1, 1]} : vector<128x128xf32> to vector<104x128xf32>
    %333 = arith.addf %331, %332 : vector<104x128xf32>
    %cst_105 = arith.constant 5.000000e-01 : f32
    %334 = vector.broadcast %cst_105 : f32 to vector<104x128xf32>
    %335 = arith.mulf %334, %333 : vector<104x128xf32>
    %336 = vector.shape_cast %335 : vector<104x128xf32> to vector<1x104x128xf32>
    %cst_106 = arith.constant dense<0.000000e+00> : vector<1xf32>
    %337 = vector.multi_reduction <add>, %336, %cst_106 [1, 2] : vector<1x104x128xf32> to vector<1xf32>
    %338 = vector.shape_cast %337 : vector<1xf32> to vector<1x1x1xf32>
    %339 = vector.extract %338[0, 0, 0] : f32 from vector<1x1x1xf32>
    %340 = vector.broadcast %339 : f32 to vector<104x128xf32>
    %341 = arith.divf %335, %340 : vector<104x128xf32>
    %cst_107 = arith.constant 1.1920929E-7 : f32
    %342 = vector.broadcast %cst_107 : f32 to vector<104x128xf32>
    %343 = arith.cmpf olt, %341, %342 : vector<104x128xf32>
    %cst_108 = arith.constant 1.1920929E-7 : f32
    %344 = vector.broadcast %cst_108 : f32 to vector<104x128xf32>
    %345 = arith.select %343, %344, %341 : vector<104x128xi1>, vector<104x128xf32>
    %cst_109 = arith.constant 0.000000e+00 : f32
    %346 = vector.broadcast %cst_109 : f32 to vector<104x128xf32>
    %347 = arith.select %52, %345, %346 : vector<104x128xi1>, vector<104x128xf32>
    %cst_110 = arith.constant dense<0.000000e+00> : vector<104xf32>
    %348 = vector.multi_reduction <add>, %347, %cst_110 [1] : vector<104x128xf32> to vector<104xf32>
    %349 = vector.shape_cast %348 : vector<104xf32> to vector<104x1xf32>
    %cst_111 = arith.constant dense<0.000000e+00> : vector<128xf32>
    %350 = vector.multi_reduction <add>, %347, %cst_111 [0] : vector<104x128xf32> to vector<128xf32>
    %351 = vector.shape_cast %350 : vector<128xf32> to vector<1x128xf32>
    %352 = vector.broadcast %349 : vector<104x1xf32> to vector<104x128xf32>
    %353 = vector.broadcast %351 : vector<1x128xf32> to vector<104x128xf32>
    %354 = arith.mulf %352, %353 : vector<104x128xf32>
    %355 = arith.divf %354, %345 : vector<104x128xf32>
    %cst_112 = arith.constant 1.000000e+00 : f32
    %356 = vector.broadcast %cst_112 : f32 to vector<104x128xf32>
    %357 = arith.select %52, %355, %356 : vector<104x128xi1>, vector<104x128xf32>
    %358 = math.log %357 : vector<104x128xf32>
    %359 = arith.mulf %347, %358 : vector<104x128xf32>
    %360 = vector.shape_cast %359 : vector<104x128xf32> to vector<1x104x128xf32>
    %cst_113 = arith.constant dense<0.000000e+00> : vector<1xf32>
    %361 = vector.multi_reduction <add>, %360, %cst_113 [1, 2] : vector<1x104x128xf32> to vector<1xf32>
    %362 = vector.shape_cast %361 : vector<1xf32> to vector<1x1x1xf32>
    %363 = vector.extract %362[0, 0, 0] : f32 from vector<1x1x1xf32>
    %cst_114 = arith.constant 0.000000e+00 : f32
    %364 = arith.addf %cst_114, %363 : f32
    %365 = vector.extract_strided_slice %33 {offsets = [0, 768], sizes = [4, 128], strides = [1, 1]} : vector<4x1280xf32> to vector<4x128xf32>
    %cst_115 = arith.constant -1.000000e+30 : f32
    %366 = vector.broadcast %cst_115 : f32 to vector<4x128xf32>
    %367 = arith.select %38, %365, %366 : vector<4x128xi1>, vector<4x128xf32>
    %cst_116 = arith.constant dense<0xFF800000> : vector<4xf32>
    %368 = vector.multi_reduction <maximumf>, %367, %cst_116 [1] : vector<4x128xf32> to vector<4xf32>
    %369 = vector.shape_cast %368 : vector<4xf32> to vector<4x1xf32>
    %370 = vector.broadcast %369 : vector<4x1xf32> to vector<4x128xf32>
    %371 = arith.subf %367, %370 : vector<4x128xf32>
    %372 = math.exp %371 : vector<4x128xf32>
    %cst_117 = arith.constant 0.000000e+00 : f32
    %373 = vector.broadcast %cst_117 : f32 to vector<4x128xf32>
    %374 = arith.select %38, %372, %373 : vector<4x128xi1>, vector<4x128xf32>
    %cst_118 = arith.constant dense<0.000000e+00> : vector<4xf32>
    %375 = vector.multi_reduction <add>, %374, %cst_118 [1] : vector<4x128xf32> to vector<4xf32>
    %376 = vector.shape_cast %375 : vector<4xf32> to vector<4x1xf32>
    %377 = vector.broadcast %376 : vector<4x1xf32> to vector<4x128xf32>
    %378 = arith.divf %374, %377 : vector<4x128xf32>
    %379 = vector.extract_strided_slice %378 {offsets = [0, 0], sizes = [2, 128], strides = [1, 1]} : vector<4x128xf32> to vector<2x128xf32>
    %380 = vector.extract_strided_slice %378 {offsets = [2, 0], sizes = [2, 128], strides = [1, 1]} : vector<4x128xf32> to vector<2x128xf32>
    %cst_119 = arith.constant dense<0.000000e+00> : vector<128x128xf32>
    %381 = tpu.matmul %379, %380, %cst_119 {dimension_numbers = #tpu.dot_dimension_numbers<[0], [0], [1], [1], [0, 1, 1, 1], [], []>} : vector<2x128xf32>, vector<2x128xf32>, vector<128x128xf32> -> vector<128x128xf32>
    %cst_120 = arith.constant dense<0.000000e+00> : vector<128x128xf32>
    %382 = tpu.matmul %380, %379, %cst_120 {dimension_numbers = #tpu.dot_dimension_numbers<[0], [0], [1], [1], [0, 1, 1, 1], [], []>} : vector<2x128xf32>, vector<2x128xf32>, vector<128x128xf32> -> vector<128x128xf32>
    %383 = vector.extract_strided_slice %381 {offsets = [0, 0], sizes = [104, 128], strides = [1, 1]} : vector<128x128xf32> to vector<104x128xf32>
    %384 = vector.extract_strided_slice %382 {offsets = [0, 0], sizes = [104, 128], strides = [1, 1]} : vector<128x128xf32> to vector<104x128xf32>
    %385 = arith.addf %383, %384 : vector<104x128xf32>
    %cst_121 = arith.constant 5.000000e-01 : f32
    %386 = vector.broadcast %cst_121 : f32 to vector<104x128xf32>
    %387 = arith.mulf %386, %385 : vector<104x128xf32>
    %388 = vector.shape_cast %387 : vector<104x128xf32> to vector<1x104x128xf32>
    %cst_122 = arith.constant dense<0.000000e+00> : vector<1xf32>
    %389 = vector.multi_reduction <add>, %388, %cst_122 [1, 2] : vector<1x104x128xf32> to vector<1xf32>
    %390 = vector.shape_cast %389 : vector<1xf32> to vector<1x1x1xf32>
    %391 = vector.extract %390[0, 0, 0] : f32 from vector<1x1x1xf32>
    %392 = vector.broadcast %391 : f32 to vector<104x128xf32>
    %393 = arith.divf %387, %392 : vector<104x128xf32>
    %cst_123 = arith.constant 1.1920929E-7 : f32
    %394 = vector.broadcast %cst_123 : f32 to vector<104x128xf32>
    %395 = arith.cmpf olt, %393, %394 : vector<104x128xf32>
    %cst_124 = arith.constant 1.1920929E-7 : f32
    %396 = vector.broadcast %cst_124 : f32 to vector<104x128xf32>
    %397 = arith.select %395, %396, %393 : vector<104x128xi1>, vector<104x128xf32>
    %cst_125 = arith.constant 0.000000e+00 : f32
    %398 = vector.broadcast %cst_125 : f32 to vector<104x128xf32>
    %399 = arith.select %52, %397, %398 : vector<104x128xi1>, vector<104x128xf32>
    %cst_126 = arith.constant dense<0.000000e+00> : vector<104xf32>
    %400 = vector.multi_reduction <add>, %399, %cst_126 [1] : vector<104x128xf32> to vector<104xf32>
    %401 = vector.shape_cast %400 : vector<104xf32> to vector<104x1xf32>
    %cst_127 = arith.constant dense<0.000000e+00> : vector<128xf32>
    %402 = vector.multi_reduction <add>, %399, %cst_127 [0] : vector<104x128xf32> to vector<128xf32>
    %403 = vector.shape_cast %402 : vector<128xf32> to vector<1x128xf32>
    %404 = vector.broadcast %401 : vector<104x1xf32> to vector<104x128xf32>
    %405 = vector.broadcast %403 : vector<1x128xf32> to vector<104x128xf32>
    %406 = arith.mulf %404, %405 : vector<104x128xf32>
    %407 = arith.divf %406, %397 : vector<104x128xf32>
    %cst_128 = arith.constant 1.000000e+00 : f32
    %408 = vector.broadcast %cst_128 : f32 to vector<104x128xf32>
    %409 = arith.select %52, %407, %408 : vector<104x128xi1>, vector<104x128xf32>
    %410 = math.log %409 : vector<104x128xf32>
    %411 = arith.mulf %399, %410 : vector<104x128xf32>
    %412 = vector.shape_cast %411 : vector<104x128xf32> to vector<1x104x128xf32>
    %cst_129 = arith.constant dense<0.000000e+00> : vector<1xf32>
    %413 = vector.multi_reduction <add>, %412, %cst_129 [1, 2] : vector<1x104x128xf32> to vector<1xf32>
    %414 = vector.shape_cast %413 : vector<1xf32> to vector<1x1x1xf32>
    %415 = vector.extract %414[0, 0, 0] : f32 from vector<1x1x1xf32>
    %416 = arith.addf %364, %415 : f32
    %417 = vector.extract_strided_slice %33 {offsets = [0, 896], sizes = [4, 128], strides = [1, 1]} : vector<4x1280xf32> to vector<4x128xf32>
    %cst_130 = arith.constant -1.000000e+30 : f32
    %418 = vector.broadcast %cst_130 : f32 to vector<4x128xf32>
    %419 = arith.select %38, %417, %418 : vector<4x128xi1>, vector<4x128xf32>
    %cst_131 = arith.constant dense<0xFF800000> : vector<4xf32>
    %420 = vector.multi_reduction <maximumf>, %419, %cst_131 [1] : vector<4x128xf32> to vector<4xf32>
    %421 = vector.shape_cast %420 : vector<4xf32> to vector<4x1xf32>
    %422 = vector.broadcast %421 : vector<4x1xf32> to vector<4x128xf32>
    %423 = arith.subf %419, %422 : vector<4x128xf32>
    %424 = math.exp %423 : vector<4x128xf32>
    %cst_132 = arith.constant 0.000000e+00 : f32
    %425 = vector.broadcast %cst_132 : f32 to vector<4x128xf32>
    %426 = arith.select %38, %424, %425 : vector<4x128xi1>, vector<4x128xf32>
    %cst_133 = arith.constant dense<0.000000e+00> : vector<4xf32>
    %427 = vector.multi_reduction <add>, %426, %cst_133 [1] : vector<4x128xf32> to vector<4xf32>
    %428 = vector.shape_cast %427 : vector<4xf32> to vector<4x1xf32>
    %429 = vector.broadcast %428 : vector<4x1xf32> to vector<4x128xf32>
    %430 = arith.divf %426, %429 : vector<4x128xf32>
    %431 = vector.extract_strided_slice %430 {offsets = [0, 0], sizes = [2, 128], strides = [1, 1]} : vector<4x128xf32> to vector<2x128xf32>
    %432 = vector.extract_strided_slice %430 {offsets = [2, 0], sizes = [2, 128], strides = [1, 1]} : vector<4x128xf32> to vector<2x128xf32>
    %cst_134 = arith.constant dense<0.000000e+00> : vector<128x128xf32>
    %433 = tpu.matmul %431, %432, %cst_134 {dimension_numbers = #tpu.dot_dimension_numbers<[0], [0], [1], [1], [0, 1, 1, 1], [], []>} : vector<2x128xf32>, vector<2x128xf32>, vector<128x128xf32> -> vector<128x128xf32>
    %cst_135 = arith.constant dense<0.000000e+00> : vector<128x128xf32>
    %434 = tpu.matmul %432, %431, %cst_135 {dimension_numbers = #tpu.dot_dimension_numbers<[0], [0], [1], [1], [0, 1, 1, 1], [], []>} : vector<2x128xf32>, vector<2x128xf32>, vector<128x128xf32> -> vector<128x128xf32>
    %435 = vector.extract_strided_slice %433 {offsets = [0, 0], sizes = [104, 128], strides = [1, 1]} : vector<128x128xf32> to vector<104x128xf32>
    %436 = vector.extract_strided_slice %434 {offsets = [0, 0], sizes = [104, 128], strides = [1, 1]} : vector<128x128xf32> to vector<104x128xf32>
    %437 = arith.addf %435, %436 : vector<104x128xf32>
    %cst_136 = arith.constant 5.000000e-01 : f32
    %438 = vector.broadcast %cst_136 : f32 to vector<104x128xf32>
    %439 = arith.mulf %438, %437 : vector<104x128xf32>
    %440 = vector.shape_cast %439 : vector<104x128xf32> to vector<1x104x128xf32>
    %cst_137 = arith.constant dense<0.000000e+00> : vector<1xf32>
    %441 = vector.multi_reduction <add>, %440, %cst_137 [1, 2] : vector<1x104x128xf32> to vector<1xf32>
    %442 = vector.shape_cast %441 : vector<1xf32> to vector<1x1x1xf32>
    %443 = vector.extract %442[0, 0, 0] : f32 from vector<1x1x1xf32>
    %444 = vector.broadcast %443 : f32 to vector<104x128xf32>
    %445 = arith.divf %439, %444 : vector<104x128xf32>
    %cst_138 = arith.constant 1.1920929E-7 : f32
    %446 = vector.broadcast %cst_138 : f32 to vector<104x128xf32>
    %447 = arith.cmpf olt, %445, %446 : vector<104x128xf32>
    %cst_139 = arith.constant 1.1920929E-7 : f32
    %448 = vector.broadcast %cst_139 : f32 to vector<104x128xf32>
    %449 = arith.select %447, %448, %445 : vector<104x128xi1>, vector<104x128xf32>
    %cst_140 = arith.constant 0.000000e+00 : f32
    %450 = vector.broadcast %cst_140 : f32 to vector<104x128xf32>
    %451 = arith.select %52, %449, %450 : vector<104x128xi1>, vector<104x128xf32>
    %cst_141 = arith.constant dense<0.000000e+00> : vector<104xf32>
    %452 = vector.multi_reduction <add>, %451, %cst_141 [1] : vector<104x128xf32> to vector<104xf32>
    %453 = vector.shape_cast %452 : vector<104xf32> to vector<104x1xf32>
    %cst_142 = arith.constant dense<0.000000e+00> : vector<128xf32>
    %454 = vector.multi_reduction <add>, %451, %cst_142 [0] : vector<104x128xf32> to vector<128xf32>
    %455 = vector.shape_cast %454 : vector<128xf32> to vector<1x128xf32>
    %456 = vector.broadcast %453 : vector<104x1xf32> to vector<104x128xf32>
    %457 = vector.broadcast %455 : vector<1x128xf32> to vector<104x128xf32>
    %458 = arith.mulf %456, %457 : vector<104x128xf32>
    %459 = arith.divf %458, %449 : vector<104x128xf32>
    %cst_143 = arith.constant 1.000000e+00 : f32
    %460 = vector.broadcast %cst_143 : f32 to vector<104x128xf32>
    %461 = arith.select %52, %459, %460 : vector<104x128xi1>, vector<104x128xf32>
    %462 = math.log %461 : vector<104x128xf32>
    %463 = arith.mulf %451, %462 : vector<104x128xf32>
    %464 = vector.shape_cast %463 : vector<104x128xf32> to vector<1x104x128xf32>
    %cst_144 = arith.constant dense<0.000000e+00> : vector<1xf32>
    %465 = vector.multi_reduction <add>, %464, %cst_144 [1, 2] : vector<1x104x128xf32> to vector<1xf32>
    %466 = vector.shape_cast %465 : vector<1xf32> to vector<1x1x1xf32>
    %467 = vector.extract %466[0, 0, 0] : f32 from vector<1x1x1xf32>
    %468 = arith.addf %416, %467 : f32
    %469 = vector.extract_strided_slice %33 {offsets = [0, 1024], sizes = [4, 128], strides = [1, 1]} : vector<4x1280xf32> to vector<4x128xf32>
    %cst_145 = arith.constant -1.000000e+30 : f32
    %470 = vector.broadcast %cst_145 : f32 to vector<4x128xf32>
    %471 = arith.select %38, %469, %470 : vector<4x128xi1>, vector<4x128xf32>
    %cst_146 = arith.constant dense<0xFF800000> : vector<4xf32>
    %472 = vector.multi_reduction <maximumf>, %471, %cst_146 [1] : vector<4x128xf32> to vector<4xf32>
    %473 = vector.shape_cast %472 : vector<4xf32> to vector<4x1xf32>
    %474 = vector.broadcast %473 : vector<4x1xf32> to vector<4x128xf32>
    %475 = arith.subf %471, %474 : vector<4x128xf32>
    %476 = math.exp %475 : vector<4x128xf32>
    %cst_147 = arith.constant 0.000000e+00 : f32
    %477 = vector.broadcast %cst_147 : f32 to vector<4x128xf32>
    %478 = arith.select %38, %476, %477 : vector<4x128xi1>, vector<4x128xf32>
    %cst_148 = arith.constant dense<0.000000e+00> : vector<4xf32>
    %479 = vector.multi_reduction <add>, %478, %cst_148 [1] : vector<4x128xf32> to vector<4xf32>
    %480 = vector.shape_cast %479 : vector<4xf32> to vector<4x1xf32>
    %481 = vector.broadcast %480 : vector<4x1xf32> to vector<4x128xf32>
    %482 = arith.divf %478, %481 : vector<4x128xf32>
    %483 = vector.extract_strided_slice %482 {offsets = [0, 0], sizes = [2, 128], strides = [1, 1]} : vector<4x128xf32> to vector<2x128xf32>
    %484 = vector.extract_strided_slice %482 {offsets = [2, 0], sizes = [2, 128], strides = [1, 1]} : vector<4x128xf32> to vector<2x128xf32>
    %cst_149 = arith.constant dense<0.000000e+00> : vector<128x128xf32>
    %485 = tpu.matmul %483, %484, %cst_149 {dimension_numbers = #tpu.dot_dimension_numbers<[0], [0], [1], [1], [0, 1, 1, 1], [], []>} : vector<2x128xf32>, vector<2x128xf32>, vector<128x128xf32> -> vector<128x128xf32>
    %cst_150 = arith.constant dense<0.000000e+00> : vector<128x128xf32>
    %486 = tpu.matmul %484, %483, %cst_150 {dimension_numbers = #tpu.dot_dimension_numbers<[0], [0], [1], [1], [0, 1, 1, 1], [], []>} : vector<2x128xf32>, vector<2x128xf32>, vector<128x128xf32> -> vector<128x128xf32>
    %487 = vector.extract_strided_slice %485 {offsets = [0, 0], sizes = [104, 128], strides = [1, 1]} : vector<128x128xf32> to vector<104x128xf32>
    %488 = vector.extract_strided_slice %486 {offsets = [0, 0], sizes = [104, 128], strides = [1, 1]} : vector<128x128xf32> to vector<104x128xf32>
    %489 = arith.addf %487, %488 : vector<104x128xf32>
    %cst_151 = arith.constant 5.000000e-01 : f32
    %490 = vector.broadcast %cst_151 : f32 to vector<104x128xf32>
    %491 = arith.mulf %490, %489 : vector<104x128xf32>
    %492 = vector.shape_cast %491 : vector<104x128xf32> to vector<1x104x128xf32>
    %cst_152 = arith.constant dense<0.000000e+00> : vector<1xf32>
    %493 = vector.multi_reduction <add>, %492, %cst_152 [1, 2] : vector<1x104x128xf32> to vector<1xf32>
    %494 = vector.shape_cast %493 : vector<1xf32> to vector<1x1x1xf32>
    %495 = vector.extract %494[0, 0, 0] : f32 from vector<1x1x1xf32>
    %496 = vector.broadcast %495 : f32 to vector<104x128xf32>
    %497 = arith.divf %491, %496 : vector<104x128xf32>
    %cst_153 = arith.constant 1.1920929E-7 : f32
    %498 = vector.broadcast %cst_153 : f32 to vector<104x128xf32>
    %499 = arith.cmpf olt, %497, %498 : vector<104x128xf32>
    %cst_154 = arith.constant 1.1920929E-7 : f32
    %500 = vector.broadcast %cst_154 : f32 to vector<104x128xf32>
    %501 = arith.select %499, %500, %497 : vector<104x128xi1>, vector<104x128xf32>
    %cst_155 = arith.constant 0.000000e+00 : f32
    %502 = vector.broadcast %cst_155 : f32 to vector<104x128xf32>
    %503 = arith.select %52, %501, %502 : vector<104x128xi1>, vector<104x128xf32>
    %cst_156 = arith.constant dense<0.000000e+00> : vector<104xf32>
    %504 = vector.multi_reduction <add>, %503, %cst_156 [1] : vector<104x128xf32> to vector<104xf32>
    %505 = vector.shape_cast %504 : vector<104xf32> to vector<104x1xf32>
    %cst_157 = arith.constant dense<0.000000e+00> : vector<128xf32>
    %506 = vector.multi_reduction <add>, %503, %cst_157 [0] : vector<104x128xf32> to vector<128xf32>
    %507 = vector.shape_cast %506 : vector<128xf32> to vector<1x128xf32>
    %508 = vector.broadcast %505 : vector<104x1xf32> to vector<104x128xf32>
    %509 = vector.broadcast %507 : vector<1x128xf32> to vector<104x128xf32>
    %510 = arith.mulf %508, %509 : vector<104x128xf32>
    %511 = arith.divf %510, %501 : vector<104x128xf32>
    %cst_158 = arith.constant 1.000000e+00 : f32
    %512 = vector.broadcast %cst_158 : f32 to vector<104x128xf32>
    %513 = arith.select %52, %511, %512 : vector<104x128xi1>, vector<104x128xf32>
    %514 = math.log %513 : vector<104x128xf32>
    %515 = arith.mulf %503, %514 : vector<104x128xf32>
    %516 = vector.shape_cast %515 : vector<104x128xf32> to vector<1x104x128xf32>
    %cst_159 = arith.constant dense<0.000000e+00> : vector<1xf32>
    %517 = vector.multi_reduction <add>, %516, %cst_159 [1, 2] : vector<1x104x128xf32> to vector<1xf32>
    %518 = vector.shape_cast %517 : vector<1xf32> to vector<1x1x1xf32>
    %519 = vector.extract %518[0, 0, 0] : f32 from vector<1x1x1xf32>
    %520 = arith.addf %468, %519 : f32
    %521 = vector.extract_strided_slice %33 {offsets = [0, 1152], sizes = [4, 128], strides = [1, 1]} : vector<4x1280xf32> to vector<4x128xf32>
    %cst_160 = arith.constant -1.000000e+30 : f32
    %522 = vector.broadcast %cst_160 : f32 to vector<4x128xf32>
    %523 = arith.select %38, %521, %522 : vector<4x128xi1>, vector<4x128xf32>
    %cst_161 = arith.constant dense<0xFF800000> : vector<4xf32>
    %524 = vector.multi_reduction <maximumf>, %523, %cst_161 [1] : vector<4x128xf32> to vector<4xf32>
    %525 = vector.shape_cast %524 : vector<4xf32> to vector<4x1xf32>
    %526 = vector.broadcast %525 : vector<4x1xf32> to vector<4x128xf32>
    %527 = arith.subf %523, %526 : vector<4x128xf32>
    %528 = math.exp %527 : vector<4x128xf32>
    %cst_162 = arith.constant 0.000000e+00 : f32
    %529 = vector.broadcast %cst_162 : f32 to vector<4x128xf32>
    %530 = arith.select %38, %528, %529 : vector<4x128xi1>, vector<4x128xf32>
    %cst_163 = arith.constant dense<0.000000e+00> : vector<4xf32>
    %531 = vector.multi_reduction <add>, %530, %cst_163 [1] : vector<4x128xf32> to vector<4xf32>
    %532 = vector.shape_cast %531 : vector<4xf32> to vector<4x1xf32>
    %533 = vector.broadcast %532 : vector<4x1xf32> to vector<4x128xf32>
    %534 = arith.divf %530, %533 : vector<4x128xf32>
    %535 = vector.extract_strided_slice %534 {offsets = [0, 0], sizes = [2, 128], strides = [1, 1]} : vector<4x128xf32> to vector<2x128xf32>
    %536 = vector.extract_strided_slice %534 {offsets = [2, 0], sizes = [2, 128], strides = [1, 1]} : vector<4x128xf32> to vector<2x128xf32>
    %cst_164 = arith.constant dense<0.000000e+00> : vector<128x128xf32>
    %537 = tpu.matmul %535, %536, %cst_164 {dimension_numbers = #tpu.dot_dimension_numbers<[0], [0], [1], [1], [0, 1, 1, 1], [], []>} : vector<2x128xf32>, vector<2x128xf32>, vector<128x128xf32> -> vector<128x128xf32>
    %cst_165 = arith.constant dense<0.000000e+00> : vector<128x128xf32>
    %538 = tpu.matmul %536, %535, %cst_165 {dimension_numbers = #tpu.dot_dimension_numbers<[0], [0], [1], [1], [0, 1, 1, 1], [], []>} : vector<2x128xf32>, vector<2x128xf32>, vector<128x128xf32> -> vector<128x128xf32>
    %539 = vector.extract_strided_slice %537 {offsets = [0, 0], sizes = [104, 128], strides = [1, 1]} : vector<128x128xf32> to vector<104x128xf32>
    %540 = vector.extract_strided_slice %538 {offsets = [0, 0], sizes = [104, 128], strides = [1, 1]} : vector<128x128xf32> to vector<104x128xf32>
    %541 = arith.addf %539, %540 : vector<104x128xf32>
    %cst_166 = arith.constant 5.000000e-01 : f32
    %542 = vector.broadcast %cst_166 : f32 to vector<104x128xf32>
    %543 = arith.mulf %542, %541 : vector<104x128xf32>
    %544 = vector.shape_cast %543 : vector<104x128xf32> to vector<1x104x128xf32>
    %cst_167 = arith.constant dense<0.000000e+00> : vector<1xf32>
    %545 = vector.multi_reduction <add>, %544, %cst_167 [1, 2] : vector<1x104x128xf32> to vector<1xf32>
    %546 = vector.shape_cast %545 : vector<1xf32> to vector<1x1x1xf32>
    %547 = vector.extract %546[0, 0, 0] : f32 from vector<1x1x1xf32>
    %548 = vector.broadcast %547 : f32 to vector<104x128xf32>
    %549 = arith.divf %543, %548 : vector<104x128xf32>
    %cst_168 = arith.constant 1.1920929E-7 : f32
    %550 = vector.broadcast %cst_168 : f32 to vector<104x128xf32>
    %551 = arith.cmpf olt, %549, %550 : vector<104x128xf32>
    %cst_169 = arith.constant 1.1920929E-7 : f32
    %552 = vector.broadcast %cst_169 : f32 to vector<104x128xf32>
    %553 = arith.select %551, %552, %549 : vector<104x128xi1>, vector<104x128xf32>
    %cst_170 = arith.constant 0.000000e+00 : f32
    %554 = vector.broadcast %cst_170 : f32 to vector<104x128xf32>
    %555 = arith.select %52, %553, %554 : vector<104x128xi1>, vector<104x128xf32>
    %cst_171 = arith.constant dense<0.000000e+00> : vector<104xf32>
    %556 = vector.multi_reduction <add>, %555, %cst_171 [1] : vector<104x128xf32> to vector<104xf32>
    %557 = vector.shape_cast %556 : vector<104xf32> to vector<104x1xf32>
    %cst_172 = arith.constant dense<0.000000e+00> : vector<128xf32>
    %558 = vector.multi_reduction <add>, %555, %cst_172 [0] : vector<104x128xf32> to vector<128xf32>
    %559 = vector.shape_cast %558 : vector<128xf32> to vector<1x128xf32>
    %560 = vector.broadcast %557 : vector<104x1xf32> to vector<104x128xf32>
    %561 = vector.broadcast %559 : vector<1x128xf32> to vector<104x128xf32>
    %562 = arith.mulf %560, %561 : vector<104x128xf32>
    %563 = arith.divf %562, %553 : vector<104x128xf32>
    %cst_173 = arith.constant 1.000000e+00 : f32
    %564 = vector.broadcast %cst_173 : f32 to vector<104x128xf32>
    %565 = arith.select %52, %563, %564 : vector<104x128xi1>, vector<104x128xf32>
    %566 = math.log %565 : vector<104x128xf32>
    %567 = arith.mulf %555, %566 : vector<104x128xf32>
    %568 = vector.shape_cast %567 : vector<104x128xf32> to vector<1x104x128xf32>
    %cst_174 = arith.constant dense<0.000000e+00> : vector<1xf32>
    %569 = vector.multi_reduction <add>, %568, %cst_174 [1, 2] : vector<1x104x128xf32> to vector<1xf32>
    %570 = vector.shape_cast %569 : vector<1xf32> to vector<1x1x1xf32>
    %571 = vector.extract %570[0, 0, 0] : f32 from vector<1x1x1xf32>
    %572 = arith.addf %520, %571 : f32
    %c0_175 = arith.constant 0 : index
    %573 = memref.load %arg5[%c0_175] : memref<2xf32, #tpu.memory_space<smem>>
    memref.store %312, %arg5[%c0_175] : memref<2xf32, #tpu.memory_space<smem>>
    %c1 = arith.constant 1 : index
    %574 = memref.load %arg5[%c1] : memref<2xf32, #tpu.memory_space<smem>>
    memref.store %572, %arg5[%c1] : memref<2xf32, #tpu.memory_space<smem>>
    return
  }
}

</mosaic_0001>

<bundles_post_ra>
// kernel: iic_usl.1
= control target key start
LH: loop header
LB: loop body
LE: loop exit
PB: predicated region body
PF: predicated region fallthrough
CT: control target
= control target key end

     0   :  { %vm161_vm0 = vcmask 293888   ;;  %vm546_vm1 = vcmask 1043456   ;;  %s13479_s0 = inlined_call_operand.vmem [shape: f32[1024,36], index: 0, kind: input, shape index: {}]   ;;  %s13480_s1 = inlined_call_operand.vmem [shape: f32[36,32], index: 1, kind: input, shape index: {}]   ;;  %s13481_s2 = inlined_call_operand.vmem [shape: f32[1,32], index: 2, kind: input, shape index: {}]   ;;  %s13482_s3 = inlined_call_operand.vmem [shape: f32[32,1280], index: 3, kind: input, shape index: {}]   ;;  %s13483_s4 = inlined_call_operand.vmem [shape: f32[1,1280], index: 4, kind: input, shape index: {}]   ;;  %s13484_s5 = inlined_call_operand.hbm [shape: f32[2], index: 5, kind: output, shape index: {}]  }
   0x1   :  { %v149_v0 = vld [vmem:[%s13480_s1] sm:$0xff]  ;;  %v150_v1 = vld [vmem:[%s13480_s1 + $0x8] sm:$0xff]  ;;  %v151_v2 = vld [vmem:[%s13480_s1 + $0x10] sm:$0xff] }
   0x2   :  { %v9978_v3 = vpack.c.bf16 %v150_v1, %v149_v0  ;;  %v152_v4 = vld [vmem:[%s13480_s1 + $0x18] sm:$0xff]  ;;  %v21_v5 = vld [vmem:[%s13479_s0] sm:$0xff]  ;;  %v22_v8 = vld [vmem:[%s13479_s0 + $0x8] sm:$0xff] }
   0x3   :  { %v9982_v6 = vpack.c.bf16 %v152_v4, %v151_v2  ;;  %9266 = vmatprep.mubr.msk.f32.mxu0 %vm161_vm0, %v21_v5  ;;  %v153_v7 = vld [vmem:[%s13480_s1 + $0x20] sm:$0xf]  ;;  %v23_v9 = vld [vmem:[%s13479_s0 + $0x10] sm:$0xff]  ;;  %v24_v10 = vld [vmem:[%s13479_s0 + $0x18] sm:$0xff] }
   0x4   :  { %9979 = vmatprep.subr.bf16.mxu0 %v9978_v3  ;;  %v25_v11 = vld [vmem:[%s13479_s0 + $0x20] sm:$0xff]  ;;  %v26_v12 = vld [vmem:[%s13479_s0 + $0x28] sm:$0xff]  ;;  %v27_v13 = vld [vmem:[%s13479_s0 + $0x30] sm:$0xff] }
   0x5   :  { %9981 = vmatpush3.bf16.msra.mxu0 %v9978_v3  ;;  %v28_v14 = vld [vmem:[%s13479_s0 + $0x38] sm:$0xff]  ;;  %v29_v15 = vld [vmem:[%s13479_s0 + $0x40] sm:$0xff]  ;;  %v30_v16 = vld [vmem:[%s13479_s0 + $0x48] sm:$0xff] }
   0x6   :  { %9983 = vmatprep.subr.bf16.mxu0 %v9982_v6 }
   0x9   :  { %9985 = vmatpush3.bf16.msra.mxu0 %v9982_v6 }
   0xa   :  { %9264 = vmatprep.subr.msk.mxu0 %vm546_vm1, %v153_v7 }
   0xd   :  { %9265 = vmatpush3.msk.msra.mxu0 %vm546_vm1, %v153_v7 }
   0xe   :  { %9267 = vmatmul.mubr.msk.f32.vlgmr.msra.gmra.mrb[0].mxu0 %vm161_vm0, %v22_v8 }
   0xf   :  { %9269 = vmatprep.mubr.msk.f32.mxu0 %vm161_vm0, %v23_v9 }
  0x12   :  { %9270 = vmatmul.mubr.msk.f32.gmra.mrb[2].mxu0 %vm161_vm0, %v24_v10 }
  0x13   :  { %9272 = vmatprep.mubr.msk.f32.mxu0 %vm161_vm0, %v25_v11 }
  0x16   :  { %9273 = vmatmul.mubr.msk.f32.gmra.mrb[4].mxu0 %vm161_vm0, %v26_v12 }
  0x17   :  { %9275 = vmatprep.mubr.msk.f32.mxu0 %vm161_vm0, %v27_v13 }
  0x1a   :  { %9276 = vmatmul.mubr.msk.f32.gmra.mrb[6].mxu0 %vm161_vm0, %v28_v14 }
  0x1b   :  { %9278 = vmatprep.mubr.msk.f32.mxu0 %vm161_vm0, %v29_v15 }
  0x1c   :  { %10 = vsyncpa [#allocation3], 0  ;;  %v31_v17 = vld [vmem:[%s13479_s0 + $0x50] sm:$0xff]  ;;  %v32_v18 = vld [vmem:[%s13479_s0 + $0x58] sm:$0xff]  ;;  %vm1383_vm2 = vcmask 261120   ;;  %vm1664_vm3 = vcmask 1040384  }
  0x1d   :  { %v33_v19 = vld [vmem:[%s13479_s0 + $0x60] sm:$0xff]  ;;  %v34_v20 = vld [vmem:[%s13479_s0 + $0x68] sm:$0xff]  ;;  %v35_v21 = vld [vmem:[%s13479_s0 + $0x70] sm:$0xff]  ;;  %vm1666_vm4 = vcmask 1041408   ;;  %vm1668_vm5 = vcmask 1042432   ;;  %vm2217_vm7 = vcmask 15360  }
  0x1e   :  { %9279 = vmatmul.mubr.msk.f32.gmra.mrb[8].mxu0 %vm161_vm0, %v30_v16  ;;  %v36_v22 = vld [vmem:[%s13479_s0 + $0x78] sm:$0xff]  ;;  %v37_v23 = vld [vmem:[%s13479_s0 + $0x80] sm:$0xff]  ;;  %v38_v24 = vld [vmem:[%s13479_s0 + $0x88] sm:$0xff] }
  0x1f   :  { %9281 = vmatprep.mubr.msk.f32.mxu0 %vm161_vm0, %v31_v17  ;;  %v39_v25 = vld [vmem:[%s13479_s0 + $0x90] sm:$0xff]  ;;  %v40_v26 = vld [vmem:[%s13479_s0 + $0x98] sm:$0xff]  ;;  %v41_v27 = vld [vmem:[%s13479_s0 + $0xa0] sm:$0xff] }
  0x20   :  { %v42_v28 = vld [vmem:[%s13479_s0 + $0xa8] sm:$0xff]  ;;  %v43_v29 = vld [vmem:[%s13479_s0 + $0xb0] sm:$0xff]  ;;  %v44_v30 = vld [vmem:[%s13479_s0 + $0xb8] sm:$0xff] }
  0x21   :  { %v45_v31 = vld [vmem:[%s13479_s0 + $0xc0] sm:$0xff]  ;;  %v46_v32 = vld [vmem:[%s13479_s0 + $0xc8] sm:$0xff]  ;;  %v47_v33 = vld [vmem:[%s13479_s0 + $0xd0] sm:$0xff] }
  0x22   :  { %9282 = vmatmul.mubr.msk.f32.gmra.mrb[10].mxu0 %vm161_vm0, %v32_v18  ;;  %v48_v34 = vld [vmem:[%s13479_s0 + $0xd8] sm:$0xff]  ;;  %v49_v35 = vld [vmem:[%s13479_s0 + $0xe0] sm:$0xff]  ;;  %v50_v36 = vld [vmem:[%s13479_s0 + $0xe8] sm:$0xff] }
  0x23   :  { %9284 = vmatprep.mubr.msk.f32.mxu0 %vm161_vm0, %v33_v19  ;;  %v51_v37 = vld [vmem:[%s13479_s0 + $0xf0] sm:$0xff]  ;;  %v52_v38 = vld [vmem:[%s13479_s0 + $0xf8] sm:$0xff]  ;;  %v53_v39 = vld [vmem:[%s13479_s0 + $0x100] sm:$0xff] }
  0x24   :  { %v54_v40 = vld [vmem:[%s13479_s0 + $0x108] sm:$0xff]  ;;  %v55_v41 = vld [vmem:[%s13479_s0 + $0x110] sm:$0xff]  ;;  %v56_v42 = vld [vmem:[%s13479_s0 + $0x118] sm:$0xff] }
  0x25   :  { %v57_v43 = vld [vmem:[%s13479_s0 + $0x120] sm:$0xff]  ;;  %v58_v44 = vld [vmem:[%s13479_s0 + $0x128] sm:$0xff]  ;;  %v59_v45 = vld [vmem:[%s13479_s0 + $0x130] sm:$0xff] }
  0x26   :  { %9285 = vmatmul.mubr.msk.f32.gmra.mrb[12].mxu0 %vm161_vm0, %v34_v20  ;;  %v60_v46 = vld [vmem:[%s13479_s0 + $0x138] sm:$0xff]  ;;  %v61_v47 = vld [vmem:[%s13479_s0 + $0x140] sm:$0xff]  ;;  %v62_v48 = vld [vmem:[%s13479_s0 + $0x148] sm:$0xff] }
  0x27   :  { %9287 = vmatprep.mubr.msk.f32.mxu0 %vm161_vm0, %v35_v21  ;;  %v63_v49 = vld [vmem:[%s13479_s0 + $0x150] sm:$0xff]  ;;  %v64_v50 = vld [vmem:[%s13479_s0 + $0x158] sm:$0xff]  ;;  %v65_v51 = vld [vmem:[%s13479_s0 + $0x160] sm:$0xff] }
  0x28   :  { %v66_v52 = vld [vmem:[%s13479_s0 + $0x168] sm:$0xff]  ;;  %v67_v53 = vld [vmem:[%s13479_s0 + $0x170] sm:$0xff]  ;;  %v68_v54 = vld [vmem:[%s13479_s0 + $0x178] sm:$0xff] }
  0x29   :  { %v69_v55 = vld [vmem:[%s13479_s0 + $0x180] sm:$0xff]  ;;  %v70_v56 = vld [vmem:[%s13479_s0 + $0x188] sm:$0xff]  ;;  %v71_v57 = vld [vmem:[%s13479_s0 + $0x190] sm:$0xff] }
  0x2a   :  { %9288 = vmatmul.mubr.msk.f32.gmra.mrb[14].mxu0 %vm161_vm0, %v36_v22  ;;  %v72_v58 = vld [vmem:[%s13479_s0 + $0x198] sm:$0xff]  ;;  %v73_v59 = vld [vmem:[%s13479_s0 + $0x1a0] sm:$0xff]  ;;  %v74_v60 = vld [vmem:[%s13479_s0 + $0x1a8] sm:$0xff] }
  0x2b   :  { %9290 = vmatprep.mubr.msk.f32.mxu0 %vm161_vm0, %v37_v23  ;;  %v75_v61 = vld [vmem:[%s13479_s0 + $0x1b0] sm:$0xff]  ;;  %v76_v62 = vld [vmem:[%s13479_s0 + $0x1b8] sm:$0xff]  ;;  %v77_v63 = vld [vmem:[%s13479_s0 + $0x1c0] sm:$0xff] }
  0x2c   :  { %v78_v0 = vld [vmem:[%s13479_s0 + $0x1c8] sm:$0xff]  ;;  %v79_v1 = vld [vmem:[%s13479_s0 + $0x1d0] sm:$0xff]  ;;  %v80_v2 = vld [vmem:[%s13479_s0 + $0x1d8] sm:$0xff] }
  0x2d   :  { %v81_v3 = vld [vmem:[%s13479_s0 + $0x1e0] sm:$0xff]  ;;  %v82_v4 = vld [vmem:[%s13479_s0 + $0x1e8] sm:$0xff]  ;;  %v83_v5 = vld [vmem:[%s13479_s0 + $0x1f0] sm:$0xff] }
  0x2e   :  { %9291 = vmatmul.mubr.msk.f32.gmra.mrb[16].mxu0 %vm161_vm0, %v38_v24  ;;  %v84_v6 = vld [vmem:[%s13479_s0 + $0x1f8] sm:$0xff]  ;;  %v85_v7 = vld [vmem:[%s13479_s0 + $0x200] sm:$0xff]  ;;  %v86_v8 = vld [vmem:[%s13479_s0 + $0x208] sm:$0xff] }
  0x2f   :  { %9293 = vmatprep.mubr.msk.f32.mxu0 %vm161_vm0, %v39_v25  ;;  %v87_v9 = vld [vmem:[%s13479_s0 + $0x210] sm:$0xff]  ;;  %v88_v10 = vld [vmem:[%s13479_s0 + $0x218] sm:$0xff]  ;;  %v89_v11 = vld [vmem:[%s13479_s0 + $0x220] sm:$0xff] }
  0x30   :  { %v90_v12 = vld [vmem:[%s13479_s0 + $0x228] sm:$0xff]  ;;  %v91_v13 = vld [vmem:[%s13479_s0 + $0x230] sm:$0xff]  ;;  %v92_v14 = vld [vmem:[%s13479_s0 + $0x238] sm:$0xff] }
  0x31   :  { %v93_v15 = vld [vmem:[%s13479_s0 + $0x240] sm:$0xff]  ;;  %v94_v16 = vld [vmem:[%s13479_s0 + $0x248] sm:$0xff]  ;;  %v95_v17 = vld [vmem:[%s13479_s0 + $0x250] sm:$0xff] }
  0x32   :  { %9294 = vmatmul.mubr.msk.f32.gmra.mrb[18].mxu0 %vm161_vm0, %v40_v26  ;;  %v96_v18 = vld [vmem:[%s13479_s0 + $0x258] sm:$0xff]  ;;  %v97_v19 = vld [vmem:[%s13479_s0 + $0x260] sm:$0xff]  ;;  %v98_v20 = vld [vmem:[%s13479_s0 + $0x268] sm:$0xff] }
  0x33   :  { %9296 = vmatprep.mubr.msk.f32.mxu0 %vm161_vm0, %v41_v27  ;;  %v99_v21 = vld [vmem:[%s13479_s0 + $0x270] sm:$0xff]  ;;  %v100_v22 = vld [vmem:[%s13479_s0 + $0x278] sm:$0xff]  ;;  %v101_v23 = vld [vmem:[%s13479_s0 + $0x280] sm:$0xff] }
  0x34   :  { %v102_v24 = vld [vmem:[%s13479_s0 + $0x288] sm:$0xff]  ;;  %v103_v25 = vld [vmem:[%s13479_s0 + $0x290] sm:$0xff]  ;;  %v104_v26 = vld [vmem:[%s13479_s0 + $0x298] sm:$0xff] }
  0x35   :  { %v105_v27 = vld [vmem:[%s13479_s0 + $0x2a0] sm:$0xff] }
  0x36   :  { %9297 = vmatmul.mubr.msk.f32.gmra.mrb[20].mxu0 %vm161_vm0, %v42_v28  ;;  %v106_v28 = vld [vmem:[%s13479_s0 + $0x2a8] sm:$0xff] }
  0x37   :  { %9299 = vmatprep.mubr.msk.f32.mxu0 %vm161_vm0, %v43_v29  ;;  %v107_v29 = vld [vmem:[%s13479_s0 + $0x2b0] sm:$0xff] }
  0x3a   :  { %9300 = vmatmul.mubr.msk.f32.gmra.mrb[22].mxu0 %vm161_vm0, %v44_v30  ;;  %v108_v30 = vld [vmem:[%s13479_s0 + $0x2b8] sm:$0xff] }
  0x3b   :  { %9302 = vmatprep.mubr.msk.f32.mxu0 %vm161_vm0, %v45_v31  ;;  %v109_v31 = vld [vmem:[%s13479_s0 + $0x2c0] sm:$0xff] }
  0x3e   :  { %9303 = vmatmul.mubr.msk.f32.gmra.mrb[24].mxu0 %vm161_vm0, %v46_v32  ;;  %v110_v32 = vld [vmem:[%s13479_s0 + $0x2c8] sm:$0xff] }
  0x3f   :  { %9305 = vmatprep.mubr.msk.f32.mxu0 %vm161_vm0, %v47_v33  ;;  %v111_v33 = vld [vmem:[%s13479_s0 + $0x2d0] sm:$0xff] }
  0x42   :  { %9306 = vmatmul.mubr.msk.f32.gmra.mrb[26].mxu0 %vm161_vm0, %v48_v34  ;;  %v112_v34 = vld [vmem:[%s13479_s0 + $0x2d8] sm:$0xff] }
  0x43   :  { %9308 = vmatprep.mubr.msk.f32.mxu0 %vm161_vm0, %v49_v35  ;;  %v113_v35 = vld [vmem:[%s13479_s0 + $0x2e0] sm:$0xff] }
  0x46   :  { %9309 = vmatmul.mubr.msk.f32.gmra.mrb[28].mxu0 %vm161_vm0, %v50_v36  ;;  %v114_v36 = vld [vmem:[%s13479_s0 + $0x2e8] sm:$0xff] }
  0x47   :  { %9311 = vmatprep.mubr.msk.f32.mxu0 %vm161_vm0, %v51_v37  ;;  %v115_v37 = vld [vmem:[%s13479_s0 + $0x2f0] sm:$0xff] }
  0x4a   :  { %9312 = vmatmul.mubr.msk.f32.gmra.mrb[30].mxu0 %vm161_vm0, %v52_v38  ;;  %v116_v38 = vld [vmem:[%s13479_s0 + $0x2f8] sm:$0xff] }
  0x4b   :  { %9314 = vmatprep.mubr.msk.f32.mxu0 %vm161_vm0, %v53_v39  ;;  %v117_v39 = vld [vmem:[%s13479_s0 + $0x300] sm:$0xff] }
  0x4e   :  { %9315 = vmatmul.mubr.msk.f32.gmra.mrb[32].mxu0 %vm161_vm0, %v54_v40  ;;  %v118_v40 = vld [vmem:[%s13479_s0 + $0x308] sm:$0xff] }
  0x4f   :  { %9317 = vmatprep.mubr.msk.f32.mxu0 %vm161_vm0, %v55_v41  ;;  %v119_v41 = vld [vmem:[%s13479_s0 + $0x310] sm:$0xff] }
  0x52   :  { %9318 = vmatmul.mubr.msk.f32.gmra.mrb[34].mxu0 %vm161_vm0, %v56_v42  ;;  %v120_v42 = vld [vmem:[%s13479_s0 + $0x318] sm:$0xff] }
  0x53   :  { %9320 = vmatprep.mubr.msk.f32.mxu0 %vm161_vm0, %v57_v43  ;;  %v121_v43 = vld [vmem:[%s13479_s0 + $0x320] sm:$0xff] }
  0x56   :  { %9321 = vmatmul.mubr.msk.f32.gmra.mrb[36].mxu0 %vm161_vm0, %v58_v44  ;;  %v122_v44 = vld [vmem:[%s13479_s0 + $0x328] sm:$0xff] }
  0x57   :  { %9323 = vmatprep.mubr.msk.f32.mxu0 %vm161_vm0, %v59_v45  ;;  %v123_v45 = vld [vmem:[%s13479_s0 + $0x330] sm:$0xff] }
  0x5a   :  { %9324 = vmatmul.mubr.msk.f32.gmra.mrb[38].mxu0 %vm161_vm0, %v60_v46  ;;  %v124_v46 = vld [vmem:[%s13479_s0 + $0x338] sm:$0xff] }
  0x5b   :  { %9326 = vmatprep.mubr.msk.f32.mxu0 %vm161_vm0, %v61_v47  ;;  %v125_v47 = vld [vmem:[%s13479_s0 + $0x340] sm:$0xff] }
  0x5e   :  { %9327 = vmatmul.mubr.msk.f32.gmra.mrb[40].mxu0 %vm161_vm0, %v62_v48  ;;  %v126_v48 = vld [vmem:[%s13479_s0 + $0x348] sm:$0xff] }
  0x5f   :  { %9329 = vmatprep.mubr.msk.f32.mxu0 %vm161_vm0, %v63_v49  ;;  %v127_v49 = vld [vmem:[%s13479_s0 + $0x350] sm:$0xff] }
  0x62   :  { %9330 = vmatmul.mubr.msk.f32.gmra.mrb[42].mxu0 %vm161_vm0, %v64_v50  ;;  %v11005_v50 = vld [vmem:[%s13481_s2] ss:$0 sm:$0xff] }
  0x63   :  { %9332 = vmatprep.mubr.msk.f32.mxu0 %vm161_vm0, %v65_v51  ;;  %v128_v51 = vld [vmem:[%s13479_s0 + $0x358] sm:$0xff] }
  0x66   :  { %9333 = vmatmul.mubr.msk.f32.gmra.mrb[44].mxu0 %vm161_vm0, %v66_v52  ;;  %v129_v52 = vld [vmem:[%s13479_s0 + $0x360] sm:$0xff] }
  0x67   :  { %9335 = vmatprep.mubr.msk.f32.mxu0 %vm161_vm0, %v67_v53 }
  0x6a   :  { %9336 = vmatmul.mubr.msk.f32.gmra.mrb[46].mxu0 %vm161_vm0, %v68_v54 }
  0x6b   :  { %9338 = vmatprep.mubr.msk.f32.mxu0 %vm161_vm0, %v69_v55 }
  0x6e   :  { %9339 = vmatmul.mubr.msk.f32.gmra.mrb[48].mxu0 %vm161_vm0, %v70_v56 }
  0x6f   :  { %9341 = vmatprep.mubr.msk.f32.mxu0 %vm161_vm0, %v71_v57  ;;  %v130_v57 = vld [vmem:[%s13479_s0 + $0x368] sm:$0xff] }
  0x72   :  { %9342 = vmatmul.mubr.msk.f32.gmra.mrb[50].mxu0 %vm161_vm0, %v72_v58 }
  0x73   :  { %9344 = vmatprep.mubr.msk.f32.mxu0 %vm161_vm0, %v73_v59  ;;  %v131_v59 = vld [vmem:[%s13479_s0 + $0x370] sm:$0xff] }
  0x76   :  { %9345 = vmatmul.mubr.msk.f32.gmra.mrb[52].mxu0 %vm161_vm0, %v74_v60 }
  0x77   :  { %9347 = vmatprep.mubr.msk.f32.mxu0 %vm161_vm0, %v75_v61 }
  0x7a   :  { %9348 = vmatmul.mubr.msk.f32.gmra.mrb[54].mxu0 %vm161_vm0, %v76_v62 }
  0x7b   :  { %9350 = vmatprep.mubr.msk.f32.mxu0 %vm161_vm0, %v77_v63 }
  0x7e   :  { %9351 = vmatmul.mubr.msk.f32.gmra.mrb[56].mxu0 %vm161_vm0, %v78_v0 }
  0x7f   :  { %9353 = vmatprep.mubr.msk.f32.mxu0 %vm161_vm0, %v79_v1 }
  0x82   :  { %9354 = vmatmul.mubr.msk.f32.gmra.mrb[58].mxu0 %vm161_vm0, %v80_v2 }
  0x83   :  { %9356 = vmatprep.mubr.msk.f32.mxu0 %vm161_vm0, %v81_v3  ;;  %v132_v3 = vld [vmem:[%s13479_s0 + $0x378] sm:$0xff] }
  0x86   :  { %9357 = vmatmul.mubr.msk.f32.gmra.mrb[60].mxu0 %vm161_vm0, %v82_v4 }
  0x87   :  { %9359 = vmatprep.mubr.msk.f32.mxu0 %vm161_vm0, %v83_v5  ;;  %v133_v5 = vld [vmem:[%s13479_s0 + $0x380] sm:$0xff] }
  0x8a   :  { %9360 = vmatmul.mubr.msk.f32.gmra.mrb[62].mxu0 %vm161_vm0, %v84_v6 }
  0x8b   :  { %9362 = vmatprep.mubr.msk.f32.mxu0 %vm161_vm0, %v85_v7 }
  0x8e   :  { %9363 = vmatmul.mubr.msk.f32.gmra.mrb[64].mxu0 %vm161_vm0, %v86_v8 }
  0x8f   :  { %9365 = vmatprep.mubr.msk.f32.mxu0 %vm161_vm0, %v87_v9 }
  0x92   :  { %9366 = vmatmul.mubr.msk.f32.gmra.mrb[66].mxu0 %vm161_vm0, %v88_v10 }
  0x93   :  { %9368 = vmatprep.mubr.msk.f32.mxu0 %vm161_vm0, %v89_v11 }
  0x96   :  { %9369 = vmatmul.mubr.msk.f32.gmra.mrb[68].mxu0 %vm161_vm0, %v90_v12 }
  0x97   :  { %9371 = vmatprep.mubr.msk.f32.mxu0 %vm161_vm0, %v91_v13  ;;  %v134_v13 = vld [vmem:[%s13479_s0 + $0x388] sm:$0xff] }
  0x9a   :  { %9372 = vmatmul.mubr.msk.f32.gmra.mrb[70].mxu0 %vm161_vm0, %v92_v14 }
  0x9b   :  { %9374 = vmatprep.mubr.msk.f32.mxu0 %vm161_vm0, %v93_v15  ;;  %v135_v15 = vld [vmem:[%s13479_s0 + $0x390] sm:$0xff] }
  0x9e   :  { %9375 = vmatmul.mubr.msk.f32.gmra.mrb[72].mxu0 %vm161_vm0, %v94_v16 }
  0x9f   :  { %9377 = vmatprep.mubr.msk.f32.mxu0 %vm161_vm0, %v95_v17 }
  0xa2   :  { %9378 = vmatmul.mubr.msk.f32.gmra.mrb[74].mxu0 %vm161_vm0, %v96_v18 }
  0xa3   :  { %9380 = vmatprep.mubr.msk.f32.mxu0 %vm161_vm0, %v97_v19 }
  0xa6   :  { %9381 = vmatmul.mubr.msk.f32.gmra.mrb[76].mxu0 %vm161_vm0, %v98_v20 }
  0xa7   :  { %9383 = vmatprep.mubr.msk.f32.mxu0 %vm161_vm0, %v99_v21 }
  0xaa   :  { %9384 = vmatmul.mubr.msk.f32.gmra.mrb[78].mxu0 %vm161_vm0, %v100_v22 }
  0xab   :  { %9386 = vmatprep.mubr.msk.f32.mxu0 %vm161_vm0, %v101_v23 }
  0xae   :  { %9387 = vmatmul.mubr.msk.f32.gmra.mrb[80].mxu0 %vm161_vm0, %v102_v24 }
  0xaf   :  { %9389 = vmatprep.mubr.msk.f32.mxu0 %vm161_vm0, %v103_v25  ;;  %v136_v25 = vld [vmem:[%s13479_s0 + $0x398] sm:$0xff] }
  0xb2   :  { %9390 = vmatmul.mubr.msk.f32.gmra.mrb[82].mxu0 %vm161_vm0, %v104_v26 }
  0xb3   :  { %9392 = vmatprep.mubr.msk.f32.mxu0 %vm161_vm0, %v105_v27  ;;  %v137_v27 = vld [vmem:[%s13479_s0 + $0x3a0] sm:$0xff] }
  0xb6   :  { %9393 = vmatmul.mubr.msk.f32.gmra.mrb[84].mxu0 %vm161_vm0, %v106_v28 }
  0xb7   :  { %9395 = vmatprep.mubr.msk.f32.mxu0 %vm161_vm0, %v107_v29 }
  0xba   :  { %9396 = vmatmul.mubr.msk.f32.gmra.mrb[86].mxu0 %vm161_vm0, %v108_v30 }
  0xbb   :  { %9398 = vmatprep.mubr.msk.f32.mxu0 %vm161_vm0, %v109_v31 }
  0xbe   :  { %9399 = vmatmul.mubr.msk.f32.gmra.mrb[88].mxu0 %vm161_vm0, %v110_v32 }
  0xbf   :  { %9401 = vmatprep.mubr.msk.f32.mxu0 %vm161_vm0, %v111_v33 }
  0xc2   :  { %9402 = vmatmul.mubr.msk.f32.gmra.mrb[90].mxu0 %vm161_vm0, %v112_v34 }
  0xc3   :  { %9404 = vmatprep.mubr.msk.f32.mxu0 %vm161_vm0, %v113_v35 }
  0xc6   :  { %9405 = vmatmul.mubr.msk.f32.gmra.mrb[92].mxu0 %vm161_vm0, %v114_v36 }
  0xc7   :  { %9407 = vmatprep.mubr.msk.f32.mxu0 %vm161_vm0, %v115_v37  ;;  %v138_v37 = vld [vmem:[%s13479_s0 + $0x3a8] sm:$0xff] }
  0xca   :  { %9408 = vmatmul.mubr.msk.f32.gmra.mrb[94].mxu0 %vm161_vm0, %v116_v38 }
  0xcb   :  { %9410 = vmatprep.mubr.msk.f32.mxu0 %vm161_vm0, %v117_v39  ;;  %v139_v39 = vld [vmem:[%s13479_s0 + $0x3b0] sm:$0xff] }
  0xce   :  { %9411 = vmatmul.mubr.msk.f32.gmra.mrb[96].mxu0 %vm161_vm0, %v118_v40 }
  0xcf   :  { %9413 = vmatprep.mubr.msk.f32.mxu0 %vm161_vm0, %v119_v41 }
  0xd2   :  { %9414 = vmatmul.mubr.msk.f32.gmra.mrb[98].mxu0 %vm161_vm0, %v120_v42 }
  0xd3   :  { %9416 = vmatprep.mubr.msk.f32.mxu0 %vm161_vm0, %v121_v43 }
  0xd6   :  { %9417 = vmatmul.mubr.msk.f32.gmra.mrb[100].mxu0 %vm161_vm0, %v122_v44 }
  0xd7   :  { %9419 = vmatprep.mubr.msk.f32.mxu0 %vm161_vm0, %v123_v45 }
  0xda   :  { %9420 = vmatmul.mubr.msk.f32.gmra.mrb[102].mxu0 %vm161_vm0, %v124_v46 }
  0xdb   :  { %9422 = vmatprep.mubr.msk.f32.mxu0 %vm161_vm0, %v125_v47 }
  0xde   :  { %9423 = vmatmul.mubr.msk.f32.gmra.mrb[104].mxu0 %vm161_vm0, %v126_v48 }
  0xdf   :  { %9425 = vmatprep.mubr.msk.f32.mxu0 %vm161_vm0, %v127_v49  ;;  %v140_v49 = vld [vmem:[%s13479_s0 + $0x3b8] sm:$0xff] }
  0xe1   :  { %v9268_v53 = vpop.f32.mrb[0].mxu0 }
  0xe2   :  { %v622_v54 = vadd.f32 %v9268_v53, %v11005_v50  ;;  %v616_v55 = vpop.f32.mrb[1].mxu0  ;;  %9426 = vmatmul.mubr.msk.f32.gmra.mrb[106].mxu0 %vm161_vm0, %v128_v51 }
  0xe3   :  { %v617_v56 = vadd.f32 %v11005_v50, %v616_v55  ;;  %9428 = vmatprep.mubr.msk.f32.mxu0 %vm161_vm0, %v129_v52  ;;  %v141_v52 = vld [vmem:[%s13479_s0 + $0x3c0] sm:$0xff] }
  0xe4   :  { %v1256_v58 = vmax.f32 %v622_v54, 0.0 }
  0xe5   :  { %v1255_v60 = vmax.f32 %v617_v56, 0.0  ;;  %v9271_v61 = vpop.f32.mrb[2].mxu0 }
  0xe6   :  { %v1385_v62 = vsel %vm1383_vm2, %v1256_v58, 0.0  ;;  %v632_v63 = vadd.f32 %v9271_v61, %v11005_v50  ;;  %v626_v0 = vpop.f32.mrb[3].mxu0  ;;  %9429 = vmatmul.mubr.msk.f32.gmra.mrb[108].mxu0 %vm161_vm0, %v130_v57 }
  0xe7   :  { %v1384_v1 = vsel %vm1383_vm2, %v1255_v60, 0.0  ;;  %v627_v2 = vadd.f32 %v11005_v50, %v626_v0  ;;  %9431 = vmatprep.mubr.msk.f32.mxu0 %vm161_vm0, %v131_v59  ;;  %v143_v0 = vld [vmem:[%s13479_s0 + $0x3d0] sm:$0xff] }
  0xe8   :  { %v1386_v4 = vadd.f32 %v1385_v62, %v1384_v1  ;;  %v1258_v6 = vmax.f32 %v632_v63, 0.0  ;;  %v142_v62 = vld [vmem:[%s13479_s0 + $0x3c8] sm:$0xff] }
  0xe9   :  { %v1257_v7 = vmax.f32 %v627_v2, 0.0  ;;  %v9274_v8 = vpop.f32.mrb[4].mxu0 }
  0xea   :  { %v642_v9 = vadd.f32 %v9274_v8, %v11005_v50  ;;  %v636_v10 = vpop.f32.mrb[5].mxu0  ;;  %9432 = vmatmul.mubr.msk.f32.gmra.mrb[110].mxu0 %vm161_vm0, %v132_v3  ;;  %v1389_v16 = vsel %vm1383_vm2, %v1258_v6, 0.0 }
  0xeb   :  { %v1387_v11 = vsel %vm1383_vm2, %v1257_v7, 0.0  ;;  %v637_v12 = vadd.f32 %v11005_v50, %v636_v10  ;;  %9434 = vmatprep.mubr.msk.f32.mxu0 %vm161_vm0, %v133_v5  ;;  %v144_v10 = vld [vmem:[%s13479_s0 + $0x3d8] sm:$0xff] }
  0xec   :  { %v1388_v14 = vadd.f32 %v1387_v11, %v1386_v4  ;;  %v1260_v17 = vmax.f32 %v642_v9, 0.0 }
  0xed   :  { %v1259_v18 = vmax.f32 %v637_v12, 0.0  ;;  %v9277_v19 = vpop.f32.mrb[6].mxu0  ;;  %v145_v12 = vld [vmem:[%s13479_s0 + $0x3e0] sm:$0xff] }
  0xee   :  { %v1390_v20 = vadd.f32 %v1389_v16, %v1388_v14  ;;  %v652_v21 = vadd.f32 %v9277_v19, %v11005_v50  ;;  %v646_v22 = vpop.f32.mrb[7].mxu0  ;;  %9435 = vmatmul.mubr.msk.f32.gmra.mrb[112].mxu0 %vm161_vm0, %v134_v13  ;;  %v1393_v28 = vsel %vm1383_vm2, %v1260_v17, 0.0 }
  0xef   :  { %v1391_v23 = vsel %vm1383_vm2, %v1259_v18, 0.0  ;;  %v647_v24 = vadd.f32 %v11005_v50, %v646_v22  ;;  %9437 = vmatprep.mubr.msk.f32.mxu0 %vm161_vm0, %v135_v15  ;;  %v146_v22 = vld [vmem:[%s13479_s0 + $0x3e8] sm:$0xff] }
  0xf0   :  { %v1392_v26 = vadd.f32 %v1391_v23, %v1390_v20  ;;  %v1262_v29 = vmax.f32 %v652_v21, 0.0 }
  0xf1   :  { %v1261_v30 = vmax.f32 %v647_v24, 0.0  ;;  %v9280_v31 = vpop.f32.mrb[8].mxu0  ;;  %v147_v24 = vld [vmem:[%s13479_s0 + $0x3f0] sm:$0xff] }
  0xf2   :  { %v1394_v32 = vadd.f32 %v1393_v28, %v1392_v26  ;;  %v662_v33 = vadd.f32 %v9280_v31, %v11005_v50  ;;  %v656_v34 = vpop.f32.mrb[9].mxu0  ;;  %9438 = vmatmul.mubr.msk.f32.gmra.mrb[114].mxu0 %vm161_vm0, %v136_v25  ;;  %v1397_v40 = vsel %vm1383_vm2, %v1262_v29, 0.0 }
  0xf3   :  { %v1395_v35 = vsel %vm1383_vm2, %v1261_v30, 0.0  ;;  %v657_v36 = vadd.f32 %v11005_v50, %v656_v34  ;;  %9440 = vmatprep.mubr.msk.f32.mxu0 %vm161_vm0, %v137_v27  ;;  %v148_v34 = vld [vmem:[%s13479_s0 + $0x3f8] sm:$0xff] }
  0xf4   :  { %v1396_v38 = vadd.f32 %v1395_v35, %v1394_v32  ;;  %v1264_v41 = vmax.f32 %v662_v33, 0.0 }
  0xf5   :  { %v1263_v42 = vmax.f32 %v657_v36, 0.0  ;;  %v9283_v43 = vpop.f32.mrb[10].mxu0 }
  0xf6   :  { %v1398_v44 = vadd.f32 %v1397_v40, %v1396_v38  ;;  %v672_v45 = vadd.f32 %v9283_v43, %v11005_v50  ;;  %v666_v46 = vpop.f32.mrb[11].mxu0  ;;  %9441 = vmatmul.mubr.msk.f32.gmra.mrb[116].mxu0 %vm161_vm0, %v138_v37  ;;  %v1401_v53 = vsel %vm1383_vm2, %v1264_v41, 0.0 }
  0xf7   :  { %v1399_v47 = vsel %vm1383_vm2, %v1263_v42, 0.0  ;;  %v667_v48 = vadd.f32 %v11005_v50, %v666_v46  ;;  %9443 = vmatprep.mubr.msk.f32.mxu0 %vm161_vm0, %v139_v39 }
  0xf8   :  { %v1400_v51 = vadd.f32 %v1399_v47, %v1398_v44  ;;  %v1266_v54 = vmax.f32 %v672_v45, 0.0 }
  0xf9   :  { %v1265_v55 = vmax.f32 %v667_v48, 0.0  ;;  %v9286_v56 = vpop.f32.mrb[12].mxu0 }
  0xfa   :  { %v1402_v57 = vadd.f32 %v1401_v53, %v1400_v51  ;;  %v682_v58 = vadd.f32 %v9286_v56, %v11005_v50  ;;  %v676_v59 = vpop.f32.mrb[13].mxu0  ;;  %9444 = vmatmul.mubr.msk.f32.gmra.mrb[118].mxu0 %vm161_vm0, %v140_v49  ;;  %v1405_v1 = vsel %vm1383_vm2, %v1266_v54, 0.0 }
  0xfb   :  { %v1403_v60 = vsel %vm1383_vm2, %v1265_v55, 0.0  ;;  %v677_v61 = vadd.f32 %v11005_v50, %v676_v59  ;;  %9446 = vmatprep.mubr.msk.f32.mxu0 %vm161_vm0, %v141_v52 }
  0xfc   :  { %v1404_v63 = vadd.f32 %v1403_v60, %v1402_v57  ;;  %v1268_v2 = vmax.f32 %v682_v58, 0.0 }
  0xfd   :  { %v1267_v3 = vmax.f32 %v677_v61, 0.0  ;;  %v9289_v4 = vpop.f32.mrb[14].mxu0 }
  0xfe   :  { %v1406_v5 = vadd.f32 %v1405_v1, %v1404_v63  ;;  %v692_v6 = vadd.f32 %v9289_v4, %v11005_v50  ;;  %v686_v7 = vpop.f32.mrb[15].mxu0  ;;  %9447 = vmatmul.mubr.msk.f32.gmra.mrb[120].mxu0 %vm161_vm0, %v142_v62  ;;  %v1409_v13 = vsel %vm1383_vm2, %v1268_v2, 0.0 }
  0xff   :  { %v1407_v8 = vsel %vm1383_vm2, %v1267_v3, 0.0  ;;  %v687_v9 = vadd.f32 %v11005_v50, %v686_v7  ;;  %9449 = vmatprep.mubr.msk.f32.mxu0 %vm161_vm0, %v143_v0 }
 0x100   :  { %v1408_v11 = vadd.f32 %v1407_v8, %v1406_v5  ;;  %v1270_v14 = vmax.f32 %v692_v6, 0.0 }
 0x101   :  { %v1269_v15 = vmax.f32 %v687_v9, 0.0  ;;  %v9292_v16 = vpop.f32.mrb[16].mxu0 }
 0x102   :  { %v1410_v17 = vadd.f32 %v1409_v13, %v1408_v11  ;;  %v702_v18 = vadd.f32 %v9292_v16, %v11005_v50  ;;  %v696_v19 = vpop.f32.mrb[17].mxu0  ;;  %9450 = vmatmul.mubr.msk.f32.gmra.mrb[122].mxu0 %vm161_vm0, %v144_v10  ;;  %v1413_v25 = vsel %vm1383_vm2, %v1270_v14, 0.0 }
 0x103   :  { %v1411_v20 = vsel %vm1383_vm2, %v1269_v15, 0.0  ;;  %v697_v21 = vadd.f32 %v11005_v50, %v696_v19  ;;  %9452 = vmatprep.mubr.msk.f32.mxu0 %vm161_vm0, %v145_v12 }
 0x104   :  { %v1412_v23 = vadd.f32 %v1411_v20, %v1410_v17  ;;  %v1272_v26 = vmax.f32 %v702_v18, 0.0 }
 0x105   :  { %v1271_v27 = vmax.f32 %v697_v21, 0.0  ;;  %v9295_v28 = vpop.f32.mrb[18].mxu0 }
 0x106   :  { %v1414_v29 = vadd.f32 %v1413_v25, %v1412_v23  ;;  %v712_v30 = vadd.f32 %v9295_v28, %v11005_v50  ;;  %v706_v31 = vpop.f32.mrb[19].mxu0  ;;  %9453 = vmatmul.mubr.msk.f32.gmra.mrb[124].mxu0 %vm161_vm0, %v146_v22  ;;  %v1417_v36 = vsel %vm1383_vm2, %v1272_v26, 0.0 }
 0x107   :  { %v1415_v32 = vsel %vm1383_vm2, %v1271_v27, 0.0  ;;  %v707_v33 = vadd.f32 %v11005_v50, %v706_v31  ;;  %9455 = vmatprep.mubr.msk.f32.mxu0 %vm161_vm0, %v147_v24 }
 0x108   :  { %v1416_v35 = vadd.f32 %v1415_v32, %v1414_v29  ;;  %v1274_v37 = vmax.f32 %v712_v30, 0.0 }
 0x109   :  { %v1273_v38 = vmax.f32 %v707_v33, 0.0  ;;  %v9298_v39 = vpop.f32.mrb[20].mxu0 }
 0x10a   :  { %v1418_v40 = vadd.f32 %v1417_v36, %v1416_v35  ;;  %v722_v41 = vadd.f32 %v9298_v39, %v11005_v50  ;;  %v716_v42 = vpop.f32.mrb[21].mxu0  ;;  %9456 = vmatmul.mubr.msk.f32.gmra.mrb[126].mxu0 %vm161_vm0, %v148_v34  ;;  %v1421_v46 = vsel %vm1383_vm2, %v1274_v37, 0.0 }
 0x10b   :  { %v1419_v43 = vsel %vm1383_vm2, %v1273_v38, 0.0  ;;  %v717_v44 = vadd.f32 %v11005_v50, %v716_v42 }
 0x10c   :  { %v1420_v45 = vadd.f32 %v1419_v43, %v1418_v40  ;;  %v1276_v47 = vmax.f32 %v722_v41, 0.0 }
 0x10d   :  { %v1275_v48 = vmax.f32 %v717_v44, 0.0  ;;  %v9301_v49 = vpop.f32.mrb[22].mxu0 }
 0x10e   :  { %v1422_v51 = vadd.f32 %v1421_v46, %v1420_v45  ;;  %v732_v52 = vadd.f32 %v9301_v49, %v11005_v50  ;;  %v726_v53 = vpop.f32.mrb[23].mxu0  ;;  %v1425_v57 = vsel %vm1383_vm2, %v1276_v47, 0.0 }
 0x10f   :  { %v1423_v54 = vsel %vm1383_vm2, %v1275_v48, 0.0  ;;  %v727_v55 = vadd.f32 %v11005_v50, %v726_v53 }
 0x110   :  { %v1424_v56 = vadd.f32 %v1423_v54, %v1422_v51  ;;  %v1278_v58 = vmax.f32 %v732_v52, 0.0 }
 0x111   :  { %v1277_v59 = vmax.f32 %v727_v55, 0.0  ;;  %v9304_v60 = vpop.f32.mrb[24].mxu0 }
 0x112   :  { %v1426_v61 = vadd.f32 %v1425_v57, %v1424_v56  ;;  %v742_v62 = vadd.f32 %v9304_v60, %v11005_v50  ;;  %v736_v63 = vpop.f32.mrb[25].mxu0  ;;  %v1429_v3 = vsel %vm1383_vm2, %v1278_v58, 0.0 }
 0x113   :  { %v1427_v0 = vsel %vm1383_vm2, %v1277_v59, 0.0  ;;  %v737_v1 = vadd.f32 %v11005_v50, %v736_v63 }
 0x114   :  { %v1428_v2 = vadd.f32 %v1427_v0, %v1426_v61  ;;  %v1280_v4 = vmax.f32 %v742_v62, 0.0 }
 0x115   :  { %v1279_v5 = vmax.f32 %v737_v1, 0.0  ;;  %v9307_v6 = vpop.f32.mrb[26].mxu0 }
 0x116   :  { %v1430_v7 = vadd.f32 %v1429_v3, %v1428_v2  ;;  %v752_v8 = vadd.f32 %v9307_v6, %v11005_v50  ;;  %v746_v9 = vpop.f32.mrb[27].mxu0  ;;  %v1433_v13 = vsel %vm1383_vm2, %v1280_v4, 0.0 }
 0x117   :  { %v1431_v10 = vsel %vm1383_vm2, %v1279_v5, 0.0  ;;  %v747_v11 = vadd.f32 %v11005_v50, %v746_v9 }
 0x118   :  { %v1432_v12 = vadd.f32 %v1431_v10, %v1430_v7  ;;  %v1282_v14 = vmax.f32 %v752_v8, 0.0 }
 0x119   :  { %v1281_v15 = vmax.f32 %v747_v11, 0.0  ;;  %v9310_v16 = vpop.f32.mrb[28].mxu0 }
 0x11a   :  { %v1434_v17 = vadd.f32 %v1433_v13, %v1432_v12  ;;  %v762_v18 = vadd.f32 %v9310_v16, %v11005_v50  ;;  %v756_v19 = vpop.f32.mrb[29].mxu0  ;;  %v1437_v23 = vsel %vm1383_vm2, %v1282_v14, 0.0 }
 0x11b   :  { %v1435_v20 = vsel %vm1383_vm2, %v1281_v15, 0.0  ;;  %v757_v21 = vadd.f32 %v11005_v50, %v756_v19 }
 0x11c   :  { %v1436_v22 = vadd.f32 %v1435_v20, %v1434_v17  ;;  %v1284_v24 = vmax.f32 %v762_v18, 0.0 }
 0x11d   :  { %v1283_v25 = vmax.f32 %v757_v21, 0.0  ;;  %v9313_v26 = vpop.f32.mrb[30].mxu0 }
 0x11e   :  { %v1438_v27 = vadd.f32 %v1437_v23, %v1436_v22  ;;  %v772_v28 = vadd.f32 %v9313_v26, %v11005_v50  ;;  %v766_v29 = vpop.f32.mrb[31].mxu0  ;;  %v1441_v33 = vsel %vm1383_vm2, %v1284_v24, 0.0 }
 0x11f   :  { %v1439_v30 = vsel %vm1383_vm2, %v1283_v25, 0.0  ;;  %v767_v31 = vadd.f32 %v11005_v50, %v766_v29 }
 0x120   :  { %v1440_v32 = vadd.f32 %v1439_v30, %v1438_v27  ;;  %v1286_v34 = vmax.f32 %v772_v28, 0.0 }
 0x121   :  { %v1285_v35 = vmax.f32 %v767_v31, 0.0  ;;  %v9316_v36 = vpop.f32.mrb[32].mxu0 }
 0x122   :  { %v1442_v37 = vadd.f32 %v1441_v33, %v1440_v32  ;;  %v782_v38 = vadd.f32 %v9316_v36, %v11005_v50  ;;  %v776_v39 = vpop.f32.mrb[33].mxu0  ;;  %v1445_v44 = vsel %vm1383_vm2, %v1286_v34, 0.0 }
 0x123   :  { %v1443_v40 = vsel %vm1383_vm2, %v1285_v35, 0.0  ;;  %v777_v41 = vadd.f32 %v11005_v50, %v776_v39 }
 0x124   :  { %v1444_v42 = vadd.f32 %v1443_v40, %v1442_v37  ;;  %v1288_v43 = vmax.f32 %v782_v38, 0.0 }
 0x125   :  { %v1287_v45 = vmax.f32 %v777_v41, 0.0  ;;  %v9319_v46 = vpop.f32.mrb[34].mxu0 }
 0x126   :  { %v11158_v47 = vadd.f32 %v1445_v44, %v1444_v42  ;;  %v1455_v48 = vsel %vm1383_vm2, %v1288_v43, 0.0  ;;  %v792_v49 = vadd.f32 %v9319_v46, %v11005_v50  ;;  %v786_v51 = vpop.f32.mrb[35].mxu0 }
 0x127   :  { %v1454_v52 = vsel %vm1383_vm2, %v1287_v45, 0.0  ;;  %v787_v53 = vadd.f32 %v11005_v50, %v786_v51 }
 0x128   :  { %v1456_v54 = vadd.f32 %v1455_v48, %v1454_v52  ;;  %v1290_v55 = vmax.f32 %v792_v49, 0.0 }
 0x129   :  { %v1289_v56 = vmax.f32 %v787_v53, 0.0  ;;  %v9322_v57 = vpop.f32.mrb[36].mxu0 }
 0x12a   :  { %v802_v58 = vadd.f32 %v9322_v57, %v11005_v50  ;;  %v796_v59 = vpop.f32.mrb[37].mxu0  ;;  %v1459_v63 = vsel %vm1383_vm2, %v1290_v55, 0.0 }
 0x12b   :  { %v1457_v60 = vsel %vm1383_vm2, %v1289_v56, 0.0  ;;  %v797_v61 = vadd.f32 %v11005_v50, %v796_v59 }
 0x12c   :  { %v1458_v62 = vadd.f32 %v1457_v60, %v1456_v54  ;;  %v1292_v0 = vmax.f32 %v802_v58, 0.0 }
 0x12d   :  { %v1291_v1 = vmax.f32 %v797_v61, 0.0  ;;  %v9325_v2 = vpop.f32.mrb[38].mxu0 }
 0x12e   :  { %v1460_v3 = vadd.f32 %v1459_v63, %v1458_v62  ;;  %v812_v4 = vadd.f32 %v9325_v2, %v11005_v50  ;;  %v806_v5 = vpop.f32.mrb[39].mxu0  ;;  %v1463_v9 = vsel %vm1383_vm2, %v1292_v0, 0.0 }
 0x12f   :  { %v1461_v6 = vsel %vm1383_vm2, %v1291_v1, 0.0  ;;  %v807_v7 = vadd.f32 %v11005_v50, %v806_v5 }
 0x130   :  { %v1462_v8 = vadd.f32 %v1461_v6, %v1460_v3  ;;  %v1294_v10 = vmax.f32 %v812_v4, 0.0 }
 0x131   :  { %v1293_v11 = vmax.f32 %v807_v7, 0.0  ;;  %v9328_v12 = vpop.f32.mrb[40].mxu0 }
 0x132   :  { %v1464_v13 = vadd.f32 %v1463_v9, %v1462_v8  ;;  %v822_v14 = vadd.f32 %v9328_v12, %v11005_v50  ;;  %v816_v15 = vpop.f32.mrb[41].mxu0  ;;  %v1467_v19 = vsel %vm1383_vm2, %v1294_v10, 0.0 }
 0x133   :  { %v1465_v16 = vsel %vm1383_vm2, %v1293_v11, 0.0  ;;  %v817_v17 = vadd.f32 %v11005_v50, %v816_v15 }
 0x134   :  { %v1466_v18 = vadd.f32 %v1465_v16, %v1464_v13  ;;  %v1296_v20 = vmax.f32 %v822_v14, 0.0 }
 0x135   :  { %v1295_v21 = vmax.f32 %v817_v17, 0.0  ;;  %v9331_v22 = vpop.f32.mrb[42].mxu0 }
 0x136   :  { %v1468_v23 = vadd.f32 %v1467_v19, %v1466_v18  ;;  %v832_v24 = vadd.f32 %v9331_v22, %v11005_v50  ;;  %v826_v25 = vpop.f32.mrb[43].mxu0  ;;  %v1471_v29 = vsel %vm1383_vm2, %v1296_v20, 0.0 }
 0x137   :  { %v1469_v26 = vsel %vm1383_vm2, %v1295_v21, 0.0  ;;  %v827_v27 = vadd.f32 %v11005_v50, %v826_v25 }
 0x138   :  { %v1470_v28 = vadd.f32 %v1469_v26, %v1468_v23  ;;  %v1298_v30 = vmax.f32 %v832_v24, 0.0 }
 0x139   :  { %v1297_v31 = vmax.f32 %v827_v27, 0.0  ;;  %v9334_v32 = vpop.f32.mrb[44].mxu0 }
 0x13a   :  { %v1472_v33 = vadd.f32 %v1471_v29, %v1470_v28  ;;  %v842_v34 = vadd.f32 %v9334_v32, %v11005_v50  ;;  %v836_v35 = vpop.f32.mrb[45].mxu0  ;;  %v1475_v39 = vsel %vm1383_vm2, %v1298_v30, 0.0 }
 0x13b   :  { %v1473_v36 = vsel %vm1383_vm2, %v1297_v31, 0.0  ;;  %v837_v37 = vadd.f32 %v11005_v50, %v836_v35 }
 0x13c   :  { %v1474_v38 = vadd.f32 %v1473_v36, %v1472_v33  ;;  %v1300_v40 = vmax.f32 %v842_v34, 0.0 }
 0x13d   :  { %v1299_v41 = vmax.f32 %v837_v37, 0.0  ;;  %v9337_v42 = vpop.f32.mrb[46].mxu0 }
 0x13e   :  { %v1476_v43 = vadd.f32 %v1475_v39, %v1474_v38  ;;  %v852_v44 = vadd.f32 %v9337_v42, %v11005_v50  ;;  %v846_v45 = vpop.f32.mrb[47].mxu0  ;;  %v1479_v51 = vsel %vm1383_vm2, %v1300_v40, 0.0 }
 0x13f   :  { %v1477_v46 = vsel %vm1383_vm2, %v1299_v41, 0.0  ;;  %v847_v48 = vadd.f32 %v11005_v50, %v846_v45 }
 0x140   :  { %v1478_v49 = vadd.f32 %v1477_v46, %v1476_v43  ;;  %v1302_v52 = vmax.f32 %v852_v44, 0.0 }
 0x141   :  { %v1301_v53 = vmax.f32 %v847_v48, 0.0  ;;  %v9340_v54 = vpop.f32.mrb[48].mxu0 }
 0x142   :  { %v1480_v55 = vadd.f32 %v1479_v51, %v1478_v49  ;;  %v862_v56 = vadd.f32 %v9340_v54, %v11005_v50  ;;  %v856_v57 = vpop.f32.mrb[49].mxu0  ;;  %v1483_v61 = vsel %vm1383_vm2, %v1302_v52, 0.0 }
 0x143   :  { %v1481_v58 = vsel %vm1383_vm2, %v1301_v53, 0.0  ;;  %v857_v59 = vadd.f32 %v11005_v50, %v856_v57 }
 0x144   :  { %v1482_v60 = vadd.f32 %v1481_v58, %v1480_v55  ;;  %v1304_v62 = vmax.f32 %v862_v56, 0.0  ;;  %v1447_v56 = vrot.slane %v11158_v47, 4 }
 0x145   :  { %v1303_v63 = vmax.f32 %v857_v59, 0.0  ;;  %v9343_v0 = vpop.f32.mrb[50].mxu0 }
 0x146   :  { %v1484_v1 = vadd.f32 %v1483_v61, %v1482_v60  ;;  %v872_v2 = vadd.f32 %v9343_v0, %v11005_v50  ;;  %v866_v3 = vpop.f32.mrb[51].mxu0  ;;  %v1487_v7 = vsel %vm1383_vm2, %v1304_v62, 0.0 }
 0x147   :  { %v1485_v4 = vsel %vm1383_vm2, %v1303_v63, 0.0  ;;  %v867_v5 = vadd.f32 %v11005_v50, %v866_v3  ;;  %v1448_v3 = vadd.f32 %v1447_v56, %v11158_v47 }
 0x148   :  { %v1486_v6 = vadd.f32 %v1485_v4, %v1484_v1  ;;  %v1306_v8 = vmax.f32 %v872_v2, 0.0 }
 0x149   :  { %v1305_v9 = vmax.f32 %v867_v5, 0.0  ;;  %v9346_v10 = vpop.f32.mrb[52].mxu0 }
 0x14a   :  { %v1488_v11 = vadd.f32 %v1487_v7, %v1486_v6  ;;  %v882_v12 = vadd.f32 %v9346_v10, %v11005_v50  ;;  %v876_v13 = vpop.f32.mrb[53].mxu0  ;;  %v1491_v17 = vsel %vm1383_vm2, %v1306_v8, 0.0 }
 0x14b   :  { %v1489_v14 = vsel %vm1383_vm2, %v1305_v9, 0.0  ;;  %v877_v15 = vadd.f32 %v11005_v50, %v876_v13 }
 0x14c   :  { %v1490_v16 = vadd.f32 %v1489_v14, %v1488_v11  ;;  %v1308_v18 = vmax.f32 %v882_v12, 0.0  ;;  %v1449_v14 = vrot.slane %v1448_v3, 2 }
 0x14d   :  { %v1307_v19 = vmax.f32 %v877_v15, 0.0  ;;  %v9349_v20 = vpop.f32.mrb[54].mxu0 }
 0x14e   :  { %v1492_v21 = vadd.f32 %v1491_v17, %v1490_v16  ;;  %v892_v22 = vadd.f32 %v9349_v20, %v11005_v50  ;;  %v886_v23 = vpop.f32.mrb[55].mxu0  ;;  %v1495_v27 = vsel %vm1383_vm2, %v1308_v18, 0.0 }
 0x14f   :  { %v1493_v24 = vsel %vm1383_vm2, %v1307_v19, 0.0  ;;  %v887_v25 = vadd.f32 %v11005_v50, %v886_v23 }
 0x150   :  { %v1494_v26 = vadd.f32 %v1493_v24, %v1492_v21  ;;  %v1310_v28 = vmax.f32 %v892_v22, 0.0 }
 0x151   :  { %v1309_v29 = vmax.f32 %v887_v25, 0.0  ;;  %v9352_v30 = vpop.f32.mrb[56].mxu0  ;;  %v1450_v25 = vadd.f32 %v1449_v14, %v1448_v3  ;;  %v1700_v3 = vld [vmem:[%s13482_s3 + $0xf0] sm:$0xff]  ;;  %v10526_v14 = vmov 0.0  }
 0x152   :  { %v1496_v31 = vadd.f32 %v1495_v27, %v1494_v26  ;;  %v902_v32 = vadd.f32 %v9352_v30, %v11005_v50  ;;  %v896_v33 = vpop.f32.mrb[57].mxu0  ;;  %v1499_v37 = vsel %vm1383_vm2, %v1310_v28, 0.0  ;;  %1831 = vmatprep.mubr.f32.mxu1 %v10526_v14 }
 0x153   :  { %v1497_v34 = vsel %vm1383_vm2, %v1309_v29, 0.0  ;;  %v897_v35 = vadd.f32 %v11005_v50, %v896_v33 }
 0x154   :  { %v1498_v36 = vadd.f32 %v1497_v34, %v1496_v31  ;;  %v1312_v38 = vmax.f32 %v902_v32, 0.0 }
 0x155   :  { %v1311_v39 = vmax.f32 %v897_v35, 0.0  ;;  %v9355_v40 = vpop.f32.mrb[58].mxu0 }
 0x156   :  { %v1500_v41 = vadd.f32 %v1499_v37, %v1498_v36  ;;  %v912_v42 = vadd.f32 %v9355_v40, %v11005_v50  ;;  %v906_v43 = vpop.f32.mrb[59].mxu0  ;;  %v1503_v48 = vsel %vm1383_vm2, %v1312_v38, 0.0  ;;  %v1451_v36 = vrot.slane %v1450_v25, 1  ;;  %v1681_v40 = vld [vmem:[%s13482_s3 + $0x58] sm:$0xff] }
 0x157   :  { %v1501_v44 = vsel %vm1383_vm2, %v1311_v39, 0.0  ;;  %v907_v45 = vadd.f32 %v11005_v50, %v906_v43  ;;  %v1671_v39 = vld [vmem:[%s13482_s3 + $0x8] sm:$0xff] }
 0x158   :  { %v1502_v46 = vadd.f32 %v1501_v44, %v1500_v41  ;;  %v1314_v49 = vmax.f32 %v912_v42, 0.0  ;;  %v9986_v44 = vpack.c.bf16 %v1681_v40, %v1671_v39 }
 0x159   :  { %v1313_v51 = vmax.f32 %v907_v45, 0.0  ;;  %v9358_v52 = vpop.f32.mrb[60].mxu0  ;;  %v1670_v45 = vld [vmem:[%s13482_s3] sm:$0xff] }
 0x15a   :  { %v1504_v53 = vadd.f32 %v1503_v48, %v1502_v46  ;;  %v922_v54 = vadd.f32 %v9358_v52, %v11005_v50  ;;  %v916_v55 = vpop.f32.mrb[61].mxu0  ;;  %v1507_v60 = vsel %vm1383_vm2, %v1314_v49, 0.0  ;;  %v1680_v46 = vld [vmem:[%s13482_s3 + $0x50] sm:$0xff]  ;;  %9987 = vmatprep.subr.bf16.mxu1 %v9986_v44 }
 0x15b   :  { %v1505_v57 = vsel %vm1383_vm2, %v1313_v51, 0.0  ;;  %v917_v58 = vadd.f32 %v11005_v50, %v916_v55  ;;  %v9988_v52 = vpack.c.bf16 %v1680_v46, %v1670_v45 }
 0x15c   :  { %v1506_v59 = vadd.f32 %v1505_v57, %v1504_v53  ;;  %v1316_v61 = vmax.f32 %v922_v54, 0.0  ;;  %v1452_v57 = vadd.f32 %v1451_v36, %v1450_v25 }
 0x15d   :  { %v1315_v62 = vmax.f32 %v917_v58, 0.0  ;;  %v9361_v63 = vpop.f32.mrb[62].mxu0  ;;  %9989 = vmatpush1.bf16.msra.mxu1 %v9988_v52 }
 0x15e   :  { %v1508_v0 = vadd.f32 %v1507_v60, %v1506_v59  ;;  %v932_v1 = vadd.f32 %v9361_v63, %v11005_v50  ;;  %v926_v2 = vpop.f32.mrb[63].mxu0  ;;  %v1511_v7 = vsel %vm1383_vm2, %v1316_v61, 0.0  ;;  %v1691_v60 = vld [vmem:[%s13482_s3 + $0xa8] sm:$0xff]  ;;  %v1701_v61 = vld [vmem:[%s13482_s3 + $0xf8] sm:$0xff] }
 0x15f   :  { %v1509_v4 = vsel %vm1383_vm2, %v1315_v62, 0.0  ;;  %v927_v5 = vadd.f32 %v11005_v50, %v926_v2  ;;  %v1690_v2 = vld [vmem:[%s13482_s3 + $0xa0] sm:$0xff] }
 0x160   :  { %v1510_v6 = vadd.f32 %v1509_v4, %v1508_v0  ;;  %v1318_v8 = vmax.f32 %v932_v1, 0.0  ;;  %v9990_v1 = vpack.c.bf16 %v1701_v61, %v1691_v60  ;;  %v1673_v4 = vld [vmem:[%s13482_s3 + $0x18] sm:$0xff] }
 0x161   :  { %v1317_v9 = vmax.f32 %v927_v5, 0.0  ;;  %v9364_v10 = vpop.f32.mrb[64].mxu0 }
 0x162   :  { %v1512_v11 = vadd.f32 %v1511_v7, %v1510_v6  ;;  %v942_v12 = vadd.f32 %v9364_v10, %v11005_v50  ;;  %v936_v13 = vpop.f32.mrb[65].mxu0  ;;  %v1515_v18 = vsel %vm1383_vm2, %v1318_v8, 0.0  ;;  %v9992_v8 = vpack.c.bf16 %v1700_v3, %v1690_v2  ;;  %9991 = vmatprep.subr.bf16.mxu1 %v9990_v1 }
 0x163   :  { %v1513_v15 = vsel %vm1383_vm2, %v1317_v9, 0.0  ;;  %v937_v16 = vadd.f32 %v11005_v50, %v936_v13  ;;  %v1683_v9 = vld [vmem:[%s13482_s3 + $0x68] sm:$0xff] }
 0x164   :  { %v1514_v47 = vadd.f32 %v1513_v15, %v1512_v11  ;;  %v1320_v17 = vmax.f32 %v942_v12, 0.0  ;;  %9993 = vmatpush1.bf16.msra.mxu1 %v9992_v8 }
 0x165   :  { %v1319_v19 = vmax.f32 %v937_v16, 0.0  ;;  %v9367_v20 = vpop.f32.mrb[66].mxu0 }
 0x166   :  { %v1516_v21 = vadd.f32 %v1515_v18, %v1514_v47  ;;  %v1525_v22 = vsel %vm1383_vm2, %v1320_v17, 0.0  ;;  %v952_v23 = vadd.f32 %v9367_v20, %v11005_v50  ;;  %v946_v24 = vpop.f32.mrb[67].mxu0  ;;  %v9994_v47 = vpack.c.bf16 %v1683_v9, %v1673_v4 }
 0x167   :  { %v1524_v26 = vsel %vm1383_vm2, %v1319_v19, 0.0  ;;  %v947_v27 = vadd.f32 %v11005_v50, %v946_v24  ;;  %v1453_v17 = vmul.f32 0.00390625, %v1452_v57 }
 0x168   :  { %v1517_v28 = vrot.slane %v1516_v21, 4  ;;  %v1526_v29 = vadd.f32 %v1525_v22, %v1524_v26  ;;  %v1322_v30 = vmax.f32 %v952_v23, 0.0  ;;  %9995 = vmatprep.subr.bf16.mxu1 %v9994_v47 }
 0x169   :  { %v1321_v31 = vmax.f32 %v947_v27, 0.0  ;;  %v9370_v32 = vpop.f32.mrb[68].mxu0 }
 0x16a   :  { %v1518_v33 = vadd.f32 %v1517_v28, %v1516_v21  ;;  %v962_v34 = vadd.f32 %v9370_v32, %v11005_v50  ;;  %v956_v35 = vpop.f32.mrb[69].mxu0  ;;  %v1529_v48 = vsel %vm1383_vm2, %v1322_v30, 0.0 }
 0x16b   :  { %v1527_v37 = vsel %vm1383_vm2, %v1321_v31, 0.0  ;;  %v957_v38 = vadd.f32 %v11005_v50, %v956_v35 }
 0x16c   :  { %v1519_v41 = vrot.slane %v1518_v33, 2  ;;  %v1528_v42 = vadd.f32 %v1527_v37, %v1526_v29  ;;  %v1324_v43 = vmax.f32 %v962_v34, 0.0 }
 0x16d   :  { %v1323_v49 = vmax.f32 %v957_v38, 0.0  ;;  %v9373_v51 = vpop.f32.mrb[70].mxu0 }
 0x16e   :  { %v1520_v53 = vadd.f32 %v1519_v41, %v1518_v33  ;;  %v1530_v54 = vadd.f32 %v1529_v48, %v1528_v42  ;;  %v972_v55 = vadd.f32 %v9373_v51, %v11005_v50  ;;  %v966_v56 = vpop.f32.mrb[71].mxu0  ;;  %v1533_v63 = vsel %vm1383_vm2, %v1324_v43, 0.0 }
 0x16f   :  { %v1531_v58 = vsel %vm1383_vm2, %v1323_v49, 0.0  ;;  %v967_v59 = vadd.f32 %v11005_v50, %v966_v56 }
 0x170   :  { %v1521_v62 = vrot.slane %v1520_v53, 1  ;;  %v1532_v0 = vadd.f32 %v1531_v58, %v1530_v54  ;;  %v1326_v5 = vmax.f32 %v972_v55, 0.0 }
 0x171   :  { %v1325_v6 = vmax.f32 %v967_v59, 0.0  ;;  %v9376_v7 = vpop.f32.mrb[72].mxu0 }
 0x172   :  { %v1522_v10 = vadd.f32 %v1521_v62, %v1520_v53  ;;  %v1534_v11 = vadd.f32 %v1533_v63, %v1532_v0  ;;  %v982_v12 = vadd.f32 %v9376_v7, %v11005_v50  ;;  %v976_v13 = vpop.f32.mrb[73].mxu0  ;;  %v1537_v20 = vsel %vm1383_vm2, %v1326_v5, 0.0 }
 0x173   :  { %v1535_v15 = vsel %vm1383_vm2, %v1325_v6, 0.0  ;;  %v977_v16 = vadd.f32 %v11005_v50, %v976_v13 }
 0x174   :  { %v1523_v18 = vmul.f32 0.00390625, %v1522_v10  ;;  %v1536_v19 = vadd.f32 %v1535_v15, %v1534_v11  ;;  %v1328_v21 = vmax.f32 %v982_v12, 0.0 }
 0x175   :  { %v1327_v22 = vmax.f32 %v977_v16, 0.0  ;;  %v9379_v23 = vpop.f32.mrb[74].mxu0 }
 0x176   :  { %v1538_v24 = vadd.f32 %v1537_v20, %v1536_v19  ;;  %v992_v25 = vadd.f32 %v9379_v23, %v11005_v50  ;;  %v986_v26 = vpop.f32.mrb[75].mxu0  ;;  %v11274_v27 = vsel %vm1664_vm3, %v1453_v17, %v1523_v18  ;;  %v1541_v31 = vsel %vm1383_vm2, %v1328_v21, 0.0 }
 0x177   :  { %v1539_v28 = vsel %vm1383_vm2, %v1327_v22, 0.0  ;;  %v987_v29 = vadd.f32 %v11005_v50, %v986_v26 }
 0x178   :  { %v1540_v30 = vadd.f32 %v1539_v28, %v1538_v24  ;;  %v1330_v32 = vmax.f32 %v992_v25, 0.0 }
 0x179   :  { %v1329_v33 = vmax.f32 %v987_v29, 0.0  ;;  %v9382_v34 = vpop.f32.mrb[76].mxu0 }
 0x17a   :  { %v1542_v35 = vadd.f32 %v1541_v31, %v1540_v30  ;;  %v1002_v36 = vadd.f32 %v9382_v34, %v11005_v50  ;;  %v996_v37 = vpop.f32.mrb[77].mxu0  ;;  %v1545_v41 = vsel %vm1383_vm2, %v1330_v32, 0.0 }
 0x17b   :  { %v1543_v38 = vsel %vm1383_vm2, %v1329_v33, 0.0  ;;  %v997_v39 = vadd.f32 %v11005_v50, %v996_v37 }
 0x17c   :  { %v1544_v40 = vadd.f32 %v1543_v38, %v1542_v35  ;;  %v1332_v42 = vmax.f32 %v1002_v36, 0.0  ;;  %v11306_v35 = vld [vmem:[%s13481_s2] ss:$0 sm:$0xff] }
 0x17d   :  { %v1331_v43 = vmax.f32 %v997_v39, 0.0  ;;  %v9385_v44 = vpop.f32.mrb[78].mxu0 }
 0x17e   :  { %v1546_v45 = vadd.f32 %v1545_v41, %v1544_v40  ;;  %v1012_v46 = vadd.f32 %v9385_v44, %v11005_v50  ;;  %v1006_v48 = vpop.f32.mrb[79].mxu0  ;;  %v1549_v53 = vsel %vm1383_vm2, %v1332_v42, 0.0 }
 0x17f   :  { %v1547_v49 = vsel %vm1383_vm2, %v1331_v43, 0.0  ;;  %v1007_v51 = vadd.f32 %v11005_v50, %v1006_v48 }
 0x180   :  { %v1548_v52 = vadd.f32 %v1547_v49, %v1546_v45  ;;  %v1334_v54 = vmax.f32 %v1012_v46, 0.0 }
 0x181   :  { %v1333_v55 = vmax.f32 %v1007_v51, 0.0  ;;  %v9388_v56 = vpop.f32.mrb[80].mxu0 }
 0x182   :  { %v1550_v57 = vadd.f32 %v1549_v53, %v1548_v52  ;;  %v1022_v58 = vadd.f32 %v9388_v56, %v11005_v50  ;;  %v1016_v59 = vpop.f32.mrb[81].mxu0  ;;  %v1553_v63 = vsel %vm1383_vm2, %v1334_v54, 0.0 }
 0x183   :  { %v1551_v60 = vsel %vm1383_vm2, %v1333_v55, 0.0  ;;  %v1017_v61 = vadd.f32 %v11005_v50, %v1016_v59 }
 0x184   :  { %v1552_v62 = vadd.f32 %v1551_v60, %v1550_v57  ;;  %v1336_v0 = vmax.f32 %v1022_v58, 0.0 }
 0x185   :  { %v1335_v1 = vmax.f32 %v1017_v61, 0.0  ;;  %v9391_v2 = vpop.f32.mrb[82].mxu0 }
 0x186   :  { %v1554_v3 = vadd.f32 %v1553_v63, %v1552_v62  ;;  %v1032_v4 = vadd.f32 %v9391_v2, %v11005_v50  ;;  %v1026_v5 = vpop.f32.mrb[83].mxu0  ;;  %v1557_v9 = vsel %vm1383_vm2, %v1336_v0, 0.0 }
 0x187   :  { %v1555_v6 = vsel %vm1383_vm2, %v1335_v1, 0.0  ;;  %v1027_v7 = vadd.f32 %v11005_v50, %v1026_v5 }
 0x188   :  { %v1556_v8 = vadd.f32 %v1555_v6, %v1554_v3  ;;  %v1338_v10 = vmax.f32 %v1032_v4, 0.0 }
 0x189   :  { %v1337_v11 = vmax.f32 %v1027_v7, 0.0  ;;  %v9394_v12 = vpop.f32.mrb[84].mxu0 }
 0x18a   :  { %v1558_v13 = vadd.f32 %v1557_v9, %v1556_v8  ;;  %v1042_v15 = vadd.f32 %v9394_v12, %v11005_v50  ;;  %v1036_v16 = vpop.f32.mrb[85].mxu0  ;;  %v1561_v19 = vsel %vm1383_vm2, %v1338_v10, 0.0 }
 0x18b   :  { %v1559_v47 = vsel %vm1383_vm2, %v1337_v11, 0.0  ;;  %v1037_v17 = vadd.f32 %v11005_v50, %v1036_v16 }
 0x18c   :  { %v1560_v18 = vadd.f32 %v1559_v47, %v1558_v13  ;;  %v1340_v20 = vmax.f32 %v1042_v15, 0.0 }
 0x18d   :  { %v1339_v21 = vmax.f32 %v1037_v17, 0.0  ;;  %v9397_v22 = vpop.f32.mrb[86].mxu0 }
 0x18e   :  { %v1562_v23 = vadd.f32 %v1561_v19, %v1560_v18  ;;  %v1052_v24 = vadd.f32 %v9397_v22, %v11005_v50  ;;  %v1046_v25 = vpop.f32.mrb[87].mxu0  ;;  %v1565_v30 = vsel %vm1383_vm2, %v1340_v20, 0.0 }
 0x18f   :  { %v1563_v26 = vsel %vm1383_vm2, %v1339_v21, 0.0  ;;  %v1047_v28 = vadd.f32 %v11005_v50, %v1046_v25 }
 0x190   :  { %v1564_v29 = vadd.f32 %v1563_v26, %v1562_v23  ;;  %v1342_v31 = vmax.f32 %v1052_v24, 0.0 }
 0x191   :  { %v1341_v32 = vmax.f32 %v1047_v28, 0.0  ;;  %v9400_v33 = vpop.f32.mrb[88].mxu0 }
 0x192   :  { %v1566_v34 = vadd.f32 %v1565_v30, %v1564_v29  ;;  %v1062_v36 = vadd.f32 %v11306_v35, %v9400_v33  ;;  %v1056_v37 = vpop.f32.mrb[89].mxu0  ;;  %v1569_v40 = vsel %vm1383_vm2, %v1342_v31, 0.0 }
 0x193   :  { %v1567_v38 = vsel %vm1383_vm2, %v1341_v32, 0.0  ;;  %v1057_v39 = vadd.f32 %v11306_v35, %v1056_v37 }
 0x194   :  { %v1568_v50 = vadd.f32 %v1567_v38, %v1566_v34  ;;  %v1344_v41 = vmax.f32 %v1062_v36, 0.0 }
 0x195   :  { %v1343_v42 = vmax.f32 %v1057_v39, 0.0  ;;  %v9403_v43 = vpop.f32.mrb[90].mxu0 }
 0x196   :  { %v1570_v44 = vadd.f32 %v1569_v40, %v1568_v50  ;;  %v1072_v45 = vadd.f32 %v11306_v35, %v9403_v43  ;;  %v1066_v46 = vpop.f32.mrb[91].mxu0  ;;  %v1573_v52 = vsel %vm1383_vm2, %v1344_v41, 0.0 }
 0x197   :  { %v1571_v48 = vsel %vm1383_vm2, %v1343_v42, 0.0  ;;  %v1067_v49 = vadd.f32 %v11306_v35, %v1066_v46 }
 0x198   :  { %v1572_v51 = vadd.f32 %v1571_v48, %v1570_v44  ;;  %v1346_v53 = vmax.f32 %v1072_v45, 0.0 }
 0x199   :  { %v1345_v54 = vmax.f32 %v1067_v49, 0.0  ;;  %v9406_v55 = vpop.f32.mrb[92].mxu0 }
 0x19a   :  { %v1574_v56 = vadd.f32 %v1573_v52, %v1572_v51  ;;  %v1082_v57 = vadd.f32 %v11306_v35, %v9406_v55  ;;  %v1076_v58 = vpop.f32.mrb[93].mxu0  ;;  %v1577_v62 = vsel %vm1383_vm2, %v1346_v53, 0.0 }
 0x19b   :  { %v1575_v59 = vsel %vm1383_vm2, %v1345_v54, 0.0  ;;  %v1077_v60 = vadd.f32 %v11306_v35, %v1076_v58 }
 0x19c   :  { %v1576_v61 = vadd.f32 %v1575_v59, %v1574_v56  ;;  %v1348_v63 = vmax.f32 %v1082_v57, 0.0 }
 0x19d   :  { %v1347_v0 = vmax.f32 %v1077_v60, 0.0  ;;  %v9409_v1 = vpop.f32.mrb[94].mxu0 }
 0x19e   :  { %v1578_v2 = vadd.f32 %v1577_v62, %v1576_v61  ;;  %v1092_v3 = vadd.f32 %v11306_v35, %v9409_v1  ;;  %v1086_v4 = vpop.f32.mrb[95].mxu0  ;;  %v1581_v8 = vsel %vm1383_vm2, %v1348_v63, 0.0 }
 0x19f   :  { %v1579_v5 = vsel %vm1383_vm2, %v1347_v0, 0.0  ;;  %v1087_v6 = vadd.f32 %v11306_v35, %v1086_v4 }
 0x1a0   :  { %v1580_v7 = vadd.f32 %v1579_v5, %v1578_v2  ;;  %v1350_v9 = vmax.f32 %v1092_v3, 0.0 }
 0x1a1   :  { %v1349_v10 = vmax.f32 %v1087_v6, 0.0  ;;  %v9412_v11 = vpop.f32.mrb[96].mxu0 }
 0x1a2   :  { %v1582_v12 = vadd.f32 %v1581_v8, %v1580_v7  ;;  %v1102_v13 = vadd.f32 %v11306_v35, %v9412_v11  ;;  %v1096_v15 = vpop.f32.mrb[97].mxu0  ;;  %v1585_v19 = vsel %vm1383_vm2, %v1350_v9, 0.0 }
 0x1a3   :  { %v1583_v16 = vsel %vm1383_vm2, %v1349_v10, 0.0  ;;  %v1097_v47 = vadd.f32 %v11306_v35, %v1096_v15 }
 0x1a4   :  { %v1584_v17 = vadd.f32 %v1583_v16, %v1582_v12  ;;  %v1352_v18 = vmax.f32 %v1102_v13, 0.0 }
 0x1a5   :  { %v1351_v20 = vmax.f32 %v1097_v47, 0.0  ;;  %v9415_v21 = vpop.f32.mrb[98].mxu0 }
 0x1a6   :  { %v1586_v22 = vadd.f32 %v1585_v19, %v1584_v17  ;;  %v1595_v23 = vsel %vm1383_vm2, %v1352_v18, 0.0  ;;  %v1112_v24 = vadd.f32 %v11306_v35, %v9415_v21  ;;  %v1106_v25 = vpop.f32.mrb[99].mxu0 }
 0x1a7   :  { %v1594_v26 = vsel %vm1383_vm2, %v1351_v20, 0.0  ;;  %v1107_v28 = vadd.f32 %v11306_v35, %v1106_v25 }
 0x1a8   :  { %v1587_v29 = vrot.slane %v1586_v22, 4  ;;  %v1596_v30 = vadd.f32 %v1595_v23, %v1594_v26  ;;  %v1354_v31 = vmax.f32 %v1112_v24, 0.0 }
 0x1a9   :  { %v1353_v32 = vmax.f32 %v1107_v28, 0.0  ;;  %v9418_v33 = vpop.f32.mrb[100].mxu0 }
 0x1aa   :  { %v1588_v34 = vadd.f32 %v1587_v29, %v1586_v22  ;;  %v1122_v36 = vadd.f32 %v11306_v35, %v9418_v33  ;;  %v1116_v37 = vpop.f32.mrb[101].mxu0  ;;  %v1599_v41 = vsel %vm1383_vm2, %v1354_v31, 0.0 }
 0x1ab   :  { %v1597_v38 = vsel %vm1383_vm2, %v1353_v32, 0.0  ;;  %v1117_v39 = vadd.f32 %v11306_v35, %v1116_v37 }
 0x1ac   :  { %v1589_v50 = vrot.slane %v1588_v34, 2  ;;  %v1598_v40 = vadd.f32 %v1597_v38, %v1596_v30  ;;  %v1356_v42 = vmax.f32 %v1122_v36, 0.0 }
 0x1ad   :  { %v1355_v43 = vmax.f32 %v1117_v39, 0.0  ;;  %v9421_v44 = vpop.f32.mrb[102].mxu0 }
 0x1ae   :  { %v1590_v45 = vadd.f32 %v1589_v50, %v1588_v34  ;;  %v1600_v46 = vadd.f32 %v1599_v41, %v1598_v40  ;;  %v1132_v48 = vadd.f32 %v11306_v35, %v9421_v44  ;;  %v1126_v49 = vpop.f32.mrb[103].mxu0  ;;  %v1603_v55 = vsel %vm1383_vm2, %v1356_v42, 0.0 }
 0x1af   :  { %v1601_v51 = vsel %vm1383_vm2, %v1355_v43, 0.0  ;;  %v1127_v52 = vadd.f32 %v11306_v35, %v1126_v49 }
 0x1b0   :  { %v1591_v53 = vrot.slane %v1590_v45, 1  ;;  %v1602_v54 = vadd.f32 %v1601_v51, %v1600_v46  ;;  %v1358_v56 = vmax.f32 %v1132_v48, 0.0 }
 0x1b1   :  { %v1357_v57 = vmax.f32 %v1127_v52, 0.0  ;;  %v9424_v58 = vpop.f32.mrb[104].mxu0 }
 0x1b2   :  { %v1592_v59 = vadd.f32 %v1591_v53, %v1590_v45  ;;  %v1604_v60 = vadd.f32 %v1603_v55, %v1602_v54  ;;  %v1142_v61 = vadd.f32 %v11306_v35, %v9424_v58  ;;  %v1136_v62 = vpop.f32.mrb[105].mxu0  ;;  %v1607_v3 = vsel %vm1383_vm2, %v1358_v56, 0.0 }
 0x1b3   :  { %v1605_v63 = vsel %vm1383_vm2, %v1357_v57, 0.0  ;;  %v1137_v0 = vadd.f32 %v11306_v35, %v1136_v62 }
 0x1b4   :  { %v1606_v1 = vadd.f32 %v1605_v63, %v1604_v60  ;;  %v1593_v2 = vmul.f32 0.00390625, %v1592_v59  ;;  %v1360_v4 = vmax.f32 %v1142_v61, 0.0 }
 0x1b5   :  { %v1359_v5 = vmax.f32 %v1137_v0, 0.0  ;;  %v9427_v6 = vpop.f32.mrb[106].mxu0 }
 0x1b6   :  { %v1608_v7 = vadd.f32 %v1607_v3, %v1606_v1  ;;  %v1152_v8 = vadd.f32 %v11306_v35, %v9427_v6  ;;  %v1146_v9 = vpop.f32.mrb[107].mxu0  ;;  %v11347_v10 = vsel %vm1666_vm4, %v11274_v27, %v1593_v2  ;;  %v1611_v15 = vsel %vm1383_vm2, %v1360_v4, 0.0 }
 0x1b7   :  { %v1609_v11 = vsel %vm1383_vm2, %v1359_v5, 0.0  ;;  %v1147_v12 = vadd.f32 %v11306_v35, %v1146_v9 }
 0x1b8   :  { %v1610_v13 = vadd.f32 %v1609_v11, %v1608_v7  ;;  %v1362_v16 = vmax.f32 %v1152_v8, 0.0 }
 0x1b9   :  { %v1361_v47 = vmax.f32 %v1147_v12, 0.0  ;;  %v9430_v17 = vpop.f32.mrb[108].mxu0 }
 0x1ba   :  { %v1612_v18 = vadd.f32 %v1611_v15, %v1610_v13  ;;  %v1162_v19 = vadd.f32 %v11306_v35, %v9430_v17  ;;  %v1156_v20 = vpop.f32.mrb[109].mxu0  ;;  %v1615_v23 = vsel %vm1383_vm2, %v1362_v16, 0.0 }
 0x1bb   :  { %v1613_v21 = vsel %vm1383_vm2, %v1361_v47, 0.0  ;;  %v1157_v22 = vadd.f32 %v11306_v35, %v1156_v20 }
 0x1bc   :  { %v1614_v27 = vadd.f32 %v1613_v21, %v1612_v18  ;;  %v1364_v24 = vmax.f32 %v1162_v19, 0.0 }
 0x1bd   :  { %v1363_v25 = vmax.f32 %v1157_v22, 0.0  ;;  %v9433_v26 = vpop.f32.mrb[110].mxu0 }
 0x1be   :  { %v1616_v28 = vadd.f32 %v1615_v23, %v1614_v27  ;;  %v1172_v29 = vadd.f32 %v11306_v35, %v9433_v26  ;;  %v1166_v30 = vpop.f32.mrb[111].mxu0  ;;  %v1619_v34 = vsel %vm1383_vm2, %v1364_v24, 0.0 }
 0x1bf   :  { %v1617_v31 = vsel %vm1383_vm2, %v1363_v25, 0.0  ;;  %v1167_v32 = vadd.f32 %v11306_v35, %v1166_v30 }
 0x1c0   :  { %v1618_v33 = vadd.f32 %v1617_v31, %v1616_v28  ;;  %v1366_v36 = vmax.f32 %v1172_v29, 0.0 }
 0x1c1   :  { %v1365_v37 = vmax.f32 %v1167_v32, 0.0  ;;  %v9436_v38 = vpop.f32.mrb[112].mxu0 }
 0x1c2   :  { %v1620_v39 = vadd.f32 %v1619_v34, %v1618_v33  ;;  %v1182_v50 = vadd.f32 %v11306_v35, %v9436_v38  ;;  %v1176_v40 = vpop.f32.mrb[113].mxu0  ;;  %v1623_v44 = vsel %vm1383_vm2, %v1366_v36, 0.0 }
 0x1c3   :  { %v1621_v41 = vsel %vm1383_vm2, %v1365_v37, 0.0  ;;  %v1177_v42 = vadd.f32 %v11306_v35, %v1176_v40 }
 0x1c4   :  { %v1622_v43 = vadd.f32 %v1621_v41, %v1620_v39  ;;  %v1368_v45 = vmax.f32 %v1182_v50, 0.0 }
 0x1c5   :  { %v1367_v46 = vmax.f32 %v1177_v42, 0.0  ;;  %v9439_v48 = vpop.f32.mrb[114].mxu0 }
 0x1c6   :  { %v1624_v49 = vadd.f32 %v1623_v44, %v1622_v43  ;;  %v1192_v51 = vadd.f32 %v11306_v35, %v9439_v48  ;;  %v1186_v52 = vpop.f32.mrb[115].mxu0  ;;  %v1627_v56 = vsel %vm1383_vm2, %v1368_v45, 0.0 }
 0x1c7   :  { %v1625_v53 = vsel %vm1383_vm2, %v1367_v46, 0.0  ;;  %v1187_v54 = vadd.f32 %v11306_v35, %v1186_v52 }
 0x1c8   :  { %v1626_v55 = vadd.f32 %v1625_v53, %v1624_v49  ;;  %v1370_v57 = vmax.f32 %v1192_v51, 0.0 }
 0x1c9   :  { %v1369_v58 = vmax.f32 %v1187_v54, 0.0  ;;  %v9442_v59 = vpop.f32.mrb[116].mxu0 }
 0x1ca   :  { %v1628_v60 = vadd.f32 %v1627_v56, %v1626_v55  ;;  %v1202_v61 = vadd.f32 %v11306_v35, %v9442_v59  ;;  %v1196_v62 = vpop.f32.mrb[117].mxu0  ;;  %v1631_v2 = vsel %vm1383_vm2, %v1370_v57, 0.0 }
 0x1cb   :  { %v1629_v63 = vsel %vm1383_vm2, %v1369_v58, 0.0  ;;  %v1197_v0 = vadd.f32 %v11306_v35, %v1196_v62 }
 0x1cc   :  { %v1630_v1 = vadd.f32 %v1629_v63, %v1628_v60  ;;  %v1372_v3 = vmax.f32 %v1202_v61, 0.0 }
 0x1cd   :  { %v1371_v4 = vmax.f32 %v1197_v0, 0.0  ;;  %v9445_v5 = vpop.f32.mrb[118].mxu0 }
 0x1ce   :  { %v1632_v6 = vadd.f32 %v1631_v2, %v1630_v1  ;;  %v1212_v7 = vadd.f32 %v11306_v35, %v9445_v5  ;;  %v1206_v8 = vpop.f32.mrb[119].mxu0  ;;  %v1635_v13 = vsel %vm1383_vm2, %v1372_v3, 0.0 }
 0x1cf   :  { %v1633_v9 = vsel %vm1383_vm2, %v1371_v4, 0.0  ;;  %v1207_v11 = vadd.f32 %v11306_v35, %v1206_v8  ;;  %v1682_v4 = vld [vmem:[%s13482_s3 + $0x60] sm:$0xff] }
 0x1d0   :  { %v1634_v12 = vadd.f32 %v1633_v9, %v1632_v6  ;;  %v1374_v15 = vmax.f32 %v1212_v7, 0.0  ;;  %v1693_v6 = vld [vmem:[%s13482_s3 + $0xb8] sm:$0xff]  ;;  %v1703_v7 = vld [vmem:[%s13482_s3 + $0x108] sm:$0xff] }
 0x1d1   :  { %v1373_v16 = vmax.f32 %v1207_v11, 0.0  ;;  %v9448_v47 = vpop.f32.mrb[120].mxu0  ;;  %v9998_v11 = vpack.c.bf16 %v1703_v7, %v1693_v6 }
 0x1d2   :  { %v1636_v17 = vadd.f32 %v1635_v13, %v1634_v12  ;;  %v1222_v18 = vadd.f32 %v11306_v35, %v9448_v47  ;;  %v1216_v19 = vpop.f32.mrb[121].mxu0  ;;  %v1639_v27 = vsel %vm1383_vm2, %v1374_v15, 0.0  ;;  %v1692_v12 = vld [vmem:[%s13482_s3 + $0xb0] sm:$0xff]  ;;  %v1702_v13 = vld [vmem:[%s13482_s3 + $0x100] sm:$0xff]  ;;  %v1685_v47 = vld [vmem:[%s13482_s3 + $0x78] sm:$0xff] }
 0x1d3   :  { %v1637_v20 = vsel %vm1383_vm2, %v1373_v16, 0.0  ;;  %v1217_v21 = vadd.f32 %v11306_v35, %v1216_v19  ;;  %v1675_v16 = vld [vmem:[%s13482_s3 + $0x28] sm:$0xff]  ;;  %v1684_v19 = vld [vmem:[%s13482_s3 + $0x70] sm:$0xff] }
 0x1d4   :  { %v1638_v22 = vadd.f32 %v1637_v20, %v1636_v17  ;;  %v1376_v23 = vmax.f32 %v1222_v18, 0.0  ;;  %v10000_v17 = vpack.c.bf16 %v1702_v13, %v1692_v12  ;;  %v10002_v18 = vpack.c.bf16 %v1685_v47, %v1675_v16  ;;  %v1695_v20 = vld [vmem:[%s13482_s3 + $0xc8] sm:$0xff] }
 0x1d5   :  { %v1375_v24 = vmax.f32 %v1217_v21, 0.0  ;;  %v9451_v25 = vpop.f32.mrb[122].mxu0  ;;  %v1705_v21 = vld [vmem:[%s13482_s3 + $0x118] sm:$0xff] }
 0x1d6   :  { %v1640_v26 = vadd.f32 %v1639_v27, %v1638_v22  ;;  %v1232_v28 = vadd.f32 %v11306_v35, %v9451_v25  ;;  %v1226_v29 = vpop.f32.mrb[123].mxu0  ;;  %v1643_v33 = vsel %vm1383_vm2, %v1376_v23, 0.0  ;;  %v10006_v27 = vpack.c.bf16 %v1705_v21, %v1695_v20  ;;  %v1694_v23 = vld [vmem:[%s13482_s3 + $0xc0] sm:$0xff]  ;;  %v1677_v25 = vld [vmem:[%s13482_s3 + $0x38] sm:$0xff] }
 0x1d7   :  { %v1641_v30 = vsel %vm1383_vm2, %v1375_v24, 0.0  ;;  %v1227_v31 = vadd.f32 %v11306_v35, %v1226_v29  ;;  %v1704_v24 = vld [vmem:[%s13482_s3 + $0x110] sm:$0xff] }
 0x1d8   :  { %v1642_v32 = vadd.f32 %v1641_v30, %v1640_v26  ;;  %v1378_v34 = vmax.f32 %v1232_v28, 0.0  ;;  %v1687_v26 = vld [vmem:[%s13482_s3 + $0x88] sm:$0xff]  ;;  %v10008_v28 = vpack.c.bf16 %v1704_v24, %v1694_v23  ;;  %v1676_v30 = vld [vmem:[%s13482_s3 + $0x30] sm:$0xff] }
 0x1d9   :  { %v1377_v36 = vmax.f32 %v1227_v31, 0.0  ;;  %v9454_v37 = vpop.f32.mrb[124].mxu0  ;;  %v10010_v29 = vpack.c.bf16 %v1687_v26, %v1677_v25  ;;  %v1686_v31 = vld [vmem:[%s13482_s3 + $0x80] sm:$0xff] }
 0x1da   :  { %v1644_v38 = vadd.f32 %v1643_v33, %v1642_v32  ;;  %v1242_v39 = vadd.f32 %v11306_v35, %v9454_v37  ;;  %v1236_v50 = vpop.f32.mrb[125].mxu0  ;;  %v1647_v43 = vsel %vm1383_vm2, %v1378_v34, 0.0  ;;  %v1697_v32 = vld [vmem:[%s13482_s3 + $0xd8] sm:$0xff]  ;;  %v1707_v33 = vld [vmem:[%s13482_s3 + $0x128] sm:$0xff]  ;;  %v10012_v34 = vpack.c.bf16 %v1686_v31, %v1676_v30  ;;  %v1696_v37 = vld [vmem:[%s13482_s3 + $0xd0] sm:$0xff] }
 0x1db   :  { %v1645_v40 = vsel %vm1383_vm2, %v1377_v36, 0.0  ;;  %v1237_v41 = vadd.f32 %v11306_v35, %v1236_v50  ;;  %v10014_v36 = vpack.c.bf16 %v1707_v33, %v1697_v32  ;;  %v1689_v50 = vld [vmem:[%s13482_s3 + $0x98] sm:$0xff] }
 0x1dc   :  { %v1646_v42 = vadd.f32 %v1645_v40, %v1644_v38  ;;  %v1380_v44 = vmax.f32 %v1242_v39, 0.0  ;;  %v1706_v38 = vld [vmem:[%s13482_s3 + $0x120] sm:$0xff]  ;;  %v1679_v39 = vld [vmem:[%s13482_s3 + $0x48] sm:$0xff] }
 0x1dd   :  { %v1379_v45 = vmax.f32 %v1237_v41, 0.0  ;;  %v9457_v46 = vpop.f32.mrb[126].mxu0  ;;  %v10016_v40 = vpack.c.bf16 %v1706_v38, %v1696_v37  ;;  %v10018_v41 = vpack.c.bf16 %v1689_v50, %v1679_v39 }
 0x1de   :  { %v1648_v48 = vadd.f32 %v1647_v43, %v1646_v42  ;;  %v1252_v49 = vadd.f32 %v11306_v35, %v9457_v46  ;;  %v1246_v51 = vpop.f32.mrb[127].mxu0  ;;  %v1651_v55 = vsel %vm1383_vm2, %v1380_v44, 0.0  ;;  %v1678_v42 = vld [vmem:[%s13482_s3 + $0x40] sm:$0xff]  ;;  %v1688_v43 = vld [vmem:[%s13482_s3 + $0x90] sm:$0xff]  ;;  %v1699_v44 = vld [vmem:[%s13482_s3 + $0xe8] sm:$0xff] }
 0x1df   :  { %v1649_v52 = vsel %vm1383_vm2, %v1379_v45, 0.0  ;;  %v1247_v53 = vadd.f32 %v11306_v35, %v1246_v51  ;;  %v1672_v35 = vld [vmem:[%s13482_s3 + $0x10] sm:$0xff]  ;;  %v1709_v45 = vld [vmem:[%s13482_s3 + $0x138] sm:$0xff]  ;;  %v10020_v46 = vpack.c.bf16 %v1688_v43, %v1678_v42 }
 0x1e0   :  { %v1650_v54 = vadd.f32 %v1649_v52, %v1648_v48  ;;  %v1382_v56 = vmax.f32 %v1252_v49, 0.0  ;;  %v9996_v9 = vpack.c.bf16 %v1682_v4, %v1672_v35  ;;  %v10022_v48 = vpack.c.bf16 %v1709_v45, %v1699_v44  ;;  %v1698_v49 = vld [vmem:[%s13482_s3 + $0xe0] sm:$0xff]  ;;  %v1708_v51 = vld [vmem:[%s13482_s3 + $0x130] sm:$0xff] }
 0x1e1   :  { %v1381_v57 = vmax.f32 %v1247_v53, 0.0  ;;  %v10024_v52 = vpack.c.bf16 %v1708_v51, %v1698_v49  ;;  %v1714_v53 = vlaneseq }
 0x1e2   :  { %v1652_v58 = vadd.f32 %v1651_v55, %v1650_v54  ;;  %v1655_v61 = vsel %vm1383_vm2, %v1382_v56, 0.0  ;;  %v1711_v55 = vld [vmem:[%s13483_s4 + $0x8] sm:$0x3] }
 0x1e3   :  { %v1653_v59 = vsel %vm1383_vm2, %v1381_v57, 0.0  ;;  %v11494_v54 = vshrl.u32 %v1714_v53, 7 }
 0x1e4   :  { %v1654_v60 = vadd.f32 %v1653_v59, %v1652_v58  ;;  %v11506_v59 = vand.u32 127, %v1714_v53 }
 0x1e5   :  { %v1720_v56 = vsub.s32 1, %v11494_v54  ;;  %v1716_v58 = vsub.s32 0, %v11494_v54 }
 0x1e6   :  { %v1656_v62 = vadd.f32 %v1655_v61, %v1654_v60  ;;  %vm2124_vm6 = vcmp.lt.s32.totalorder %v11506_v59, 10  ;;  %vm2125_vm0 = vcmp.lt.s32.totalorder %v11506_v59, 100 }
 0x1e7   :  { %v1753_v57 = vrot.slane %v1711_v55, %v1720_v56 }
 0x1e8   :  { %v1657_v63 = vrot.slane %v1656_v62, 4 }
 0x1ea   :  { %v1658_v0 = vadd.f32 %v1657_v63, %v1656_v62 }
 0x1ec   :  { %v1659_v1 = vrot.slane %v1658_v0, 2 }
 0x1ee   :  { %v1660_v2 = vadd.f32 %v1659_v1, %v1658_v0 }
 0x1f0   :  { %v1661_v3 = vrot.slane %v1660_v2, 1 }
 0x1f2   :  { %v1662_v5 = vadd.f32 %v1661_v3, %v1660_v2 }
 0x1f4   :  { %v1663_v8 = vmul.f32 0.00390625, %v1662_v5 }
 0x1f6   :  { %v1669_v15 = vsel %vm1668_vm5, %v11347_v10, %v1663_v8  ;;  %v1674_v10 = vld [vmem:[%s13482_s3 + $0x20] sm:$0xff] }
 0x1f7   :  { %8438 = vmatmul.mubr.msk.f32.vlgmr.msra.gmra.mrb[0].mxu1 %vm1383_vm2, %v1669_v15  ;;  %v10004_v22 = vpack.c.bf16 %v1684_v19, %v1674_v10 }
 0x1f8   :  { %9997 = vmatpush1.bf16.msra.mxu1 %v9996_v9  ;;  %1902 = vmatprep.mubr.f32.mxu1 %v10526_v14 }
 0x1f9   :  { %9999 = vmatprep.subr.bf16.mxu1 %v9998_v11 }
 0x1fc   :  { %10001 = vmatpush1.bf16.msra.mxu1 %v10000_v17 }
 0x1fd   :  { %10003 = vmatprep.subr.bf16.mxu1 %v10002_v18 }
 0x1ff   :  { %8439 = vmatmul.mubr.msk.f32.vlgmr.msra.gmra.mrb[2].mxu1 %vm1383_vm2, %v1669_v15 }
 0x200   :  { %10005 = vmatpush1.bf16.msra.mxu1 %v10004_v22  ;;  %1973 = vmatprep.mubr.f32.mxu1 %v10526_v14 }
 0x201   :  { %10007 = vmatprep.subr.bf16.mxu1 %v10006_v27 }
 0x204   :  { %10009 = vmatpush1.bf16.msra.mxu1 %v10008_v28 }
 0x205   :  { %10011 = vmatprep.subr.bf16.mxu1 %v10010_v29 }
 0x207   :  { %8440 = vmatmul.mubr.msk.f32.vlgmr.msra.gmra.mrb[4].mxu1 %vm1383_vm2, %v1669_v15 }
 0x208   :  { %10013 = vmatpush1.bf16.msra.mxu1 %v10012_v34  ;;  %2044 = vmatprep.mubr.f32.mxu1 %v10526_v14 }
 0x209   :  { %10015 = vmatprep.subr.bf16.mxu1 %v10014_v36 }
 0x20c   :  { %10017 = vmatpush1.bf16.msra.mxu1 %v10016_v40 }
 0x20d   :  { %10019 = vmatprep.subr.bf16.mxu1 %v10018_v41 }
 0x20f   :  { %8441 = vmatmul.mubr.msk.f32.vlgmr.msra.gmra.mrb[6].mxu1 %vm1383_vm2, %v1669_v15 }
 0x210   :  { %10021 = vmatpush1.bf16.msra.mxu1 %v10020_v46  ;;  %2115 = vmatprep.mubr.f32.mxu1 %v10526_v14  ;;  %v11504_v14 = vld [vmem:[%s13483_s4] sm:$0xff] }
 0x211   :  { %10023 = vmatprep.subr.bf16.mxu1 %v10022_v48  ;;  %v1717_v60 = vrot.slane %v11504_v14, %v1716_v58 }
 0x214   :  { %10025 = vmatpush1.bf16.msra.mxu1 %v10024_v52 }
 0x217   :  { %8442 = vmatmul.mubr.msk.f32.vlgmr.msra.gmra.mrb[8].mxu1 %vm1383_vm2, %v1669_v15  ;;  %v1721_v15 = vrot.slane %v11504_v14, %v1720_v56 }
 0x2ca   :  { %v1833_v61 = vpop.f32.mrb[0].mxu1 }
 0x2cb   :  { %v1834_v62 = vadd.f32 %v1833_v61, %v1717_v60  ;;  %v1835_v63 = vpop.f32.mrb[1].mxu1 }
 0x2cc   :  { %v1836_v16 = vadd.f32 %v1835_v63, %v1721_v15 }
 0x2cd   :  { %v2170_v0 = vsel %vm2124_vm6, %v1834_v62, -1e+30 }
 0x2ce   :  { %v2171_v1 = vsel %vm546_vm1, %v2170_v0, -inf  ;;  %v2673_v10 = vsel %vm2124_vm6, %v1836_v16, -1e+30 }
 0x2cf   :  { %2172 = vmax.xlane.f32.xlu0 %v2171_v1  ;;  %v2674_v19 = vsel %vm546_vm1, %v2673_v10, -inf }
 0x2d2   :  { %v11515_v2 = vpop.f32.mrb[2].mxu1 }
 0x2d3   :  { %v11517_v3 = vpop.f32.mrb[3].mxu1 }
 0x2da   :  { %v11519_v35 = vpop.f32.mrb[4].mxu1 }
 0x2db   :  { %v11521_v4 = vpop.f32.mrb[5].mxu1 }
 0x2e2   :  { %v11523_v5 = vpop.f32.mrb[6].mxu1 }
 0x2e3   :  { %v11525_v6 = vpop.f32.mrb[7].mxu1 }
 0x2ea   :  { %v11527_v7 = vpop.f32.mrb[8].mxu1 }
 0x2eb   :  { %v2119_v8 = vpop.f32.mrb[9].mxu1 }
 0x2ec   :  { %v11529_v9 = vadd.f32 %v2119_v8, %v1753_v57 }
 0x35c   :  { %v2173_v11 = vpop.xlane.xlu0 %2172 }
 0x35d   :  { %v2174_v12 = vsub.f32 %v2170_v0, %v2173_v11 }
 0x35f   :  { %v2175_v13 = vmul.f32 1.442695, %v2174_v12 }
 0x361   :  { %10150 = vpow2.f32 %v2175_v13 }
 0x36b   :  { %v10151_v47 = vpop.eup %10150 }
 0x36c   :  { %v2177_v17 = vsel %vm2124_vm6, %v10151_v47, 0.0 }
 0x36d   :  { %v2178_v18 = vsel %vm546_vm1, %v2177_v17, 0.0 }
 0x36e   :  { %2179 = vadd.xlane.f32.xlu0 %v2178_v18 }
 0x372   :  { %2675 = vmax.xlane.f32.xlu0 %v2674_v19 }
 0x3fb   :  { %v2180_v20 = vpop.xlane.xlu0 %2179 }
 0x3fc   :  { %10152 = vrcp.f32 %v2180_v20  ;;  %v1724_v20 = vsub.s32 2, %v11494_v54 }
 0x3ff   :  { %v2676_v21 = vpop.xlane.xlu0 %2675 }
 0x400   :  { %v2677_v22 = vsub.f32 %v2673_v10, %v2676_v21 }
 0x402   :  { %v2678_v27 = vmul.f32 1.442695, %v2677_v22  ;;  %v1725_v22 = vrot.slane %v11504_v14, %v1724_v20 }
 0x404   :  { %10154 = vpow2.f32 %v2678_v27 }
 0x406   :  { %v10153_v23 = vpop.eup %10152 }
 0x407   :  { %v2182_v24 = vmul.f32 %v10153_v23, %v2177_v17  ;;  %v1905_v23 = vadd.f32 %v11515_v2, %v1725_v22 }
 0x409   :  { %2183 = vxpose.xlu1.b32.start.end [1/1] (short) %v2182_v24, 128  ;;  %v2216_v25 = vrot.slane %v2182_v24, 2 }
 0x40b   :  { %9458 = vmatprep.subr.msk.mxu0 %vm1666_vm4, %v2216_v25  ;;  %10026 = vmatprep.subr.msk.mxu1 %vm1666_vm4, %v2216_v25 }
 0x40c   :  { %9459 = vmatpush3.msk.msra.mxu0 %vm1666_vm4, %v2216_v25  ;;  %10027 = vmatpush3.msk.msra.mxu1 %vm1666_vm4, %v2216_v25 }
 0x40d   :  { %9484 = vmatprep.subr.msk.mxu1 %vm1666_vm4, %v2182_v24 }
 0x40e   :  { %v10155_v26 = vpop.eup %10154 }
 0x40f   :  { %v2680_v28 = vsel %vm2124_vm6, %v10155_v26, 0.0 }
 0x410   :  { %v2681_v29 = vsel %vm546_vm1, %v2680_v28, 0.0 }
 0x411   :  { %2682 = vadd.xlane.f32.xlu0 %v2681_v29 }
 0x446   :  { %2400 = vxpose.xlu1.b32.start.end [1/1] (short) %v2216_v25, 128  ;;  %v11597_v25 = vsel %vm2124_vm6, %v1905_v23, -1e+30 }
 0x489   :  { %v2199_v30 = vpop.trf.xlu1 }
 0x48a   :  { %9460 = vmatprep.mubr.msk.f32.mxu0 %vm2217_vm7, %v2199_v30 }
 0x48d   :  { %v2200_v31 = vpop.trf.xlu1 }
 0x48e   :  { %9461 = vmatmul.mubr.msk.f32.vlgmr.msra.gmra.mrb[128].mxu0 %vm2217_vm7, %v2200_v31 }
 0x491   :  { %v2201_v32 = vpop.trf.xlu1 }
 0x492   :  { %9463 = vmatprep.mubr.msk.f32.mxu0 %vm2217_vm7, %v2201_v32 }
 0x495   :  { %v2202_v33 = vpop.trf.xlu1 }
 0x496   :  { %9464 = vmatmul.mubr.msk.f32.gmra.mrb[130].mxu0 %vm2217_vm7, %v2202_v33 }
 0x499   :  { %v2203_v34 = vpop.trf.xlu1 }
 0x49a   :  { %9466 = vmatprep.mubr.msk.f32.mxu0 %vm2217_vm7, %v2203_v34 }
 0x49d   :  { %v2204_v36 = vpop.trf.xlu1 }
 0x49e   :  { %v2683_v37 = vpop.xlane.xlu0 %2682  ;;  %9467 = vmatmul.mubr.msk.f32.gmra.mrb[132].mxu0 %vm2217_vm7, %v2204_v36 }
 0x49f   :  { %10156 = vrcp.f32 %v2683_v37 }
 0x4a1   :  { %v2205_v38 = vpop.trf.xlu1 }
 0x4a2   :  { %9469 = vmatprep.mubr.msk.f32.mxu0 %vm2217_vm7, %v2205_v38 }
 0x4a5   :  { %v2206_v39 = vpop.trf.xlu1 }
 0x4a6   :  { %9470 = vmatmul.mubr.msk.f32.gmra.mrb[134].mxu0 %vm2217_vm7, %v2206_v39 }
 0x4a9   :  { %v10157_v50 = vpop.eup %10156  ;;  %v2207_v40 = vpop.trf.xlu1 }
 0x4aa   :  { %v2685_v41 = vmul.f32 %v10157_v50, %v2680_v28  ;;  %9472 = vmatprep.mubr.msk.f32.mxu1 %vm2217_vm7, %v2207_v40  ;;  %v3176_v28 = vsel %vm546_vm1, %v11597_v25, -inf }
 0x4ac   :  { %2686 = vxpose.xlu0.b32.start.end [1/1] (short) %v2685_v41, 128  ;;  %v2719_v42 = vrot.slane %v2685_v41, 2 }
 0x4ad   :  { %v2208_v43 = vpop.trf.xlu1 }
 0x4ae   :  { %9473 = vmatmul.mubr.msk.f32.vlgmr.msra.gmra.mrb[10].mxu1 %vm2217_vm7, %v2208_v43 }
 0x4af   :  { %9485 = vmatpush3.msk.msra.mxu1 %vm1666_vm4, %v2182_v24 }
 0x4b0   :  { %9510 = vmatprep.subr.msk.mxu1 %vm1666_vm4, %v2719_v42 }
 0x4b1   :  { %v2209_v44 = vpop.trf.xlu1 }
 0x4b2   :  { %9475 = vmatprep.mubr.msk.f32.mxu1 %vm2217_vm7, %v2209_v44 }
 0x4b5   :  { %v2210_v45 = vpop.trf.xlu1 }
 0x4b6   :  { %9476 = vmatmul.mubr.msk.f32.gmra.mrb[12].mxu1 %vm2217_vm7, %v2210_v45 }
 0x4b9   :  { %v2211_v46 = vpop.trf.xlu1 }
 0x4ba   :  { %9478 = vmatprep.mubr.msk.f32.mxu1 %vm2217_vm7, %v2211_v46 }
 0x4bd   :  { %v2212_v48 = vpop.trf.xlu1 }
 0x4be   :  { %9479 = vmatmul.mubr.msk.f32.gmra.mrb[14].mxu1 %vm2217_vm7, %v2212_v48 }
 0x4c1   :  { %v2213_v49 = vpop.trf.xlu1 }
 0x4c2   :  { %9481 = vmatprep.mubr.msk.f32.mxu1 %vm2217_vm7, %v2213_v49 }
 0x4c5   :  { %v2214_v51 = vpop.trf.xlu1 }
 0x4c6   :  { %9482 = vmatmul.mubr.msk.f32.gmra.mrb[16].mxu1 %vm2217_vm7, %v2214_v51 }
 0x4c9   :  { %v2416_v52 = vpop.trf.xlu1 }
 0x4ca   :  { %9486 = vmatprep.mubr.msk.f32.mxu1 %vm2217_vm7, %v2416_v52 }
 0x4cd   :  { %v2417_v53 = vpop.trf.xlu1 }
 0x4ce   :  { %9487 = vmatmul.mubr.msk.f32.vlgmr.msra.gmra.mrb[18].mxu1 %vm2217_vm7, %v2417_v53 }
 0x4cf   :  { %9511 = vmatpush3.msk.msra.mxu1 %vm1666_vm4, %v2719_v42 }
 0x4d0   :  { %9536 = vmatprep.subr.msk.mxu1 %vm1666_vm4, %v2685_v41 }
 0x4d1   :  { %v2418_v55 = vpop.trf.xlu1 }
 0x4d2   :  { %9489 = vmatprep.mubr.msk.f32.mxu1 %vm2217_vm7, %v2418_v55 }
 0x4d5   :  { %v2419_v56 = vpop.trf.xlu1 }
 0x4d6   :  { %9490 = vmatmul.mubr.msk.f32.gmra.mrb[20].mxu1 %vm2217_vm7, %v2419_v56 }
 0x4d9   :  { %v2420_v57 = vpop.trf.xlu1 }
 0x4da   :  { %9492 = vmatprep.mubr.msk.f32.mxu1 %vm2217_vm7, %v2420_v57 }
 0x4dd   :  { %v2421_v60 = vpop.trf.xlu1 }
 0x4de   :  { %9493 = vmatmul.mubr.msk.f32.gmra.mrb[22].mxu1 %vm2217_vm7, %v2421_v60 }
 0x4e1   :  { %v2422_v61 = vpop.trf.xlu1 }
 0x4e2   :  { %9495 = vmatprep.mubr.msk.f32.mxu1 %vm2217_vm7, %v2422_v61 }
 0x4e5   :  { %v2423_v62 = vpop.trf.xlu1 }
 0x4e6   :  { %9496 = vmatmul.mubr.msk.f32.gmra.mrb[24].mxu1 %vm2217_vm7, %v2423_v62 }
 0x4e9   :  { %2902 = vxpose.xlu0.b32.start.end [1/1] (short) %v2719_v42, 128  ;;  %v2424_v63 = vpop.trf.xlu1 }
 0x4ea   :  { %9498 = vmatprep.mubr.msk.f32.mxu1 %vm2217_vm7, %v2424_v63 }
 0x4ed   :  { %v2425_v0 = vpop.trf.xlu1 }
 0x4ee   :  { %9499 = vmatmul.mubr.msk.f32.gmra.mrb[26].mxu1 %vm2217_vm7, %v2425_v0 }
 0x4f1   :  { %v2426_v1 = vpop.trf.xlu1 }
 0x4f2   :  { %9501 = vmatprep.mubr.msk.f32.mxu1 %vm2217_vm7, %v2426_v1 }
 0x4f5   :  { %v2427_v8 = vpop.trf.xlu1 }
 0x4f6   :  { %9502 = vmatmul.mubr.msk.f32.gmra.mrb[28].mxu1 %vm2217_vm7, %v2427_v8 }
 0x4f9   :  { %v2428_v11 = vpop.trf.xlu1 }
 0x4fa   :  { %9504 = vmatprep.mubr.msk.f32.mxu1 %vm2217_vm7, %v2428_v11 }
 0x4fd   :  { %v2429_v12 = vpop.trf.xlu1 }
 0x4fe   :  { %9505 = vmatmul.mubr.msk.f32.gmra.mrb[30].mxu1 %vm2217_vm7, %v2429_v12 }
 0x501   :  { %v2430_v13 = vpop.trf.xlu1 }
 0x502   :  { %9507 = vmatprep.mubr.msk.f32.mxu1 %vm2217_vm7, %v2430_v13 }
 0x505   :  { %v2431_v15 = vpop.trf.xlu1 }
 0x506   :  { %9508 = vmatmul.mubr.msk.f32.gmra.mrb[32].mxu1 %vm2217_vm7, %v2431_v15 }
 0x52c   :  { %v2702_v16 = vpop.trf.xlu0 }
 0x52d   :  { %9512 = vmatprep.mubr.msk.f32.mxu1 %vm2217_vm7, %v2702_v16 }
 0x530   :  { %v2703_v47 = vpop.trf.xlu0 }
 0x531   :  { %9513 = vmatmul.mubr.msk.f32.vlgmr.msra.gmra.mrb[34].mxu1 %vm2217_vm7, %v2703_v47 }
 0x532   :  { %9537 = vmatpush3.msk.msra.mxu1 %vm1666_vm4, %v2685_v41 }
 0x534   :  { %v2704_v17 = vpop.trf.xlu0 }
 0x535   :  { %9515 = vmatprep.mubr.msk.f32.mxu1 %vm2217_vm7, %v2704_v17 }
 0x538   :  { %v2705_v18 = vpop.trf.xlu0 }
 0x539   :  { %9516 = vmatmul.mubr.msk.f32.gmra.mrb[36].mxu1 %vm2217_vm7, %v2705_v18 }
 0x53c   :  { %v2706_v10 = vpop.trf.xlu0 }
 0x53d   :  { %9518 = vmatprep.mubr.msk.f32.mxu1 %vm2217_vm7, %v2706_v10 }
 0x540   :  { %v2707_v19 = vpop.trf.xlu0 }
 0x541   :  { %9519 = vmatmul.mubr.msk.f32.gmra.mrb[38].mxu1 %vm2217_vm7, %v2707_v19 }
 0x544   :  { %v2708_v21 = vpop.trf.xlu0 }
 0x545   :  { %9521 = vmatprep.mubr.msk.f32.mxu1 %vm2217_vm7, %v2708_v21 }
 0x548   :  { %v2709_v27 = vpop.trf.xlu0 }
 0x549   :  { %9522 = vmatmul.mubr.msk.f32.gmra.mrb[40].mxu1 %vm2217_vm7, %v2709_v27 }
 0x54c   :  { %v2710_v24 = vpop.trf.xlu0 }
 0x54d   :  { %9524 = vmatprep.mubr.msk.f32.mxu1 %vm2217_vm7, %v2710_v24 }
 0x550   :  { %v2711_v26 = vpop.trf.xlu0 }
 0x551   :  { %9525 = vmatmul.mubr.msk.f32.gmra.mrb[42].mxu1 %vm2217_vm7, %v2711_v26 }
 0x552   :  { %3177 = vmax.xlane.f32.xlu0 %v3176_v28 }
 0x554   :  { %v2712_v29 = vpop.trf.xlu0 }
 0x555   :  { %9527 = vmatprep.mubr.msk.f32.mxu1 %vm2217_vm7, %v2712_v29 }
 0x558   :  { %v2713_v30 = vpop.trf.xlu0 }
 0x559   :  { %9528 = vmatmul.mubr.msk.f32.gmra.mrb[44].mxu1 %vm2217_vm7, %v2713_v30 }
 0x55c   :  { %v2714_v2 = vpop.trf.xlu0 }
 0x55d   :  { %9530 = vmatprep.mubr.msk.f32.mxu1 %vm2217_vm7, %v2714_v2 }
 0x560   :  { %v2715_v31 = vpop.trf.xlu0 }
 0x561   :  { %v9462_v32 = vpop.f32.mrb[128].mxu0  ;;  %9531 = vmatmul.mubr.msk.f32.gmra.mrb[46].mxu1 %vm2217_vm7, %v2715_v31 }
 0x562   :  { %v2334_v33 = vpop.f32.mrb[129].mxu0 }
 0x564   :  { %v2716_v34 = vpop.trf.xlu0 }
 0x565   :  { %9533 = vmatprep.mubr.msk.f32.mxu1 %vm2217_vm7, %v2716_v34 }
 0x568   :  { %v2717_v36 = vpop.trf.xlu0 }
 0x569   :  { %v9465_v37 = vpop.f32.mrb[130].mxu0  ;;  %9534 = vmatmul.mubr.msk.f32.gmra.mrb[48].mxu1 %vm2217_vm7, %v2717_v36 }
 0x56a   :  { %v2344_v38 = vpop.f32.mrb[131].mxu0 }
 0x56c   :  { %v2918_v39 = vpop.trf.xlu0 }
 0x56d   :  { %9538 = vmatprep.mubr.msk.f32.mxu1 %vm2217_vm7, %v2918_v39 }
 0x570   :  { %v2919_v50 = vpop.trf.xlu0 }
 0x571   :  { %v9468_v40 = vpop.f32.mrb[132].mxu0  ;;  %9539 = vmatmul.mubr.msk.f32.vlgmr.msra.gmra.mrb[34].mxu1 %vm2217_vm7, %v2919_v50 }
 0x572   :  { %v2352_v41 = vpop.f32.mrb[133].mxu0 }
 0x574   :  { %v2920_v42 = vpop.trf.xlu0 }
 0x575   :  { %9541 = vmatprep.mubr.msk.f32.mxu1 %vm2217_vm7, %v2920_v42 }
 0x578   :  { %v2921_v43 = vpop.trf.xlu0 }
 0x579   :  { %v9471_v44 = vpop.f32.mrb[134].mxu0  ;;  %9542 = vmatmul.mubr.msk.f32.gmra.mrb[50].mxu1 %vm2217_vm7, %v2921_v43 }
 0x57a   :  { %v2360_v45 = vpop.f32.mrb[135].mxu0 }
 0x57c   :  { %v2922_v46 = vpop.trf.xlu0 }
 0x57d   :  { %9544 = vmatprep.mubr.msk.f32.mxu1 %vm2217_vm7, %v2922_v46 }
 0x580   :  { %v2923_v48 = vpop.trf.xlu0 }
 0x581   :  { %v9474_v49 = vpop.f32.mrb[10].mxu1  ;;  %9545 = vmatmul.mubr.msk.f32.gmra.mrb[52].mxu1 %vm2217_vm7, %v2923_v48 }
 0x582   :  { %v2368_v51 = vpop.f32.mrb[11].mxu1 }
 0x584   :  { %v2924_v52 = vpop.trf.xlu0 }
 0x585   :  { %9547 = vmatprep.mubr.msk.f32.mxu1 %vm2217_vm7, %v2924_v52 }
 0x588   :  { %v2925_v53 = vpop.trf.xlu0 }
 0x589   :  { %v9477_v55 = vpop.f32.mrb[12].mxu1  ;;  %9548 = vmatmul.mubr.msk.f32.gmra.mrb[54].mxu1 %vm2217_vm7, %v2925_v53 }
 0x58a   :  { %v2376_v56 = vpop.f32.mrb[13].mxu1 }
 0x58c   :  { %v2926_v57 = vpop.trf.xlu0 }
 0x58d   :  { %9550 = vmatprep.mubr.msk.f32.mxu1 %vm2217_vm7, %v2926_v57 }
 0x590   :  { %v2927_v60 = vpop.trf.xlu0 }
 0x591   :  { %v9480_v61 = vpop.f32.mrb[14].mxu1  ;;  %9551 = vmatmul.mubr.msk.f32.gmra.mrb[56].mxu1 %vm2217_vm7, %v2927_v60 }
 0x592   :  { %v2384_v62 = vpop.f32.mrb[15].mxu1 }
 0x594   :  { %v2928_v63 = vpop.trf.xlu0 }
 0x595   :  { %9553 = vmatprep.mubr.msk.f32.mxu1 %vm2217_vm7, %v2928_v63 }
 0x598   :  { %v2929_v0 = vpop.trf.xlu0 }
 0x599   :  { %v9483_v1 = vpop.f32.mrb[16].mxu1  ;;  %9554 = vmatmul.mubr.msk.f32.gmra.mrb[58].mxu1 %vm2217_vm7, %v2929_v0 }
 0x59a   :  { %v2392_v8 = vpop.f32.mrb[17].mxu1 }
 0x59c   :  { %v2930_v11 = vpop.trf.xlu0 }
 0x59d   :  { %9556 = vmatprep.mubr.msk.f32.mxu1 %vm2217_vm7, %v2930_v11 }
 0x5a0   :  { %v2931_v12 = vpop.trf.xlu0 }
 0x5a1   :  { %v9488_v13 = vpop.f32.mrb[18].mxu1  ;;  %9557 = vmatmul.mubr.msk.f32.gmra.mrb[60].mxu1 %vm2217_vm7, %v2931_v12 }
 0x5a2   :  { %v2614_v15 = vadd.f32 %v9488_v13, %v9462_v32  ;;  %v2548_v16 = vpop.f32.mrb[19].mxu1 }
 0x5a3   :  { %v2613_v47 = vadd.f32 %v2548_v16, %v2334_v33 }
 0x5a4   :  { %v11622_v17 = vmul.f32 0.5, %v2614_v15  ;;  %v2932_v18 = vpop.trf.xlu0 }
 0x5a5   :  { %v11624_v10 = vmul.f32 0.5, %v2613_v47  ;;  %9559 = vmatprep.mubr.msk.f32.mxu1 %vm2217_vm7, %v2932_v18 }
 0x5a7   :  { %v2617_v19 = vadd.f32 %v11622_v17, %v11624_v10 }
 0x5a8   :  { %v2933_v20 = vpop.trf.xlu0 }
 0x5a9   :  { %2618 = vadd.xlane.f32.xlu1 %v2617_v19  ;;  %9560 = vmatmul.mubr.msk.f32.gmra.mrb[62].mxu1 %vm2217_vm7, %v2933_v20  ;;  %v9491_v21 = vpop.f32.mrb[20].mxu1 }
 0x5aa   :  { %v2558_v22 = vpop.f32.mrb[21].mxu1 }
 0x5b1   :  { %v9494_v27 = vpop.f32.mrb[22].mxu1 }
 0x5b2   :  { %v2566_v23 = vpop.f32.mrb[23].mxu1 }
 0x5b9   :  { %v9497_v24 = vpop.f32.mrb[24].mxu1 }
 0x5ba   :  { %v2574_v26 = vpop.f32.mrb[25].mxu1 }
 0x5c1   :  { %v9500_v28 = vpop.f32.mrb[26].mxu1 }
 0x5c2   :  { %v2582_v29 = vpop.f32.mrb[27].mxu1 }
 0x5c9   :  { %v9503_v30 = vpop.f32.mrb[28].mxu1 }
 0x5ca   :  { %v2590_v2 = vpop.f32.mrb[29].mxu1  ;;  %v2128_v30 = vadd.s32 8, %v11494_v54 }
 0x5cc   :  { %vm2130_vm9 = vcmp.lt.s32.totalorder %v2128_v30, 10 }
 0x5cd   :  { %vm11641_vm11 = vmand %vm2130_vm9, %vm2124_vm6 }
 0x5d1   :  { %v9506_v31 = vpop.f32.mrb[30].mxu1 }
 0x5d2   :  { %v2598_v32 = vpop.f32.mrb[31].mxu1 }
 0x5d9   :  { %v9509_v33 = vpop.f32.mrb[32].mxu1 }
 0x5da   :  { %v2606_v34 = vpop.f32.mrb[33].mxu1 }
 0x5df   :  { %v3178_v36 = vpop.xlane.xlu0 %3177 }
 0x5e0   :  { %v3179_v37 = vsub.f32 %v11597_v25, %v3178_v36 }
 0x5e2   :  { %v3180_v38 = vmul.f32 1.442695, %v3179_v37 }
 0x5e4   :  { %10158 = vpow2.f32 %v3180_v38 }
 0x5ee   :  { %v10159_v39 = vpop.eup %10158 }
 0x5ef   :  { %v3182_v50 = vsel %vm2124_vm6, %v10159_v39, 0.0 }
 0x5f0   :  { %v3183_v40 = vsel %vm546_vm1, %v3182_v50, 0.0 }
 0x5f1   :  { %3184 = vadd.xlane.f32.xlu1 %v3183_v40 }
 0x60c   :  { %v9517_v41 = vpop.f32.mrb[36].mxu1 }
 0x60d   :  { %v2846_v42 = vpop.f32.mrb[37].mxu1 }
 0x614   :  { %v9520_v43 = vpop.f32.mrb[38].mxu1 }
 0x615   :  { %v2854_v44 = vpop.f32.mrb[39].mxu1 }
 0x61c   :  { %v9523_v45 = vpop.f32.mrb[40].mxu1 }
 0x61d   :  { %v2862_v46 = vpop.f32.mrb[41].mxu1 }
 0x624   :  { %v9526_v48 = vpop.f32.mrb[42].mxu1 }
 0x625   :  { %v2870_v49 = vpop.f32.mrb[43].mxu1 }
 0x62c   :  { %v9529_v51 = vpop.f32.mrb[44].mxu1 }
 0x62d   :  { %v2878_v52 = vpop.f32.mrb[45].mxu1 }
 0x634   :  { %v9532_v25 = vpop.f32.mrb[46].mxu1 }
 0x635   :  { %v2886_v53 = vpop.f32.mrb[47].mxu1 }
 0x636   :  { %v2619_v55 = vpop.xlane.xlu1 %2618 }
 0x637   :  { %v2620_v56 = vrot.slane %v2619_v55, 4 }
 0x639   :  { %v2621_v57 = vadd.f32 %v2620_v56, %v2619_v55 }
 0x63b   :  { %v2622_v60 = vrot.slane %v2621_v57, 2 }
 0x63c   :  { %v9535_v61 = vpop.f32.mrb[48].mxu1 }
 0x63d   :  { %v2623_v62 = vadd.f32 %v2622_v60, %v2621_v57  ;;  %v2894_v63 = vpop.f32.mrb[49].mxu1 }
 0x63e   :  { %v1728_v63 = vsub.s32 3, %v11494_v54 }
 0x63f   :  { %v2624_v0 = vrot.slane %v2623_v62, 1 }
 0x641   :  { %v2625_v1 = vadd.f32 %v2624_v0, %v2623_v62 }
 0x643   :  { %10108 = vpush %v2625_v1  ;;  %v1729_v1 = vrot.slane %v11504_v14, %v1728_v63 }
 0x644   :  { %v9540_v8 = vpop.f32.mrb[34].mxu1 }
 0x645   :  { %v3050_v11 = vpop.f32.mrb[35].mxu1  ;;  %v11650_v40 = vmul.f32 0.5, %v9540_v8 }
 0x646   :  { %v11652_v41 = vmul.f32 0.5, %v3050_v11 }
 0x648   :  { %v3119_v42 = vadd.f32 %v11650_v40, %v11652_v41 }
 0x64c   :  { %v9543_v12 = vpop.f32.mrb[50].mxu1 }
 0x64d   :  { %v3060_v13 = vpop.f32.mrb[51].mxu1 }
 0x64e   :  { %v1907_v13 = vadd.f32 %v11517_v3, %v1729_v1 }
 0x654   :  { %v9546_v15 = vpop.f32.mrb[52].mxu1 }
 0x655   :  { %v3068_v16 = vpop.f32.mrb[53].mxu1 }
 0x65c   :  { %v9549_v47 = vpop.f32.mrb[54].mxu1 }
 0x65d   :  { %v3076_v18 = vpop.f32.mrb[55].mxu1 }
 0x65e   :  { %v11665_v18 = vsel %vm2124_vm6, %v1907_v13, -1e+30 }
 0x664   :  { %v9552_v19 = vpop.f32.mrb[56].mxu1 }
 0x665   :  { %v3084_v20 = vpop.f32.mrb[57].mxu1  ;;  %v3678_v19 = vsel %vm546_vm1, %v11665_v18, -inf }
 0x66c   :  { %v9555_v21 = vpop.f32.mrb[58].mxu1 }
 0x66d   :  { %v3092_v22 = vpop.f32.mrb[59].mxu1 }
 0x674   :  { %s10109_s26 = spop %10108  ;;  %v9558_v27 = vpop.f32.mrb[60].mxu1 }
 0x675   :  { %v2627_v23 = vstv %s10109_s26  ;;  %v3100_v24 = vpop.f32.mrb[61].mxu1 }
 0x676   :  { %10160 = vrcp.f32 %v2627_v23 }
 0x67c   :  { %v9561_v26 = vpop.f32.mrb[62].mxu1 }
 0x67d   :  { %v3108_v28 = vpop.f32.mrb[63].mxu1 }
 0x67e   :  { %v3185_v29 = vpop.xlane.xlu1 %3184 }
 0x67f   :  { %10162 = vrcp.f32 %v3185_v29 }
 0x680   :  { %v10161_v2 = vpop.eup %10160 }
 0x681   :  { %v2629_v31 = vmul.f32 %v10161_v2, %v11624_v10  ;;  %v2630_v32 = vmul.f32 %v10161_v2, %v11622_v17 }
 0x683   :  { %vm2631_vm8 = vcmp.lt.f32.partialorder %v2629_v31, 1.1920929e-07  ;;  %vm2632_vm10 = vcmp.lt.f32.partialorder %v2630_v32, 1.1920929e-07 }
 0x684   :  { %v2633_v33 = vsel %vm2631_vm8, 1.1920929e-07, %v2629_v31  ;;  %v2634_v37 = vsel %vm2632_vm10, 1.1920929e-07, %v2630_v32 }
 0x685   :  { %v2635_v34 = vsel %vm2124_vm6, %v2633_v33, 0.0  ;;  %v2636_v10 = vsel %vm11641_vm11, %v2634_v37, 0.0  ;;  %10164 = vrcp.f32 %v2633_v33 }
 0x686   :  { %2637 = vadd.xlane.f32.xlu1 %v2635_v34  ;;  %v2641_v43 = vadd.f32 %v2636_v10, %v2635_v34  ;;  %10166 = vrcp.f32 %v2634_v37 }
 0x689   :  { %v10163_v38 = vpop.eup %10162 }
 0x68a   :  { %v3187_v17 = vmul.f32 %v10163_v38, %v3182_v50  ;;  %2639 = vadd.xlane.f32.xlu1 %v2636_v10  ;;  %v2642_v50 = vrot.slane %v2641_v43, 4 }
 0x68c   :  { %v3221_v39 = vrot.slane %v3187_v17, 2  ;;  %v2643_v44 = vadd.f32 %v2642_v50, %v2641_v43 }
 0x68e   :  { %3404 = vxpose.xlu0.b32.start.end [1/1] (short) %v3221_v39, 128  ;;  %9562 = vmatprep.subr.msk.mxu1 %vm1666_vm4, %v3221_v39  ;;  %v2644_v45 = vrot.slane %v2643_v44, 2 }
 0x68f   :  { %9563 = vmatpush3.msk.msra.mxu1 %vm1666_vm4, %v3221_v39  ;;  %v10165_v25 = vpop.eup %10164 }
 0x690   :  { %9588 = vmatprep.subr.msk.mxu1 %vm1666_vm4, %v3187_v17  ;;  %v2645_v46 = vadd.f32 %v2644_v45, %v2643_v44  ;;  %v10167_v60 = vpop.eup %10166 }
 0x692   :  { %v2646_v48 = vrot.slane %v2645_v46, 1 }
 0x694   :  { %v2647_v49 = vadd.f32 %v2646_v48, %v2645_v46 }
 0x6bd   :  { %3188 = vxpose.xlu1.b32.start.end [1/1] (short) %v3187_v17, 128 }
 0x6f7   :  { %3120 = vadd.xlane.f32.xlu0 %v3119_v42 }
 0x70e   :  { %v3420_v14 = vpop.trf.xlu0 }
 0x712   :  { %v3421_v3 = vpop.trf.xlu0 }
 0x713   :  { %v2638_v51 = vpop.xlane.xlu1 %2637 }
 0x714   :  { %v2648_v52 = vmul.f32 %v2647_v49, %v2638_v51 }
 0x716   :  { %v2651_v53 = vmul.f32 %v10165_v25, %v2648_v52  ;;  %v3422_v23 = vpop.trf.xlu0 }
 0x717   :  { %v2640_v55 = vpop.xlane.xlu1 %2639 }
 0x718   :  { %v2654_v56 = vsel %vm2124_vm6, %v2651_v53, 1.0  ;;  %v2649_v57 = vmul.f32 %v2647_v49, %v2640_v55 }
 0x719   :  { %10168 = vlog2.f32 %v2654_v56 }
 0x71a   :  { %v2653_v61 = vmul.f32 %v10167_v60, %v2649_v57  ;;  %v3423_v26 = vpop.trf.xlu0 }
 0x71c   :  { %v2655_v62 = vsel %vm11641_vm11, %v2653_v61, 1.0 }
 0x71d   :  { %10170 = vlog2.f32 %v2655_v62 }
 0x71e   :  { %v3424_v30 = vpop.trf.xlu0 }
 0x722   :  { %v3425_v31 = vpop.trf.xlu0 }
 0x723   :  { %v10169_v0 = vpop.eup %10168 }
 0x724   :  { %v2657_v8 = vmul.f32 0.6931472, %v10169_v0 }
 0x726   :  { %v2660_v15 = vmul.f32 %v2657_v8, %v2635_v34  ;;  %v3426_v34 = vpop.trf.xlu0 }
 0x727   :  { %v10171_v11 = vpop.eup %10170 }
 0x728   :  { %v2659_v12 = vmul.f32 0.6931472, %v10171_v11 }
 0x72a   :  { %v2661_v16 = vmul.f32 %v2659_v12, %v2636_v10  ;;  %v3427_v38 = vpop.trf.xlu0 }
 0x72c   :  { %v2662_v47 = vadd.f32 %v2661_v16, %v2660_v15 }
 0x72e   :  { %2663 = vadd.xlane.f32.xlu1 %v2662_v47  ;;  %v3428_v39 = vpop.trf.xlu0 }
 0x732   :  { %3679 = vmax.xlane.f32.xlu1 %v3678_v19  ;;  %v3429_v43 = vpop.trf.xlu0 }
 0x736   :  { %v3430_v45 = vpop.trf.xlu0 }
 0x73a   :  { %v3431_v46 = vpop.trf.xlu0 }
 0x73d   :  { %v3204_v20 = vpop.trf.xlu1 }
 0x73e   :  { %9564 = vmatprep.mubr.msk.f32.mxu1 %vm2217_vm7, %v3204_v20  ;;  %v3432_v48 = vpop.trf.xlu0 }
 0x741   :  { %v3205_v21 = vpop.trf.xlu1 }
 0x742   :  { %9565 = vmatmul.mubr.msk.f32.vlgmr.msra.gmra.mrb[64].mxu1 %vm2217_vm7, %v3205_v21  ;;  %v3433_v49 = vpop.trf.xlu0 }
 0x743   :  { %9589 = vmatpush3.msk.msra.mxu1 %vm1666_vm4, %v3187_v17 }
 0x745   :  { %v3206_v22 = vpop.trf.xlu1 }
 0x746   :  { %9567 = vmatprep.mubr.msk.f32.mxu1 %vm2217_vm7, %v3206_v22  ;;  %v3434_v51 = vpop.trf.xlu0 }
 0x749   :  { %v3207_v27 = vpop.trf.xlu1 }
 0x74a   :  { %9568 = vmatmul.mubr.msk.f32.gmra.mrb[66].mxu1 %vm2217_vm7, %v3207_v27  ;;  %v3435_v52 = vpop.trf.xlu0 }
 0x74d   :  { %v3208_v24 = vpop.trf.xlu1 }
 0x74e   :  { %9570 = vmatprep.mubr.msk.f32.mxu1 %vm2217_vm7, %v3208_v24 }
 0x751   :  { %v3209_v28 = vpop.trf.xlu1 }
 0x752   :  { %9571 = vmatmul.mubr.msk.f32.gmra.mrb[68].mxu1 %vm2217_vm7, %v3209_v28 }
 0x755   :  { %v3210_v29 = vpop.trf.xlu1 }
 0x756   :  { %9573 = vmatprep.mubr.msk.f32.mxu1 %vm2217_vm7, %v3210_v29 }
 0x759   :  { %v3211_v2 = vpop.trf.xlu1 }
 0x75a   :  { %9574 = vmatmul.mubr.msk.f32.gmra.mrb[70].mxu1 %vm2217_vm7, %v3211_v2 }
 0x75d   :  { %v3212_v32 = vpop.trf.xlu1 }
 0x75e   :  { %9576 = vmatprep.mubr.msk.f32.mxu1 %vm2217_vm7, %v3212_v32 }
 0x761   :  { %v3213_v33 = vpop.trf.xlu1 }
 0x762   :  { %9577 = vmatmul.mubr.msk.f32.gmra.mrb[72].mxu1 %vm2217_vm7, %v3213_v33 }
 0x765   :  { %v3214_v37 = vpop.trf.xlu1 }
 0x766   :  { %9579 = vmatprep.mubr.msk.f32.mxu1 %vm2217_vm7, %v3214_v37 }
 0x769   :  { %v3215_v10 = vpop.trf.xlu1 }
 0x76a   :  { %9580 = vmatmul.mubr.msk.f32.gmra.mrb[74].mxu1 %vm2217_vm7, %v3215_v10 }
 0x76d   :  { %v3216_v17 = vpop.trf.xlu1 }
 0x76e   :  { %9582 = vmatprep.mubr.msk.f32.mxu1 %vm2217_vm7, %v3216_v17 }
 0x771   :  { %v3217_v42 = vpop.trf.xlu1 }
 0x772   :  { %9583 = vmatmul.mubr.msk.f32.gmra.mrb[76].mxu1 %vm2217_vm7, %v3217_v42 }
 0x775   :  { %v3218_v50 = vpop.trf.xlu1 }
 0x776   :  { %9585 = vmatprep.mubr.msk.f32.mxu1 %vm2217_vm7, %v3218_v50 }
 0x779   :  { %v3219_v44 = vpop.trf.xlu1 }
 0x77a   :  { %9586 = vmatmul.mubr.msk.f32.gmra.mrb[78].mxu1 %vm2217_vm7, %v3219_v44 }
 0x77b   :  { %9590 = vmatprep.mubr.msk.f32.mxu1 %vm2217_vm7, %v3420_v14 }
 0x77e   :  { %9591 = vmatmul.mubr.msk.f32.vlgmr.msra.gmra.mrb[64].mxu1 %vm2217_vm7, %v3421_v3 }
 0x77f   :  { %9593 = vmatprep.mubr.msk.f32.mxu1 %vm2217_vm7, %v3422_v23 }
 0x782   :  { %9594 = vmatmul.mubr.msk.f32.gmra.mrb[80].mxu1 %vm2217_vm7, %v3423_v26 }
 0x783   :  { %9596 = vmatprep.mubr.msk.f32.mxu1 %vm2217_vm7, %v3424_v30 }
 0x784   :  { %v3121_v25 = vpop.xlane.xlu0 %3120 }
 0x785   :  { %v3122_v53 = vrot.slane %v3121_v25, 4 }
 0x786   :  { %9597 = vmatmul.mubr.msk.f32.gmra.mrb[82].mxu1 %vm2217_vm7, %v3425_v31 }
 0x787   :  { %9599 = vmatprep.mubr.msk.f32.mxu1 %vm2217_vm7, %v3426_v34  ;;  %v3123_v55 = vadd.f32 %v3122_v53, %v3121_v25 }
 0x789   :  { %v3124_v56 = vrot.slane %v3123_v55, 2 }
 0x78a   :  { %9600 = vmatmul.mubr.msk.f32.gmra.mrb[84].mxu1 %vm2217_vm7, %v3427_v38 }
 0x78b   :  { %9602 = vmatprep.mubr.msk.f32.mxu1 %vm2217_vm7, %v3428_v39  ;;  %v3125_v63 = vadd.f32 %v3124_v56, %v3123_v55 }
 0x78d   :  { %v3126_v12 = vrot.slane %v3125_v63, 1 }
 0x78e   :  { %9603 = vmatmul.mubr.msk.f32.gmra.mrb[86].mxu1 %vm2217_vm7, %v3429_v43 }
 0x78f   :  { %9605 = vmatprep.mubr.msk.f32.mxu1 %vm2217_vm7, %v3430_v45  ;;  %v3127_v16 = vadd.f32 %v3126_v12, %v3125_v63 }
 0x792   :  { %9606 = vmatmul.mubr.msk.f32.gmra.mrb[88].mxu1 %vm2217_vm7, %v3431_v46 }
 0x793   :  { %9608 = vmatprep.mubr.msk.f32.mxu1 %vm2217_vm7, %v3432_v48 }
 0x796   :  { %9609 = vmatmul.mubr.msk.f32.gmra.mrb[90].mxu1 %vm2217_vm7, %v3433_v49 }
 0x797   :  { %9611 = vmatprep.mubr.msk.f32.mxu1 %vm2217_vm7, %v3434_v51 }
 0x79a   :  { %9612 = vmatmul.mubr.msk.f32.gmra.mrb[92].mxu1 %vm2217_vm7, %v3435_v52 }
 0x7bb   :  { %v2664_v57 = vpop.xlane.xlu1 %2663 }
 0x7bc   :  { %v2665_v60 = vrot.slane %v2664_v57, 4 }
 0x7be   :  { %v2666_v61 = vadd.f32 %v2665_v60, %v2664_v57 }
 0x7bf   :  { %v3680_v62 = vpop.xlane.xlu1 %3679 }
 0x7c0   :  { %v2667_v0 = vrot.slane %v2666_v61, 2  ;;  %v3681_v1 = vsub.f32 %v11665_v18, %v3680_v62 }
 0x7c2   :  { %v3682_v8 = vmul.f32 1.442695, %v3681_v1  ;;  %v2668_v11 = vadd.f32 %v2667_v0, %v2666_v61 }
 0x7c4   :  { %10172 = vpow2.f32 %v3682_v8  ;;  %v2669_v13 = vrot.slane %v2668_v11, 1 }
 0x7c6   :  { %v2670_v15 = vadd.f32 %v2669_v13, %v2668_v11 }
 0x7c8   :  { %10110 = vpush %v2670_v15 }
 0x7c9   :  { %10112 = vpush %v3127_v16 }
 0x7ce   :  { %v10173_v47 = vpop.eup %10172 }
 0x7cf   :  { %v3684_v19 = vsel %vm2124_vm6, %v10173_v47, 0.0 }
 0x7d0   :  { %v3685_v20 = vsel %vm546_vm1, %v3684_v19, 0.0 }
 0x7d1   :  { %3686 = vadd.xlane.f32.xlu1 %v3685_v20 }
 0x7f9   :  { %s11706_s27 = spop %10110 }
 0x7fa   :  { %s10113_s28 = spop %10112 }
 0x7fb   :  { %v3129_v18 = vstv %s10113_s28 }
 0x7fc   :  { %10174 = vrcp.f32 %v3129_v18 }
 0x806   :  { %v10175_v14 = vpop.eup %10174 }
 0x807   :  { %v3131_v21 = vmul.f32 %v10175_v14, %v11652_v41  ;;  %v3132_v3 = vmul.f32 %v10175_v14, %v11650_v40 }
 0x809   :  { %vm3133_vm12 = vcmp.lt.f32.partialorder %v3131_v21, 1.1920929e-07  ;;  %vm3134_vm13 = vcmp.lt.f32.partialorder %v3132_v3, 1.1920929e-07 }
 0x80a   :  { %v3135_v22 = vsel %vm3133_vm12, 1.1920929e-07, %v3131_v21  ;;  %v3136_v23 = vsel %vm3134_vm13, 1.1920929e-07, %v3132_v3 }
 0x80b   :  { %v11712_v27 = vsel %vm2124_vm6, %v3135_v22, 0.0  ;;  %v11717_v24 = vsel %vm11641_vm11, %v3136_v23, 0.0 }
 0x80c   :  { %3139 = vadd.xlane.f32.xlu1 %v11712_v27  ;;  %v3143_v63 = vadd.f32 %v11717_v24, %v11712_v27 }
 0x80e   :  { %v3144_v0 = vrot.slane %v3143_v63, 4 }
 0x810   :  { %3141 = vadd.xlane.f32.xlu1 %v11717_v24  ;;  %v3145_v1 = vadd.f32 %v3144_v0, %v3143_v63 }
 0x812   :  { %v3146_v8 = vrot.slane %v3145_v1, 2 }
 0x814   :  { %v3147_v11 = vadd.f32 %v3146_v8, %v3145_v1 }
 0x816   :  { %v3148_v12 = vrot.slane %v3147_v11, 1 }
 0x818   :  { %v3149_v13 = vadd.f32 %v3148_v12, %v3147_v11 }
 0x81d   :  { %v9569_v26 = vpop.f32.mrb[66].mxu1 }
 0x81e   :  { %v3348_v41 = vpop.f32.mrb[67].mxu1 }
 0x825   :  { %v9572_v28 = vpop.f32.mrb[68].mxu1 }
 0x826   :  { %v3356_v40 = vpop.f32.mrb[69].mxu1 }
 0x82d   :  { %v9575_v29 = vpop.f32.mrb[70].mxu1 }
 0x82e   :  { %v3364_v30 = vpop.f32.mrb[71].mxu1 }
 0x835   :  { %v9578_v2 = vpop.f32.mrb[72].mxu1 }
 0x836   :  { %v3372_v31 = vpop.f32.mrb[73].mxu1  ;;  %v1732_v2 = vsub.s32 4, %v11494_v54 }
 0x837   :  { %v11735_v31 = vld [vmem:[%s13483_s4] sm:$0xff] }
 0x83d   :  { %v9581_v32 = vpop.f32.mrb[74].mxu1 }
 0x83e   :  { %v3380_v33 = vpop.f32.mrb[75].mxu1  ;;  %v1733_v32 = vrot.slane %v11735_v31, %v1732_v2 }
 0x840   :  { %v1976_v33 = vadd.f32 %v11519_v35, %v1733_v32 }
 0x845   :  { %v9584_v34 = vpop.f32.mrb[76].mxu1 }
 0x846   :  { %v3388_v37 = vpop.f32.mrb[77].mxu1  ;;  %v11741_v34 = vsel %vm2124_vm6, %v1976_v33, -1e+30 }
 0x847   :  { %v4180_v37 = vsel %vm546_vm1, %v11741_v34, -inf }
 0x84d   :  { %v9587_v38 = vpop.f32.mrb[78].mxu1 }
 0x84e   :  { %v3396_v10 = vpop.f32.mrb[79].mxu1 }
 0x851   :  { %v9592_v17 = vpop.f32.mrb[64].mxu1 }
 0x852   :  { %v3552_v39 = vpop.f32.mrb[65].mxu1 }
 0x855   :  { %v9595_v42 = vpop.f32.mrb[80].mxu1 }
 0x856   :  { %v3562_v43 = vpop.f32.mrb[81].mxu1 }
 0x859   :  { %v9598_v50 = vpop.f32.mrb[82].mxu1 }
 0x85a   :  { %v3570_v44 = vpop.f32.mrb[83].mxu1 }
 0x85d   :  { %v9601_v45 = vpop.f32.mrb[84].mxu1 }
 0x85e   :  { %v3687_v46 = vpop.xlane.xlu1 %3686  ;;  %v3578_v48 = vpop.f32.mrb[85].mxu1 }
 0x85f   :  { %10176 = vrcp.f32 %v3687_v46 }
 0x860   :  { %10178 = vrcp.f32 %v3135_v22 }
 0x861   :  { %v9604_v49 = vpop.f32.mrb[86].mxu1  ;;  %10180 = vrcp.f32 %v3136_v23 }
 0x862   :  { %v3586_v51 = vpop.f32.mrb[87].mxu1 }
 0x865   :  { %v9607_v52 = vpop.f32.mrb[88].mxu1 }
 0x866   :  { %v3594_v25 = vpop.f32.mrb[89].mxu1 }
 0x869   :  { %v10177_v53 = vpop.eup %10176  ;;  %v9610_v55 = vpop.f32.mrb[90].mxu1 }
 0x86a   :  { %v3689_v56 = vmul.f32 %v10177_v53, %v3684_v19  ;;  %v3602_v57 = vpop.f32.mrb[91].mxu1  ;;  %v10179_v47 = vpop.eup %10178 }
 0x86b   :  { %v10181_v21 = vpop.eup %10180 }
 0x86c   :  { %3690 = vxpose.xlu1.b32.start.end [1/1] (short) %v3689_v56, 128  ;;  %v3723_v60 = vrot.slane %v3689_v56, 2 }
 0x86d   :  { %v9613_v61 = vpop.f32.mrb[92].mxu1 }
 0x86e   :  { %9614 = vmatprep.subr.msk.mxu1 %vm1666_vm4, %v3723_v60  ;;  %3906 = vxpose.xlu0.b32.start.end [1/1] (short) %v3723_v60, 128  ;;  %v3610_v62 = vpop.f32.mrb[93].mxu1 }
 0x86f   :  { %9615 = vmatpush3.msk.msra.mxu1 %vm1666_vm4, %v3723_v60 }
 0x870   :  { %9640 = vmatprep.subr.msk.mxu1 %vm1666_vm4, %v3689_v56 }
 0x899   :  { %v3140_v15 = vpop.xlane.xlu1 %3139 }
 0x89a   :  { %v3150_v16 = vmul.f32 %v3149_v13, %v3140_v15 }
 0x89c   :  { %v3153_v19 = vmul.f32 %v10179_v47, %v3150_v16 }
 0x89d   :  { %v3142_v20 = vpop.xlane.xlu1 %3141 }
 0x89e   :  { %v3156_v18 = vsel %vm2124_vm6, %v3153_v19, 1.0  ;;  %v3151_v14 = vmul.f32 %v3149_v13, %v3142_v20 }
 0x89f   :  { %10182 = vlog2.f32 %v3156_v18 }
 0x8a0   :  { %v3155_v3 = vmul.f32 %v10181_v21, %v3151_v14 }
 0x8a2   :  { %v3157_v26 = vsel %vm11641_vm11, %v3155_v3, 1.0 }
 0x8a3   :  { %10184 = vlog2.f32 %v3157_v26 }
 0x8a9   :  { %v10183_v22 = vpop.eup %10182 }
 0x8aa   :  { %v3159_v41 = vmul.f32 0.6931472, %v10183_v22 }
 0x8ac   :  { %v3162_v40 = vmul.f32 %v3159_v41, %v11712_v27  ;;  %v11743_v27 = vmul.f32 0.5, %v9592_v17 }
 0x8ad   :  { %v10185_v23 = vpop.eup %10184 }
 0x8ae   :  { %v3161_v28 = vmul.f32 0.6931472, %v10185_v23 }
 0x8b0   :  { %v3163_v29 = vmul.f32 %v3161_v28, %v11717_v24  ;;  %v11745_v24 = vmul.f32 0.5, %v3552_v39 }
 0x8b2   :  { %v3164_v30 = vadd.f32 %v3163_v29, %v3162_v40  ;;  %v3621_v38 = vadd.f32 %v11743_v27, %v11745_v24 }
 0x8cf   :  { %3165 = vadd.xlane.f32.xlu1 %v3164_v30 }
 0x8d3   :  { %4181 = vmax.xlane.f32.xlu1 %v4180_v37 }
 0x8d7   :  { %3622 = vadd.xlane.f32.xlu0 %v3621_v38 }
 0x8ec   :  { %v3706_v10 = vpop.trf.xlu1 }
 0x8ed   :  { %9616 = vmatprep.mubr.msk.f32.mxu1 %vm2217_vm7, %v3706_v10 }
 0x8ee   :  { %v3922_v35 = vpop.trf.xlu0 }
 0x8f0   :  { %v3707_v42 = vpop.trf.xlu1 }
 0x8f1   :  { %9617 = vmatmul.mubr.msk.f32.vlgmr.msra.gmra.mrb[94].mxu1 %vm2217_vm7, %v3707_v42 }
 0x8f2   :  { %9641 = vmatpush3.msk.msra.mxu1 %vm1666_vm4, %v3689_v56  ;;  %v3923_v39 = vpop.trf.xlu0 }
 0x8f4   :  { %v3708_v17 = vpop.trf.xlu1 }
 0x8f5   :  { %9619 = vmatprep.mubr.msk.f32.mxu1 %vm2217_vm7, %v3708_v17 }
 0x8f6   :  { %v3924_v50 = vpop.trf.xlu0 }
 0x8f8   :  { %v3709_v43 = vpop.trf.xlu1 }
 0x8f9   :  { %9620 = vmatmul.mubr.msk.f32.gmra.mrb[96].mxu1 %vm2217_vm7, %v3709_v43 }
 0x8fa   :  { %v3925_v46 = vpop.trf.xlu0 }
 0x8fc   :  { %v3710_v44 = vpop.trf.xlu1 }
 0x8fd   :  { %9622 = vmatprep.mubr.msk.f32.mxu1 %vm2217_vm7, %v3710_v44 }
 0x8fe   :  { %v3926_v49 = vpop.trf.xlu0 }
 0x900   :  { %v3711_v45 = vpop.trf.xlu1 }
 0x901   :  { %9623 = vmatmul.mubr.msk.f32.gmra.mrb[98].mxu1 %vm2217_vm7, %v3711_v45 }
 0x902   :  { %v3927_v52 = vpop.trf.xlu0 }
 0x904   :  { %v3712_v48 = vpop.trf.xlu1 }
 0x905   :  { %9625 = vmatprep.mubr.msk.f32.mxu1 %vm2217_vm7, %v3712_v48 }
 0x906   :  { %v3928_v55 = vpop.trf.xlu0 }
 0x908   :  { %v3713_v51 = vpop.trf.xlu1 }
 0x909   :  { %9626 = vmatmul.mubr.msk.f32.gmra.mrb[100].mxu1 %vm2217_vm7, %v3713_v51 }
 0x90a   :  { %v3929_v57 = vpop.trf.xlu0 }
 0x90c   :  { %v3714_v25 = vpop.trf.xlu1 }
 0x90d   :  { %9628 = vmatprep.mubr.msk.f32.mxu1 %vm2217_vm7, %v3714_v25 }
 0x90e   :  { %v3930_v62 = vpop.trf.xlu0 }
 0x910   :  { %v3715_v53 = vpop.trf.xlu1 }
 0x911   :  { %9629 = vmatmul.mubr.msk.f32.gmra.mrb[102].mxu1 %vm2217_vm7, %v3715_v53 }
 0x912   :  { %v3931_v0 = vpop.trf.xlu0 }
 0x914   :  { %v3716_v56 = vpop.trf.xlu1 }
 0x915   :  { %9631 = vmatprep.mubr.msk.f32.mxu1 %vm2217_vm7, %v3716_v56 }
 0x916   :  { %v3932_v11 = vpop.trf.xlu0 }
 0x918   :  { %v3717_v60 = vpop.trf.xlu1 }
 0x919   :  { %9632 = vmatmul.mubr.msk.f32.gmra.mrb[104].mxu1 %vm2217_vm7, %v3717_v60 }
 0x91a   :  { %v3933_v12 = vpop.trf.xlu0 }
 0x91c   :  { %v3718_v61 = vpop.trf.xlu1 }
 0x91d   :  { %9634 = vmatprep.mubr.msk.f32.mxu1 %vm2217_vm7, %v3718_v61 }
 0x91e   :  { %v3934_v13 = vpop.trf.xlu0 }
 0x920   :  { %v3719_v63 = vpop.trf.xlu1 }
 0x921   :  { %9635 = vmatmul.mubr.msk.f32.gmra.mrb[106].mxu1 %vm2217_vm7, %v3719_v63 }
 0x922   :  { %v3935_v15 = vpop.trf.xlu0 }
 0x924   :  { %v3720_v1 = vpop.trf.xlu1 }
 0x925   :  { %9637 = vmatprep.mubr.msk.f32.mxu1 %vm2217_vm7, %v3720_v1 }
 0x926   :  { %v3936_v16 = vpop.trf.xlu0 }
 0x928   :  { %v3721_v8 = vpop.trf.xlu1 }
 0x929   :  { %9638 = vmatmul.mubr.msk.f32.gmra.mrb[108].mxu1 %vm2217_vm7, %v3721_v8 }
 0x92a   :  { %9642 = vmatprep.mubr.msk.f32.mxu1 %vm2217_vm7, %v3922_v35  ;;  %v3937_v47 = vpop.trf.xlu0 }
 0x92d   :  { %9643 = vmatmul.mubr.msk.f32.vlgmr.msra.gmra.mrb[94].mxu1 %vm2217_vm7, %v3923_v39 }
 0x92e   :  { %9645 = vmatprep.mubr.msk.f32.mxu1 %vm2217_vm7, %v3924_v50 }
 0x931   :  { %9646 = vmatmul.mubr.msk.f32.gmra.mrb[110].mxu1 %vm2217_vm7, %v3925_v46 }
 0x932   :  { %9648 = vmatprep.mubr.msk.f32.mxu1 %vm2217_vm7, %v3926_v49 }
 0x935   :  { %9649 = vmatmul.mubr.msk.f32.gmra.mrb[112].mxu1 %vm2217_vm7, %v3927_v52 }
 0x936   :  { %9651 = vmatprep.mubr.msk.f32.mxu1 %vm2217_vm7, %v3928_v55 }
 0x939   :  { %9652 = vmatmul.mubr.msk.f32.gmra.mrb[114].mxu1 %vm2217_vm7, %v3929_v57 }
 0x93a   :  { %9654 = vmatprep.mubr.msk.f32.mxu1 %vm2217_vm7, %v3930_v62 }
 0x93d   :  { %9655 = vmatmul.mubr.msk.f32.gmra.mrb[116].mxu1 %vm2217_vm7, %v3931_v0 }
 0x93e   :  { %9657 = vmatprep.mubr.msk.f32.mxu1 %vm2217_vm7, %v3932_v11 }
 0x941   :  { %9658 = vmatmul.mubr.msk.f32.gmra.mrb[118].mxu1 %vm2217_vm7, %v3933_v12 }
 0x942   :  { %9660 = vmatprep.mubr.msk.f32.mxu1 %vm2217_vm7, %v3934_v13 }
 0x945   :  { %9661 = vmatmul.mubr.msk.f32.gmra.mrb[120].mxu1 %vm2217_vm7, %v3935_v15 }
 0x946   :  { %9663 = vmatprep.mubr.msk.f32.mxu1 %vm2217_vm7, %v3936_v16 }
 0x949   :  { %9664 = vmatmul.mubr.msk.f32.gmra.mrb[122].mxu1 %vm2217_vm7, %v3937_v47 }
 0x95c   :  { %v3166_v19 = vpop.xlane.xlu1 %3165 }
 0x95d   :  { %v3167_v20 = vrot.slane %v3166_v19, 4 }
 0x95f   :  { %v3168_v18 = vadd.f32 %v3167_v20, %v3166_v19 }
 0x960   :  { %v4182_v14 = vpop.xlane.xlu1 %4181 }
 0x961   :  { %v3169_v21 = vrot.slane %v3168_v18, 2  ;;  %v4183_v3 = vsub.f32 %v11741_v34, %v4182_v14 }
 0x963   :  { %v4184_v26 = vmul.f32 1.442695, %v4183_v3  ;;  %v3170_v22 = vadd.f32 %v3169_v21, %v3168_v18 }
 0x964   :  { %v3623_v41 = vpop.xlane.xlu0 %3622 }
 0x965   :  { %10186 = vpow2.f32 %v4184_v26  ;;  %v3624_v23 = vrot.slane %v3623_v41, 4  ;;  %v3171_v28 = vrot.slane %v3170_v22, 1 }
 0x967   :  { %v3625_v40 = vadd.f32 %v3624_v23, %v3623_v41  ;;  %v3172_v29 = vadd.f32 %v3171_v28, %v3170_v22 }
 0x969   :  { %v3626_v30 = vrot.slane %v3625_v40, 2  ;;  %10114 = vpush %v3172_v29 }
 0x96b   :  { %v3627_v2 = vadd.f32 %v3626_v30, %v3625_v40 }
 0x96d   :  { %v3628_v32 = vrot.slane %v3627_v2, 1 }
 0x96f   :  { %v10187_v33 = vpop.eup %10186  ;;  %v3629_v37 = vadd.f32 %v3628_v32, %v3627_v2 }
 0x970   :  { %v4186_v38 = vsel %vm2124_vm6, %v10187_v33, 0.0 }
 0x971   :  { %10116 = vpush %v3629_v37  ;;  %v4187_v34 = vsel %vm546_vm1, %v4186_v38, 0.0 }
 0x972   :  { %4188 = vadd.xlane.f32.xlu1 %v4187_v34 }
 0x99a   :  { %s11788_s6 = spop %10114 }
 0x99b   :  { %s3174_s8 = sadd.f32 %s11788_s6, %s11706_s27 }
 0x9a2   :  { %s10117_s7 = spop %10116 }
 0x9a3   :  { %v3631_v10 = vstv %s10117_s7  ;;  %s10514_s7 = scalar_lea.hbm %s13484_s5, 16 }
 0x9a4   :  { %10188 = vrcp.f32 %v3631_v10  ;;  %p10515_p0 = scmp.ne.s32.totalorder %s13484_s5, %s10514_s7  ;;  %p10518_p1 = scmp.lt.u32.totalorder %s10514_s7, %s13484_s5 }
 0x9a6   :  { %p10520_p2 = pnand %p10518_p1, %p10515_p0 }
 0x9ae   :  { %v10189_v35 = vpop.eup %10188 }
 0x9af   :  { %v3633_v42 = vmul.f32 %v10189_v35, %v11745_v24  ;;  %v3634_v17 = vmul.f32 %v10189_v35, %v11743_v27 }
 0x9b1   :  { %vm3635_vm14 = vcmp.lt.f32.partialorder %v3633_v42, 1.1920929e-07  ;;  %vm3636_vm15 = vcmp.lt.f32.partialorder %v3634_v17, 1.1920929e-07 }
 0x9b2   :  { %v3637_v39 = vsel %vm3635_vm14, 1.1920929e-07, %v3633_v42  ;;  %v3638_v50 = vsel %vm3636_vm15, 1.1920929e-07, %v3634_v17 }
 0x9b3   :  { %v11794_v43 = vsel %vm2124_vm6, %v3637_v39, 0.0  ;;  %v11799_v44 = vsel %vm11641_vm11, %v3638_v50, 0.0 }
 0x9b4   :  { %3641 = vadd.xlane.f32.xlu1 %v11794_v43  ;;  %v3645_v41 = vadd.f32 %v11799_v44, %v11794_v43 }
 0x9b6   :  { %v3646_v23 = vrot.slane %v3645_v41, 4 }
 0x9b8   :  { %3643 = vadd.xlane.f32.xlu1 %v11799_v44  ;;  %v3647_v28 = vadd.f32 %v3646_v23, %v3645_v41 }
 0x9ba   :  { %v3648_v40 = vrot.slane %v3647_v28, 2 }
 0x9bc   :  { %v3649_v29 = vadd.f32 %v3648_v40, %v3647_v28 }
 0x9be   :  { %v3650_v30 = vrot.slane %v3649_v29, 1 }
 0x9c0   :  { %v3651_v2 = vadd.f32 %v3650_v30, %v3649_v29 }
 0x9cc   :  { %v9621_v45 = vpop.f32.mrb[96].mxu1 }
 0x9cd   :  { %v3850_v24 = vpop.f32.mrb[97].mxu1 }
 0x9d4   :  { %v9624_v46 = vpop.f32.mrb[98].mxu1 }
 0x9d5   :  { %v3858_v27 = vpop.f32.mrb[99].mxu1 }
 0x9dc   :  { %v9627_v48 = vpop.f32.mrb[100].mxu1 }
 0x9dd   :  { %v3866_v49 = vpop.f32.mrb[101].mxu1 }
 0x9e4   :  { %v9630_v51 = vpop.f32.mrb[102].mxu1 }
 0x9e5   :  { %v3874_v52 = vpop.f32.mrb[103].mxu1  ;;  %v1736_v51 = vsub.s32 5, %v11494_v54 }
 0x9e7   :  { %v1737_v52 = vrot.slane %v11735_v31, %v1736_v51 }
 0x9ec   :  { %v9633_v25 = vpop.f32.mrb[104].mxu1 }
 0x9ed   :  { %v3882_v53 = vpop.f32.mrb[105].mxu1  ;;  %v1978_v25 = vadd.f32 %v11521_v4, %v1737_v52 }
 0x9ef   :  { %v11819_v53 = vsel %vm2125_vm0, %v1978_v25, -1e+30 }
 0x9f4   :  { %v9636_v55 = vpop.f32.mrb[106].mxu1 }
 0x9f5   :  { %v3890_v56 = vpop.f32.mrb[107].mxu1 }
 0x9fc   :  { %v9639_v57 = vpop.f32.mrb[108].mxu1 }
 0x9fd   :  { %v3898_v60 = vpop.f32.mrb[109].mxu1 }
 0x9ff   :  { %v4189_v61 = vpop.xlane.xlu1 %4188 }
 0xa00   :  { %10190 = vrcp.f32 %v4189_v61  ;;  %v9644_v62 = vpop.f32.mrb[94].mxu1 }
 0xa01   :  { %v4054_v63 = vpop.f32.mrb[95].mxu1  ;;  %10192 = vrcp.f32 %v3637_v39  ;;  %v11821_v55 = vmul.f32 0.5, %v9644_v62 }
 0xa02   :  { %10194 = vrcp.f32 %v3638_v50  ;;  %v11823_v56 = vmul.f32 0.5, %v4054_v63 }
 0xa04   :  { %v9647_v0 = vpop.f32.mrb[110].mxu1 }
 0xa05   :  { %v4064_v1 = vpop.f32.mrb[111].mxu1 }
 0xa08   :  { %v9650_v8 = vpop.f32.mrb[112].mxu1 }
 0xa09   :  { %v4072_v11 = vpop.f32.mrb[113].mxu1 }
 0xa0a   :  { %v10191_v12 = vpop.eup %10190 }
 0xa0b   :  { %v4191_v13 = vmul.f32 %v10191_v12, %v4186_v38  ;;  %v10193_v37 = vpop.eup %10192 }
 0xa0c   :  { %v9653_v15 = vpop.f32.mrb[114].mxu1  ;;  %v10195_v42 = vpop.eup %10194 }
 0xa0d   :  { %4192 = vxpose.xlu1.b32.start.end [1/1] (short) %v4191_v13, 128  ;;  %v4225_v16 = vrot.slane %v4191_v13, 2  ;;  %v4080_v47 = vpop.f32.mrb[115].mxu1 }
 0xa0f   :  { %9666 = vmatprep.subr.msk.mxu0 %vm1666_vm4, %v4225_v16  ;;  %4408 = vxpose.xlu0.b32.start.end [1/1] (short) %v4225_v16, 128 }
 0xa10   :  { %9667 = vmatpush3.msk.msra.mxu0 %vm1666_vm4, %v4225_v16  ;;  %v9656_v19 = vpop.f32.mrb[116].mxu1 }
 0xa11   :  { %9692 = vmatprep.subr.msk.mxu0 %vm1666_vm4, %v4191_v13  ;;  %v4088_v20 = vpop.f32.mrb[117].mxu1 }
 0xa14   :  { %v9659_v18 = vpop.f32.mrb[118].mxu1 }
 0xa15   :  { %v4096_v14 = vpop.f32.mrb[119].mxu1 }
 0xa18   :  { %v9662_v21 = vpop.f32.mrb[120].mxu1 }
 0xa19   :  { %v4104_v3 = vpop.f32.mrb[121].mxu1 }
 0xa1c   :  { %v9665_v26 = vpop.f32.mrb[122].mxu1 }
 0xa1d   :  { %v4112_v22 = vpop.f32.mrb[123].mxu1 }
 0xa41   :  { %v3642_v32 = vpop.xlane.xlu1 %3641 }
 0xa42   :  { %v3652_v33 = vmul.f32 %v3651_v2, %v3642_v32 }
 0xa44   :  { %v3655_v38 = vmul.f32 %v10193_v37, %v3652_v33 }
 0xa45   :  { %v3644_v34 = vpop.xlane.xlu1 %3643 }
 0xa46   :  { %v3658_v10 = vsel %vm2124_vm6, %v3655_v38, 1.0  ;;  %v3653_v35 = vmul.f32 %v3651_v2, %v3644_v34 }
 0xa47   :  { %10196 = vlog2.f32 %v3658_v10 }
 0xa48   :  { %v3657_v17 = vmul.f32 %v10195_v42, %v3653_v35 }
 0xa4a   :  { %v3659_v45 = vsel %vm11641_vm11, %v3657_v17, 1.0 }
 0xa4b   :  { %10198 = vlog2.f32 %v3659_v45 }
 0xa51   :  { %v10197_v39 = vpop.eup %10196 }
 0xa52   :  { %v3661_v24 = vmul.f32 0.6931472, %v10197_v39 }
 0xa54   :  { %v3664_v27 = vmul.f32 %v3661_v24, %v11794_v43  ;;  %v4682_v43 = vsel %vm546_vm1, %v11819_v53, -inf }
 0xa55   :  { %v10199_v50 = vpop.eup %10198 }
 0xa56   :  { %v3663_v46 = vmul.f32 0.6931472, %v10199_v50 }
 0xa58   :  { %v3665_v48 = vmul.f32 %v3663_v46, %v11799_v44  ;;  %v4123_v44 = vadd.f32 %v11821_v55, %v11823_v56 }
 0xa5a   :  { %v3666_v49 = vadd.f32 %v3665_v48, %v3664_v27 }
 0xa70   :  { %3667 = vadd.xlane.f32.xlu1 %v3666_v49 }
 0xa74   :  { %4683 = vmax.xlane.f32.xlu1 %v4682_v43 }
 0xa78   :  { %4124 = vadd.xlane.f32.xlu0 %v4123_v44 }
 0xa8d   :  { %v4208_v4 = vpop.trf.xlu1 }
 0xa8e   :  { %9668 = vmatprep.mubr.msk.f32.mxu0 %vm2217_vm7, %v4208_v4 }
 0xa8f   :  { %v4424_v57 = vpop.trf.xlu0 }
 0xa91   :  { %v4209_v60 = vpop.trf.xlu1 }
 0xa92   :  { %9669 = vmatmul.mubr.msk.f32.vlgmr.msra.gmra.mrb[136].mxu0 %vm2217_vm7, %v4209_v60 }
 0xa93   :  { %9693 = vmatpush3.msk.msra.mxu0 %vm1666_vm4, %v4191_v13  ;;  %v4425_v62 = vpop.trf.xlu0 }
 0xa95   :  { %v4210_v61 = vpop.trf.xlu1 }
 0xa96   :  { %9671 = vmatprep.mubr.msk.f32.mxu0 %vm2217_vm7, %v4210_v61 }
 0xa97   :  { %v4426_v0 = vpop.trf.xlu0 }
 0xa99   :  { %v4211_v63 = vpop.trf.xlu1 }
 0xa9a   :  { %9672 = vmatmul.mubr.msk.f32.gmra.mrb[138].mxu0 %vm2217_vm7, %v4211_v63 }
 0xa9b   :  { %v4427_v11 = vpop.trf.xlu0 }
 0xa9d   :  { %v4212_v1 = vpop.trf.xlu1 }
 0xa9e   :  { %9674 = vmatprep.mubr.msk.f32.mxu0 %vm2217_vm7, %v4212_v1 }
 0xa9f   :  { %v4428_v15 = vpop.trf.xlu0 }
 0xaa1   :  { %v4213_v8 = vpop.trf.xlu1 }
 0xaa2   :  { %9675 = vmatmul.mubr.msk.f32.gmra.mrb[140].mxu0 %vm2217_vm7, %v4213_v8 }
 0xaa3   :  { %v4429_v16 = vpop.trf.xlu0 }
 0xaa5   :  { %v4214_v12 = vpop.trf.xlu1 }
 0xaa6   :  { %9677 = vmatprep.mubr.msk.f32.mxu0 %vm2217_vm7, %v4214_v12 }
 0xaa7   :  { %v4430_v20 = vpop.trf.xlu0 }
 0xaa9   :  { %v4215_v13 = vpop.trf.xlu1 }
 0xaaa   :  { %9678 = vmatmul.mubr.msk.f32.gmra.mrb[142].mxu0 %vm2217_vm7, %v4215_v13 }
 0xaab   :  { %v4431_v14 = vpop.trf.xlu0 }
 0xaad   :  { %v4216_v47 = vpop.trf.xlu1 }
 0xaae   :  { %9680 = vmatprep.mubr.msk.f32.mxu0 %vm2217_vm7, %v4216_v47 }
 0xaaf   :  { %v4432_v26 = vpop.trf.xlu0 }
 0xab1   :  { %v4217_v19 = vpop.trf.xlu1 }
 0xab2   :  { %9681 = vmatmul.mubr.msk.f32.gmra.mrb[144].mxu0 %vm2217_vm7, %v4217_v19 }
 0xab3   :  { %v4433_v41 = vpop.trf.xlu0 }
 0xab5   :  { %v4218_v18 = vpop.trf.xlu1 }
 0xab6   :  { %9683 = vmatprep.mubr.msk.f32.mxu0 %vm2217_vm7, %v4218_v18 }
 0xab7   :  { %v4434_v40 = vpop.trf.xlu0 }
 0xab9   :  { %v4219_v21 = vpop.trf.xlu1 }
 0xaba   :  { %9684 = vmatmul.mubr.msk.f32.gmra.mrb[146].mxu0 %vm2217_vm7, %v4219_v21 }
 0xabb   :  { %v4435_v29 = vpop.trf.xlu0 }
 0xabd   :  { %v4220_v3 = vpop.trf.xlu1 }
 0xabe   :  { %9686 = vmatprep.mubr.msk.f32.mxu0 %vm2217_vm7, %v4220_v3 }
 0xabf   :  { %v4436_v30 = vpop.trf.xlu0 }
 0xac1   :  { %v4221_v22 = vpop.trf.xlu1 }
 0xac2   :  { %9687 = vmatmul.mubr.msk.f32.gmra.mrb[148].mxu0 %vm2217_vm7, %v4221_v22 }
 0xac3   :  { %v4437_v2 = vpop.trf.xlu0 }
 0xac5   :  { %v4222_v23 = vpop.trf.xlu1 }
 0xac6   :  { %9689 = vmatprep.mubr.msk.f32.mxu0 %vm2217_vm7, %v4222_v23 }
 0xac7   :  { %v4438_v32 = vpop.trf.xlu0 }
 0xac9   :  { %v4223_v28 = vpop.trf.xlu1 }
 0xaca   :  { %9690 = vmatmul.mubr.msk.f32.gmra.mrb[150].mxu0 %vm2217_vm7, %v4223_v28 }
 0xacb   :  { %9694 = vmatprep.mubr.msk.f32.mxu0 %vm2217_vm7, %v4424_v57  ;;  %v4439_v33 = vpop.trf.xlu0 }
 0xace   :  { %9695 = vmatmul.mubr.msk.f32.vlgmr.msra.gmra.mrb[136].mxu0 %vm2217_vm7, %v4425_v62 }
 0xacf   :  { %9697 = vmatprep.mubr.msk.f32.mxu0 %vm2217_vm7, %v4426_v0 }
 0xad2   :  { %9698 = vmatmul.mubr.msk.f32.gmra.mrb[152].mxu0 %vm2217_vm7, %v4427_v11 }
 0xad3   :  { %9700 = vmatprep.mubr.msk.f32.mxu0 %vm2217_vm7, %v4428_v15 }
 0xad6   :  { %9701 = vmatmul.mubr.msk.f32.gmra.mrb[154].mxu0 %vm2217_vm7, %v4429_v16 }
 0xad7   :  { %9703 = vmatprep.mubr.msk.f32.mxu0 %vm2217_vm7, %v4430_v20 }
 0xada   :  { %9704 = vmatmul.mubr.msk.f32.gmra.mrb[156].mxu0 %vm2217_vm7, %v4431_v14 }
 0xadb   :  { %9706 = vmatprep.mubr.msk.f32.mxu0 %vm2217_vm7, %v4432_v26 }
 0xade   :  { %9707 = vmatmul.mubr.msk.f32.gmra.mrb[158].mxu0 %vm2217_vm7, %v4433_v41 }
 0xadf   :  { %9709 = vmatprep.mubr.msk.f32.mxu0 %vm2217_vm7, %v4434_v40 }
 0xae2   :  { %9710 = vmatmul.mubr.msk.f32.gmra.mrb[160].mxu0 %vm2217_vm7, %v4435_v29 }
 0xae3   :  { %9712 = vmatprep.mubr.msk.f32.mxu0 %vm2217_vm7, %v4436_v30 }
 0xae6   :  { %9713 = vmatmul.mubr.msk.f32.gmra.mrb[162].mxu0 %vm2217_vm7, %v4437_v2 }
 0xae7   :  { %9715 = vmatprep.mubr.msk.f32.mxu0 %vm2217_vm7, %v4438_v32 }
 0xaea   :  { %9716 = vmatmul.mubr.msk.f32.gmra.mrb[164].mxu0 %vm2217_vm7, %v4439_v33 }
 0xafd   :  { %v3668_v37 = vpop.xlane.xlu1 %3667 }
 0xafe   :  { %v3669_v38 = vrot.slane %v3668_v37, 4 }
 0xb00   :  { %v3670_v34 = vadd.f32 %v3669_v38, %v3668_v37 }
 0xb01   :  { %v4684_v10 = vpop.xlane.xlu1 %4683 }
 0xb02   :  { %v3671_v35 = vrot.slane %v3670_v34, 2  ;;  %v4685_v42 = vsub.f32 %v11819_v53, %v4684_v10 }
 0xb04   :  { %v4686_v17 = vmul.f32 1.442695, %v4685_v42  ;;  %v3672_v45 = vadd.f32 %v3671_v35, %v3670_v34 }
 0xb05   :  { %v4125_v39 = vpop.xlane.xlu0 %4124 }
 0xb06   :  { %10200 = vpow2.f32 %v4686_v17  ;;  %v4126_v24 = vrot.slane %v4125_v39, 4  ;;  %v3673_v50 = vrot.slane %v3672_v45, 1 }
 0xb08   :  { %v4127_v46 = vadd.f32 %v4126_v24, %v4125_v39  ;;  %v3674_v27 = vadd.f32 %v3673_v50, %v3672_v45 }
 0xb0a   :  { %v4128_v48 = vrot.slane %v4127_v46, 2  ;;  %10118 = vpush %v3674_v27 }
 0xb0c   :  { %v4129_v49 = vadd.f32 %v4128_v48, %v4127_v46 }
 0xb0e   :  { %v4130_v51 = vrot.slane %v4129_v49, 1 }
 0xb10   :  { %v10201_v52 = vpop.eup %10200  ;;  %v4131_v25 = vadd.f32 %v4130_v51, %v4129_v49 }
 0xb11   :  { %v4688_v43 = vsel %vm2125_vm0, %v10201_v52, 0.0 }
 0xb12   :  { %10120 = vpush %v4131_v25  ;;  %v4689_v53 = vsel %vm546_vm1, %v4688_v43, 0.0 }
 0xb13   :  { %4690 = vadd.xlane.f32.xlu1 %v4689_v53 }
 0xb3b   :  { %s10119_s9 = spop %10118 }
 0xb3c   :  { %s11868_s1 = sadd.f32 %s10119_s9, %s3174_s8 }
 0xb43   :  { %s10121_s10 = spop %10120 }
 0xb44   :  { %v4133_v44 = vstv %s10121_s10 }
 0xb45   :  { %10202 = vrcp.f32 %v4133_v44 }
 0xb4f   :  { %v10203_v4 = vpop.eup %10202 }
 0xb50   :  { %v4135_v57 = vmul.f32 %v10203_v4, %v11823_v56  ;;  %v4136_v60 = vmul.f32 %v10203_v4, %v11821_v55 }
 0xb52   :  { %vm4137_vm2 = vcmp.lt.f32.partialorder %v4135_v57, 1.1920929e-07  ;;  %vm4138_vm3 = vcmp.lt.f32.partialorder %v4136_v60, 1.1920929e-07 }
 0xb53   :  { %v4139_v61 = vsel %vm4137_vm2, 1.1920929e-07, %v4135_v57  ;;  %v4140_v63 = vsel %vm4138_vm3, 1.1920929e-07, %v4136_v60 }
 0xb54   :  { %v11874_v62 = vsel %vm2124_vm6, %v4139_v61, 0.0  ;;  %v11879_v0 = vsel %vm11641_vm11, %v4140_v63, 0.0 }
 0xb55   :  { %4143 = vadd.xlane.f32.xlu1 %v11874_v62  ;;  %v4147_v45 = vadd.f32 %v11879_v0, %v11874_v62 }
 0xb57   :  { %v4148_v39 = vrot.slane %v4147_v45, 4 }
 0xb59   :  { %4145 = vadd.xlane.f32.xlu1 %v11879_v0  ;;  %v4149_v24 = vadd.f32 %v4148_v39, %v4147_v45 }
 0xb5b   :  { %v4150_v50 = vrot.slane %v4149_v24, 2 }
 0xb5d   :  { %v4151_v46 = vadd.f32 %v4150_v50, %v4149_v24 }
 0xb5f   :  { %v4152_v27 = vrot.slane %v4151_v46, 1 }
 0xb61   :  { %v4153_v48 = vadd.f32 %v4152_v27, %v4151_v46 }
 0xb6d   :  { %v9673_v1 = vpop.f32.mrb[138].mxu0 }
 0xb6e   :  { %v4352_v56 = vpop.f32.mrb[139].mxu0 }
 0xb75   :  { %v9676_v8 = vpop.f32.mrb[140].mxu0 }
 0xb76   :  { %v4360_v55 = vpop.f32.mrb[141].mxu0 }
 0xb7d   :  { %v9679_v11 = vpop.f32.mrb[142].mxu0 }
 0xb7e   :  { %v4368_v12 = vpop.f32.mrb[143].mxu0 }
 0xb7f   :  { %v1740_v12 = vsub.s32 6, %v11494_v54 }
 0xb85   :  { %v9682_v15 = vpop.f32.mrb[144].mxu0 }
 0xb86   :  { %v4376_v13 = vpop.f32.mrb[145].mxu0  ;;  %v1741_v15 = vrot.slane %v11735_v31, %v1740_v12 }
 0xb8d   :  { %v9685_v16 = vpop.f32.mrb[146].mxu0 }
 0xb8e   :  { %v4384_v47 = vpop.f32.mrb[147].mxu0 }
 0xb8f   :  { %v2047_v47 = vadd.f32 %v11523_v5, %v1741_v15 }
 0xb95   :  { %v9688_v19 = vpop.f32.mrb[148].mxu0 }
 0xb96   :  { %v4392_v20 = vpop.f32.mrb[149].mxu0 }
 0xb97   :  { %v11904_v20 = vsel %vm2125_vm0, %v2047_v47, -1e+30 }
 0xb9d   :  { %v9691_v18 = vpop.f32.mrb[150].mxu0 }
 0xb9e   :  { %v4400_v14 = vpop.f32.mrb[151].mxu0 }
 0xba0   :  { %v4691_v21 = vpop.xlane.xlu1 %4690 }
 0xba1   :  { %10204 = vrcp.f32 %v4691_v21  ;;  %v9696_v3 = vpop.f32.mrb[136].mxu0 }
 0xba2   :  { %v4556_v26 = vpop.f32.mrb[137].mxu0  ;;  %10206 = vrcp.f32 %v4139_v61  ;;  %v11895_v13 = vmul.f32 0.5, %v9696_v3 }
 0xba3   :  { %10208 = vrcp.f32 %v4140_v63  ;;  %v11897_v16 = vmul.f32 0.5, %v4556_v26 }
 0xba5   :  { %v9699_v22 = vpop.f32.mrb[152].mxu0  ;;  %v4625_v19 = vadd.f32 %v11895_v13, %v11897_v16 }
 0xba6   :  { %v4566_v41 = vpop.f32.mrb[153].mxu0 }
 0xba9   :  { %v9702_v23 = vpop.f32.mrb[154].mxu0 }
 0xbaa   :  { %v4574_v28 = vpop.f32.mrb[155].mxu0 }
 0xbab   :  { %v10205_v40 = vpop.eup %10204 }
 0xbac   :  { %v4693_v29 = vmul.f32 %v10205_v40, %v4688_v43  ;;  %v10207_v52 = vpop.eup %10206 }
 0xbad   :  { %v9705_v30 = vpop.f32.mrb[156].mxu0  ;;  %v10209_v4 = vpop.eup %10208 }
 0xbae   :  { %4694 = vxpose.xlu1.b32.start.end [1/1] (short) %v4693_v29, 128  ;;  %v4727_v2 = vrot.slane %v4693_v29, 2  ;;  %v4582_v32 = vpop.f32.mrb[157].mxu0 }
 0xbb0   :  { %9718 = vmatprep.subr.msk.mxu1 %vm1666_vm4, %v4727_v2  ;;  %4921 = vxpose.xlu0.b32.start.end [1/1] (short) %v4727_v2, 128 }
 0xbb1   :  { %9719 = vmatpush3.msk.msra.mxu1 %vm1666_vm4, %v4727_v2  ;;  %v9708_v33 = vpop.f32.mrb[158].mxu0 }
 0xbb2   :  { %9744 = vmatprep.subr.msk.mxu1 %vm1666_vm4, %v4693_v29  ;;  %v4590_v37 = vpop.f32.mrb[159].mxu0 }
 0xbb5   :  { %v9711_v38 = vpop.f32.mrb[160].mxu0 }
 0xbb6   :  { %v4598_v34 = vpop.f32.mrb[161].mxu0 }
 0xbb9   :  { %v9714_v10 = vpop.f32.mrb[162].mxu0 }
 0xbba   :  { %v4606_v35 = vpop.f32.mrb[163].mxu0 }
 0xbbd   :  { %v9717_v42 = vpop.f32.mrb[164].mxu0 }
 0xbbe   :  { %v4614_v17 = vpop.f32.mrb[165].mxu0 }
 0xbe2   :  { %v4144_v49 = vpop.xlane.xlu1 %4143 }
 0xbe3   :  { %v4154_v51 = vmul.f32 %v4153_v48, %v4144_v49 }
 0xbe5   :  { %v4157_v25 = vmul.f32 %v10207_v52, %v4154_v51 }
 0xbe6   :  { %v4146_v43 = vpop.xlane.xlu1 %4145 }
 0xbe7   :  { %v4160_v53 = vsel %vm2124_vm6, %v4157_v25, 1.0  ;;  %v4155_v44 = vmul.f32 %v4153_v48, %v4146_v43 }
 0xbe8   :  { %10210 = vlog2.f32 %v4160_v53 }
 0xbe9   :  { %v4159_v57 = vmul.f32 %v10209_v4, %v4155_v44 }
 0xbeb   :  { %v4161_v60 = vsel %vm11641_vm11, %v4159_v57, 1.0 }
 0xbec   :  { %10212 = vlog2.f32 %v4161_v60 }
 0xbf2   :  { %v10211_v61 = vpop.eup %10210 }
 0xbf3   :  { %v4163_v1 = vmul.f32 0.6931472, %v10211_v61 }
 0xbf5   :  { %v4166_v8 = vmul.f32 %v4163_v1, %v11874_v62  ;;  %v5404_v62 = vsel %vm546_vm1, %v11904_v20, -inf }
 0xbf6   :  { %v10213_v63 = vpop.eup %10212 }
 0xbf7   :  { %v4165_v56 = vmul.f32 0.6931472, %v10213_v63 }
 0xbf9   :  { %v4167_v55 = vmul.f32 %v4165_v56, %v11879_v0 }
 0xbfb   :  { %v4168_v11 = vadd.f32 %v4167_v55, %v4166_v8 }
 0xc11   :  { %4626 = vadd.xlane.f32.xlu1 %v4625_v19 }
 0xc15   :  { %5405 = vmax.xlane.f32.xlu1 %v5404_v62 }
 0xc19   :  { %4169 = vadd.xlane.f32.xlu0 %v4168_v11 }
 0xc2e   :  { %v4710_v31 = vpop.trf.xlu1 }
 0xc2f   :  { %9720 = vmatprep.mubr.msk.f32.mxu1 %vm2217_vm7, %v4710_v31 }
 0xc30   :  { %v4937_v18 = vpop.trf.xlu0 }
 0xc32   :  { %v4711_v0 = vpop.trf.xlu1 }
 0xc33   :  { %9721 = vmatmul.mubr.msk.f32.vlgmr.msra.gmra.mrb[124].mxu1 %vm2217_vm7, %v4711_v0 }
 0xc34   :  { %9745 = vmatpush3.msk.msra.mxu1 %vm1666_vm4, %v4693_v29  ;;  %v4938_v14 = vpop.trf.xlu0 }
 0xc36   :  { %v4712_v5 = vpop.trf.xlu1 }
 0xc37   :  { %9723 = vmatprep.mubr.msk.f32.mxu1 %vm2217_vm7, %v4712_v5 }
 0xc38   :  { %v4939_v26 = vpop.trf.xlu0 }
 0xc3a   :  { %v4713_v21 = vpop.trf.xlu1 }
 0xc3b   :  { %9724 = vmatmul.mubr.msk.f32.gmra.mrb[126].mxu1 %vm2217_vm7, %v4713_v21 }
 0xc3c   :  { %v4940_v41 = vpop.trf.xlu0 }
 0xc3e   :  { %v4714_v3 = vpop.trf.xlu1 }
 0xc3f   :  { %9726 = vmatprep.mubr.msk.f32.mxu1 %vm2217_vm7, %v4714_v3 }
 0xc40   :  { %v4941_v28 = vpop.trf.xlu0 }
 0xc42   :  { %v4715_v22 = vpop.trf.xlu1 }
 0xc43   :  { %9727 = vmatmul.mubr.msk.f32.gmra.mrb[128].mxu1 %vm2217_vm7, %v4715_v22 }
 0xc44   :  { %v4942_v30 = vpop.trf.xlu0 }
 0xc46   :  { %v4716_v23 = vpop.trf.xlu1 }
 0xc47   :  { %9729 = vmatprep.mubr.msk.f32.mxu1 %vm2217_vm7, %v4716_v23 }
 0xc48   :  { %v4943_v32 = vpop.trf.xlu0 }
 0xc4a   :  { %v4717_v40 = vpop.trf.xlu1 }
 0xc4b   :  { %9730 = vmatmul.mubr.msk.f32.gmra.mrb[130].mxu1 %vm2217_vm7, %v4717_v40 }
 0xc4c   :  { %v4944_v38 = vpop.trf.xlu0 }
 0xc4e   :  { %v4718_v29 = vpop.trf.xlu1 }
 0xc4f   :  { %9732 = vmatprep.mubr.msk.f32.mxu1 %vm2217_vm7, %v4718_v29 }
 0xc50   :  { %v4945_v10 = vpop.trf.xlu0 }
 0xc52   :  { %v4719_v2 = vpop.trf.xlu1 }
 0xc53   :  { %9733 = vmatmul.mubr.msk.f32.gmra.mrb[132].mxu1 %vm2217_vm7, %v4719_v2 }
 0xc54   :  { %v4946_v17 = vpop.trf.xlu0 }
 0xc56   :  { %v4720_v33 = vpop.trf.xlu1 }
 0xc57   :  { %9735 = vmatprep.mubr.msk.f32.mxu1 %vm2217_vm7, %v4720_v33 }
 0xc58   :  { %v4947_v39 = vpop.trf.xlu0 }
 0xc5a   :  { %v4721_v37 = vpop.trf.xlu1 }
 0xc5b   :  { %9736 = vmatmul.mubr.msk.f32.gmra.mrb[134].mxu1 %vm2217_vm7, %v4721_v37 }
 0xc5c   :  { %v4948_v24 = vpop.trf.xlu0 }
 0xc5e   :  { %v4722_v34 = vpop.trf.xlu1 }
 0xc5f   :  { %9738 = vmatprep.mubr.msk.f32.mxu1 %vm2217_vm7, %v4722_v34 }
 0xc60   :  { %v4949_v50 = vpop.trf.xlu0 }
 0xc62   :  { %v4723_v35 = vpop.trf.xlu1 }
 0xc63   :  { %9739 = vmatmul.mubr.msk.f32.gmra.mrb[136].mxu1 %vm2217_vm7, %v4723_v35 }
 0xc64   :  { %v4950_v46 = vpop.trf.xlu0 }
 0xc66   :  { %v4724_v42 = vpop.trf.xlu1 }
 0xc67   :  { %9741 = vmatprep.mubr.msk.f32.mxu1 %vm2217_vm7, %v4724_v42 }
 0xc68   :  { %v4951_v27 = vpop.trf.xlu0 }
 0xc6a   :  { %v4725_v45 = vpop.trf.xlu1 }
 0xc6b   :  { %9742 = vmatmul.mubr.msk.f32.gmra.mrb[138].mxu1 %vm2217_vm7, %v4725_v45 }
 0xc6c   :  { %9746 = vmatprep.mubr.msk.f32.mxu1 %vm2217_vm7, %v4937_v18  ;;  %v4952_v48 = vpop.trf.xlu0 }
 0xc6f   :  { %9747 = vmatmul.mubr.msk.f32.vlgmr.msra.gmra.mrb[124].mxu1 %vm2217_vm7, %v4938_v14 }
 0xc70   :  { %9749 = vmatprep.mubr.msk.f32.mxu1 %vm2217_vm7, %v4939_v26 }
 0xc73   :  { %9750 = vmatmul.mubr.msk.f32.gmra.mrb[126].mxu1 %vm2217_vm7, %v4940_v41 }
 0xc74   :  { %9752 = vmatprep.mubr.msk.f32.mxu1 %vm2217_vm7, %v4941_v28 }
 0xc77   :  { %9753 = vmatmul.mubr.msk.f32.gmra.mrb[128].mxu1 %vm2217_vm7, %v4942_v30 }
 0xc78   :  { %9755 = vmatprep.mubr.msk.f32.mxu1 %vm2217_vm7, %v4943_v32 }
 0xc7b   :  { %9756 = vmatmul.mubr.msk.f32.gmra.mrb[130].mxu1 %vm2217_vm7, %v4944_v38 }
 0xc7c   :  { %9758 = vmatprep.mubr.msk.f32.mxu1 %vm2217_vm7, %v4945_v10 }
 0xc7f   :  { %9759 = vmatmul.mubr.msk.f32.gmra.mrb[132].mxu1 %vm2217_vm7, %v4946_v17 }
 0xc80   :  { %9761 = vmatprep.mubr.msk.f32.mxu1 %vm2217_vm7, %v4947_v39 }
 0xc83   :  { %9762 = vmatmul.mubr.msk.f32.gmra.mrb[134].mxu1 %vm2217_vm7, %v4948_v24 }
 0xc84   :  { %9764 = vmatprep.mubr.msk.f32.mxu1 %vm2217_vm7, %v4949_v50 }
 0xc87   :  { %9765 = vmatmul.mubr.msk.f32.gmra.mrb[136].mxu1 %vm2217_vm7, %v4950_v46 }
 0xc88   :  { %9767 = vmatprep.mubr.msk.f32.mxu1 %vm2217_vm7, %v4951_v27 }
 0xc8b   :  { %9768 = vmatmul.mubr.msk.f32.gmra.mrb[140].mxu1 %vm2217_vm7, %v4952_v48 }
 0xc9e   :  { %v4627_v49 = vpop.xlane.xlu1 %4626 }
 0xc9f   :  { %v4628_v51 = vrot.slane %v4627_v49, 4 }
 0xca1   :  { %v4629_v52 = vadd.f32 %v4628_v51, %v4627_v49 }
 0xca2   :  { %v5406_v25 = vpop.xlane.xlu1 %5405 }
 0xca3   :  { %v5407_v43 = vsub.f32 %v11904_v20, %v5406_v25  ;;  %v4630_v4 = vrot.slane %v4629_v52, 2 }
 0xca5   :  { %v5408_v53 = vmul.f32 1.442695, %v5407_v43  ;;  %v4631_v61 = vadd.f32 %v4630_v4, %v4629_v52 }
 0xca6   :  { %v4170_v44 = vpop.xlane.xlu0 %4169 }
 0xca7   :  { %10214 = vpow2.f32 %v5408_v53  ;;  %v4171_v57 = vrot.slane %v4170_v44, 4  ;;  %v4632_v56 = vrot.slane %v4631_v61, 1 }
 0xca9   :  { %v4172_v60 = vadd.f32 %v4171_v57, %v4170_v44  ;;  %v4633_v12 = vadd.f32 %v4632_v56, %v4631_v61 }
 0xcab   :  { %v4173_v1 = vrot.slane %v4172_v60, 2 }
 0xcad   :  { %v4174_v63 = vadd.f32 %v4173_v1, %v4172_v60 }
 0xcaf   :  { %v4175_v8 = vrot.slane %v4174_v63, 1 }
 0xcb1   :  { %v10215_v55 = vpop.eup %10214  ;;  %v4176_v11 = vadd.f32 %v4175_v8, %v4174_v63 }
 0xcb2   :  { %v5410_v15 = vsel %vm2125_vm0, %v10215_v55, 0.0 }
 0xcb3   :  { %10122 = vpush %v4176_v11  ;;  %v5411_v47 = vsel %vm546_vm1, %v5410_v15, 0.0 }
 0xcb4   :  { %10124 = vpush %v4633_v12  ;;  %5412 = vadd.xlane.f32.xlu0 %v5411_v47 }
 0xce4   :  { %s11945_s11 = spop %10122 }
 0xce5   :  { %s4178_s12 = sadd.f32 %s11945_s11, %s11868_s1  ;;  %s10125_s13 = spop %10124 }
 0xce6   :  { %v4635_v19 = vstv %s10125_s13 }
 0xce7   :  { %10216 = vrcp.f32 %v4635_v19 }
 0xcf1   :  { %v10217_v20 = vpop.eup %10216 }
 0xcf2   :  { %v4638_v62 = vmul.f32 %v10217_v20, %v11895_v13  ;;  %v4637_v31 = vmul.f32 %v10217_v20, %v11897_v16 }
 0xcf4   :  { %vm4640_vm5 = vcmp.lt.f32.partialorder %v4638_v62, 1.1920929e-07  ;;  %vm4639_vm8 = vcmp.lt.f32.partialorder %v4637_v31, 1.1920929e-07 }
 0xcf5   :  { %v4642_v0 = vsel %vm4640_vm5, 1.1920929e-07, %v4638_v62  ;;  %v4641_v18 = vsel %vm4639_vm8, 1.1920929e-07, %v4637_v31 }
 0xcf6   :  { %v11953_v5 = vsel %vm11641_vm11, %v4642_v0, 0.0  ;;  %v11957_v14 = vsel %vm2124_vm6, %v4641_v18, 0.0 }
 0xcf7   :  { %4647 = vadd.xlane.f32.xlu0 %v11953_v5  ;;  %4645 = vadd.xlane.f32.xlu1 %v11957_v14  ;;  %v4649_v45 = vadd.f32 %v11953_v5, %v11957_v14 }
 0xcf9   :  { %v4650_v39 = vrot.slane %v4649_v45, 4 }
 0xcfb   :  { %v4651_v24 = vadd.f32 %v4650_v39, %v4649_v45 }
 0xcfd   :  { %v4652_v50 = vrot.slane %v4651_v24, 2 }
 0xcff   :  { %v4653_v46 = vadd.f32 %v4652_v50, %v4651_v24 }
 0xd01   :  { %v4654_v27 = vrot.slane %v4653_v46, 1 }
 0xd03   :  { %v4655_v51 = vadd.f32 %v4654_v27, %v4653_v46 }
 0xd3e   :  { %v9743_v21 = vpop.f32.mrb[138].mxu1 }
 0xd3f   :  { %v4913_v13 = vpop.f32.mrb[139].mxu1 }
 0xd41   :  { %v5413_v3 = vpop.xlane.xlu0 %5412 }
 0xd42   :  { %10218 = vrcp.f32 %v5413_v3  ;;  %v9748_v16 = vpop.f32.mrb[124].mxu1 }
 0xd43   :  { %v5069_v26 = vpop.f32.mrb[125].mxu1  ;;  %10220 = vrcp.f32 %v4642_v0  ;;  %v11971_v48 = vmul.f32 0.5, %v9748_v16 }
 0xd44   :  { %10222 = vrcp.f32 %v4641_v18  ;;  %v11973_v49 = vmul.f32 0.5, %v5069_v26 }
 0xd46   :  { %v9751_v22 = vpop.f32.mrb[126].mxu1  ;;  %v5171_v60 = vadd.f32 %v11971_v48, %v11973_v49 }
 0xd47   :  { %v5079_v41 = vpop.f32.mrb[127].mxu1  ;;  %v11984_v55 = vmul.f32 0.5, %v9751_v22 }
 0xd48   :  { %v11975_v52 = vmul.f32 0.5, %v5079_v41 }
 0xd4a   :  { %v9754_v23 = vpop.f32.mrb[128].mxu1  ;;  %v5172_v63 = vadd.f32 %v5171_v60, %v11975_v52 }
 0xd4b   :  { %v5089_v28 = vpop.f32.mrb[129].mxu1  ;;  %v11990_v47 = vmul.f32 0.5, %v9754_v23 }
 0xd4c   :  { %v10219_v40 = vpop.eup %10218  ;;  %v11986_v11 = vmul.f32 0.5, %v5089_v28  ;;  %v5173_v12 = vadd.f32 %v5172_v63, %v11984_v55 }
 0xd4d   :  { %v11961_v29 = vmul.f32 %v10219_v40, %v5410_v15  ;;  %v10221_v53 = vpop.eup %10220 }
 0xd4e   :  { %v9757_v30 = vpop.f32.mrb[130].mxu1  ;;  %v10223_v57 = vpop.eup %10222  ;;  %v5174_v15 = vadd.f32 %v5173_v12, %v11986_v11 }
 0xd4f   :  { %5416 = vxpose.xlu1.b32.start.end [1/1] (short) %v11961_v29, 128  ;;  %v5449_v2 = vrot.slane %v11961_v29, 2  ;;  %v5099_v32 = vpop.f32.mrb[131].mxu1  ;;  %v11998_v3 = vmul.f32 0.5, %v9757_v30  ;;  %v10512_v30 = vld [vmem:[%s13483_s4] sm:$0xff] }
 0xd50   :  { %v11992_v20 = vmul.f32 0.5, %v5099_v32  ;;  %v5175_v62 = vadd.f32 %v5174_v15, %v11990_v47 }
 0xd51   :  { %5643 = vxpose.xlu0.b32.start.end [1/1] (short) %v5449_v2, 128  ;;  %9770 = vmatprep.subr.msk.mxu0 %vm1666_vm4, %v5449_v2 }
 0xd52   :  { %9771 = vmatpush3.msk.msra.mxu0 %vm1666_vm4, %v5449_v2  ;;  %v9760_v33 = vpop.f32.mrb[132].mxu1  ;;  %v5176_v21 = vadd.f32 %v5175_v62, %v11992_v20 }
 0xd53   :  { %9796 = vmatprep.subr.msk.mxu0 %vm1666_vm4, %v11961_v29  ;;  %v5109_v37 = vpop.f32.mrb[133].mxu1  ;;  %v12003_v41 = vmul.f32 0.5, %v9760_v33 }
 0xd54   :  { %v12000_v26 = vmul.f32 0.5, %v5109_v37  ;;  %v5177_v22 = vadd.f32 %v5176_v21, %v11998_v3 }
 0xd56   :  { %v9763_v38 = vpop.f32.mrb[134].mxu1  ;;  %v5178_v23 = vadd.f32 %v5177_v22, %v12000_v26 }
 0xd57   :  { %v5119_v34 = vpop.f32.mrb[135].mxu1  ;;  %v12010_v2 = vmul.f32 0.5, %v9763_v38 }
 0xd58   :  { %v12006_v28 = vmul.f32 0.5, %v5119_v34  ;;  %v5179_v40 = vadd.f32 %v5178_v23, %v12003_v41 }
 0xd5a   :  { %v9766_v10 = vpop.f32.mrb[136].mxu1 }
 0xd5b   :  { %v5129_v35 = vpop.f32.mrb[137].mxu1 }
 0xd5c   :  { %v12016_v37 = vmul.f32 0.5, %v5129_v35 }
 0xd5e   :  { %v9769_v42 = vpop.f32.mrb[140].mxu1 }
 0xd5f   :  { %v5138_v17 = vpop.f32.mrb[141].mxu1 }
 0xd84   :  { %v4646_v25 = vpop.xlane.xlu1 %4645  ;;  %v4648_v43 = vpop.xlane.xlu0 %4647 }
 0xd85   :  { %v4656_v44 = vmul.f32 %v4655_v51, %v4646_v25  ;;  %v4657_v4 = vmul.f32 %v4655_v51, %v4648_v43 }
 0xd87   :  { %v4659_v61 = vmul.f32 %v10223_v57, %v4656_v44  ;;  %v4661_v1 = vmul.f32 %v10221_v53, %v4657_v4 }
 0xd89   :  { %v4662_v56 = vsel %vm2124_vm6, %v4659_v61, 1.0  ;;  %v4663_v8 = vsel %vm11641_vm11, %v4661_v1, 1.0 }
 0xd8a   :  { %10224 = vlog2.f32 %v4662_v56 }
 0xd8b   :  { %10226 = vlog2.f32 %v4663_v8 }
 0xd94   :  { %v10225_v19 = vpop.eup %10224 }
 0xd95   :  { %v10227_v31 = vpop.eup %10226  ;;  %v4665_v36 = vmul.f32 0.6931472, %v10225_v19 }
 0xd96   :  { %v4667_v0 = vmul.f32 0.6931472, %v10227_v31 }
 0xd97   :  { %v4668_v18 = vmul.f32 %v4665_v36, %v11957_v14  ;;  %v1744_v14 = vsub.s32 7, %v11494_v54 }
 0xd98   :  { %v4669_v13 = vmul.f32 %v4667_v0, %v11953_v5  ;;  %v5180_v5 = vadd.f32 %v5179_v40, %v12006_v28 }
 0xd99   :  { %v1745_v32 = vrot.slane %v10512_v30, %v1744_v14 }
 0xd9a   :  { %v4670_v16 = vadd.f32 %v4669_v13, %v4668_v18  ;;  %v5181_v33 = vadd.f32 %v5180_v5, %v12010_v2 }
 0xd9b   :  { %v2049_v34 = vadd.f32 %v11525_v6, %v1745_v32 }
 0xd9c   :  { %v5182_v10 = vadd.f32 %v5181_v33, %v12016_v37 }
 0xd9d   :  { %v12023_v42 = vsel %vm2125_vm0, %v2049_v34, -1e+30 }
 0xd9e   :  { %v6126_v38 = vsel %vm546_vm1, %v12023_v42, -inf }
 0xdb2   :  { %5183 = vadd.xlane.f32.xlu1 %v5182_v10 }
 0xdb6   :  { %6127 = vmax.xlane.f32.xlu1 %v6126_v38 }
 0xdba   :  { %4671 = vadd.xlane.f32.xlu0 %v4670_v16 }
 0xdcf   :  { %v5432_v17 = vpop.trf.xlu1 }
 0xdd0   :  { %9772 = vmatprep.mubr.msk.f32.mxu0 %vm2217_vm7, %v5432_v17 }
 0xdd1   :  { %v5659_v45 = vpop.trf.xlu0 }
 0xdd3   :  { %v5433_v35 = vpop.trf.xlu1 }
 0xdd4   :  { %9773 = vmatmul.mubr.msk.f32.vlgmr.msra.gmra.mrb[166].mxu0 %vm2217_vm7, %v5433_v35 }
 0xdd5   :  { %9797 = vmatpush3.msk.msra.mxu0 %vm1666_vm4, %v11961_v29  ;;  %v5660_v39 = vpop.trf.xlu0 }
 0xdd7   :  { %v5434_v6 = vpop.trf.xlu1 }
 0xdd8   :  { %9775 = vmatprep.mubr.msk.f32.mxu0 %vm2217_vm7, %v5434_v6 }
 0xdd9   :  { %v5661_v46 = vpop.trf.xlu0 }
 0xddb   :  { %v5435_v24 = vpop.trf.xlu1 }
 0xddc   :  { %9776 = vmatmul.mubr.msk.f32.gmra.mrb[168].mxu0 %vm2217_vm7, %v5435_v24 }
 0xddd   :  { %v5662_v51 = vpop.trf.xlu0 }
 0xddf   :  { %v5436_v50 = vpop.trf.xlu1 }
 0xde0   :  { %9778 = vmatprep.mubr.msk.f32.mxu0 %vm2217_vm7, %v5436_v50 }
 0xde1   :  { %v5663_v43 = vpop.trf.xlu0 }
 0xde3   :  { %v5437_v27 = vpop.trf.xlu1 }
 0xde4   :  { %9779 = vmatmul.mubr.msk.f32.gmra.mrb[170].mxu0 %vm2217_vm7, %v5437_v27 }
 0xde5   :  { %v5664_v44 = vpop.trf.xlu0 }
 0xde7   :  { %v5438_v25 = vpop.trf.xlu1 }
 0xde8   :  { %9781 = vmatprep.mubr.msk.f32.mxu0 %vm2217_vm7, %v5438_v25 }
 0xde9   :  { %v5665_v57 = vpop.trf.xlu0 }
 0xdeb   :  { %v5439_v29 = vpop.trf.xlu1 }
 0xdec   :  { %9782 = vmatmul.mubr.msk.f32.gmra.mrb[172].mxu0 %vm2217_vm7, %v5439_v29 }
 0xded   :  { %v5666_v1 = vpop.trf.xlu0 }
 0xdef   :  { %v5440_v53 = vpop.trf.xlu1 }
 0xdf0   :  { %9784 = vmatprep.mubr.msk.f32.mxu0 %vm2217_vm7, %v5440_v53 }
 0xdf1   :  { %v5667_v56 = vpop.trf.xlu0 }
 0xdf3   :  { %v5441_v4 = vpop.trf.xlu1 }
 0xdf4   :  { %9785 = vmatmul.mubr.msk.f32.gmra.mrb[174].mxu0 %vm2217_vm7, %v5441_v4 }
 0xdf5   :  { %v5668_v15 = vpop.trf.xlu0 }
 0xdf7   :  { %v5442_v60 = vpop.trf.xlu1 }
 0xdf8   :  { %9787 = vmatprep.mubr.msk.f32.mxu0 %vm2217_vm7, %v5442_v60 }
 0xdf9   :  { %v5669_v62 = vpop.trf.xlu0 }
 0xdfb   :  { %v5443_v61 = vpop.trf.xlu1 }
 0xdfc   :  { %9788 = vmatmul.mubr.msk.f32.gmra.mrb[176].mxu0 %vm2217_vm7, %v5443_v61 }
 0xdfd   :  { %v5670_v31 = vpop.trf.xlu0 }
 0xdff   :  { %v5444_v63 = vpop.trf.xlu1 }
 0xe00   :  { %9790 = vmatprep.mubr.msk.f32.mxu0 %vm2217_vm7, %v5444_v63 }
 0xe01   :  { %v5671_v36 = vpop.trf.xlu0 }
 0xe03   :  { %v5445_v8 = vpop.trf.xlu1 }
 0xe04   :  { %9791 = vmatmul.mubr.msk.f32.gmra.mrb[178].mxu0 %vm2217_vm7, %v5445_v8 }
 0xe05   :  { %v5672_v0 = vpop.trf.xlu0 }
 0xe07   :  { %v5446_v12 = vpop.trf.xlu1 }
 0xe08   :  { %9793 = vmatprep.mubr.msk.f32.mxu0 %vm2217_vm7, %v5446_v12 }
 0xe09   :  { %v5673_v18 = vpop.trf.xlu0 }
 0xe0b   :  { %v5447_v19 = vpop.trf.xlu1 }
 0xe0c   :  { %9794 = vmatmul.mubr.msk.f32.gmra.mrb[180].mxu0 %vm2217_vm7, %v5447_v19 }
 0xe0d   :  { %9798 = vmatprep.mubr.msk.f32.mxu0 %vm2217_vm7, %v5659_v45  ;;  %v5674_v21 = vpop.trf.xlu0 }
 0xe10   :  { %9799 = vmatmul.mubr.msk.f32.vlgmr.msra.gmra.mrb[166].mxu0 %vm2217_vm7, %v5660_v39 }
 0xe11   :  { %9801 = vmatprep.mubr.msk.f32.mxu0 %vm2217_vm7, %v5661_v46 }
 0xe14   :  { %9802 = vmatmul.mubr.msk.f32.gmra.mrb[168].mxu0 %vm2217_vm7, %v5662_v51 }
 0xe15   :  { %9804 = vmatprep.mubr.msk.f32.mxu0 %vm2217_vm7, %v5663_v43 }
 0xe18   :  { %9805 = vmatmul.mubr.msk.f32.gmra.mrb[170].mxu0 %vm2217_vm7, %v5664_v44 }
 0xe19   :  { %9807 = vmatprep.mubr.msk.f32.mxu0 %vm2217_vm7, %v5665_v57 }
 0xe1c   :  { %9808 = vmatmul.mubr.msk.f32.gmra.mrb[172].mxu0 %vm2217_vm7, %v5666_v1 }
 0xe1d   :  { %9810 = vmatprep.mubr.msk.f32.mxu0 %vm2217_vm7, %v5667_v56 }
 0xe20   :  { %9811 = vmatmul.mubr.msk.f32.gmra.mrb[174].mxu0 %vm2217_vm7, %v5668_v15 }
 0xe21   :  { %9813 = vmatprep.mubr.msk.f32.mxu0 %vm2217_vm7, %v5669_v62 }
 0xe24   :  { %9814 = vmatmul.mubr.msk.f32.gmra.mrb[176].mxu0 %vm2217_vm7, %v5670_v31 }
 0xe25   :  { %9816 = vmatprep.mubr.msk.f32.mxu0 %vm2217_vm7, %v5671_v36 }
 0xe28   :  { %9817 = vmatmul.mubr.msk.f32.gmra.mrb[178].mxu0 %vm2217_vm7, %v5672_v0 }
 0xe29   :  { %9819 = vmatprep.mubr.msk.f32.mxu0 %vm2217_vm7, %v5673_v18 }
 0xe2c   :  { %9820 = vmatmul.mubr.msk.f32.gmra.mrb[182].mxu0 %vm2217_vm7, %v5674_v21 }
 0xe3f   :  { %v5184_v13 = vpop.xlane.xlu1 %5183 }
 0xe40   :  { %v5185_v16 = vrot.slane %v5184_v13, 4 }
 0xe42   :  { %v5186_v22 = vadd.f32 %v5185_v16, %v5184_v13 }
 0xe43   :  { %v6128_v23 = vpop.xlane.xlu1 %6127 }
 0xe44   :  { %v6129_v40 = vsub.f32 %v12023_v42, %v6128_v23  ;;  %v5187_v30 = vrot.slane %v5186_v22, 2 }
 0xe46   :  { %v6130_v14 = vmul.f32 1.442695, %v6129_v40  ;;  %v5188_v34 = vadd.f32 %v5187_v30, %v5186_v22 }
 0xe47   :  { %v4672_v5 = vpop.xlane.xlu0 %4671 }
 0xe48   :  { %10228 = vpow2.f32 %v6130_v14  ;;  %v4673_v32 = vrot.slane %v4672_v5, 4  ;;  %v5189_v17 = vrot.slane %v5188_v34, 1 }
 0xe4a   :  { %v4674_v33 = vadd.f32 %v4673_v32, %v4672_v5  ;;  %v5190_v39 = vadd.f32 %v5189_v17, %v5188_v34 }
 0xe4c   :  { %v4675_v10 = vrot.slane %v4674_v33, 2 }
 0xe4e   :  { %v4676_v38 = vadd.f32 %v4675_v10, %v4674_v33 }
 0xe50   :  { %v4677_v35 = vrot.slane %v4676_v38, 1 }
 0xe52   :  { %v10229_v45 = vpop.eup %10228  ;;  %v4678_v6 = vadd.f32 %v4677_v35, %v4676_v38 }
 0xe53   :  { %v12064_v24 = vsel %vm2125_vm0, %v10229_v45, 0.0 }
 0xe54   :  { %10126 = vpush %v4678_v6  ;;  %v6133_v42 = vsel %vm546_vm1, %v12064_v24, 0.0 }
 0xe55   :  { %10128 = vpush %v5190_v39  ;;  %6134 = vadd.xlane.f32.xlu0 %v6133_v42 }
 0xe85   :  { %s10127_s16 = spop %10126 }
 0xe86   :  { %s4680_s17 = sadd.f32 %s10127_s16, %s4178_s12  ;;  %s10129_s18 = spop %10128 }
 0xe87   :  { %v5192_v50 = vstv %s10129_s18 }
 0xe88   :  { %8292 = sst [smem:[#allocation2]] %s4680_s17  ;;  %10230 = vrcp.f32 %v5192_v50 }
 0xe92   :  { %v10231_v46 = vpop.eup %10230 }
 0xe93   :  { %v5194_v27 = vmul.f32 %v10231_v46, %v11973_v49  ;;  %v5195_v51 = vmul.f32 %v10231_v46, %v11971_v48  ;;  %v5196_v25 = vmul.f32 %v10231_v46, %v11975_v52  ;;  %v5197_v43 = vmul.f32 %v10231_v46, %v11984_v55 }
 0xe94   :  { %v5198_v29 = vmul.f32 %v10231_v46, %v11986_v11  ;;  %v5199_v53 = vmul.f32 %v10231_v46, %v11990_v47  ;;  %v5200_v11 = vmul.f32 %v10231_v46, %v11992_v20  ;;  %v5201_v47 = vmul.f32 %v10231_v46, %v11998_v3 }
 0xe95   :  { %vm5207_vm6 = vcmp.lt.f32.partialorder %v5194_v27, 1.1920929e-07  ;;  %vm5208_vm9 = vcmp.lt.f32.partialorder %v5195_v51, 1.1920929e-07  ;;  %vm5209_vm10 = vcmp.lt.f32.partialorder %v5196_v25, 1.1920929e-07  ;;  %vm5210_vm11 = vcmp.lt.f32.partialorder %v5197_v43, 1.1920929e-07 }
 0xe96   :  { %v12077_v44 = vsel %vm5207_vm6, 1.1920929e-07, %v5194_v27  ;;  %v12079_v4 = vsel %vm5208_vm9, 1.1920929e-07, %v5195_v51  ;;  %v12093_v52 = vsel %vm5209_vm10, 1.1920929e-07, %v5196_v25  ;;  %v12095_v55 = vsel %vm5210_vm11, 1.1920929e-07, %v5197_v43 }
 0xe97   :  { %v12084_v48 = vsel %vm2125_vm0, %v12077_v44, 0.0  ;;  %v12089_v49 = vsel %vm2125_vm0, %v12079_v4, 0.0  ;;  %vm5211_vm12 = vcmp.lt.f32.partialorder %v5198_v29, 1.1920929e-07  ;;  %vm5212_vm13 = vcmp.lt.f32.partialorder %v5199_v53, 1.1920929e-07 }
 0xe98   :  { %5246 = vadd.xlane.f32.xlu1 %v12084_v48  ;;  %5248 = vadd.xlane.f32.xlu0 %v12089_v49  ;;  %v12102_v57 = vsel %vm2125_vm0, %v12093_v52, 0.0  ;;  %v12107_v60 = vsel %vm2125_vm0, %v12095_v55, 0.0  ;;  %v12111_v61 = vsel %vm5211_vm12, 1.1920929e-07, %v5198_v29  ;;  %v12113_v1 = vsel %vm5212_vm13, 1.1920929e-07, %v5199_v53 }
 0xe99   :  { %vm5213_vm14 = vcmp.lt.f32.partialorder %v5200_v11, 1.1920929e-07  ;;  %vm5214_vm15 = vcmp.lt.f32.partialorder %v5201_v47, 1.1920929e-07  ;;  %v5202_v20 = vmul.f32 %v10231_v46, %v12000_v26  ;;  %v5203_v3 = vmul.f32 %v10231_v46, %v12003_v41 }
 0xe9a   :  { %v12120_v63 = vsel %vm2125_vm0, %v12111_v61, 0.0  ;;  %v12125_v56 = vsel %vm2125_vm0, %v12113_v1, 0.0  ;;  %v12129_v8 = vsel %vm5213_vm14, 1.1920929e-07, %v5200_v11  ;;  %v12131_v12 = vsel %vm5214_vm15, 1.1920929e-07, %v5201_v47 }
 0xe9b   :  { %vm5215_vm2 = vcmp.lt.f32.partialorder %v5202_v20, 1.1920929e-07  ;;  %vm5216_vm3 = vcmp.lt.f32.partialorder %v5203_v3, 1.1920929e-07  ;;  %v5204_v26 = vmul.f32 %v10231_v46, %v12006_v28  ;;  %v5205_v41 = vmul.f32 %v10231_v46, %v12010_v2 }
 0xe9c   :  { %5250 = vadd.xlane.f32.xlu1 %v12102_v57  ;;  %5252 = vadd.xlane.f32.xlu0 %v12107_v60  ;;  %v12138_v15 = vsel %vm2125_vm0, %v12129_v8, 0.0  ;;  %v12143_v19 = vsel %vm2125_vm0, %v12131_v12, 0.0  ;;  %v12147_v62 = vsel %vm5215_vm2, 1.1920929e-07, %v5202_v20  ;;  %v12149_v31 = vsel %vm5216_vm3, 1.1920929e-07, %v5203_v3 }
 0xe9d   :  { %vm5217_vm5 = vcmp.lt.f32.partialorder %v5204_v26, 1.1920929e-07  ;;  %vm5218_vm8 = vcmp.lt.f32.partialorder %v5205_v41, 1.1920929e-07  ;;  %v2143_v28 = vadd.s32 96, %v11494_v54  ;;  %v5206_v2 = vmul.f32 %v10231_v46, %v12016_v37 }
 0xe9e   :  { %v12156_v36 = vsel %vm2125_vm0, %v12147_v62, 0.0  ;;  %v12161_v0 = vsel %vm2125_vm0, %v12149_v31, 0.0  ;;  %v12165_v18 = vsel %vm5217_vm5, 1.1920929e-07, %v5204_v26  ;;  %v12167_v21 = vsel %vm5218_vm8, 1.1920929e-07, %v5205_v41 }
 0xe9f   :  { %vm2156_vm6 = vcmp.lt.s32.totalorder %v2143_v28, 100  ;;  %vm5219_vm9 = vcmp.lt.f32.partialorder %v5206_v2, 1.1920929e-07  ;;  %v12172_v37 = vsel %vm2125_vm0, %v12165_v18, 0.0  ;;  %v12177_v13 = vsel %vm2125_vm0, %v12167_v21, 0.0 }
 0xea0   :  { %5254 = vadd.xlane.f32.xlu1 %v12120_v63  ;;  %5256 = vadd.xlane.f32.xlu0 %v12125_v56  ;;  %vm12183_vm10 = vmand %vm2156_vm6, %vm2125_vm0  ;;  %v12187_v22 = vsel %vm5219_vm9, 1.1920929e-07, %v5206_v2  ;;  %v5272_v14 = vadd.f32 %v12089_v49, %v12084_v48 }
 0xea1   :  { %v12192_v23 = vsel %vm12183_vm10, %v12187_v22, 0.0 }
 0xea2   :  { %v5273_v33 = vadd.f32 %v5272_v14, %v12102_v57 }
 0xea4   :  { %5258 = vadd.xlane.f32.xlu1 %v12138_v15  ;;  %5260 = vadd.xlane.f32.xlu0 %v12143_v19  ;;  %v5274_v38 = vadd.f32 %v5273_v33, %v12107_v60 }
 0xea6   :  { %v5275_v45 = vadd.f32 %v5274_v38, %v12120_v63 }
 0xea8   :  { %5262 = vadd.xlane.f32.xlu1 %v12156_v36  ;;  %5264 = vadd.xlane.f32.xlu0 %v12161_v0  ;;  %v5276_v46 = vadd.f32 %v5275_v45, %v12125_v56 }
 0xeac   :  { %5266 = vadd.xlane.f32.xlu1 %v12172_v37  ;;  %5268 = vadd.xlane.f32.xlu0 %v12177_v13 }
 0xeb0   :  { %5270 = vadd.xlane.f32.xlu1 %v12192_v23 }
 0xedf   :  { %v9795_v40 = vpop.f32.mrb[180].mxu0 }
 0xee0   :  { %v5635_v5 = vpop.f32.mrb[181].mxu0 }
 0xee2   :  { %v6135_v30 = vpop.xlane.xlu0 %6134 }
 0xee3   :  { %10232 = vrcp.f32 %v6135_v30  ;;  %v9800_v32 = vpop.f32.mrb[166].mxu0 }
 0xee4   :  { %v5791_v34 = vpop.f32.mrb[167].mxu0  ;;  %10234 = vrcp.f32 %v12077_v44 }
 0xee5   :  { %10236 = vrcp.f32 %v12079_v4 }
 0xee6   :  { %10238 = vrcp.f32 %v12093_v52 }
 0xee7   :  { %v12198_v10 = vpop.f32.mrb[168].mxu0  ;;  %10240 = vrcp.f32 %v12095_v55 }
 0xee8   :  { %v5801_v17 = vpop.f32.mrb[169].mxu0  ;;  %10242 = vrcp.f32 %v12111_v61 }
 0xee9   :  { %10244 = vrcp.f32 %v12113_v1 }
 0xeea   :  { %10246 = vrcp.f32 %v12129_v8 }
 0xeeb   :  { %v12201_v35 = vpop.f32.mrb[170].mxu0  ;;  %10248 = vrcp.f32 %v12131_v12 }
 0xeec   :  { %v12204_v6 = vpop.f32.mrb[171].mxu0  ;;  %10250 = vrcp.f32 %v12147_v62 }
 0xeed   :  { %v10233_v39 = vpop.eup %10232  ;;  %10252 = vrcp.f32 %v12149_v31 }
 0xeee   :  { %v12207_v42 = vmul.f32 %v10233_v39, %v12064_v24  ;;  %v5277_v24 = vadd.f32 %v5276_v46, %v12138_v15  ;;  %v12241_v39 = vmul.f32 0.5, %v9800_v32  ;;  %v12243_v46 = vmul.f32 0.5, %v5791_v34  ;;  %v10235_v4 = vpop.eup %10234 }
 0xeef   :  { %v12209_v50 = vpop.f32.mrb[172].mxu0  ;;  %v10237_v32 = vpop.eup %10236 }
 0xef0   :  { %6138 = vxpose.xlu0.b32.start.end [1/1] (short) %v12207_v42, 128  ;;  %v6171_v27 = vrot.slane %v12207_v42, 2  ;;  %v12214_v51 = vpop.f32.mrb[173].mxu0  ;;  %v5278_v53 = vadd.f32 %v5277_v24, %v12143_v19  ;;  %v12249_v24 = vmul.f32 0.5, %v5801_v17  ;;  %v5893_v61 = vadd.f32 %v12241_v39, %v12243_v46 }
 0xef2   :  { %6365 = vxpose.xlu1.b32.start.end [1/1] (short) %v6171_v27, 128  ;;  %9822 = vmatprep.subr.msk.mxu1 %vm1666_vm4, %v6171_v27  ;;  %v5279_v20 = vadd.f32 %v5278_v53, %v12156_v36  ;;  %v5894_v17 = vadd.f32 %v5893_v61, %v12249_v24 }
 0xef3   :  { %9823 = vmatpush3.msk.msra.mxu1 %vm1666_vm4, %v6171_v27  ;;  %v12218_v25 = vpop.f32.mrb[174].mxu0 }
 0xef4   :  { %9848 = vmatprep.subr.msk.mxu1 %vm1666_vm4, %v12207_v42  ;;  %v12223_v43 = vpop.f32.mrb[175].mxu0  ;;  %v5280_v41 = vadd.f32 %v5279_v20, %v12161_v0  ;;  %v10239_v20 = vpop.eup %10238 }
 0xef5   :  { %v10241_v62 = vpop.eup %10240 }
 0xef6   :  { %v5281_v2 = vadd.f32 %v5280_v41, %v12172_v37 }
 0xef7   :  { %v12225_v29 = vpop.f32.mrb[176].mxu0 }
 0xef8   :  { %v12228_v11 = vpop.f32.mrb[177].mxu0  ;;  %v5282_v40 = vadd.f32 %v5281_v2, %v12177_v13  ;;  %v12267_v2 = vmul.f32 0.5, %v12198_v10 }
 0xefa   :  { %v5283_v14 = vadd.f32 %v5282_v40, %v12192_v23 }
 0xefb   :  { %v9818_v47 = vpop.f32.mrb[178].mxu0 }
 0xefc   :  { %v12231_v3 = vpop.f32.mrb[179].mxu0  ;;  %v5284_v5 = vrot.slane %v5283_v14, 4 }
 0xefe   :  { %v5285_v30 = vadd.f32 %v5284_v5, %v5283_v14  ;;  %v12271_v14 = vmul.f32 0.5, %v12204_v6  ;;  %v5895_v5 = vadd.f32 %v5894_v17, %v12267_v2 }
 0xeff   :  { %v9821_v26 = vpop.f32.mrb[182].mxu0 }
 0xf00   :  { %v5860_v28 = vpop.f32.mrb[183].mxu0  ;;  %v5286_v33 = vrot.slane %v5285_v30, 2 }
 0xf02   :  { %v5287_v38 = vadd.f32 %v5286_v33, %v5285_v30 }
 0xf04   :  { %v5288_v45 = vrot.slane %v5287_v38, 1 }
 0xf06   :  { %v12246_v27 = vadd.f32 %v5288_v45, %v5287_v38  ;;  %v10243_v38 = vpop.eup %10242 }
 0xf25   :  { %v5249_v44 = vpop.xlane.xlu0 %5248  ;;  %v5247_v53 = vpop.xlane.xlu1 %5246 }
 0xf26   :  { %v5291_v52 = vmul.f32 %v12246_v27, %v5249_v44  ;;  %v5290_v55 = vmul.f32 %v12246_v27, %v5247_v53 }
 0xf28   :  { %v5306_v1 = vmul.f32 %v10237_v32, %v5291_v52  ;;  %v5304_v34 = vmul.f32 %v10235_v4, %v5290_v55  ;;  %v10245_v4 = vpop.eup %10244  ;;  %v5896_v32 = vadd.f32 %v5895_v5, %v12271_v14 }
 0xf29   :  { %v5253_v47 = vpop.xlane.xlu0 %5252  ;;  %v5251_v8 = vpop.xlane.xlu1 %5250 }
 0xf2a   :  { %v5330_v26 = vsel %vm2125_vm0, %v5306_v1, 1.0  ;;  %v5329_v12 = vsel %vm2125_vm0, %v5304_v34, 1.0  ;;  %v5293_v41 = vmul.f32 %v12246_v27, %v5253_v47  ;;  %v5292_v28 = vmul.f32 %v12246_v27, %v5251_v8 }
 0xf2b   :  { %10254 = vlog2.f32 %v5330_v26 }
 0xf2c   :  { %10256 = vlog2.f32 %v5329_v12  ;;  %v5310_v31 = vmul.f32 %v10241_v62, %v5293_v41  ;;  %v5308_v40 = vmul.f32 %v10239_v20, %v5292_v28  ;;  %v12289_v12 = vmul.f32 0.5, %v12201_v35 }
 0xf2d   :  { %10258 = vrcp.f32 %v12165_v18  ;;  %v5257_v30 = vpop.xlane.xlu0 %5256  ;;  %v5255_v33 = vpop.xlane.xlu1 %5254  ;;  %v12293_v62 = vmul.f32 0.5, %v12214_v51 }
 0xf2e   :  { %v5332_v45 = vsel %vm2125_vm0, %v5310_v31, 1.0  ;;  %v5331_v10 = vsel %vm2125_vm0, %v5308_v40, 1.0  ;;  %v5295_v44 = vmul.f32 %v12246_v27, %v5257_v30  ;;  %v5294_v53 = vmul.f32 %v12246_v27, %v5255_v33  ;;  %v10247_v18 = vpop.eup %10246 }
 0xf2f   :  { %10260 = vlog2.f32 %v5332_v45  ;;  %v10249_v55 = vpop.eup %10248  ;;  %v5897_v31 = vadd.f32 %v5896_v32, %v12289_v12 }
 0xf30   :  { %10262 = vlog2.f32 %v5331_v10  ;;  %v5314_v6 = vmul.f32 %v10245_v4, %v5295_v44  ;;  %v5312_v52 = vmul.f32 %v10243_v38, %v5294_v53  ;;  %v10251_v34 = vpop.eup %10250 }
 0xf31   :  { %10264 = vrcp.f32 %v12167_v21  ;;  %v5261_v61 = vpop.xlane.xlu0 %5260  ;;  %v5259_v1 = vpop.xlane.xlu1 %5258 }
 0xf32   :  { %v5334_v17 = vsel %vm2125_vm0, %v5314_v6, 1.0  ;;  %v5333_v47 = vsel %vm2125_vm0, %v5312_v52, 1.0  ;;  %v5297_v8 = vmul.f32 %v12246_v27, %v5261_v61  ;;  %v5296_v20 = vmul.f32 %v12246_v27, %v5259_v1  ;;  %v10253_v26 = vpop.eup %10252 }
 0xf33   :  { %10266 = vlog2.f32 %v5334_v17  ;;  %v5898_v6 = vadd.f32 %v5897_v31, %v12293_v62 }
 0xf34   :  { %10268 = vlog2.f32 %v5333_v47  ;;  %v5318_v21 = vmul.f32 %v10249_v55, %v5297_v8  ;;  %v5316_v41 = vmul.f32 %v10247_v18, %v5296_v20  ;;  %v12304_v18 = vmul.f32 0.5, %v12209_v50 }
 0xf35   :  { %v10255_v28 = vpop.eup %10254  ;;  %10270 = vrcp.f32 %v12187_v22  ;;  %v5265_v40 = vpop.xlane.xlu0 %5264 }
 0xf36   :  { %v5263_v5 = vpop.xlane.xlu1 %5262  ;;  %v10257_v30 = vpop.eup %10256  ;;  %v5345_v33 = vmul.f32 0.6931472, %v10255_v28  ;;  %v5336_v35 = vsel %vm2125_vm0, %v5318_v21, 1.0  ;;  %v5335_v38 = vsel %vm2125_vm0, %v5316_v41, 1.0  ;;  %v5299_v45 = vmul.f32 %v12246_v27, %v5265_v40 }
 0xf37   :  { %v10259_v10 = vpop.eup %10258  ;;  %v5343_v44 = vmul.f32 0.6931472, %v10257_v30  ;;  %10272 = vlog2.f32 %v5336_v35  ;;  %v5298_v22 = vmul.f32 %v12246_v27, %v5263_v5  ;;  %v12315_v28 = vmul.f32 0.5, %v12223_v43 }
 0xf38   :  { %v5369_v51 = vmul.f32 %v5345_v33, %v12089_v49  ;;  %10274 = vlog2.f32 %v5335_v38  ;;  %v5322_v53 = vmul.f32 %v10253_v26, %v5299_v45  ;;  %v5899_v31 = vadd.f32 %v5898_v6, %v12304_v18 }
 0xf39   :  { %v10261_v4 = vpop.eup %10260  ;;  %v5368_v52 = vmul.f32 %v5343_v44, %v12084_v48  ;;  %v5320_v55 = vmul.f32 %v10251_v34, %v5298_v22  ;;  %v5269_v32 = vpop.xlane.xlu0 %5268 }
 0xf3a   :  { %v5267_v61 = vpop.xlane.xlu1 %5266  ;;  %v10263_v1 = vpop.eup %10262  ;;  %v5349_v17 = vmul.f32 0.6931472, %v10261_v4  ;;  %v5338_v47 = vsel %vm2125_vm0, %v5322_v53, 1.0  ;;  %v5301_v49 = vmul.f32 %v12246_v27, %v5269_v32 }
 0xf3b   :  { %v5300_v8 = vmul.f32 %v12246_v27, %v5267_v61  ;;  %v10265_v20 = vpop.eup %10264  ;;  %v5381_v26 = vadd.f32 %v5369_v51, %v5368_v52  ;;  %v5347_v50 = vmul.f32 0.6931472, %v10263_v1  ;;  %10276 = vlog2.f32 %v5338_v47 }
 0xf3c   :  { %v5337_v21 = vsel %vm2125_vm0, %v5320_v55, 1.0  ;;  %v5326_v48 = vmul.f32 %v10265_v20, %v5301_v49  ;;  %v5371_v44 = vmul.f32 %v5349_v17, %v12107_v60  ;;  %v12327_v52 = vmul.f32 0.5, %v12218_v25 }
 0xf3d   :  { %10278 = vlog2.f32 %v5337_v21  ;;  %v5324_v34 = vmul.f32 %v10259_v10, %v5300_v8  ;;  %v10267_v41 = vpop.eup %10266  ;;  %v5370_v40 = vmul.f32 %v5347_v50, %v12102_v57  ;;  %v5900_v55 = vadd.f32 %v5899_v31, %v12315_v28 }
 0xf3e   :  { %v5271_v5 = vpop.xlane.xlu1 %5270  ;;  %v10269_v30 = vpop.eup %10268  ;;  %v5353_v33 = vmul.f32 0.6931472, %v10267_v41  ;;  %v5340_v35 = vsel %vm2125_vm0, %v5326_v48, 1.0  ;;  %v12335_v8 = vmul.f32 0.5, %v12228_v11  ;;  %v12341_v31 = vmul.f32 0.5, %v12225_v29 }
 0xf3f   :  { %v5339_v38 = vsel %vm2125_vm0, %v5324_v34, 1.0  ;;  %v5302_v45 = vmul.f32 %v12246_v27, %v5271_v5  ;;  %v10271_v10 = vpop.eup %10270  ;;  %v5382_v43 = vadd.f32 %v5381_v26, %v5370_v40  ;;  %v5351_v22 = vmul.f32 0.6931472, %v10269_v30 }
 0xf40   :  { %10280 = vlog2.f32 %v5340_v35  ;;  %v5373_v27 = vmul.f32 %v5353_v33, %v12125_v56  ;;  %v5901_v25 = vadd.f32 %v5900_v55, %v12327_v52 }
 0xf41   :  { %10282 = vlog2.f32 %v5339_v38  ;;  %v5328_v51 = vmul.f32 %v10271_v10, %v5302_v45  ;;  %v10273_v57 = vpop.eup %10272  ;;  %v5383_v53 = vadd.f32 %v5382_v43, %v5371_v44  ;;  %v5372_v4 = vmul.f32 %v5351_v22, %v12120_v63 }
 0xf42   :  { %v10275_v6 = vpop.eup %10274  ;;  %v5357_v61 = vmul.f32 0.6931472, %v10273_v57  ;;  %v12347_v45 = vmul.f32 0.5, %v12231_v3 }
 0xf43   :  { %v5341_v60 = vsel %vm12183_vm10, %v5328_v51, 1.0  ;;  %v5384_v32 = vadd.f32 %v5383_v53, %v5372_v4  ;;  %v5355_v1 = vmul.f32 0.6931472, %v10275_v6 }
 0xf44   :  { %10284 = vlog2.f32 %v5341_v60  ;;  %v5375_v20 = vmul.f32 %v5357_v61, %v12143_v19 }
 0xf45   :  { %v10277_v17 = vpop.eup %10276  ;;  %v5385_v47 = vadd.f32 %v5384_v32, %v5373_v27  ;;  %v5374_v49 = vmul.f32 %v5355_v1, %v12138_v15  ;;  %v5902_v15 = vadd.f32 %v5901_v25, %v12335_v8 }
 0xf46   :  { %v5361_v26 = vmul.f32 0.6931472, %v10277_v17 }
 0xf47   :  { %v10279_v63 = vpop.eup %10278  ;;  %v5386_v56 = vadd.f32 %v5385_v47, %v5374_v49 }
 0xf48   :  { %v5359_v50 = vmul.f32 0.6931472, %v10279_v63  ;;  %v5377_v11 = vmul.f32 %v5361_v26, %v12161_v0  ;;  %v10513_v0 = vld [vmem:[%s13483_s4 + $0x8] sm:$0x3] }
 0xf49   :  { %v5387_v34 = vadd.f32 %v5386_v56, %v5375_v20  ;;  %v1749_v43 = vrot.slane %v10513_v0, %v1716_v58 }
 0xf4a   :  { %v10281_v21 = vpop.eup %10280  ;;  %v5376_v48 = vmul.f32 %v5359_v50, %v12156_v36  ;;  %v5903_v36 = vadd.f32 %v5902_v15, %v12341_v31 }
 0xf4b   :  { %v10283_v41 = vpop.eup %10282  ;;  %v5365_v40 = vmul.f32 0.6931472, %v10281_v21  ;;  %v2118_v3 = vadd.f32 %v11527_v7, %v1749_v43 }
 0xf4c   :  { %v5363_v5 = vmul.f32 0.6931472, %v10283_v41  ;;  %v5388_v30 = vadd.f32 %v5387_v34, %v5376_v48  ;;  %v5904_v22 = vadd.f32 %v5903_v36, %v12347_v45 }
 0xf4d   :  { %v5379_v29 = vmul.f32 %v5365_v40, %v12177_v13  ;;  %v12361_v13 = vsel %vm2125_vm0, %v2118_v3, -1e+30 }
 0xf4e   :  { %v10285_v33 = vpop.eup %10284  ;;  %v5378_v19 = vmul.f32 %v5363_v5, %v12172_v37  ;;  %v5389_v35 = vadd.f32 %v5388_v30, %v5377_v11 }
 0xf4f   :  { %v5367_v38 = vmul.f32 0.6931472, %v10285_v33 }
 0xf50   :  { %v5390_v10 = vadd.f32 %v5389_v35, %v5378_v19 }
 0xf51   :  { %v5380_v44 = vmul.f32 %v5367_v38, %v12192_v23  ;;  %v6848_v23 = vsel %vm546_vm1, %v12361_v13, -inf }
 0xf52   :  { %v5391_v37 = vadd.f32 %v5390_v10, %v5379_v29 }
 0xf54   :  { %v5392_v51 = vadd.f32 %v5391_v37, %v5380_v44 }
 0xf55   :  { %5905 = vadd.xlane.f32.xlu1 %v5904_v22 }
 0xf59   :  { %5393 = vadd.xlane.f32.xlu0 %v5392_v51 }
 0xf5d   :  { %6849 = vmax.xlane.f32.xlu0 %v6848_v23 }
 0xf70   :  { %v6154_v57 = vpop.trf.xlu0 }
 0xf71   :  { %9824 = vmatprep.mubr.msk.f32.mxu1 %vm2217_vm7, %v6154_v57 }
 0xf72   :  { %v6381_v58 = vpop.trf.xlu1 }
 0xf74   :  { %v6155_v54 = vpop.trf.xlu0 }
 0xf75   :  { %9825 = vmatmul.mubr.msk.f32.vlgmr.msra.gmra.mrb[142].mxu1 %vm2217_vm7, %v6155_v54 }
 0xf76   :  { %9849 = vmatpush3.msk.msra.mxu1 %vm1666_vm4, %v12207_v42  ;;  %v6382_v53 = vpop.trf.xlu1 }
 0xf78   :  { %v6156_v7 = vpop.trf.xlu0 }
 0xf79   :  { %9827 = vmatprep.mubr.msk.f32.mxu1 %vm2217_vm7, %v6156_v7 }
 0xf7a   :  { %v6383_v6 = vpop.trf.xlu1 }
 0xf7c   :  { %v6157_v4 = vpop.trf.xlu0 }
 0xf7d   :  { %9828 = vmatmul.mubr.msk.f32.gmra.mrb[144].mxu1 %vm2217_vm7, %v6157_v4 }
 0xf7e   :  { %v6384_v60 = vpop.trf.xlu1 }
 0xf80   :  { %v6158_v55 = vpop.trf.xlu0 }
 0xf81   :  { %9830 = vmatprep.mubr.msk.f32.mxu1 %vm2217_vm7, %v6158_v55 }
 0xf82   :  { %v6385_v61 = vpop.trf.xlu1 }
 0xf84   :  { %v6159_v27 = vpop.trf.xlu0 }
 0xf85   :  { %9831 = vmatmul.mubr.msk.f32.gmra.mrb[146].mxu1 %vm2217_vm7, %v6159_v27 }
 0xf86   :  { %v6386_v17 = vpop.trf.xlu1 }
 0xf88   :  { %v6160_v32 = vpop.trf.xlu0 }
 0xf89   :  { %9833 = vmatprep.mubr.msk.f32.mxu1 %vm2217_vm7, %v6160_v32 }
 0xf8a   :  { %v6387_v49 = vpop.trf.xlu1 }
 0xf8c   :  { %v6161_v42 = vpop.trf.xlu0 }
 0xf8d   :  { %9834 = vmatmul.mubr.msk.f32.gmra.mrb[148].mxu1 %vm2217_vm7, %v6161_v42 }
 0xf8e   :  { %v6388_v20 = vpop.trf.xlu1 }
 0xf90   :  { %v6162_v1 = vpop.trf.xlu0 }
 0xf91   :  { %9836 = vmatprep.mubr.msk.f32.mxu1 %vm2217_vm7, %v6162_v1 }
 0xf92   :  { %v6389_v26 = vpop.trf.xlu1 }
 0xf94   :  { %v6163_v47 = vpop.trf.xlu0 }
 0xf95   :  { %9837 = vmatmul.mubr.msk.f32.gmra.mrb[150].mxu1 %vm2217_vm7, %v6163_v47 }
 0xf96   :  { %v6390_v48 = vpop.trf.xlu1 }
 0xf98   :  { %v6164_v63 = vpop.trf.xlu0 }
 0xf99   :  { %9839 = vmatprep.mubr.msk.f32.mxu1 %vm2217_vm7, %v6164_v63 }
 0xf9a   :  { %v6391_v41 = vpop.trf.xlu1 }
 0xf9c   :  { %v6165_v25 = vpop.trf.xlu0 }
 0xf9d   :  { %9840 = vmatmul.mubr.msk.f32.gmra.mrb[152].mxu1 %vm2217_vm7, %v6165_v25 }
 0xf9e   :  { %v6392_v15 = vpop.trf.xlu1 }
 0xfa0   :  { %v6166_v56 = vpop.trf.xlu0 }
 0xfa1   :  { %9842 = vmatprep.mubr.msk.f32.mxu1 %vm2217_vm7, %v6166_v56 }
 0xfa2   :  { %v6393_v11 = vpop.trf.xlu1 }
 0xfa4   :  { %v6167_v50 = vpop.trf.xlu0 }
 0xfa5   :  { %9843 = vmatmul.mubr.msk.f32.gmra.mrb[154].mxu1 %vm2217_vm7, %v6167_v50 }
 0xfa6   :  { %v6394_v40 = vpop.trf.xlu1 }
 0xfa8   :  { %v6168_v21 = vpop.trf.xlu0 }
 0xfa9   :  { %9845 = vmatprep.mubr.msk.f32.mxu1 %vm2217_vm7, %v6168_v21 }
 0xfaa   :  { %v6395_v5 = vpop.trf.xlu1 }
 0xfac   :  { %v6169_v34 = vpop.trf.xlu0 }
 0xfad   :  { %9846 = vmatmul.mubr.msk.f32.gmra.mrb[156].mxu1 %vm2217_vm7, %v6169_v34 }
 0xfae   :  { %9850 = vmatprep.mubr.msk.f32.mxu1 %vm2217_vm7, %v6381_v58  ;;  %v6396_v30 = vpop.trf.xlu1 }
 0xfb1   :  { %9851 = vmatmul.mubr.msk.f32.vlgmr.msra.gmra.mrb[142].mxu1 %vm2217_vm7, %v6382_v53 }
 0xfb2   :  { %9853 = vmatprep.mubr.msk.f32.mxu1 %vm2217_vm7, %v6383_v6 }
 0xfb5   :  { %9854 = vmatmul.mubr.msk.f32.gmra.mrb[144].mxu1 %vm2217_vm7, %v6384_v60 }
 0xfb6   :  { %9856 = vmatprep.mubr.msk.f32.mxu1 %vm2217_vm7, %v6385_v61 }
 0xfb9   :  { %9857 = vmatmul.mubr.msk.f32.gmra.mrb[146].mxu1 %vm2217_vm7, %v6386_v17 }
 0xfba   :  { %9859 = vmatprep.mubr.msk.f32.mxu1 %vm2217_vm7, %v6387_v49 }
 0xfbd   :  { %9860 = vmatmul.mubr.msk.f32.gmra.mrb[148].mxu1 %vm2217_vm7, %v6388_v20 }
 0xfbe   :  { %9862 = vmatprep.mubr.msk.f32.mxu1 %vm2217_vm7, %v6389_v26 }
 0xfc1   :  { %9863 = vmatmul.mubr.msk.f32.gmra.mrb[150].mxu1 %vm2217_vm7, %v6390_v48 }
 0xfc2   :  { %9865 = vmatprep.mubr.msk.f32.mxu1 %vm2217_vm7, %v6391_v41 }
 0xfc5   :  { %9866 = vmatmul.mubr.msk.f32.gmra.mrb[152].mxu1 %vm2217_vm7, %v6392_v15 }
 0xfc6   :  { %9868 = vmatprep.mubr.msk.f32.mxu1 %vm2217_vm7, %v6393_v11 }
 0xfc9   :  { %9869 = vmatmul.mubr.msk.f32.gmra.mrb[154].mxu1 %vm2217_vm7, %v6394_v40 }
 0xfca   :  { %9871 = vmatprep.mubr.msk.f32.mxu1 %vm2217_vm7, %v6395_v5 }
 0xfcd   :  { %9872 = vmatmul.mubr.msk.f32.gmra.mrb[158].mxu1 %vm2217_vm7, %v6396_v30 }
 0xfe2   :  { %v5906_v33 = vpop.xlane.xlu1 %5905 }
 0xfe3   :  { %v5907_v19 = vrot.slane %v5906_v33, 4 }
 0xfe5   :  { %v5908_v35 = vadd.f32 %v5907_v19, %v5906_v33 }
 0xfe6   :  { %v5394_v38 = vpop.xlane.xlu0 %5393 }
 0xfe7   :  { %v5395_v36 = vrot.slane %v5394_v38, 4  ;;  %v5909_v29 = vrot.slane %v5908_v35, 2 }
 0xfe9   :  { %v5396_v10 = vadd.f32 %v5395_v36, %v5394_v38  ;;  %v5910_v0 = vadd.f32 %v5909_v29, %v5908_v35 }
 0xfea   :  { %v6850_v44 = vpop.xlane.xlu0 %6849 }
 0xfeb   :  { %v6851_v43 = vsub.f32 %v12361_v13, %v6850_v44  ;;  %v5397_v37 = vrot.slane %v5396_v10, 2  ;;  %v5911_v3 = vrot.slane %v5910_v0, 1 }
 0xfed   :  { %v6852_v22 = vmul.f32 1.442695, %v6851_v43  ;;  %v5398_v51 = vadd.f32 %v5397_v37, %v5396_v10  ;;  %v5912_v54 = vadd.f32 %v5911_v3, %v5910_v0 }
 0xfef   :  { %10286 = vpow2.f32 %v6852_v22  ;;  %v5399_v23 = vrot.slane %v5398_v51, 1 }
 0xff1   :  { %v5400_v57 = vadd.f32 %v5399_v23, %v5398_v51 }
 0xff3   :  { %10130 = vpush %v5400_v57 }
 0xff4   :  { %10132 = vpush %v5912_v54 }
 0xff9   :  { %v10287_v58 = vpop.eup %10286 }
 0xffa   :  { %v12402_v7 = vsel %vm2125_vm0, %v10287_v58, 0.0 }
 0xffb   :  { %v6855_v53 = vsel %vm546_vm1, %v12402_v7, 0.0 }
 0xffc   :  { %6856 = vadd.xlane.f32.xlu1 %v6855_v53 }
0x1024   :  { %s12406_s4 = spop %10130 }
0x1025   :  { %s10133_s2 = spop %10132 }
0x1026   :  { %v5914_v13 = vstv %s10133_s2 }
0x1027   :  { %10288 = vrcp.f32 %v5914_v13 }
0x1031   :  { %v10289_v4 = vpop.eup %10288 }
0x1032   :  { %v5917_v6 = vmul.f32 %v10289_v4, %v12241_v39  ;;  %v5916_v55 = vmul.f32 %v10289_v4, %v12243_v46  ;;  %v5919_v27 = vmul.f32 %v10289_v4, %v12267_v2  ;;  %v5918_v60 = vmul.f32 %v10289_v4, %v12249_v24 }
0x1033   :  { %v5921_v32 = vmul.f32 %v10289_v4, %v12289_v12  ;;  %v5920_v61 = vmul.f32 %v10289_v4, %v12271_v14  ;;  %v5923_v14 = vmul.f32 %v10289_v4, %v12304_v18  ;;  %v5922_v12 = vmul.f32 %v10289_v4, %v12293_v62 }
0x1034   :  { %vm5930_vm11 = vcmp.lt.f32.partialorder %v5917_v6, 1.1920929e-07  ;;  %vm5929_vm12 = vcmp.lt.f32.partialorder %v5916_v55, 1.1920929e-07  ;;  %vm5932_vm13 = vcmp.lt.f32.partialorder %v5919_v27, 1.1920929e-07  ;;  %vm5931_vm14 = vcmp.lt.f32.partialorder %v5918_v60, 1.1920929e-07 }
0x1035   :  { %v12414_v42 = vsel %vm5930_vm11, 1.1920929e-07, %v5917_v6  ;;  %v12416_v1 = vsel %vm5929_vm12, 1.1920929e-07, %v5916_v55  ;;  %v12430_v24 = vsel %vm5932_vm13, 1.1920929e-07, %v5919_v27  ;;  %v12432_v2 = vsel %vm5931_vm14, 1.1920929e-07, %v5918_v60 }
0x1036   :  { %v12421_v39 = vsel %vm2125_vm0, %v12414_v42, 0.0  ;;  %v12426_v46 = vsel %vm2125_vm0, %v12416_v1, 0.0  ;;  %vm5934_vm15 = vcmp.lt.f32.partialorder %v5921_v32, 1.1920929e-07  ;;  %vm5933_vm2 = vcmp.lt.f32.partialorder %v5920_v61, 1.1920929e-07 }
0x1037   :  { %5970 = vadd.xlane.f32.xlu1 %v12421_v39  ;;  %5968 = vadd.xlane.f32.xlu0 %v12426_v46  ;;  %v12439_v17 = vsel %vm2125_vm0, %v12430_v24, 0.0  ;;  %v12444_v47 = vsel %vm2125_vm0, %v12432_v2, 0.0  ;;  %v12448_v49 = vsel %vm5934_vm15, 1.1920929e-07, %v5921_v32  ;;  %v12450_v63 = vsel %vm5933_vm2, 1.1920929e-07, %v5920_v61 }
0x1038   :  { %vm5936_vm3 = vcmp.lt.f32.partialorder %v5923_v14, 1.1920929e-07  ;;  %vm5935_vm5 = vcmp.lt.f32.partialorder %v5922_v12, 1.1920929e-07  ;;  %v5925_v62 = vmul.f32 %v10289_v4, %v12327_v52  ;;  %v5924_v18 = vmul.f32 %v10289_v4, %v12315_v28 }
0x1039   :  { %v12457_v25 = vsel %vm2125_vm0, %v12448_v49, 0.0  ;;  %v12462_v20 = vsel %vm2125_vm0, %v12450_v63, 0.0  ;;  %v12466_v56 = vsel %vm5936_vm3, 1.1920929e-07, %v5923_v14  ;;  %v12468_v26 = vsel %vm5935_vm5, 1.1920929e-07, %v5922_v12 }
0x103a   :  { %vm5938_vm8 = vcmp.lt.f32.partialorder %v5925_v62, 1.1920929e-07  ;;  %vm5937_vm6 = vcmp.lt.f32.partialorder %v5924_v18, 1.1920929e-07  ;;  %v5927_v28 = vmul.f32 %v10289_v4, %v12341_v31  ;;  %v5926_v52 = vmul.f32 %v10289_v4, %v12335_v8 }
0x103b   :  { %5974 = vadd.xlane.f32.xlu1 %v12439_v17  ;;  %5972 = vadd.xlane.f32.xlu0 %v12444_v47  ;;  %v12475_v50 = vsel %vm2125_vm0, %v12466_v56, 0.0  ;;  %v12480_v21 = vsel %vm2125_vm0, %v12468_v26, 0.0  ;;  %v12484_v48 = vsel %vm5938_vm8, 1.1920929e-07, %v5925_v62  ;;  %v12486_v34 = vsel %vm5937_vm6, 1.1920929e-07, %v5924_v18 }
0x103c   :  { %vm5940_vm9 = vcmp.lt.f32.partialorder %v5927_v28, 1.1920929e-07  ;;  %vm5939_vm11 = vcmp.lt.f32.partialorder %v5926_v52, 1.1920929e-07  ;;  %v5928_v8 = vmul.f32 %v10289_v4, %v12347_v45  ;;  %v12492_v31 = vsel %vm2125_vm0, %v12484_v48, 0.0 }
0x103d   :  { %v12497_v41 = vsel %vm2125_vm0, %v12486_v34, 0.0  ;;  %v12501_v15 = vsel %vm5940_vm9, 1.1920929e-07, %v5927_v28  ;;  %v12503_v11 = vsel %vm5939_vm11, 1.1920929e-07, %v5926_v52  ;;  %v5994_v33 = vadd.f32 %v12421_v39, %v12426_v46 }
0x103e   :  { %vm5941_vm12 = vcmp.lt.f32.partialorder %v5928_v8, 1.1920929e-07  ;;  %v12508_v45 = vsel %vm2125_vm0, %v12501_v15, 0.0  ;;  %v12513_v40 = vsel %vm2125_vm0, %v12503_v11, 0.0 }
0x103f   :  { %5978 = vadd.xlane.f32.xlu1 %v12457_v25  ;;  %5976 = vadd.xlane.f32.xlu0 %v12462_v20  ;;  %v12517_v5 = vsel %vm5941_vm12, 1.1920929e-07, %v5928_v8  ;;  %v5995_v38 = vadd.f32 %v5994_v33, %v12444_v47 }
0x1040   :  { %v12522_v30 = vsel %vm12183_vm10, %v12517_v5, 0.0 }
0x1041   :  { %v5996_v10 = vadd.f32 %v5995_v38, %v12439_v17 }
0x1043   :  { %5982 = vadd.xlane.f32.xlu1 %v12475_v50  ;;  %5980 = vadd.xlane.f32.xlu0 %v12480_v21  ;;  %v5997_v37 = vadd.f32 %v5996_v10, %v12462_v20 }
0x1045   :  { %v5998_v3 = vadd.f32 %v5997_v37, %v12457_v25 }
0x1047   :  { %5986 = vadd.xlane.f32.xlu1 %v12492_v31  ;;  %5984 = vadd.xlane.f32.xlu0 %v12497_v41  ;;  %v5999_v54 = vadd.f32 %v5998_v3, %v12480_v21 }
0x1049   :  { %v6000_v6 = vadd.f32 %v5999_v54, %v12475_v50 }
0x104b   :  { %5990 = vadd.xlane.f32.xlu1 %v12508_v45  ;;  %5988 = vadd.xlane.f32.xlu0 %v12513_v40 }
0x104f   :  { %5992 = vadd.xlane.f32.xlu0 %v12522_v30 }
0x1080   :  { %v9847_v19 = vpop.f32.mrb[156].mxu1 }
0x1081   :  { %v6357_v35 = vpop.f32.mrb[157].mxu1 }
0x1084   :  { %v12528_v36 = vpop.f32.mrb[142].mxu1 }
0x1085   :  { %v12530_v29 = vpop.f32.mrb[143].mxu1 }
0x1088   :  { %v12533_v44 = vpop.f32.mrb[144].mxu1 }
0x1089   :  { %v6857_v0 = vpop.xlane.xlu1 %6856  ;;  %v12535_v43 = vpop.f32.mrb[145].mxu1 }
0x108a   :  { %10290 = vrcp.f32 %v6857_v0 }
0x108b   :  { %10292 = vrcp.f32 %v12414_v42 }
0x108c   :  { %v12538_v22 = vpop.f32.mrb[146].mxu1  ;;  %10294 = vrcp.f32 %v12416_v1 }
0x108d   :  { %v12540_v51 = vpop.f32.mrb[147].mxu1  ;;  %10296 = vrcp.f32 %v12430_v24 }
0x108e   :  { %10298 = vrcp.f32 %v12432_v2 }
0x108f   :  { %10300 = vrcp.f32 %v12448_v49 }
0x1090   :  { %v12543_v23 = vpop.f32.mrb[148].mxu1  ;;  %10302 = vrcp.f32 %v12450_v63 }
0x1091   :  { %v12545_v57 = vpop.f32.mrb[149].mxu1  ;;  %10304 = vrcp.f32 %v12466_v56 }
0x1092   :  { %10306 = vrcp.f32 %v12468_v26 }
0x1093   :  { %10308 = vrcp.f32 %v12484_v48  ;;  %v12594_v48 = vmul.f32 0.5, %v12528_v36 }
0x1094   :  { %v10291_v58 = vpop.eup %10290  ;;  %v12548_v53 = vpop.f32.mrb[150].mxu1  ;;  %10310 = vrcp.f32 %v12486_v34 }
0x1095   :  { %v12551_v13 = vmul.f32 %v10291_v58, %v12402_v7  ;;  %v12553_v4 = vpop.f32.mrb[151].mxu1  ;;  %v6001_v7 = vadd.f32 %v6000_v6, %v12497_v41  ;;  %v10293_v3 = vpop.eup %10292 }
0x1096   :  { %v10295_v54 = vpop.eup %10294 }
0x1097   :  { %6860 = vxpose.xlu1.b32.start.end [1/1] (short) %v12551_v13, 128  ;;  %v6893_v55 = vrot.slane %v12551_v13, 2  ;;  %v6002_v14 = vadd.f32 %v6001_v7, %v12492_v31  ;;  %v10297_v58 = vpop.eup %10296 }
0x1098   :  { %v12558_v27 = vpop.f32.mrb[152].mxu1  ;;  %v10299_v26 = vpop.eup %10298 }
0x1099   :  { %7087 = vxpose.xlu0.b32.start.end [1/1] (short) %v6893_v55, 128  ;;  %9874 = vmatprep.subr.msk.mxu0 %vm1666_vm4, %v6893_v55  ;;  %v12561_v60 = vpop.f32.mrb[153].mxu1  ;;  %v6003_v18 = vadd.f32 %v6002_v14, %v12513_v40 }
0x109a   :  { %9875 = vmatpush3.msk.msra.mxu0 %vm1666_vm4, %v6893_v55 }
0x109b   :  { %9900 = vmatprep.subr.msk.mxu0 %vm1666_vm4, %v12551_v13  ;;  %v6004_v28 = vadd.f32 %v6003_v18, %v12508_v45 }
0x109c   :  { %v9870_v32 = vpop.f32.mrb[154].mxu1 }
0x109d   :  { %v12567_v61 = vpop.f32.mrb[155].mxu1  ;;  %v6005_v52 = vadd.f32 %v6004_v28, %v12522_v30  ;;  %v12597_v32 = vmul.f32 0.5, %v12530_v29  ;;  %v10301_v28 = vpop.eup %10300 }
0x109f   :  { %v6006_v8 = vrot.slane %v6005_v52, 4 }
0x10a0   :  { %v9873_v12 = vpop.f32.mrb[158].mxu1 }
0x10a1   :  { %v6582_v62 = vpop.f32.mrb[159].mxu1  ;;  %v6007_v33 = vadd.f32 %v6006_v8, %v6005_v52  ;;  %v12601_v12 = vmul.f32 0.5, %v12535_v43 }
0x10a3   :  { %v6008_v19 = vrot.slane %v6007_v33, 2 }
0x10a5   :  { %v6009_v35 = vadd.f32 %v6008_v19, %v6007_v33  ;;  %v10303_v33 = vpop.eup %10302 }
0x10a6   :  { %v10305_v43 = vpop.eup %10304 }
0x10a7   :  { %v6010_v38 = vrot.slane %v6009_v35, 1 }
0x10a9   :  { %v12578_v10 = vadd.f32 %v6010_v38, %v6009_v35  ;;  %v10307_v38 = vpop.eup %10306 }
0x10c4   :  { %v5969_v0 = vpop.xlane.xlu0 %5968  ;;  %v5971_v37 = vpop.xlane.xlu1 %5970 }
0x10c5   :  { %v6012_v42 = vmul.f32 %v12578_v10, %v5969_v0  ;;  %v6013_v1 = vmul.f32 %v12578_v10, %v5971_v37 }
0x10c7   :  { %v6026_v24 = vmul.f32 %v10295_v54, %v6012_v42  ;;  %v6028_v2 = vmul.f32 %v10293_v3, %v6013_v1  ;;  %v10309_v42 = vpop.eup %10308 }
0x10c8   :  { %v5973_v49 = vpop.xlane.xlu0 %5972  ;;  %v5975_v63 = vpop.xlane.xlu1 %5974 }
0x10c9   :  { %v6051_v6 = vsel %vm2125_vm0, %v6026_v24, 1.0  ;;  %v6052_v56 = vsel %vm2125_vm0, %v6028_v2, 1.0  ;;  %v6014_v55 = vmul.f32 %v12578_v10, %v5973_v49  ;;  %v6015_v7 = vmul.f32 %v12578_v10, %v5975_v63  ;;  %v10311_v49 = vpop.eup %10310 }
0x10ca   :  { %10312 = vlog2.f32 %v6051_v6  ;;  %v12620_v63 = vmul.f32 0.5, %v12533_v44 }
0x10cb   :  { %10314 = vlog2.f32 %v6052_v56  ;;  %v6030_v34 = vmul.f32 %v10299_v26, %v6014_v55  ;;  %v6032_v14 = vmul.f32 %v10297_v58, %v6015_v7  ;;  %v12624_v56 = vmul.f32 0.5, %v12540_v51 }
0x10cc   :  { %10316 = vrcp.f32 %v12501_v15  ;;  %v5977_v62 = vpop.xlane.xlu0 %5976  ;;  %v5979_v18 = vpop.xlane.xlu1 %5978  ;;  %v6615_v15 = vadd.f32 %v12594_v48, %v12597_v32 }
0x10cd   :  { %v6053_v52 = vsel %vm2125_vm0, %v6030_v34, 1.0  ;;  %v6054_v36 = vsel %vm2125_vm0, %v6032_v14, 1.0  ;;  %v6016_v29 = vmul.f32 %v12578_v10, %v5977_v62  ;;  %v6017_v8 = vmul.f32 %v12578_v10, %v5979_v18 }
0x10ce   :  { %10318 = vlog2.f32 %v6053_v52  ;;  %v6616_v0 = vadd.f32 %v6615_v15, %v12601_v12 }
0x10cf   :  { %10320 = vlog2.f32 %v6054_v36  ;;  %v6034_v19 = vmul.f32 %v10303_v33, %v6016_v29  ;;  %v6036_v35 = vmul.f32 %v10301_v28, %v6017_v8  ;;  %v12635_v8 = vmul.f32 0.5, %v12538_v22 }
0x10d0   :  { %10322 = vrcp.f32 %v12503_v11  ;;  %v5981_v37 = vpop.xlane.xlu0 %5980  ;;  %v5983_v3 = vpop.xlane.xlu1 %5982  ;;  %v6617_v55 = vadd.f32 %v6616_v0, %v12620_v63 }
0x10d1   :  { %v6055_v1 = vsel %vm2125_vm0, %v6034_v19, 1.0  ;;  %v6056_v54 = vsel %vm2125_vm0, %v6036_v35, 1.0  ;;  %v6018_v24 = vmul.f32 %v12578_v10, %v5981_v37  ;;  %v6019_v2 = vmul.f32 %v12578_v10, %v5983_v3 }
0x10d2   :  { %10324 = vlog2.f32 %v6055_v1  ;;  %v6618_v33 = vadd.f32 %v6617_v55, %v12624_v56 }
0x10d3   :  { %10326 = vlog2.f32 %v6056_v54  ;;  %v6038_v11 = vmul.f32 %v10307_v38, %v6018_v24  ;;  %v6040_v58 = vmul.f32 %v10305_v43, %v6019_v2 }
0x10d4   :  { %v10313_v6 = vpop.eup %10312  ;;  %10328 = vrcp.f32 %v12517_v5  ;;  %v5985_v7 = vpop.xlane.xlu0 %5984 }
0x10d5   :  { %v5987_v26 = vpop.xlane.xlu1 %5986  ;;  %v10315_v34 = vpop.eup %10314  ;;  %v6065_v14 = vmul.f32 0.6931472, %v10313_v6  ;;  %v6057_v44 = vsel %vm2125_vm0, %v6038_v11, 1.0  ;;  %v6058_v62 = vsel %vm2125_vm0, %v6040_v58, 1.0  ;;  %v6020_v18 = vmul.f32 %v12578_v10, %v5985_v7 }
0x10d6   :  { %v10317_v28 = vpop.eup %10316  ;;  %v6067_v52 = vmul.f32 0.6931472, %v10315_v34  ;;  %10330 = vlog2.f32 %v6057_v44  ;;  %v6021_v5 = vmul.f32 %v12578_v10, %v5987_v26  ;;  %v12647_v11 = vmul.f32 0.5, %v12545_v57 }
0x10d7   :  { %v6090_v51 = vmul.f32 %v6065_v14, %v12426_v46  ;;  %10332 = vlog2.f32 %v6058_v62  ;;  %v6042_v36 = vmul.f32 %v10311_v49, %v6020_v18  ;;  %v6619_v58 = vadd.f32 %v6618_v33, %v12635_v8 }
0x10d8   :  { %v10319_v29 = vpop.eup %10318  ;;  %v6091_v15 = vmul.f32 %v6067_v52, %v12421_v39  ;;  %v6044_v43 = vmul.f32 %v10309_v42, %v6021_v5  ;;  %v5989_v19 = vpop.xlane.xlu0 %5988  ;;  %v12658_v52 = vmul.f32 0.5, %v12543_v23  ;;  %v12666_v23 = vmul.f32 0.5, %v12553_v4 }
0x10d9   :  { %v5991_v35 = vpop.xlane.xlu1 %5990  ;;  %v10321_v38 = vpop.eup %10320  ;;  %v6069_v0 = vmul.f32 0.6931472, %v10319_v29  ;;  %v6059_v37 = vsel %vm2125_vm0, %v6042_v36, 1.0  ;;  %v6022_v46 = vmul.f32 %v12578_v10, %v5989_v19  ;;  %v6620_v5 = vadd.f32 %v6619_v58, %v12647_v11 }
0x10da   :  { %v6023_v3 = vmul.f32 %v12578_v10, %v5991_v35  ;;  %v10323_v1 = vpop.eup %10322  ;;  %v6103_v54 = vadd.f32 %v6091_v15, %v6090_v51  ;;  %v6071_v22 = vmul.f32 0.6931472, %v10321_v38  ;;  %10334 = vlog2.f32 %v6059_v37 }
0x10db   :  { %v6060_v24 = vsel %vm2125_vm0, %v6044_v43, 1.0  ;;  %v6092_v39 = vmul.f32 %v6069_v0, %v12444_v47  ;;  %v6046_v42 = vmul.f32 %v10323_v1, %v6022_v46  ;;  %v6621_v38 = vadd.f32 %v6620_v5, %v12658_v52 }
0x10dc   :  { %10336 = vlog2.f32 %v6060_v24  ;;  %v6048_v2 = vmul.f32 %v10317_v28, %v6023_v3  ;;  %v10325_v49 = vpop.eup %10324  ;;  %v6093_v6 = vmul.f32 %v6071_v22, %v12439_v17  ;;  %v5993_v55 = vpop.xlane.xlu0 %5992  ;;  %v12672_v24 = vmul.f32 0.5, %v12548_v53 }
0x10dd   :  { %v10327_v7 = vpop.eup %10326  ;;  %v6104_v26 = vadd.f32 %v6103_v54, %v6092_v39  ;;  %v6073_v34 = vmul.f32 0.6931472, %v10325_v49  ;;  %v6061_v14 = vsel %vm2125_vm0, %v6046_v42, 1.0  ;;  %v6024_v57 = vmul.f32 %v12578_v10, %v5993_v55 }
0x10de   :  { %v6062_v47 = vsel %vm2125_vm0, %v6048_v2, 1.0  ;;  %v10329_v44 = vpop.eup %10328  ;;  %v6075_v62 = vmul.f32 0.6931472, %v10327_v7  ;;  %10338 = vlog2.f32 %v6061_v14  ;;  %v12683_v14 = vmul.f32 0.5, %v12558_v27 }
0x10df   :  { %v6105_v18 = vadd.f32 %v6104_v26, %v6093_v6  ;;  %v6094_v28 = vmul.f32 %v6073_v34, %v12462_v20  ;;  %10340 = vlog2.f32 %v6062_v47  ;;  %v6050_v51 = vmul.f32 %v10329_v44, %v6024_v57 }
0x10e0   :  { %v10331_v17 = vpop.eup %10330  ;;  %v6095_v33 = vmul.f32 %v6075_v62, %v12457_v25  ;;  %v12678_v6 = vmul.f32 0.5, %v12561_v60  ;;  %v12688_v44 = vmul.f32 0.5, %v12567_v61 }
0x10e1   :  { %v10333_v36 = vpop.eup %10332  ;;  %v6106_v29 = vadd.f32 %v6105_v18, %v6094_v28  ;;  %v6077_v15 = vmul.f32 0.6931472, %v10331_v17  ;;  %v6063_v10 = vsel %vm12183_vm10, %v6050_v51, 1.0 }
0x10e2   :  { %v6079_v43 = vmul.f32 0.6931472, %v10333_v36  ;;  %10342 = vlog2.f32 %v6063_v10 }
0x10e3   :  { %v6107_v19 = vadd.f32 %v6106_v29, %v6095_v33  ;;  %v6096_v20 = vmul.f32 %v6077_v15, %v12480_v21  ;;  %v6622_v21 = vadd.f32 %v6621_v38, %v12666_v23 }
0x10e4   :  { %v10335_v35 = vpop.eup %10334  ;;  %v6097_v46 = vmul.f32 %v6079_v43, %v12475_v50 }
0x10e5   :  { %v6108_v37 = vadd.f32 %v6107_v19, %v6096_v20  ;;  %v6081_v25 = vmul.f32 0.6931472, %v10335_v35 }
0x10e6   :  { %v10337_v0 = vpop.eup %10336 }
0x10e7   :  { %v6083_v3 = vmul.f32 0.6931472, %v10337_v0  ;;  %v6109_v1 = vadd.f32 %v6108_v37, %v6097_v46  ;;  %v6098_v54 = vmul.f32 %v6081_v25, %v12497_v41  ;;  %v6623_v41 = vadd.f32 %v6622_v21, %v12672_v24 }
0x10e8   :  { %v10339_v22 = vpop.eup %10338 }
0x10e9   :  { %v10341_v39 = vpop.eup %10340  ;;  %v6099_v4 = vmul.f32 %v6083_v3, %v12492_v31  ;;  %v6085_v42 = vmul.f32 0.6931472, %v10339_v22  ;;  %v6110_v2 = vadd.f32 %v6109_v1, %v6098_v54  ;;  %v6624_v31 = vadd.f32 %v6623_v41, %v12678_v6 }
0x10ea   :  { %v6087_v49 = vmul.f32 0.6931472, %v10341_v39 }
0x10eb   :  { %v6100_v58 = vmul.f32 %v6085_v42, %v12513_v40  ;;  %v6111_v50 = vadd.f32 %v6110_v2, %v6099_v4  ;;  %v6625_v60 = vadd.f32 %v6624_v31, %v12683_v14 }
0x10ec   :  { %v10343_v55 = vpop.eup %10342  ;;  %v6101_v53 = vmul.f32 %v6087_v49, %v12508_v45  ;;  %v12695_v45 = vsel %vm2125_vm0, %v11529_v9, -1e+30 }
0x10ed   :  { %v6112_v7 = vadd.f32 %v6111_v50, %v6100_v58  ;;  %v6089_v26 = vmul.f32 0.6931472, %v10343_v55  ;;  %v6626_v62 = vadd.f32 %v6625_v60, %v12688_v44  ;;  %v7570_v27 = vsel %vm546_vm1, %v12695_v45, -inf }
0x10ef   :  { %v6113_v34 = vadd.f32 %v6112_v7, %v6101_v53  ;;  %v6102_v47 = vmul.f32 %v6089_v26, %v12522_v30 }
0x10f1   :  { %v6114_v40 = vadd.f32 %v6113_v34, %v6102_v47 }
0x10fa   :  { %6627 = vadd.xlane.f32.xlu1 %v6626_v62 }
0x10fe   :  { %7571 = vmax.xlane.f32.xlu1 %v7570_v27 }
0x1102   :  { %6115 = vadd.xlane.f32.xlu0 %v6114_v40 }
0x1117   :  { %v6876_v30 = vpop.trf.xlu1 }
0x1118   :  { %9876 = vmatprep.mubr.msk.f32.mxu0 %vm2217_vm7, %v6876_v30 }
0x1119   :  { %v7103_v57 = vpop.trf.xlu0 }
0x111b   :  { %v6877_v61 = vpop.trf.xlu1 }
0x111c   :  { %9877 = vmatmul.mubr.msk.f32.vlgmr.msra.gmra.mrb[184].mxu0 %vm2217_vm7, %v6877_v61 }
0x111d   :  { %9901 = vmatpush3.msk.msra.mxu0 %vm1666_vm4, %v12551_v13  ;;  %v7104_v9 = vpop.trf.xlu0 }
0x111f   :  { %v6878_v18 = vpop.trf.xlu1 }
0x1120   :  { %9879 = vmatprep.mubr.msk.f32.mxu0 %vm2217_vm7, %v6878_v18 }
0x1121   :  { %v7105_v5 = vpop.trf.xlu0 }
0x1123   :  { %v6879_v28 = vpop.trf.xlu1 }
0x1124   :  { %9880 = vmatmul.mubr.msk.f32.gmra.mrb[186].mxu0 %vm2217_vm7, %v6879_v28 }
0x1125   :  { %v7106_v36 = vpop.trf.xlu0 }
0x1127   :  { %v6880_v17 = vpop.trf.xlu1 }
0x1128   :  { %9882 = vmatprep.mubr.msk.f32.mxu0 %vm2217_vm7, %v6880_v17 }
0x1129   :  { %v7107_v33 = vpop.trf.xlu0 }
0x112b   :  { %v6881_v51 = vpop.trf.xlu1 }
0x112c   :  { %9883 = vmatmul.mubr.msk.f32.gmra.mrb[188].mxu0 %vm2217_vm7, %v6881_v51 }
0x112d   :  { %v7108_v43 = vpop.trf.xlu0 }
0x112f   :  { %v6882_v29 = vpop.trf.xlu1 }
0x1130   :  { %9885 = vmatprep.mubr.msk.f32.mxu0 %vm2217_vm7, %v6882_v29 }
0x1131   :  { %v7109_v19 = vpop.trf.xlu0 }
0x1133   :  { %v6883_v13 = vpop.trf.xlu1 }
0x1134   :  { %9886 = vmatmul.mubr.msk.f32.gmra.mrb[190].mxu0 %vm2217_vm7, %v6883_v13 }
0x1135   :  { %v7110_v38 = vpop.trf.xlu0 }
0x1137   :  { %v6884_v15 = vpop.trf.xlu1 }
0x1138   :  { %9888 = vmatprep.mubr.msk.f32.mxu0 %vm2217_vm7, %v6884_v15 }
0x1139   :  { %v7111_v37 = vpop.trf.xlu0 }
0x113b   :  { %v6885_v10 = vpop.trf.xlu1 }
0x113c   :  { %9889 = vmatmul.mubr.msk.f32.gmra.mrb[192].mxu0 %vm2217_vm7, %v6885_v10 }
0x113d   :  { %v7112_v3 = vpop.trf.xlu0 }
0x113f   :  { %v6886_v20 = vpop.trf.xlu1 }
0x1140   :  { %9891 = vmatprep.mubr.msk.f32.mxu0 %vm2217_vm7, %v6886_v20 }
0x1141   :  { %v7113_v54 = vpop.trf.xlu0 }
0x1143   :  { %v6887_v35 = vpop.trf.xlu1 }
0x1144   :  { %9892 = vmatmul.mubr.msk.f32.gmra.mrb[194].mxu0 %vm2217_vm7, %v6887_v35 }
0x1145   :  { %v7114_v22 = vpop.trf.xlu0 }
0x1147   :  { %v6888_v0 = vpop.trf.xlu1 }
0x1148   :  { %9894 = vmatprep.mubr.msk.f32.mxu0 %vm2217_vm7, %v6888_v0 }
0x1149   :  { %v7115_v21 = vpop.trf.xlu0 }
0x114b   :  { %v6889_v46 = vpop.trf.xlu1 }
0x114c   :  { %9895 = vmatmul.mubr.msk.f32.gmra.mrb[196].mxu0 %vm2217_vm7, %v6889_v46 }
0x114d   :  { %v7116_v39 = vpop.trf.xlu0 }
0x114f   :  { %v6890_v25 = vpop.trf.xlu1 }
0x1150   :  { %9897 = vmatprep.mubr.msk.f32.mxu0 %vm2217_vm7, %v6890_v25 }
0x1151   :  { %v7117_v4 = vpop.trf.xlu0 }
0x1153   :  { %v6891_v1 = vpop.trf.xlu1 }
0x1154   :  { %9898 = vmatmul.mubr.msk.f32.gmra.mrb[198].mxu0 %vm2217_vm7, %v6891_v1 }
0x1155   :  { %9902 = vmatprep.mubr.msk.f32.mxu0 %vm2217_vm7, %v7103_v57  ;;  %v7118_v42 = vpop.trf.xlu0 }
0x1158   :  { %9903 = vmatmul.mubr.msk.f32.vlgmr.msra.gmra.mrb[184].mxu0 %vm2217_vm7, %v7104_v9 }
0x1159   :  { %9905 = vmatprep.mubr.msk.f32.mxu0 %vm2217_vm7, %v7105_v5 }
0x115c   :  { %9906 = vmatmul.mubr.msk.f32.gmra.mrb[186].mxu0 %vm2217_vm7, %v7106_v36 }
0x115d   :  { %9908 = vmatprep.mubr.msk.f32.mxu0 %vm2217_vm7, %v7107_v33 }
0x1160   :  { %9909 = vmatmul.mubr.msk.f32.gmra.mrb[188].mxu0 %vm2217_vm7, %v7108_v43 }
0x1161   :  { %9911 = vmatprep.mubr.msk.f32.mxu0 %vm2217_vm7, %v7109_v19 }
0x1164   :  { %9912 = vmatmul.mubr.msk.f32.gmra.mrb[190].mxu0 %vm2217_vm7, %v7110_v38 }
0x1165   :  { %9914 = vmatprep.mubr.msk.f32.mxu0 %vm2217_vm7, %v7111_v37 }
0x1168   :  { %9915 = vmatmul.mubr.msk.f32.gmra.mrb[192].mxu0 %vm2217_vm7, %v7112_v3 }
0x1169   :  { %9917 = vmatprep.mubr.msk.f32.mxu0 %vm2217_vm7, %v7113_v54 }
0x116c   :  { %9918 = vmatmul.mubr.msk.f32.gmra.mrb[194].mxu0 %vm2217_vm7, %v7114_v22 }
0x116d   :  { %9920 = vmatprep.mubr.msk.f32.mxu0 %vm2217_vm7, %v7115_v21 }
0x1170   :  { %9921 = vmatmul.mubr.msk.f32.gmra.mrb[196].mxu0 %vm2217_vm7, %v7116_v39 }
0x1171   :  { %9923 = vmatprep.mubr.msk.f32.mxu0 %vm2217_vm7, %v7117_v4 }
0x1174   :  { %9924 = vmatmul.mubr.msk.f32.gmra.mrb[200].mxu0 %vm2217_vm7, %v7118_v42 }
0x1187   :  { %v6628_v2 = vpop.xlane.xlu1 %6627 }
0x1188   :  { %v6629_v49 = vrot.slane %v6628_v2, 4 }
0x118a   :  { %v6630_v58 = vadd.f32 %v6629_v49, %v6628_v2 }
0x118b   :  { %v7572_v50 = vpop.xlane.xlu1 %7571 }
0x118c   :  { %v7573_v41 = vsub.f32 %v12695_v45, %v7572_v50  ;;  %v6631_v53 = vrot.slane %v6630_v58, 2 }
0x118e   :  { %v7574_v55 = vmul.f32 1.442695, %v7573_v41  ;;  %v6632_v31 = vadd.f32 %v6631_v53, %v6630_v58 }
0x118f   :  { %v6116_v7 = vpop.xlane.xlu0 %6115 }
0x1190   :  { %10344 = vpow2.f32 %v7574_v55  ;;  %v6117_v26 = vrot.slane %v6116_v7, 4  ;;  %v6633_v60 = vrot.slane %v6632_v31, 1 }
0x1192   :  { %v6118_v34 = vadd.f32 %v6117_v26, %v6116_v7  ;;  %v6634_v61 = vadd.f32 %v6633_v60, %v6632_v31 }
0x1194   :  { %v6119_v47 = vrot.slane %v6118_v34, 2 }
0x1196   :  { %v6120_v40 = vadd.f32 %v6119_v47, %v6118_v34 }
0x1198   :  { %v6121_v62 = vrot.slane %v6120_v40, 1 }
0x119a   :  { %v10345_v27 = vpop.eup %10344  ;;  %v6122_v30 = vadd.f32 %v6121_v62, %v6120_v40 }
0x119b   :  { %v12736_v57 = vsel %vm2125_vm0, %v10345_v27, 0.0 }
0x119c   :  { %10134 = vpush %v6122_v30  ;;  %v7577_v45 = vsel %vm546_vm1, %v12736_v57, 0.0 }
0x119d   :  { %10136 = vpush %v6634_v61  ;;  %7578 = vadd.xlane.f32.xlu0 %v7577_v45 }
0x11cd   :  { %s12740_s21 = spop %10134 }
0x11ce   :  { %s10137_s22 = spop %10136  ;;  %s6124_s23 = sadd.f32 %s12740_s21, %s12406_s4 }
0x11cf   :  { %v6636_v18 = vstv %s10137_s22 }
0x11d0   :  { %10346 = vrcp.f32 %v6636_v18 }
0x11da   :  { %v10347_v9 = vpop.eup %10346 }
0x11db   :  { %v6638_v28 = vmul.f32 %v10347_v9, %v12597_v32  ;;  %v6639_v17 = vmul.f32 %v10347_v9, %v12594_v48  ;;  %v6640_v5 = vmul.f32 %v10347_v9, %v12601_v12  ;;  %v6641_v51 = vmul.f32 %v10347_v9, %v12620_v63 }
0x11dc   :  { %v6642_v36 = vmul.f32 %v10347_v9, %v12624_v56  ;;  %v6643_v29 = vmul.f32 %v10347_v9, %v12635_v8  ;;  %v6644_v56 = vmul.f32 %v10347_v9, %v12647_v11  ;;  %v6645_v8 = vmul.f32 %v10347_v9, %v12658_v52 }
0x11dd   :  { %vm6651_vm1 = vcmp.lt.f32.partialorder %v6638_v28, 1.1920929e-07  ;;  %vm6652_vm13 = vcmp.lt.f32.partialorder %v6639_v17, 1.1920929e-07  ;;  %vm6653_vm14 = vcmp.lt.f32.partialorder %v6640_v5, 1.1920929e-07  ;;  %vm6654_vm15 = vcmp.lt.f32.partialorder %v6641_v51, 1.1920929e-07 }
0x11de   :  { %v12748_v33 = vsel %vm6651_vm1, 1.1920929e-07, %v6638_v28  ;;  %v12750_v13 = vsel %vm6652_vm13, 1.1920929e-07, %v6639_v17  ;;  %v12764_v12 = vsel %vm6653_vm14, 1.1920929e-07, %v6640_v5  ;;  %v12766_v63 = vsel %vm6654_vm15, 1.1920929e-07, %v6641_v51 }
0x11df   :  { %v12755_v48 = vsel %vm2125_vm0, %v12748_v33, 0.0  ;;  %v12760_v32 = vsel %vm2125_vm0, %v12750_v13, 0.0  ;;  %vm6655_vm2 = vcmp.lt.f32.partialorder %v6642_v36, 1.1920929e-07  ;;  %vm6656_vm3 = vcmp.lt.f32.partialorder %v6643_v29, 1.1920929e-07 }
0x11e0   :  { %6690 = vadd.xlane.f32.xlu1 %v12755_v48  ;;  %6692 = vadd.xlane.f32.xlu0 %v12760_v32  ;;  %v12773_v15 = vsel %vm2125_vm0, %v12764_v12, 0.0  ;;  %v12778_v43 = vsel %vm2125_vm0, %v12766_v63, 0.0  ;;  %v12782_v10 = vsel %vm6655_vm2, 1.1920929e-07, %v6642_v36  ;;  %v12784_v19 = vsel %vm6656_vm3, 1.1920929e-07, %v6643_v29 }
0x11e1   :  { %vm6657_vm5 = vcmp.lt.f32.partialorder %v6644_v56, 1.1920929e-07  ;;  %vm6658_vm8 = vcmp.lt.f32.partialorder %v6645_v8, 1.1920929e-07  ;;  %v6646_v11 = vmul.f32 %v10347_v9, %v12666_v23  ;;  %v6647_v52 = vmul.f32 %v10347_v9, %v12672_v24 }
0x11e2   :  { %v12791_v20 = vsel %vm2125_vm0, %v12782_v10, 0.0  ;;  %v12796_v35 = vsel %vm2125_vm0, %v12784_v19, 0.0  ;;  %v12800_v38 = vsel %vm6657_vm5, 1.1920929e-07, %v6644_v56  ;;  %v12802_v0 = vsel %vm6658_vm8, 1.1920929e-07, %v6645_v8 }
0x11e3   :  { %vm6659_vm6 = vcmp.lt.f32.partialorder %v6646_v11, 1.1920929e-07  ;;  %vm6660_vm9 = vcmp.lt.f32.partialorder %v6647_v52, 1.1920929e-07  ;;  %v6648_v23 = vmul.f32 %v10347_v9, %v12678_v6  ;;  %v6649_v24 = vmul.f32 %v10347_v9, %v12683_v14 }
0x11e4   :  { %6694 = vadd.xlane.f32.xlu1 %v12773_v15  ;;  %6696 = vadd.xlane.f32.xlu0 %v12778_v43  ;;  %v12809_v37 = vsel %vm2125_vm0, %v12800_v38, 0.0  ;;  %v12814_v46 = vsel %vm2125_vm0, %v12802_v0, 0.0  ;;  %v12818_v25 = vsel %vm6659_vm6, 1.1920929e-07, %v6646_v11  ;;  %v12820_v3 = vsel %vm6660_vm9, 1.1920929e-07, %v6647_v52 }
0x11e5   :  { %vm6661_vm11 = vcmp.lt.f32.partialorder %v6648_v23, 1.1920929e-07  ;;  %vm6662_vm12 = vcmp.lt.f32.partialorder %v6649_v24, 1.1920929e-07  ;;  %v6650_v6 = vmul.f32 %v10347_v9, %v12688_v44  ;;  %v12826_v14 = vsel %vm2125_vm0, %v12818_v25, 0.0 }
0x11e6   :  { %v12831_v1 = vsel %vm2125_vm0, %v12820_v3, 0.0  ;;  %v12835_v54 = vsel %vm6661_vm11, 1.1920929e-07, %v6648_v23  ;;  %v12837_v22 = vsel %vm6662_vm12, 1.1920929e-07, %v6649_v24  ;;  %v6716_v2 = vadd.f32 %v12760_v32, %v12755_v48 }
0x11e7   :  { %vm6663_vm1 = vcmp.lt.f32.partialorder %v6650_v6, 1.1920929e-07  ;;  %v12842_v44 = vsel %vm2125_vm0, %v12835_v54, 0.0  ;;  %v12847_v21 = vsel %vm2125_vm0, %v12837_v22, 0.0 }
0x11e8   :  { %6698 = vadd.xlane.f32.xlu1 %v12791_v20  ;;  %6700 = vadd.xlane.f32.xlu0 %v12796_v35  ;;  %v12851_v39 = vsel %vm6663_vm1, 1.1920929e-07, %v6650_v6  ;;  %v6717_v41 = vadd.f32 %v6716_v2, %v12773_v15 }
0x11e9   :  { %v12856_v4 = vsel %vm12183_vm10, %v12851_v39, 0.0 }
0x11ea   :  { %v6718_v7 = vadd.f32 %v6717_v41, %v12778_v43 }
0x11ec   :  { %6702 = vadd.xlane.f32.xlu1 %v12809_v37  ;;  %6704 = vadd.xlane.f32.xlu0 %v12814_v46  ;;  %v6719_v31 = vadd.f32 %v6718_v7, %v12791_v20 }
0x11ee   :  { %v6720_v27 = vadd.f32 %v6719_v31, %v12796_v35 }
0x11f0   :  { %6706 = vadd.xlane.f32.xlu1 %v12826_v14  ;;  %6708 = vadd.xlane.f32.xlu0 %v12831_v1 }
0x11f4   :  { %6710 = vadd.xlane.f32.xlu1 %v12842_v44  ;;  %6712 = vadd.xlane.f32.xlu0 %v12847_v21 }
0x11f8   :  { %6714 = vadd.xlane.f32.xlu1 %v12856_v4 }
0x1227   :  { %v9899_v42 = vpop.f32.mrb[198].mxu0 }
0x1228   :  { %v7079_v49 = vpop.f32.mrb[199].mxu0 }
0x122a   :  { %v7579_v58 = vpop.xlane.xlu0 %7578 }
0x122b   :  { %10348 = vrcp.f32 %v7579_v58  ;;  %v9904_v50 = vpop.f32.mrb[184].mxu0 }
0x122c   :  { %v7235_v55 = vpop.f32.mrb[185].mxu0  ;;  %10350 = vrcp.f32 %v12748_v33  ;;  %v12905_v58 = vmul.f32 0.5, %v9904_v50 }
0x122d   :  { %10352 = vrcp.f32 %v12750_v13  ;;  %v12907_v41 = vmul.f32 0.5, %v7235_v55 }
0x122e   :  { %10354 = vrcp.f32 %v12764_v12 }
0x122f   :  { %v12862_v53 = vpop.f32.mrb[186].mxu0  ;;  %10356 = vrcp.f32 %v12766_v63 }
0x1230   :  { %v7245_v26 = vpop.f32.mrb[187].mxu0  ;;  %10358 = vrcp.f32 %v12782_v10  ;;  %v7337_v10 = vadd.f32 %v12905_v58, %v12907_v41 }
0x1231   :  { %10360 = vrcp.f32 %v12784_v19  ;;  %v12913_v31 = vmul.f32 0.5, %v7245_v26 }
0x1232   :  { %10362 = vrcp.f32 %v12800_v38 }
0x1233   :  { %v12865_v34 = vpop.f32.mrb[188].mxu0  ;;  %10364 = vrcp.f32 %v12802_v0  ;;  %v7338_v26 = vadd.f32 %v7337_v10, %v12913_v31 }
0x1234   :  { %v12868_v47 = vpop.f32.mrb[189].mxu0  ;;  %10366 = vrcp.f32 %v12818_v25 }
0x1235   :  { %v10349_v40 = vpop.eup %10348  ;;  %10368 = vrcp.f32 %v12820_v3 }
0x1236   :  { %v12871_v60 = vmul.f32 %v10349_v40, %v12736_v57  ;;  %v6721_v57 = vadd.f32 %v6720_v27, %v12809_v37  ;;  %v10351_v13 = vpop.eup %10350 }
0x1237   :  { %v12873_v62 = vpop.f32.mrb[190].mxu0  ;;  %v10353_v50 = vpop.eup %10352 }
0x1238   :  { %7582 = vxpose.xlu0.b32.start.end [1/1] (short) %v12871_v60, 128  ;;  %v7615_v30 = vrot.slane %v12871_v60, 2  ;;  %v12878_v61 = vpop.f32.mrb[191].mxu0  ;;  %v6722_v28 = vadd.f32 %v6721_v57, %v12814_v46 }
0x123a   :  { %7809 = vxpose.xlu1.b32.start.end [1/1] (short) %v7615_v30, 128  ;;  %9926 = vmatprep.subr.msk.mxu1 %vm1666_vm4, %v7615_v30  ;;  %v6723_v51 = vadd.f32 %v6722_v28, %v12826_v14 }
0x123b   :  { %9927 = vmatpush3.msk.msra.mxu1 %vm1666_vm4, %v7615_v30  ;;  %v12882_v45 = vpop.f32.mrb[192].mxu0  ;;  %v10355_v30 = vpop.eup %10354 }
0x123c   :  { %9952 = vmatprep.subr.msk.mxu1 %vm1666_vm4, %v12871_v60  ;;  %v12887_v18 = vpop.f32.mrb[193].mxu0  ;;  %v6724_v56 = vadd.f32 %v6723_v51, %v12831_v1  ;;  %v10357_v25 = vpop.eup %10356  ;;  %v12931_v51 = vmul.f32 0.5, %v12862_v53 }
0x123e   :  { %v6725_v11 = vadd.f32 %v6724_v56, %v12842_v44  ;;  %v12935_v56 = vmul.f32 0.5, %v12868_v47 }
0x123f   :  { %v12889_v9 = vpop.f32.mrb[194].mxu0 }
0x1240   :  { %v12892_v17 = vpop.f32.mrb[195].mxu0  ;;  %v6726_v52 = vadd.f32 %v6725_v11, %v12847_v21 }
0x1242   :  { %v6727_v23 = vadd.f32 %v6726_v52, %v12856_v4 }
0x1243   :  { %v9922_v5 = vpop.f32.mrb[196].mxu0 }
0x1244   :  { %v12895_v36 = vpop.f32.mrb[197].mxu0  ;;  %v6728_v24 = vrot.slane %v6727_v23, 4 }
0x1246   :  { %v6729_v6 = vadd.f32 %v6728_v24, %v6727_v23  ;;  %v10359_v23 = vpop.eup %10358 }
0x1247   :  { %v9925_v29 = vpop.f32.mrb[200].mxu0 }
0x1248   :  { %v7304_v8 = vpop.f32.mrb[201].mxu0  ;;  %v6730_v42 = vrot.slane %v6729_v6, 2 }
0x1249   :  { %v7339_v8 = vadd.f32 %v7338_v26, %v12931_v51 }
0x124a   :  { %v6731_v2 = vadd.f32 %v6730_v42, %v6729_v6 }
0x124c   :  { %v6732_v49 = vrot.slane %v6731_v2, 1 }
0x124e   :  { %v12910_v7 = vadd.f32 %v6732_v49, %v6731_v2  ;;  %v10361_v2 = vpop.eup %10360 }
0x126d   :  { %v6693_v33 = vpop.xlane.xlu0 %6692  ;;  %v6691_v40 = vpop.xlane.xlu1 %6690 }
0x126e   :  { %v6735_v12 = vmul.f32 %v12910_v7, %v6693_v33  ;;  %v6734_v63 = vmul.f32 %v12910_v7, %v6691_v40  ;;  %v7340_v40 = vadd.f32 %v7339_v8, %v12935_v56 }
0x1270   :  { %v6750_v19 = vmul.f32 %v10353_v50, %v6735_v12  ;;  %v6748_v55 = vmul.f32 %v10351_v13, %v6734_v63 }
0x1271   :  { %v6697_v27 = vpop.xlane.xlu0 %6696  ;;  %v6695_v38 = vpop.xlane.xlu1 %6694 }
0x1272   :  { %v6774_v57 = vsel %vm2125_vm0, %v6750_v19, 1.0  ;;  %v6773_v0 = vsel %vm2125_vm0, %v6748_v55, 1.0  ;;  %v6737_v28 = vmul.f32 %v12910_v7, %v6697_v27  ;;  %v6736_v5 = vmul.f32 %v12910_v7, %v6695_v38 }
0x1273   :  { %10370 = vlog2.f32 %v6774_v57  ;;  %v12953_v27 = vmul.f32 0.5, %v12865_v34  ;;  %v12957_v57 = vmul.f32 0.5, %v12878_v61 }
0x1274   :  { %10372 = vlog2.f32 %v6773_v0  ;;  %v6754_v3 = vmul.f32 %v10357_v25, %v6737_v28  ;;  %v6752_v29 = vmul.f32 %v10355_v30, %v6736_v5 }
0x1275   :  { %10374 = vrcp.f32 %v12835_v54  ;;  %v6701_v11 = vpop.xlane.xlu0 %6700  ;;  %v6699_v52 = vpop.xlane.xlu1 %6698  ;;  %v7341_v0 = vadd.f32 %v7340_v40, %v12953_v27 }
0x1276   :  { %v6776_v24 = vsel %vm2125_vm0, %v6754_v3, 1.0  ;;  %v6775_v53 = vsel %vm2125_vm0, %v6752_v29, 1.0  ;;  %v6739_v6 = vmul.f32 %v12910_v7, %v6701_v11  ;;  %v6738_v42 = vmul.f32 %v12910_v7, %v6699_v52  ;;  %v10363_v54 = vpop.eup %10362 }
0x1277   :  { %10376 = vlog2.f32 %v6776_v24  ;;  %v10365_v33 = vpop.eup %10364 }
0x1278   :  { %10378 = vlog2.f32 %v6775_v53  ;;  %v6758_v47 = vmul.f32 %v10361_v2, %v6739_v6  ;;  %v6756_v49 = vmul.f32 %v10359_v23, %v6738_v42  ;;  %v10367_v63 = vpop.eup %10366  ;;  %v12968_v53 = vmul.f32 0.5, %v12873_v62 }
0x1279   :  { %10380 = vrcp.f32 %v12837_v22  ;;  %v6705_v13 = vpop.xlane.xlu0 %6704  ;;  %v6703_v12 = vpop.xlane.xlu1 %6702  ;;  %v7342_v6 = vadd.f32 %v7341_v0, %v12957_v57 }
0x127a   :  { %v6778_v50 = vsel %vm2125_vm0, %v6758_v47, 1.0  ;;  %v6777_v10 = vsel %vm2125_vm0, %v6756_v49, 1.0  ;;  %v6741_v19 = vmul.f32 %v12910_v7, %v6705_v13  ;;  %v6740_v55 = vmul.f32 %v12910_v7, %v6703_v12  ;;  %v10369_v26 = vpop.eup %10368 }
0x127b   :  { %10382 = vlog2.f32 %v6778_v50 }
0x127c   :  { %10384 = vlog2.f32 %v6777_v10  ;;  %v6762_v22 = vmul.f32 %v10365_v33, %v6741_v19  ;;  %v6760_v38 = vmul.f32 %v10363_v54, %v6740_v55  ;;  %v12979_v55 = vmul.f32 0.5, %v12887_v18 }
0x127d   :  { %v10371_v30 = vpop.eup %10370  ;;  %10386 = vrcp.f32 %v12851_v39  ;;  %v6709_v28 = vpop.xlane.xlu0 %6708 }
0x127e   :  { %v6707_v5 = vpop.xlane.xlu1 %6706  ;;  %v10373_v25 = vpop.eup %10372  ;;  %v6789_v3 = vmul.f32 0.6931472, %v10371_v30  ;;  %v6780_v34 = vsel %vm2125_vm0, %v6762_v22, 1.0  ;;  %v6779_v29 = vsel %vm2125_vm0, %v6760_v38, 1.0  ;;  %v6743_v8 = vmul.f32 %v12910_v7, %v6709_v28 }
0x127f   :  { %v10375_v11 = vpop.eup %10374  ;;  %v6787_v52 = vmul.f32 0.6931472, %v10373_v25  ;;  %10388 = vlog2.f32 %v6780_v34  ;;  %v6742_v39 = vmul.f32 %v12910_v7, %v6707_v5 }
0x1280   :  { %v6813_v61 = vmul.f32 %v6789_v3, %v12760_v32  ;;  %10390 = vlog2.f32 %v6779_v29  ;;  %v6766_v23 = vmul.f32 %v10369_v26, %v6743_v8  ;;  %v7343_v26 = vadd.f32 %v7342_v6, %v12968_v53 }
0x1281   :  { %v10377_v24 = vpop.eup %10376  ;;  %v6812_v42 = vmul.f32 %v6787_v52, %v12755_v48  ;;  %v6764_v2 = vmul.f32 %v10367_v63, %v6742_v39  ;;  %v6713_v54 = vpop.xlane.xlu0 %6712 }
0x1282   :  { %v6711_v47 = vpop.xlane.xlu1 %6710  ;;  %v10379_v49 = vpop.eup %10378  ;;  %v6793_v33 = vmul.f32 0.6931472, %v10377_v24  ;;  %v6782_v40 = vsel %vm2125_vm0, %v6766_v23, 1.0  ;;  %v6745_v32 = vmul.f32 %v12910_v7, %v6713_v54  ;;  %v7344_v23 = vadd.f32 %v7343_v26, %v12979_v55 }
0x1283   :  { %v6744_v13 = vmul.f32 %v12910_v7, %v6711_v47  ;;  %v10381_v12 = vpop.eup %10380  ;;  %v6825_v50 = vadd.f32 %v6813_v61, %v6812_v42  ;;  %v6791_v62 = vmul.f32 0.6931472, %v10379_v49  ;;  %10392 = vlog2.f32 %v6782_v40 }
0x1284   :  { %v6781_v10 = vsel %vm2125_vm0, %v6764_v2, 1.0  ;;  %v6770_v48 = vmul.f32 %v10381_v12, %v6745_v32  ;;  %v6815_v34 = vmul.f32 %v6793_v33, %v12778_v43  ;;  %v12991_v61 = vmul.f32 0.5, %v12882_v45 }
0x1285   :  { %10394 = vlog2.f32 %v6781_v10  ;;  %v6768_v63 = vmul.f32 %v10375_v11, %v6744_v13  ;;  %v10383_v19 = vpop.eup %10382  ;;  %v6814_v22 = vmul.f32 %v6791_v62, %v12773_v15  ;;  %v12999_v49 = vmul.f32 0.5, %v12892_v17 }
0x1286   :  { %v6715_v38 = vpop.xlane.xlu1 %6714  ;;  %v10385_v30 = vpop.eup %10384  ;;  %v6797_v0 = vmul.f32 0.6931472, %v10383_v19  ;;  %v6784_v28 = vsel %vm2125_vm0, %v6770_v48, 1.0  ;;  %v7345_v45 = vadd.f32 %v7344_v23, %v12991_v61  ;;  %v13005_v10 = vmul.f32 0.5, %v12889_v9 }
0x1287   :  { %v6783_v5 = vsel %vm2125_vm0, %v6768_v63, 1.0  ;;  %v6746_v25 = vmul.f32 %v12910_v7, %v6715_v38  ;;  %v10387_v3 = vpop.eup %10386  ;;  %v6826_v18 = vadd.f32 %v6825_v50, %v6814_v22  ;;  %v6795_v29 = vmul.f32 0.6931472, %v10385_v30 }
0x1288   :  { %10396 = vlog2.f32 %v6784_v28  ;;  %v6817_v7 = vmul.f32 %v6797_v0, %v12796_v35  ;;  %v13011_v30 = vmul.f32 0.5, %v12895_v36 }
0x1289   :  { %10398 = vlog2.f32 %v6783_v5  ;;  %v6772_v8 = vmul.f32 %v10387_v3, %v6746_v25  ;;  %v10389_v15 = vpop.eup %10388  ;;  %v6827_v11 = vadd.f32 %v6826_v18, %v6815_v34  ;;  %v6816_v52 = vmul.f32 %v6795_v29, %v12791_v20 }
0x128a   :  { %v10391_v39 = vpop.eup %10390  ;;  %v6801_v6 = vmul.f32 0.6931472, %v10389_v15 }
0x128b   :  { %v6785_v43 = vsel %vm12183_vm10, %v6772_v8, 1.0  ;;  %v6828_v24 = vadd.f32 %v6827_v11, %v6816_v52  ;;  %v6799_v42 = vmul.f32 0.6931472, %v10391_v39 }
0x128c   :  { %10400 = vlog2.f32 %v6785_v43  ;;  %v6819_v33 = vmul.f32 %v6801_v6, %v12814_v46 }
0x128d   :  { %v10393_v2 = vpop.eup %10392  ;;  %v6829_v54 = vadd.f32 %v6828_v24, %v6817_v7  ;;  %v6818_v47 = vmul.f32 %v6799_v42, %v12809_v37  ;;  %v7346_v37 = vadd.f32 %v7345_v45, %v12999_v49 }
0x128e   :  { %v6805_v40 = vmul.f32 0.6931472, %v10393_v2 }
0x128f   :  { %v10395_v20 = vpop.eup %10394  ;;  %v6830_v35 = vadd.f32 %v6829_v54, %v6818_v47 }
0x1290   :  { %v6803_v32 = vmul.f32 0.6931472, %v10395_v20  ;;  %v6821_v17 = vmul.f32 %v6805_v40, %v12831_v1 }
0x1291   :  { %v6831_v12 = vadd.f32 %v6830_v35, %v6819_v33 }
0x1292   :  { %v10397_v13 = vpop.eup %10396  ;;  %v6820_v50 = vmul.f32 %v6803_v32, %v12826_v14  ;;  %v7347_v14 = vadd.f32 %v7346_v37, %v13005_v10 }
0x1293   :  { %v10399_v62 = vpop.eup %10398  ;;  %v6809_v63 = vmul.f32 0.6931472, %v10397_v13 }
0x1294   :  { %v6832_v48 = vadd.f32 %v6831_v12, %v6820_v50  ;;  %v6807_v19 = vmul.f32 0.6931472, %v10399_v62  ;;  %v7348_v1 = vadd.f32 %v7347_v14, %v13011_v30 }
0x1295   :  { %v6823_v9 = vmul.f32 %v6809_v63, %v12847_v21 }
0x1296   :  { %v10401_v26 = vpop.eup %10400  ;;  %v6822_v46 = vmul.f32 %v6807_v19, %v12842_v44  ;;  %v6833_v22 = vadd.f32 %v6832_v48, %v6821_v17 }
0x1297   :  { %v6811_v38 = vmul.f32 0.6931472, %v10401_v26 }
0x1298   :  { %v6834_v0 = vadd.f32 %v6833_v22, %v6822_v46 }
0x1299   :  { %v6824_v28 = vmul.f32 %v6811_v38, %v12856_v4 }
0x129a   :  { %v6835_v5 = vadd.f32 %v6834_v0, %v6823_v9 }
0x129c   :  { %v6836_v25 = vadd.f32 %v6835_v5, %v6824_v28 }
0x129d   :  { %7349 = vadd.xlane.f32.xlu1 %v7348_v1 }
0x12a1   :  { %6837 = vadd.xlane.f32.xlu0 %v6836_v25 }
0x12b8   :  { %v7598_v3 = vpop.trf.xlu0 }
0x12b9   :  { %9928 = vmatprep.mubr.msk.f32.mxu1 %vm2217_vm7, %v7598_v3 }
0x12ba   :  { %v7825_v34 = vpop.trf.xlu1 }
0x12bc   :  { %v7599_v44 = vpop.trf.xlu0 }
0x12bd   :  { %9929 = vmatmul.mubr.msk.f32.vlgmr.msra.gmra.mrb[160].mxu1 %vm2217_vm7, %v7599_v44 }
0x12be   :  { %9953 = vmatpush3.msk.msra.mxu1 %vm1666_vm4, %v12871_v60  ;;  %v7826_v4 = vpop.trf.xlu1 }
0x12c0   :  { %v7600_v21 = vpop.trf.xlu0 }
0x12c1   :  { %9931 = vmatprep.mubr.msk.f32.mxu1 %vm2217_vm7, %v7600_v21 }
0x12c2   :  { %v7827_v18 = vpop.trf.xlu1 }
0x12c4   :  { %v7601_v36 = vpop.trf.xlu0 }
0x12c5   :  { %9932 = vmatmul.mubr.msk.f32.gmra.mrb[162].mxu1 %vm2217_vm7, %v7601_v36 }
0x12c6   :  { %v7828_v15 = vpop.trf.xlu1 }
0x12c8   :  { %v7602_v29 = vpop.trf.xlu0 }
0x12c9   :  { %9934 = vmatprep.mubr.msk.f32.mxu1 %vm2217_vm7, %v7602_v29 }
0x12ca   :  { %v7829_v52 = vpop.trf.xlu1 }
0x12cc   :  { %v7603_v8 = vpop.trf.xlu0 }
0x12cd   :  { %9935 = vmatmul.mubr.msk.f32.gmra.mrb[164].mxu1 %vm2217_vm7, %v7603_v8 }
0x12ce   :  { %v7830_v23 = vpop.trf.xlu1 }
0x12d0   :  { %v7604_v11 = vpop.trf.xlu0 }
0x12d1   :  { %9937 = vmatprep.mubr.msk.f32.mxu1 %vm2217_vm7, %v7604_v11 }
0x12d2   :  { %v7831_v43 = vpop.trf.xlu1 }
0x12d4   :  { %v7605_v60 = vpop.trf.xlu0 }
0x12d5   :  { %9938 = vmatmul.mubr.msk.f32.gmra.mrb[166].mxu1 %vm2217_vm7, %v7605_v60 }
0x12d6   :  { %v7832_v42 = vpop.trf.xlu1 }
0x12d8   :  { %v7606_v39 = vpop.trf.xlu0 }
0x12d9   :  { %9940 = vmatprep.mubr.msk.f32.mxu1 %vm2217_vm7, %v7606_v39 }
0x12da   :  { %v7833_v54 = vpop.trf.xlu1 }
0x12dc   :  { %v7607_v7 = vpop.trf.xlu0 }
0x12dd   :  { %9941 = vmatmul.mubr.msk.f32.gmra.mrb[168].mxu1 %vm2217_vm7, %v7607_v7 }
0x12de   :  { %v7834_v45 = vpop.trf.xlu1 }
0x12e0   :  { %v7608_v24 = vpop.trf.xlu0 }
0x12e1   :  { %9943 = vmatprep.mubr.msk.f32.mxu1 %vm2217_vm7, %v7608_v24 }
0x12e2   :  { %v7835_v35 = vpop.trf.xlu1 }
0x12e4   :  { %v7609_v6 = vpop.trf.xlu0 }
0x12e5   :  { %9944 = vmatmul.mubr.msk.f32.gmra.mrb[170].mxu1 %vm2217_vm7, %v7609_v6 }
0x12e6   :  { %v7836_v40 = vpop.trf.xlu1 }
0x12e8   :  { %v7610_v2 = vpop.trf.xlu0 }
0x12e9   :  { %9946 = vmatprep.mubr.msk.f32.mxu1 %vm2217_vm7, %v7610_v2 }
0x12ea   :  { %v7837_v32 = vpop.trf.xlu1 }
0x12ec   :  { %v7611_v47 = vpop.trf.xlu0 }
0x12ed   :  { %9947 = vmatmul.mubr.msk.f32.gmra.mrb[172].mxu1 %vm2217_vm7, %v7611_v47 }
0x12ee   :  { %v7838_v13 = vpop.trf.xlu1 }
0x12f0   :  { %v7612_v20 = vpop.trf.xlu0 }
0x12f1   :  { %9949 = vmatprep.mubr.msk.f32.mxu1 %vm2217_vm7, %v7612_v20 }
0x12f2   :  { %v7839_v12 = vpop.trf.xlu1 }
0x12f4   :  { %v7613_v33 = vpop.trf.xlu0 }
0x12f5   :  { %9950 = vmatmul.mubr.msk.f32.gmra.mrb[174].mxu1 %vm2217_vm7, %v7613_v33 }
0x12f6   :  { %9954 = vmatprep.mubr.msk.f32.mxu1 %vm2217_vm7, %v7825_v34  ;;  %v7840_v50 = vpop.trf.xlu1 }
0x12f9   :  { %9955 = vmatmul.mubr.msk.f32.vlgmr.msra.gmra.mrb[160].mxu1 %vm2217_vm7, %v7826_v4 }
0x12fa   :  { %9957 = vmatprep.mubr.msk.f32.mxu1 %vm2217_vm7, %v7827_v18 }
0x12fd   :  { %9958 = vmatmul.mubr.msk.f32.gmra.mrb[162].mxu1 %vm2217_vm7, %v7828_v15 }
0x12fe   :  { %9960 = vmatprep.mubr.msk.f32.mxu1 %vm2217_vm7, %v7829_v52 }
0x1301   :  { %9961 = vmatmul.mubr.msk.f32.gmra.mrb[164].mxu1 %vm2217_vm7, %v7830_v23 }
0x1302   :  { %9963 = vmatprep.mubr.msk.f32.mxu1 %vm2217_vm7, %v7831_v43 }
0x1305   :  { %9964 = vmatmul.mubr.msk.f32.gmra.mrb[166].mxu1 %vm2217_vm7, %v7832_v42 }
0x1306   :  { %9966 = vmatprep.mubr.msk.f32.mxu1 %vm2217_vm7, %v7833_v54 }
0x1309   :  { %9967 = vmatmul.mubr.msk.f32.gmra.mrb[168].mxu1 %vm2217_vm7, %v7834_v45 }
0x130a   :  { %9969 = vmatprep.mubr.msk.f32.mxu1 %vm2217_vm7, %v7835_v35 }
0x130d   :  { %9970 = vmatmul.mubr.msk.f32.gmra.mrb[170].mxu1 %vm2217_vm7, %v7836_v40 }
0x130e   :  { %9972 = vmatprep.mubr.msk.f32.mxu1 %vm2217_vm7, %v7837_v32 }
0x1311   :  { %9973 = vmatmul.mubr.msk.f32.gmra.mrb[172].mxu1 %vm2217_vm7, %v7838_v13 }
0x1312   :  { %9975 = vmatprep.mubr.msk.f32.mxu1 %vm2217_vm7, %v7839_v12 }
0x1315   :  { %9976 = vmatmul.mubr.msk.f32.gmra.mrb[176].mxu1 %vm2217_vm7, %v7840_v50 }
0x132a   :  { %v7350_v62 = vpop.xlane.xlu1 %7349 }
0x132b   :  { %v7351_v37 = vrot.slane %v7350_v62, 4 }
0x132d   :  { %v7352_v17 = vadd.f32 %v7351_v37, %v7350_v62 }
0x132e   :  { %v6838_v48 = vpop.xlane.xlu0 %6837 }
0x132f   :  { %v7353_v63 = vrot.slane %v7352_v17, 2  ;;  %v6839_v19 = vrot.slane %v6838_v48, 4 }
0x1331   :  { %v6840_v26 = vadd.f32 %v6839_v19, %v6838_v48  ;;  %v7354_v46 = vadd.f32 %v7353_v63, %v7352_v17 }
0x1333   :  { %v6841_v22 = vrot.slane %v6840_v26, 2  ;;  %v7355_v14 = vrot.slane %v7354_v46, 1 }
0x1335   :  { %v6842_v38 = vadd.f32 %v6841_v22, %v6840_v26  ;;  %v7356_v28 = vadd.f32 %v7355_v14, %v7354_v46 }
0x1337   :  { %v6843_v9 = vrot.slane %v6842_v38, 1 }
0x1339   :  { %v6844_v0 = vadd.f32 %v6843_v9, %v6842_v38 }
0x133b   :  { %10138 = vpush %v6844_v0 }
0x133c   :  { %10140 = vpush %v7356_v28 }
0x136c   :  { %s10139_s24 = spop %10138 }
0x136d   :  { %s13053_s25 = sadd.f32 %s10139_s24, %s6124_s23  ;;  %s10141_s3 = spop %10140 }
0x136e   :  { %v7358_v5 = vstv %s10141_s3 }
0x136f   :  { %10402 = vrcp.f32 %v7358_v5 }
0x1379   :  { %v10403_v1 = vpop.eup %10402 }
0x137a   :  { %v7361_v25 = vmul.f32 %v10403_v1, %v12905_v58  ;;  %v7360_v3 = vmul.f32 %v10403_v1, %v12907_v41  ;;  %v7363_v44 = vmul.f32 %v10403_v1, %v12931_v51  ;;  %v7362_v34 = vmul.f32 %v10403_v1, %v12913_v31 }
0x137b   :  { %v7365_v21 = vmul.f32 %v10403_v1, %v12953_v27  ;;  %v7364_v4 = vmul.f32 %v10403_v1, %v12935_v56  ;;  %v7367_v56 = vmul.f32 %v10403_v1, %v12968_v53  ;;  %v7366_v27 = vmul.f32 %v10403_v1, %v12957_v57 }
0x137c   :  { %vm7374_vm4 = vcmp.lt.f32.partialorder %v7361_v25, 1.1920929e-07  ;;  %vm7373_vm7 = vcmp.lt.f32.partialorder %v7360_v3, 1.1920929e-07  ;;  %vm7376_vm13 = vcmp.lt.f32.partialorder %v7363_v44, 1.1920929e-07  ;;  %vm7375_vm14 = vcmp.lt.f32.partialorder %v7362_v34, 1.1920929e-07 }
0x137d   :  { %v13061_v36 = vsel %vm7374_vm4, 1.1920929e-07, %v7361_v25  ;;  %v13063_v18 = vsel %vm7373_vm7, 1.1920929e-07, %v7360_v3  ;;  %v13077_v31 = vsel %vm7376_vm13, 1.1920929e-07, %v7363_v44  ;;  %v13079_v51 = vsel %vm7375_vm14, 1.1920929e-07, %v7362_v34 }
0x137e   :  { %v13068_v58 = vsel %vm2125_vm0, %v13061_v36, 0.0  ;;  %v13073_v41 = vsel %vm2125_vm0, %v13063_v18, 0.0  ;;  %vm7378_vm15 = vcmp.lt.f32.partialorder %v7365_v21, 1.1920929e-07  ;;  %vm7377_vm2 = vcmp.lt.f32.partialorder %v7364_v4, 1.1920929e-07 }
0x137f   :  { %7414 = vadd.xlane.f32.xlu1 %v13068_v58  ;;  %7412 = vadd.xlane.f32.xlu0 %v13073_v41  ;;  %v13086_v29 = vsel %vm2125_vm0, %v13077_v31, 0.0  ;;  %v13091_v8 = vsel %vm2125_vm0, %v13079_v51, 0.0  ;;  %v13095_v15 = vsel %vm7378_vm15, 1.1920929e-07, %v7365_v21  ;;  %v13097_v11 = vsel %vm7377_vm2, 1.1920929e-07, %v7364_v4 }
0x1380   :  { %vm7380_vm3 = vcmp.lt.f32.partialorder %v7367_v56, 1.1920929e-07  ;;  %vm7379_vm5 = vcmp.lt.f32.partialorder %v7366_v27, 1.1920929e-07  ;;  %v7369_v57 = vmul.f32 %v10403_v1, %v12991_v61  ;;  %v7368_v53 = vmul.f32 %v10403_v1, %v12979_v55 }
0x1381   :  { %v13104_v52 = vsel %vm2125_vm0, %v13095_v15, 0.0  ;;  %v13109_v60 = vsel %vm2125_vm0, %v13097_v11, 0.0  ;;  %v13113_v39 = vsel %vm7380_vm3, 1.1920929e-07, %v7367_v56  ;;  %v13115_v23 = vsel %vm7379_vm5, 1.1920929e-07, %v7366_v27 }
0x1382   :  { %vm7382_vm8 = vcmp.lt.f32.partialorder %v7369_v57, 1.1920929e-07  ;;  %vm7381_vm6 = vcmp.lt.f32.partialorder %v7368_v53, 1.1920929e-07  ;;  %v7371_v55 = vmul.f32 %v10403_v1, %v13005_v10  ;;  %v7370_v61 = vmul.f32 %v10403_v1, %v12999_v49 }
0x1383   :  { %7418 = vadd.xlane.f32.xlu1 %v13086_v29  ;;  %7416 = vadd.xlane.f32.xlu0 %v13091_v8  ;;  %v13122_v7 = vsel %vm2125_vm0, %v13113_v39, 0.0  ;;  %v13127_v43 = vsel %vm2125_vm0, %v13115_v23, 0.0  ;;  %v13131_v24 = vsel %vm7382_vm8, 1.1920929e-07, %v7369_v57  ;;  %v13133_v6 = vsel %vm7381_vm6, 1.1920929e-07, %v7368_v53 }
0x1384   :  { %vm7384_vm9 = vcmp.lt.f32.partialorder %v7371_v55, 1.1920929e-07  ;;  %vm7383_vm11 = vcmp.lt.f32.partialorder %v7370_v61, 1.1920929e-07  ;;  %v7372_v49 = vmul.f32 %v10403_v1, %v13011_v30  ;;  %v13139_v10 = vsel %vm2125_vm0, %v13131_v24, 0.0 }
0x1385   :  { %v13144_v42 = vsel %vm2125_vm0, %v13133_v6, 0.0  ;;  %v13148_v2 = vsel %vm7384_vm9, 1.1920929e-07, %v7371_v55  ;;  %v13150_v54 = vsel %vm7383_vm11, 1.1920929e-07, %v7370_v61  ;;  %v7438_v33 = vadd.f32 %v13068_v58, %v13073_v41 }
0x1386   :  { %vm7385_vm12 = vcmp.lt.f32.partialorder %v7372_v49, 1.1920929e-07  ;;  %v13155_v30 = vsel %vm2125_vm0, %v13148_v2, 0.0  ;;  %v13160_v47 = vsel %vm2125_vm0, %v13150_v54, 0.0  ;;  %10404 = vrcp.f32 %v13061_v36 }
0x1387   :  { %7422 = vadd.xlane.f32.xlu1 %v13104_v52  ;;  %7420 = vadd.xlane.f32.xlu0 %v13109_v60  ;;  %v13164_v20 = vsel %vm7385_vm12, 1.1920929e-07, %v7372_v49  ;;  %v7439_v32 = vadd.f32 %v7438_v33, %v13091_v8  ;;  %10406 = vrcp.f32 %v13063_v18 }
0x1388   :  { %v13169_v45 = vsel %vm12183_vm10, %v13164_v20, 0.0  ;;  %10408 = vrcp.f32 %v13077_v31 }
0x1389   :  { %v7440_v37 = vadd.f32 %v7439_v32, %v13086_v29  ;;  %10410 = vrcp.f32 %v13079_v51 }
0x138a   :  { %10412 = vrcp.f32 %v13095_v15 }
0x138b   :  { %7426 = vadd.xlane.f32.xlu1 %v13122_v7  ;;  %7424 = vadd.xlane.f32.xlu0 %v13127_v43  ;;  %v7441_v26 = vadd.f32 %v7440_v37, %v13109_v60  ;;  %10414 = vrcp.f32 %v13097_v11 }
0x138c   :  { %10416 = vrcp.f32 %v13113_v39 }
0x138d   :  { %v7442_v5 = vadd.f32 %v7441_v26, %v13104_v52  ;;  %10418 = vrcp.f32 %v13115_v23 }
0x138e   :  { %10420 = vrcp.f32 %v13131_v24 }
0x138f   :  { %7430 = vadd.xlane.f32.xlu1 %v13139_v10  ;;  %7428 = vadd.xlane.f32.xlu0 %v13144_v42  ;;  %v7443_v4 = vadd.f32 %v7442_v5, %v13127_v43  ;;  %10422 = vrcp.f32 %v13133_v6 }
0x1391   :  { %v7444_v49 = vadd.f32 %v7443_v4, %v13122_v7 }
0x1393   :  { %7434 = vadd.xlane.f32.xlu1 %v13155_v30  ;;  %7432 = vadd.xlane.f32.xlu0 %v13160_v47  ;;  %v7445_v37 = vadd.f32 %v7444_v49, %v13144_v42 }
0x1397   :  { %7436 = vadd.xlane.f32.xlu0 %v13169_v45 }
0x13c8   :  { %v9951_v35 = vpop.f32.mrb[174].mxu1 }
0x13c9   :  { %v7801_v40 = vpop.f32.mrb[175].mxu1 }
0x13cc   :  { %v9956_v13 = vpop.f32.mrb[160].mxu1 }
0x13cd   :  { %v7957_v12 = vpop.f32.mrb[161].mxu1  ;;  %v13175_v50 = vmul.f32 0.5, %v9956_v13 }
0x13ce   :  { %v13177_v62 = vmul.f32 0.5, %v7957_v12 }
0x13d0   :  { %v9959_v17 = vpop.f32.mrb[162].mxu1  ;;  %v8059_v63 = vadd.f32 %v13175_v50, %v13177_v62 }
0x13d1   :  { %v7967_v48 = vpop.f32.mrb[163].mxu1  ;;  %v13185_v46 = vmul.f32 0.5, %v9959_v17 }
0x13d2   :  { %v13182_v19 = vmul.f32 0.5, %v7967_v48 }
0x13d4   :  { %v8060_v22 = vadd.f32 %v8059_v63, %v13182_v19  ;;  %v9962_v38 = vpop.f32.mrb[164].mxu1 }
0x13d5   :  { %v7977_v14 = vpop.f32.mrb[165].mxu1  ;;  %v13188_v9 = vmul.f32 0.5, %v9962_v38  ;;  %v7446_v38 = vadd.f32 %v7445_v37, %v13139_v10 }
0x13d6   :  { %v13190_v0 = vmul.f32 0.5, %v7977_v14  ;;  %v8061_v28 = vadd.f32 %v8060_v22, %v13185_v46 }
0x13d8   :  { %v8062_v1 = vadd.f32 %v8061_v28, %v13190_v0  ;;  %v9965_v25 = vpop.f32.mrb[166].mxu1 }
0x13d9   :  { %v7987_v3 = vpop.f32.mrb[167].mxu1  ;;  %v13195_v44 = vmul.f32 0.5, %v9965_v25 }
0x13da   :  { %v13197_v34 = vmul.f32 0.5, %v7987_v3  ;;  %v8063_v21 = vadd.f32 %v8062_v1, %v13188_v9  ;;  %v7447_v1 = vadd.f32 %v7446_v38, %v13160_v47 }
0x13dc   :  { %v8064_v56 = vadd.f32 %v8063_v21, %v13197_v34  ;;  %v9968_v27 = vpop.f32.mrb[168].mxu1  ;;  %v7448_v25 = vadd.f32 %v7447_v1, %v13155_v30 }
0x13dd   :  { %v7997_v57 = vpop.f32.mrb[169].mxu1  ;;  %v13202_v53 = vmul.f32 0.5, %v9968_v27 }
0x13de   :  { %v13204_v55 = vmul.f32 0.5, %v7997_v57  ;;  %v8065_v61 = vadd.f32 %v8064_v56, %v13195_v44  ;;  %v7449_v3 = vadd.f32 %v7448_v25, %v13169_v45 }
0x13e0   :  { %v8066_v33 = vadd.f32 %v8065_v61, %v13204_v55  ;;  %v9971_v35 = vpop.f32.mrb[170].mxu1  ;;  %v7450_v21 = vrot.slane %v7449_v3, 4 }
0x13e1   :  { %v8007_v40 = vpop.f32.mrb[171].mxu1  ;;  %v13209_v32 = vmul.f32 0.5, %v9971_v35  ;;  %v10405_v35 = vpop.eup %10404 }
0x13e2   :  { %v13211_v13 = vmul.f32 0.5, %v8007_v40  ;;  %v8067_v12 = vadd.f32 %v8066_v33, %v13202_v53  ;;  %v7451_v4 = vadd.f32 %v7450_v21, %v7449_v3  ;;  %v10407_v40 = vpop.eup %10406 }
0x13e4   :  { %v8068_v17 = vadd.f32 %v8067_v12, %v13211_v13  ;;  %v9974_v48 = vpop.f32.mrb[172].mxu1  ;;  %v7452_v56 = vrot.slane %v7451_v4, 2  ;;  %v10409_v12 = vpop.eup %10408 }
0x13e5   :  { %v8017_v63 = vpop.f32.mrb[173].mxu1  ;;  %v10411_v23 = vpop.eup %10410 }
0x13e6   :  { %v13216_v26 = vmul.f32 0.5, %v8017_v63  ;;  %v8069_v22 = vadd.f32 %v8068_v17, %v13209_v32  ;;  %v7453_v27 = vadd.f32 %v7452_v56, %v7451_v4  ;;  %v10413_v38 = vpop.eup %10412 }
0x13e7   :  { %v10415_v25 = vpop.eup %10414 }
0x13e8   :  { %v8070_v14 = vadd.f32 %v8069_v22, %v13216_v26  ;;  %v9977_v28 = vpop.f32.mrb[176].mxu1  ;;  %v7454_v57 = vrot.slane %v7453_v27, 1  ;;  %v10417_v3 = vpop.eup %10416 }
0x13e9   :  { %v8026_v5 = vpop.f32.mrb[177].mxu1 }
0x13ea   :  { %8071 = vadd.xlane.f32.xlu0 %v8070_v14  ;;  %v13229_v61 = vadd.f32 %v7454_v57, %v7453_v27 }
0x140c   :  { %v7415_v49 = vpop.xlane.xlu1 %7414  ;;  %v7413_v33 = vpop.xlane.xlu0 %7412 }
0x140d   :  { %v7457_v36 = vmul.f32 %v13229_v61, %v7415_v49  ;;  %v7456_v18 = vmul.f32 %v13229_v61, %v7413_v33 }
0x140f   :  { %v7472_v31 = vmul.f32 %v10405_v35, %v7457_v36  ;;  %v7470_v51 = vmul.f32 %v10407_v40, %v7456_v18 }
0x1410   :  { %v7419_v15 = vpop.xlane.xlu1 %7418  ;;  %v7417_v11 = vpop.xlane.xlu0 %7416 }
0x1411   :  { %v7496_v37 = vsel %vm2125_vm0, %v7472_v31, 1.0  ;;  %v7495_v39 = vsel %vm2125_vm0, %v7470_v51, 1.0  ;;  %v7459_v17 = vmul.f32 %v13229_v61, %v7419_v15  ;;  %v7458_v48 = vmul.f32 %v13229_v61, %v7417_v11 }
0x1412   :  { %10424 = vlog2.f32 %v7496_v37 }
0x1413   :  { %10426 = vlog2.f32 %v7495_v39  ;;  %v7476_v24 = vmul.f32 %v10409_v12, %v7459_v17  ;;  %v7474_v63 = vmul.f32 %v10411_v23, %v7458_v48 }
0x1414   :  { %10428 = vrcp.f32 %v13148_v2  ;;  %v7423_v6 = vpop.xlane.xlu1 %7422  ;;  %v7421_v22 = vpop.xlane.xlu0 %7420 }
0x1415   :  { %v7498_v14 = vsel %vm2125_vm0, %v7476_v24, 1.0  ;;  %v7497_v28 = vsel %vm2125_vm0, %v7474_v63, 1.0  ;;  %v7461_v5 = vmul.f32 %v13229_v61, %v7423_v6  ;;  %v7460_v1 = vmul.f32 %v13229_v61, %v7421_v22  ;;  %v10419_v2 = vpop.eup %10418 }
0x1416   :  { %10430 = vlog2.f32 %v7498_v14  ;;  %v10421_v57 = vpop.eup %10420 }
0x1417   :  { %10432 = vlog2.f32 %v7497_v28  ;;  %v7480_v21 = vmul.f32 %v10413_v38, %v7461_v5  ;;  %v7478_v4 = vmul.f32 %v10415_v25, %v7460_v1  ;;  %v10423_v18 = vpop.eup %10422 }
0x1418   :  { %10434 = vrcp.f32 %v13150_v54  ;;  %v7427_v56 = vpop.xlane.xlu1 %7426  ;;  %v7425_v27 = vpop.xlane.xlu0 %7424 }
0x1419   :  { %v7500_v49 = vsel %vm2125_vm0, %v7480_v21, 1.0  ;;  %v7499_v33 = vsel %vm2125_vm0, %v7478_v4, 1.0  ;;  %v7463_v35 = vmul.f32 %v13229_v61, %v7427_v56  ;;  %v7462_v36 = vmul.f32 %v13229_v61, %v7425_v27 }
0x141a   :  { %10436 = vlog2.f32 %v7500_v49 }
0x141b   :  { %10438 = vlog2.f32 %v7499_v33  ;;  %v7484_v40 = vmul.f32 %v10417_v3, %v7463_v35  ;;  %v7482_v31 = vmul.f32 %v10419_v2, %v7462_v36 }
0x141c   :  { %v10425_v51 = vpop.eup %10424  ;;  %10440 = vrcp.f32 %v13164_v20  ;;  %v7431_v54 = vpop.xlane.xlu1 %7430 }
0x141d   :  { %v7429_v15 = vpop.xlane.xlu0 %7428  ;;  %v10427_v11 = vpop.eup %10426  ;;  %v7511_v12 = vmul.f32 0.6931472, %v10425_v51  ;;  %v7502_v37 = vsel %vm2125_vm0, %v7484_v40, 1.0  ;;  %v7501_v39 = vsel %vm2125_vm0, %v7482_v31, 1.0  ;;  %v7465_v17 = vmul.f32 %v13229_v61, %v7431_v54 }
0x141e   :  { %v10429_v48 = vpop.eup %10428  ;;  %v7509_v23 = vmul.f32 0.6931472, %v10427_v11  ;;  %10442 = vlog2.f32 %v7502_v37  ;;  %v7464_v24 = vmul.f32 %v13229_v61, %v7429_v15 }
0x141f   :  { %v7535_v63 = vmul.f32 %v7511_v12, %v13068_v58  ;;  %10444 = vlog2.f32 %v7501_v39  ;;  %v7488_v20 = vmul.f32 %v10421_v57, %v7465_v17 }
0x1420   :  { %v10431_v6 = vpop.eup %10430  ;;  %v7534_v22 = vmul.f32 %v7509_v23, %v13073_v41  ;;  %v7486_v38 = vmul.f32 %v10423_v18, %v7464_v24  ;;  %v7435_v14 = vpop.xlane.xlu1 %7434 }
0x1421   :  { %v7433_v28 = vpop.xlane.xlu0 %7432  ;;  %v10433_v5 = vpop.eup %10432  ;;  %v7515_v1 = vmul.f32 0.6931472, %v10431_v6  ;;  %v7504_v25 = vsel %vm2125_vm0, %v7488_v20, 1.0  ;;  %v7467_v3 = vmul.f32 %v13229_v61, %v7435_v14 }
0x1422   :  { %v7466_v21 = vmul.f32 %v13229_v61, %v7433_v28  ;;  %v10435_v4 = vpop.eup %10434  ;;  %v7547_v2 = vadd.f32 %v7535_v63, %v7534_v22  ;;  %v7513_v58 = vmul.f32 0.6931472, %v10433_v5  ;;  %10446 = vlog2.f32 %v7504_v25 }
0x1423   :  { %v7503_v56 = vsel %vm2125_vm0, %v7486_v38, 1.0  ;;  %v7492_v41 = vmul.f32 %v10429_v48, %v7467_v3  ;;  %v7537_v54 = vmul.f32 %v7515_v1, %v13086_v29 }
0x1424   :  { %10448 = vlog2.f32 %v7503_v56  ;;  %v7490_v27 = vmul.f32 %v10435_v4, %v7466_v21  ;;  %v10437_v57 = vpop.eup %10436  ;;  %v7536_v49 = vmul.f32 %v7513_v58, %v13091_v8 }
0x1425   :  { %v7437_v33 = vpop.xlane.xlu0 %7436  ;;  %v10439_v35 = vpop.eup %10438  ;;  %v7519_v36 = vmul.f32 0.6931472, %v10437_v57  ;;  %v7506_v18 = vsel %vm2125_vm0, %v7492_v41, 1.0 }
0x1426   :  { %v7505_v40 = vsel %vm2125_vm0, %v7490_v27, 1.0  ;;  %v7468_v31 = vmul.f32 %v13229_v61, %v7437_v33  ;;  %v10441_v51 = vpop.eup %10440  ;;  %v7548_v15 = vadd.f32 %v7547_v2, %v7536_v49  ;;  %v7517_v11 = vmul.f32 0.6931472, %v10439_v35 }
0x1427   :  { %10450 = vlog2.f32 %v7506_v18  ;;  %v7539_v48 = vmul.f32 %v7519_v36, %v13104_v52 }
0x1428   :  { %10452 = vlog2.f32 %v7505_v40  ;;  %v7494_v12 = vmul.f32 %v10441_v51, %v7468_v31  ;;  %v10443_v8 = vpop.eup %10442  ;;  %v7538_v37 = vmul.f32 %v7517_v11, %v13109_v60  ;;  %v7549_v39 = vadd.f32 %v7548_v15, %v7537_v54 }
0x1429   :  { %v10445_v17 = vpop.eup %10444  ;;  %v7523_v61 = vmul.f32 0.6931472, %v10443_v8 }
0x142a   :  { %v7507_v23 = vsel %vm12183_vm10, %v7494_v12, 1.0  ;;  %v7550_v24 = vadd.f32 %v7549_v39, %v7538_v37  ;;  %v7521_v63 = vmul.f32 0.6931472, %v10445_v17 }
0x142b   :  { %10454 = vlog2.f32 %v7507_v23  ;;  %v7541_v38 = vmul.f32 %v7523_v61, %v13122_v7 }
0x142c   :  { %v10447_v29 = vpop.eup %10446  ;;  %v7540_v20 = vmul.f32 %v7521_v63, %v13127_v43  ;;  %v7551_v6 = vadd.f32 %v7550_v24, %v7539_v48 }
0x142d   :  { %v7527_v60 = vmul.f32 0.6931472, %v10447_v29 }
0x142e   :  { %v10449_v22 = vpop.eup %10448  ;;  %v7552_v14 = vadd.f32 %v7551_v6, %v7540_v20 }
0x142f   :  { %v7525_v28 = vmul.f32 0.6931472, %v10449_v22  ;;  %v7543_v3 = vmul.f32 %v7527_v60, %v13139_v10 }
0x1430   :  { %v7553_v1 = vadd.f32 %v7552_v14, %v7541_v38 }
0x1431   :  { %v10451_v5 = vpop.eup %10450  ;;  %v7542_v52 = vmul.f32 %v7525_v28, %v13144_v42 }
0x1432   :  { %v10453_v25 = vpop.eup %10452  ;;  %v7531_v4 = vmul.f32 0.6931472, %v10451_v5 }
0x1433   :  { %v7554_v21 = vadd.f32 %v7553_v1, %v7542_v52  ;;  %v7529_v2 = vmul.f32 0.6931472, %v10453_v25 }
0x1434   :  { %v7545_v7 = vmul.f32 %v7531_v4, %v13155_v30 }
0x1435   :  { %v10455_v58 = vpop.eup %10454  ;;  %v7544_v43 = vmul.f32 %v7529_v2, %v13160_v47  ;;  %v7555_v56 = vadd.f32 %v7554_v21, %v7543_v3 }
0x1436   :  { %v7533_v41 = vmul.f32 0.6931472, %v10455_v58 }
0x1437   :  { %v7556_v27 = vadd.f32 %v7555_v56, %v7544_v43 }
0x1438   :  { %v7546_v57 = vmul.f32 %v7533_v41, %v13169_v45 }
0x1439   :  { %v7557_v49 = vadd.f32 %v7556_v27, %v7545_v7 }
0x143b   :  { %v7558_v33 = vadd.f32 %v7557_v49, %v7546_v57 }
0x143d   :  { %7559 = vadd.xlane.f32.xlu1 %v7558_v33 }
0x1477   :  { %v8072_v42 = vpop.xlane.xlu0 %8071 }
0x1478   :  { %v8073_v35 = vrot.slane %v8072_v42, 4 }
0x147a   :  { %v8074_v10 = vadd.f32 %v8073_v35, %v8072_v42 }
0x147c   :  { %v8075_v36 = vrot.slane %v8074_v10, 2 }
0x147e   :  { %v8076_v51 = vadd.f32 %v8075_v36, %v8074_v10 }
0x1480   :  { %v8077_v15 = vrot.slane %v8076_v51, 1 }
0x1482   :  { %v8078_v12 = vadd.f32 %v8077_v15, %v8076_v51 }
0x14ca   :  { %v7560_v18 = vpop.xlane.xlu1 %7559 }
0x14cb   :  { %v7561_v40 = vrot.slane %v7560_v18, 4 }
0x14cd   :  { %v7562_v31 = vadd.f32 %v7561_v40, %v7560_v18 }
0x14cf   :  { %v7563_v47 = vrot.slane %v7562_v31, 2 }
0x14d1   :  { %v7564_v54 = vadd.f32 %v7563_v47, %v7562_v31 }
0x14d3   :  { %v7565_v11 = vrot.slane %v7564_v54, 1 }
0x14d5   :  { %v7566_v30 = vadd.f32 %v7565_v11, %v7564_v54 }
0x14d7   :  { %10142 = vpush %v7566_v30 }
0x14d8   :  { %10144 = vpush %v8078_v12 }
0x1508   :  { %s13291_s0 = spop %10142 }
0x1509   :  { %s7568_s26 = sadd.f32 %s13291_s0, %s13053_s25  ;;  %s10145_s27 = spop %10144 }
0x150a   :  { %v8080_v45 = vstv %s10145_s27 }
0x150b   :  { %10456 = vrcp.f32 %v8080_v45 }
0x1515   :  { %v10457_v8 = vpop.eup %10456 }
0x1516   :  { %v8083_v37 = vmul.f32 %v10457_v8, %v13175_v50  ;;  %v8082_v39 = vmul.f32 %v10457_v8, %v13177_v62  ;;  %v8085_v17 = vmul.f32 %v10457_v8, %v13185_v46  ;;  %v8084_v48 = vmul.f32 %v10457_v8, %v13182_v19 }
0x1517   :  { %v8087_v23 = vmul.f32 %v10457_v8, %v13188_v9  ;;  %v8086_v24 = vmul.f32 %v10457_v8, %v13190_v0  ;;  %v8089_v9 = vmul.f32 %v10457_v8, %v13195_v44  ;;  %v8088_v0 = vmul.f32 %v10457_v8, %v13197_v34 }
0x1518   :  { %vm8096_vm1 = vcmp.lt.f32.partialorder %v8083_v37, 1.1920929e-07  ;;  %vm8095_vm4 = vcmp.lt.f32.partialorder %v8082_v39, 1.1920929e-07  ;;  %vm8098_vm7 = vcmp.lt.f32.partialorder %v8085_v17, 1.1920929e-07  ;;  %vm8097_vm13 = vcmp.lt.f32.partialorder %v8084_v48, 1.1920929e-07 }
0x1519   :  { %v13301_v61 = vsel %vm8096_vm1, 1.1920929e-07, %v8083_v37  ;;  %v13303_v63 = vsel %vm8095_vm4, 1.1920929e-07, %v8082_v39  ;;  %v13317_v19 = vsel %vm8098_vm7, 1.1920929e-07, %v8085_v17  ;;  %v13319_v46 = vsel %vm8097_vm13, 1.1920929e-07, %v8084_v48 }
0x151a   :  { %v13308_v50 = vsel %vm2125_vm0, %v13301_v61, 0.0  ;;  %v13313_v62 = vsel %vm2125_vm0, %v13303_v63, 0.0  ;;  %vm8100_vm14 = vcmp.lt.f32.partialorder %v8087_v23, 1.1920929e-07  ;;  %vm8099_vm15 = vcmp.lt.f32.partialorder %v8086_v24, 1.1920929e-07 }
0x151b   :  { %8136 = vadd.xlane.f32.xlu0 %v13308_v50  ;;  %8134 = vadd.xlane.f32.xlu1 %v13313_v62  ;;  %v13326_v29 = vsel %vm2125_vm0, %v13317_v19, 0.0  ;;  %v13331_v20 = vsel %vm2125_vm0, %v13319_v46, 0.0  ;;  %v8113_v6 = vsel %vm8100_vm14, 1.1920929e-07, %v8087_v23  ;;  %v8112_v22 = vsel %vm8099_vm15, 1.1920929e-07, %v8086_v24 }
0x151c   :  { %vm8102_vm2 = vcmp.lt.f32.partialorder %v8089_v9, 1.1920929e-07  ;;  %vm8101_vm3 = vcmp.lt.f32.partialorder %v8088_v0, 1.1920929e-07  ;;  %v8091_v44 = vmul.f32 %v10457_v8, %v13202_v53  ;;  %v8090_v34 = vmul.f32 %v10457_v8, %v13204_v55 }
0x151d   :  { %v13339_v38 = vsel %vm2125_vm0, %v8113_v6, 0.0  ;;  %v13343_v14 = vsel %vm2125_vm0, %v8112_v22, 0.0  ;;  %v8115_v60 = vsel %vm8102_vm2, 1.1920929e-07, %v8089_v9  ;;  %v8114_v28 = vsel %vm8101_vm3, 1.1920929e-07, %v8088_v0 }
0x151e   :  { %vm8104_vm5 = vcmp.lt.f32.partialorder %v8091_v44, 1.1920929e-07  ;;  %vm8103_vm8 = vcmp.lt.f32.partialorder %v8090_v34, 1.1920929e-07  ;;  %v8093_v53 = vmul.f32 %v10457_v8, %v13209_v32  ;;  %v8092_v55 = vmul.f32 %v10457_v8, %v13211_v13 }
0x151f   :  { %8140 = vadd.xlane.f32.xlu0 %v13326_v29  ;;  %8138 = vadd.xlane.f32.xlu1 %v13331_v20  ;;  %v13351_v5 = vsel %vm2125_vm0, %v8115_v60, 0.0  ;;  %v13355_v52 = vsel %vm2125_vm0, %v8114_v28, 0.0  ;;  %v8117_v1 = vsel %vm8104_vm5, 1.1920929e-07, %v8091_v44  ;;  %v8116_v25 = vsel %vm8103_vm8, 1.1920929e-07, %v8090_v34 }
0x1520   :  { %vm8106_vm6 = vcmp.lt.f32.partialorder %v8093_v53, 1.1920929e-07  ;;  %vm8105_vm9 = vcmp.lt.f32.partialorder %v8092_v55, 1.1920929e-07  ;;  %v8094_v32 = vmul.f32 %v10457_v8, %v13216_v26  ;;  %v13362_v13 = vsel %vm2125_vm0, %v8117_v1, 0.0 }
0x1521   :  { %v13366_v3 = vsel %vm2125_vm0, %v8116_v25, 0.0  ;;  %v8119_v21 = vsel %vm8106_vm6, 1.1920929e-07, %v8093_v53  ;;  %v13370_v4 = vsel %vm8105_vm9, 1.1920929e-07, %v8092_v55  ;;  %v8160_v56 = vadd.f32 %v13308_v50, %v13313_v62 }
0x1522   :  { %vm8107_vm11 = vcmp.lt.f32.partialorder %v8094_v32, 1.1920929e-07  ;;  %v13374_v2 = vsel %vm2125_vm0, %v8119_v21, 0.0  ;;  %v13379_v26 = vsel %vm2125_vm0, %v13370_v4, 0.0  ;;  %10458 = vrcp.f32 %v13301_v61 }
0x1523   :  { %8144 = vadd.xlane.f32.xlu0 %v13339_v38  ;;  %8142 = vadd.xlane.f32.xlu1 %v13343_v14  ;;  %v13383_v58 = vsel %vm8107_vm11, 1.1920929e-07, %v8094_v32  ;;  %v8161_v41 = vadd.f32 %v8160_v56, %v13331_v20  ;;  %10460 = vrcp.f32 %v13303_v63 }
0x1524   :  { %v13388_v43 = vsel %vm12183_vm10, %v13383_v58, 0.0  ;;  %10462 = vrcp.f32 %v13317_v19 }
0x1525   :  { %v8162_v7 = vadd.f32 %v8161_v41, %v13326_v29  ;;  %10464 = vrcp.f32 %v13319_v46 }
0x1526   :  { %10466 = vrcp.f32 %v8113_v6 }
0x1527   :  { %8148 = vadd.xlane.f32.xlu0 %v13351_v5  ;;  %8146 = vadd.xlane.f32.xlu1 %v13355_v52  ;;  %v8163_v27 = vadd.f32 %v8162_v7, %v13343_v14  ;;  %10468 = vrcp.f32 %v8112_v22 }
0x1528   :  { %10470 = vrcp.f32 %v8115_v60 }
0x1529   :  { %v8164_v57 = vadd.f32 %v8163_v27, %v13339_v38  ;;  %10472 = vrcp.f32 %v8114_v28 }
0x152a   :  { %10474 = vrcp.f32 %v8117_v1 }
0x152b   :  { %8152 = vadd.xlane.f32.xlu0 %v13362_v13  ;;  %8150 = vadd.xlane.f32.xlu1 %v13366_v3  ;;  %v8165_v49 = vadd.f32 %v8164_v57, %v13355_v52  ;;  %10476 = vrcp.f32 %v8116_v25 }
0x152c   :  { %v10459_v12 = vpop.eup %10458 }
0x152d   :  { %v8166_v33 = vadd.f32 %v8165_v49, %v13351_v5  ;;  %v10461_v37 = vpop.eup %10460 }
0x152e   :  { %v10463_v24 = vpop.eup %10462 }
0x152f   :  { %8156 = vadd.xlane.f32.xlu0 %v13374_v2  ;;  %8154 = vadd.xlane.f32.xlu1 %v13379_v26  ;;  %v8167_v42 = vadd.f32 %v8166_v33, %v13366_v3  ;;  %v10465_v9 = vpop.eup %10464 }
0x1530   :  { %v10467_v34 = vpop.eup %10466 }
0x1531   :  { %v8168_v35 = vadd.f32 %v8167_v42, %v13362_v13  ;;  %v10469_v1 = vpop.eup %10468 }
0x1532   :  { %v10471_v25 = vpop.eup %10470 }
0x1533   :  { %8158 = vadd.xlane.f32.xlu1 %v13388_v43  ;;  %v8169_v10 = vadd.f32 %v8168_v35, %v13379_v26 }
0x1535   :  { %v8170_v36 = vadd.f32 %v8169_v10, %v13374_v2 }
0x1537   :  { %v8171_v18 = vadd.f32 %v8170_v36, %v13388_v43 }
0x1539   :  { %v8172_v40 = vrot.slane %v8171_v18, 4 }
0x153b   :  { %v8173_v31 = vadd.f32 %v8172_v40, %v8171_v18 }
0x153d   :  { %v8174_v51 = vrot.slane %v8173_v31, 2 }
0x153f   :  { %v8175_v47 = vadd.f32 %v8174_v51, %v8173_v31 }
0x1541   :  { %v8176_v54 = vrot.slane %v8175_v47, 1 }
0x1543   :  { %v13408_v15 = vadd.f32 %v8176_v54, %v8175_v47 }
0x15a8   :  { %v8137_v11 = vpop.xlane.xlu0 %8136  ;;  %v8135_v30 = vpop.xlane.xlu1 %8134 }
0x15a9   :  { %v8179_v45 = vmul.f32 %v13408_v15, %v8137_v11  ;;  %v8178_v8 = vmul.f32 %v13408_v15, %v8135_v30 }
0x15ab   :  { %v8194_v39 = vmul.f32 %v10459_v12, %v8179_v45  ;;  %v8192_v17 = vmul.f32 %v10461_v37, %v8178_v8 }
0x15ac   :  { %v8141_v48 = vpop.xlane.xlu0 %8140  ;;  %v8139_v23 = vpop.xlane.xlu1 %8138 }
0x15ad   :  { %v8218_v61 = vsel %vm2125_vm0, %v8194_v39, 1.0  ;;  %v8217_v63 = vsel %vm2125_vm0, %v8192_v17, 1.0  ;;  %v8181_v19 = vmul.f32 %v13408_v15, %v8141_v48  ;;  %v8180_v46 = vmul.f32 %v13408_v15, %v8139_v23 }
0x15ae   :  { %10478 = vlog2.f32 %v8218_v61 }
0x15af   :  { %10480 = vlog2.f32 %v8217_v63  ;;  %v8198_v0 = vmul.f32 %v10463_v24, %v8181_v19  ;;  %v8196_v6 = vmul.f32 %v10465_v9, %v8180_v46 }
0x15b0   :  { %10482 = vrcp.f32 %v8119_v21  ;;  %v8145_v22 = vpop.xlane.xlu0 %8144  ;;  %v8143_v44 = vpop.xlane.xlu1 %8142 }
0x15b1   :  { %v8220_v60 = vsel %vm2125_vm0, %v8198_v0, 1.0  ;;  %v8219_v28 = vsel %vm2125_vm0, %v8196_v6, 1.0  ;;  %v8183_v53 = vmul.f32 %v13408_v15, %v8145_v22  ;;  %v8182_v55 = vmul.f32 %v13408_v15, %v8143_v44  ;;  %v10473_v21 = vpop.eup %10472 }
0x15b2   :  { %10484 = vlog2.f32 %v8220_v60  ;;  %v10475_v27 = vpop.eup %10474 }
0x15b3   :  { %10486 = vlog2.f32 %v8219_v28  ;;  %v8202_v32 = vmul.f32 %v10467_v34, %v8183_v53  ;;  %v8200_v56 = vmul.f32 %v10469_v1, %v8182_v55  ;;  %v10477_v35 = vpop.eup %10476 }
0x15b4   :  { %10488 = vrcp.f32 %v13370_v4  ;;  %v8149_v41 = vpop.xlane.xlu0 %8148  ;;  %v8147_v7 = vpop.xlane.xlu1 %8146 }
0x15b5   :  { %v8222_v57 = vsel %vm2125_vm0, %v8202_v32, 1.0  ;;  %v8221_v49 = vsel %vm2125_vm0, %v8200_v56, 1.0  ;;  %v8185_v33 = vmul.f32 %v13408_v15, %v8149_v41  ;;  %v8184_v42 = vmul.f32 %v13408_v15, %v8147_v7 }
0x15b6   :  { %10490 = vlog2.f32 %v8222_v57 }
0x15b7   :  { %10492 = vlog2.f32 %v8221_v49  ;;  %v8206_v10 = vmul.f32 %v10471_v25, %v8185_v33  ;;  %v8204_v36 = vmul.f32 %v10473_v21, %v8184_v42 }
0x15b8   :  { %v10479_v18 = vpop.eup %10478  ;;  %10494 = vrcp.f32 %v13383_v58  ;;  %v8153_v4 = vpop.xlane.xlu0 %8152 }
0x15b9   :  { %v8151_v40 = vpop.xlane.xlu1 %8150  ;;  %v10481_v31 = vpop.eup %10480  ;;  %v8233_v51 = vmul.f32 0.6931472, %v10479_v18  ;;  %v8224_v47 = vsel %vm2125_vm0, %v8206_v10, 1.0  ;;  %v8223_v54 = vsel %vm2125_vm0, %v8204_v36, 1.0  ;;  %v8187_v11 = vmul.f32 %v13408_v15, %v8153_v4 }
0x15ba   :  { %v10483_v30 = vpop.eup %10482  ;;  %v8231_v12 = vmul.f32 0.6931472, %v10481_v31  ;;  %10496 = vlog2.f32 %v8224_v47  ;;  %v8186_v45 = vmul.f32 %v13408_v15, %v8151_v40 }
0x15bb   :  { %v8257_v8 = vmul.f32 %v8233_v51, %v13308_v50  ;;  %10498 = vlog2.f32 %v8223_v54  ;;  %v8210_v58 = vmul.f32 %v10475_v27, %v8187_v11 }
0x15bc   :  { %v10485_v37 = vpop.eup %10484  ;;  %v8256_v39 = vmul.f32 %v8231_v12, %v13313_v62  ;;  %v8208_v17 = vmul.f32 %v10477_v35, %v8186_v45  ;;  %v8157_v48 = vpop.xlane.xlu0 %8156 }
0x15bd   :  { %v8155_v23 = vpop.xlane.xlu1 %8154  ;;  %v10487_v24 = vpop.eup %10486  ;;  %v8237_v61 = vmul.f32 0.6931472, %v10485_v37  ;;  %v8226_v63 = vsel %vm2125_vm0, %v8210_v58, 1.0  ;;  %v8189_v19 = vmul.f32 %v13408_v15, %v8157_v48 }
0x15be   :  { %v8188_v46 = vmul.f32 %v13408_v15, %v8155_v23  ;;  %v10489_v9 = vpop.eup %10488  ;;  %v8269_v0 = vadd.f32 %v8257_v8, %v8256_v39  ;;  %v8235_v50 = vmul.f32 0.6931472, %v10487_v24  ;;  %10500 = vlog2.f32 %v8226_v63 }
0x15bf   :  { %v8225_v6 = vsel %vm2125_vm0, %v8208_v17, 1.0  ;;  %v8214_v62 = vmul.f32 %v10483_v30, %v8189_v19  ;;  %v8259_v56 = vmul.f32 %v8237_v61, %v13326_v29 }
0x15c0   :  { %10502 = vlog2.f32 %v8225_v6  ;;  %v8212_v22 = vmul.f32 %v10489_v9, %v8188_v46  ;;  %v10491_v44 = vpop.eup %10490  ;;  %v8258_v34 = vmul.f32 %v8235_v50, %v13331_v20 }
0x15c1   :  { %v8159_v60 = vpop.xlane.xlu1 %8158  ;;  %v10493_v28 = vpop.eup %10492  ;;  %v8241_v53 = vmul.f32 0.6931472, %v10491_v44  ;;  %v8228_v55 = vsel %vm2125_vm0, %v8214_v62, 1.0 }
0x15c2   :  { %v8227_v1 = vsel %vm2125_vm0, %v8212_v22, 1.0  ;;  %v8190_v25 = vmul.f32 %v13408_v15, %v8159_v60  ;;  %v10495_v32 = vpop.eup %10494  ;;  %v8270_v21 = vadd.f32 %v8269_v0, %v8258_v34  ;;  %v8239_v41 = vmul.f32 0.6931472, %v10493_v28 }
0x15c3   :  { %10504 = vlog2.f32 %v8228_v55  ;;  %v8261_v33 = vmul.f32 %v8241_v53, %v13339_v38 }
0x15c4   :  { %10506 = vlog2.f32 %v8227_v1  ;;  %v8216_v7 = vmul.f32 %v10495_v32, %v8190_v25  ;;  %v10497_v20 = vpop.eup %10496  ;;  %v8260_v27 = vmul.f32 %v8239_v41, %v13343_v14  ;;  %v8271_v57 = vadd.f32 %v8270_v21, %v8259_v56 }
0x15c5   :  { %v10499_v49 = vpop.eup %10498  ;;  %v8245_v15 = vmul.f32 0.6931472, %v10497_v20 }
0x15c6   :  { %v8229_v59 = vsel %vm12183_vm10, %v8216_v7, 1.0  ;;  %v8272_v42 = vadd.f32 %v8271_v57, %v8260_v27  ;;  %v8243_v35 = vmul.f32 0.6931472, %v10499_v49 }
0x15c7   :  { %10508 = vlog2.f32 %v8229_v59  ;;  %v8263_v4 = vmul.f32 %v8245_v15, %v13351_v5 }
0x15c8   :  { %v10501_v29 = vpop.eup %10500  ;;  %v8262_v10 = vmul.f32 %v8243_v35, %v13355_v52  ;;  %v8273_v36 = vadd.f32 %v8272_v42, %v8261_v33 }
0x15c9   :  { %v8249_v14 = vmul.f32 0.6931472, %v10501_v29 }
0x15ca   :  { %v10503_v18 = vpop.eup %10502  ;;  %v8274_v40 = vadd.f32 %v8273_v36, %v8262_v10 }
0x15cb   :  { %v8247_v31 = vmul.f32 0.6931472, %v10503_v18  ;;  %v8265_v54 = vmul.f32 %v8249_v14, %v13362_v13 }
0x15cc   :  { %v8275_v47 = vadd.f32 %v8274_v40, %v8263_v4 }
0x15cd   :  { %v10505_v51 = vpop.eup %10504  ;;  %v8264_v38 = vmul.f32 %v8247_v31, %v13366_v3 }
0x15ce   :  { %v10507_v16 = vpop.eup %10506  ;;  %v8253_v30 = vmul.f32 0.6931472, %v10505_v51 }
0x15cf   :  { %v8276_v11 = vadd.f32 %v8275_v47, %v8264_v38  ;;  %v8251_v12 = vmul.f32 0.6931472, %v10507_v16 }
0x15d0   :  { %v8267_v5 = vmul.f32 %v8253_v30, %v13374_v2 }
0x15d1   :  { %v10509_v45 = vpop.eup %10508  ;;  %v8266_v52 = vmul.f32 %v8251_v12, %v13379_v26  ;;  %v8277_v8 = vadd.f32 %v8276_v11, %v8265_v54 }
0x15d2   :  { %v8255_v58 = vmul.f32 0.6931472, %v10509_v45 }
0x15d3   :  { %v8278_v37 = vadd.f32 %v8277_v8, %v8266_v52 }
0x15d4   :  { %v8268_v39 = vmul.f32 %v8255_v58, %v13388_v43 }
0x15d5   :  { %v8279_v3 = vadd.f32 %v8278_v37, %v8267_v5 }
0x15d7   :  { %v8280_v17 = vadd.f32 %v8279_v3, %v8268_v39 }
0x15d9   :  { %8281 = vadd.xlane.f32.xlu0 %v8280_v17 }
0x1666   :  { %v8282_v48 = vpop.xlane.xlu0 %8281 }
0x1667   :  { %v8283_v13 = vrot.slane %v8282_v48, 4 }
0x1669   :  { %v8284_v23 = vadd.f32 %v8283_v13, %v8282_v48 }
0x166b   :  { %v8285_v24 = vrot.slane %v8284_v23, 2 }
0x166d   :  { %v8286_v61 = vadd.f32 %v8285_v24, %v8284_v23 }
0x166f   :  { %v8287_v63 = vrot.slane %v8286_v61, 1 }
0x1671   :  { %v8288_v19 = vadd.f32 %v8287_v63, %v8286_v61 }
0x1673   :  { %10146 = vpush %v8288_v19 }
0x16a4   :  { %s10147_s28 = spop %10146 }
0x16a5   :  { %s8290_s29 = sadd.f32 %s10147_s28, %s7568_s26 }
0x16a7   :  { %8294 = sst [smem:[#allocation2 + $0x1]] %s8290_s29 }
0x16a8   :  { %10523 = shalt.err (!%p10520_p2)
}
0x16a9   :  { %s10527_s11 = smov [#allocation2]  }
0x16aa   :  { %8302 = dma.smem_to_hbm %s10527_s11, 16, %s13484_s5, [#allocation3]  }
0x16ab   :  { %10524 = dma.done.wait [#allocation3], 16  }
0x16ac   :  { %10525 = vsyncadd [#allocation3], 4294967280 }
0x16ad   :  { %8306 = sfence }
0x16ae   :  { %8307 = vsyncpa [#allocation3], 1 }

</bundles_post_ra>
